<compile_context>
chip_gen: v5e
topology: v5e:2x2
jax: 0.10.0
libtpu: 0.0.40
codegen_flags: <defaults>
</compile_context>

<pallas_src>
import jax
import jax.numpy as jnp
from jax.experimental import pallas as pl
from jax.experimental.pallas import tpu as pltpu


def _axial_stack_kernel(x_ref, mk_ref, wcat_ref, fgb_ref, o_ref):
    """One batch element of the full AxialTransformer stack (all layers).

    x_ref    : (H, W, C)       f32 input block (one batch element)
    mk_ref   : (L, C, 2S)      bf16 fused key maps   [mk_h | mk_w]  (resident)
    wcat_ref : (L, C + 2S, C)  bf16 fused FFN weight [fw ; mv@fw]   (resident)
    fgb_ref  : (L, 3, C)       f32 FFN bias / LN gamma / LN beta    (resident)
    o_ref    : (H, W, C)       output block
    """
    H, W, C = x_ref.shape
    HW = H * W
    L = mk_ref.shape[0]
    two_s = mk_ref.shape[2]
    S = two_s // 2

    # Branch mask over the fused 2S lane axis: lanes [0,S) = H-axis branch,
    # lanes [S,2S) = W-axis branch. Built once, reused by every layer.
    lane = jax.lax.broadcasted_iota(jnp.int32, (1, 1, two_s), 2)
    is_h = lane < S

    y0 = x_ref[...].reshape(HW, C).astype(jnp.float32)

    def layer_body(l, y):
        y_bf = y.astype(jnp.bfloat16)
        mk = mk_ref[l]                     # (C, 2S)    bf16
        wcat = wcat_ref[l]                 # (C+2S, C)  bf16
        fgb = fgb_ref[l]                   # (3, C)     f32
        fb, gamma, beta = fgb[0:1, :], fgb[1:2, :], fgb[2:3, :]

        # ---- fused axial external attention (H-axis + W-axis in one dot) ----
        a = jnp.dot(y_bf, mk,
                    preferred_element_type=jnp.float32).reshape(H, W, two_s)

        # Softmax over the sequence axis: H (axis 0) for the first half of the
        # lanes, W (axis 1) for the second half.
        m = jnp.where(is_h,
                      jnp.max(a, axis=0, keepdims=True),
                      jnp.max(a, axis=1, keepdims=True))
        e = jnp.exp(a - m)
        inv_seq = jnp.where(
            is_h,
            pl.reciprocal(jnp.sum(e, axis=0, keepdims=True), approx=True),
            pl.reciprocal(jnp.sum(e, axis=1, keepdims=True), approx=True))
        sm = e * inv_seq

        # Per-branch renormalization over its own S lanes
        # (matches `attn / attn.sum(dim=2, keepdim=True)`, no epsilon).
        total = jnp.sum(sm, axis=-1, keepdims=True)
        sum_h = jnp.sum(jnp.where(is_h, sm, 0.0), axis=-1, keepdims=True)
        sum_w = total - sum_h
        inv_norm = jnp.where(is_h,
                             pl.reciprocal(sum_h, approx=True),
                             pl.reciprocal(sum_w, approx=True))
        sm_bf = (sm * inv_norm).reshape(HW, two_s).astype(jnp.bfloat16)

        # ---- residual + AV + FFN fused into one K = C + 2S matmul ----
        # (y + sm @ mv) @ fw + fb  ==  [y | sm] @ [fw ; mv@fw] + fb
        z = jnp.dot(jnp.concatenate([y_bf, sm_bf], axis=-1), wcat,
                    preferred_element_type=jnp.float32) + fb

        # ---- LayerNorm over channels (eps = 1e-5, biased variance) ----
        mu = jnp.mean(z, axis=-1, keepdims=True)
        var = jnp.mean((z - mu) ** 2, axis=-1, keepdims=True)
        return (z - mu) * jax.lax.rsqrt(var + 1e-5) * gamma + beta

    y = jax.lax.fori_loop(0, L, layer_body, y0, unroll=True)
    o_ref[...] = y.reshape(H, W, C).astype(o_ref.dtype)


def axial_transformer_forward(x, params):
    """Run the full AxialTransformer stack in one Pallas call. x: (B,H,W,C)."""
    B, H, W, C = x.shape
    mk, wcat, fgb = params["mk"], params["wcat"], params["fgb"]
    L = mk.shape[0]
    two_s = mk.shape[2]
    HW = H * W

    flops = 2 * B * L * HW * (C * two_s            # fused QK (both axes)
                              + (C + two_s) * C)   # fused residual+AV+FFN
    transcendentals = B * L * HW * two_s           # exp
    bytes_accessed = (2 * 4 * B * HW * C           # activation in + out
                      + 2 * (mk.size + wcat.size)  # bf16 weights, fetched once
                      + 4 * fgb.size)              # f32 bias/LN params, once

    grid_spec = pltpu.PrefetchScalarGridSpec(
        num_scalar_prefetch=0,
        grid=(B,),   # batch only; layers loop inside the kernel
        in_specs=[
            pl.BlockSpec((None, H, W, C), lambda bi: (bi, 0, 0, 0)),    # x
            pl.BlockSpec((L, C, two_s), lambda bi: (0, 0, 0)),          # mk
            pl.BlockSpec((L, C + two_s, C), lambda bi: (0, 0, 0)),      # wcat
            pl.BlockSpec((L, 3, C), lambda bi: (0, 0, 0)),              # fb/g/b
        ],
        out_specs=pl.BlockSpec((None, H, W, C), lambda bi: (bi, 0, 0, 0)),
    )

    # Footprint at these shapes is ~1 MiB; no explicit vmem_limit_bytes needed.
    # Re-budget against 64 MiB physical / 32 MiB scoped if scaling C or L (v7x).
    return pl.pallas_call(
        _axial_stack_kernel,
        out_shape=jax.ShapeDtypeStruct((B, H, W, C), x.dtype),
        grid_spec=grid_spec,
        compiler_params=pltpu.CompilerParams(
            dimension_semantics=("parallel",)),
        cost_estimate=pl.CostEstimate(
            flops=flops, transcendentals=transcendentals,
            bytes_accessed=bytes_accessed),
    )(x, mk, wcat, fgb)


def init_layers(key, emb_size, num_layers, S=64):
    """Per-layer f32 parameters mirroring the PyTorch module's init.

    External-attention linears: normal(std=0.001) (init_weights), no bias.
    FFN linear: default uniform(-1/sqrt(C), 1/sqrt(C)) for weight and bias.
    LayerNorm: gamma=1, beta=0. Weights are stored in (in, out) layout.
    """
    layers = []
    for i in range(num_layers):
        keys = jax.random.split(jax.random.fold_in(key, i), 6)
        mk_h = 0.001 * jax.random.normal(keys[0], (emb_size, S), jnp.float32)
        mv_h = 0.001 * jax.random.normal(keys[1], (S, emb_size), jnp.float32)
        mk_w = 0.001 * jax.random.normal(keys[2], (emb_size, S), jnp.float32)
        mv_w = 0.001 * jax.random.normal(keys[3], (S, emb_size), jnp.float32)
        bound = 1.0 / (emb_size ** 0.5)
        fw = jax.random.uniform(keys[4], (emb_size, emb_size), jnp.float32,
                                -bound, bound)
        fb = jax.random.uniform(keys[5], (emb_size,), jnp.float32,
                                -bound, bound)
        g = jnp.ones((emb_size,), jnp.float32)
        b = jnp.zeros((emb_size,), jnp.float32)
        layers.append((mk_h, mv_h, mk_w, mv_w, fw, fb, g, b))
    return layers


def pack_params(layers):
    """Stack & fuse per-layer params for the kernel.

    mk   : (L, C, 2S)     = [mk_h | mk_w]                 bf16
    wcat : (L, C + 2S, C) = [fw ; [mv_h; mv_w] @ fw]      bf16 (product in f32)
    fgb  : (L, 3, C)      = [fb, gamma, beta]             f32
    """
    mks, wcats, fgbs = [], [], []
    for (mk_h, mv_h, mk_w, mv_w, fw, fb, g, b) in layers:
        mks.append(jnp.concatenate([mk_h, mk_w], axis=1))          # (C, 2S)
        mvfw = jnp.concatenate([mv_h, mv_w], axis=0) @ fw          # (2S, C) f32
        wcats.append(jnp.concatenate([fw, mvfw], axis=0))          # (C+2S, C)
        fgbs.append(jnp.stack([fb, g, b], axis=0))                 # (3, C)
    return dict(mk=jnp.stack(mks).astype(jnp.bfloat16),
                wcat=jnp.stack(wcats).astype(jnp.bfloat16),
                fgb=jnp.stack(fgbs))


def ref_forward(x, layers, matmul_dtype=jnp.float32, fuse_ffn=False):
    """Pure-JAX reference matching the PyTorch forward semantics.

    matmul_dtype=bfloat16 + fuse_ffn=True reproduces the kernel's MXU operand
    quantization points (f32 accumulation, mv@fw precomputed in f32 then cast)
    for a tight comparison; the default is the plain f32 unfused math.
    """
    def mm(a, w):
        return jnp.einsum('...k,kn->...n', a.astype(matmul_dtype),
                          w.astype(matmul_dtype),
                          preferred_element_type=jnp.float32)

    for (mk_h, mv_h, mk_w, mv_w, fw, fb, g, b) in layers:
        def attn_weights(xt, mk, seq_axis):
            a = mm(xt, mk)
            sm = jax.nn.softmax(a, axis=seq_axis)
            return sm / jnp.sum(sm, axis=-1, keepdims=True)
        sm_h = attn_weights(x, mk_h, seq_axis=1)   # sequence along H
        sm_w = attn_weights(x, mk_w, seq_axis=2)   # sequence along W
        if fuse_ffn:
            mvfw_h = mv_h.astype(jnp.float32) @ fw.astype(jnp.float32)
            mvfw_w = mv_w.astype(jnp.float32) @ fw.astype(jnp.float32)
            z = mm(x, fw) + mm(sm_h, mvfw_h) + mm(sm_w, mvfw_w) + fb
        else:
            x2 = x + mm(sm_h, mv_h) + mm(sm_w, mv_w)
            z = mm(x2, fw) + fb
        mu = jnp.mean(z, axis=-1, keepdims=True)
        var = jnp.mean((z - mu) ** 2, axis=-1, keepdims=True)
        x = (z - mu) * jax.lax.rsqrt(var + 1e-5) * g + b
    return x


if __name__ == "__main__":
    key = jax.random.PRNGKey(0)
    xk, pk = jax.random.split(key)

    # small shapes: batch=2, spatial 16x16, emb_size=128 (heads=8 divides it)
    B, H, W, C = 2, 16, 16, 128
    num_layers = 2
    S = 64

    x = jax.random.normal(xk, (B, H, W, C), jnp.float32)
    layers = init_layers(pk, C, num_layers, S=S)
    params = pack_params(layers)

    out = jax.block_until_ready(axial_transformer_forward(x, params))
    assert out.shape == (B, H, W, C)

    # Tight check vs a reference that matches the kernel's bf16 quantization
    # points (fused mv@fw precomputed in f32).
    ref_bf16 = ref_forward(x, layers, matmul_dtype=jnp.bfloat16, fuse_ffn=True)
    err_bf16 = float(jnp.max(jnp.abs(out - ref_bf16)))
    assert err_bf16 < 2e-3, f"mismatch vs bf16-matched reference: {err_bf16}"

    # Looser check vs the pure-f32, unfused reference (PyTorch semantics).
    ref_f32 = ref_forward(x, layers, matmul_dtype=jnp.float32, fuse_ffn=False)
    err_f32 = float(jnp.max(jnp.abs(out - ref_f32)))
    assert err_f32 < 5e-2, f"mismatch vs f32 reference: {err_f32}"

    print("KERNEL_OK")
</pallas_src>

<mosaic_0001>
module attributes {stable_mosaic.version = 11 : i64} {
  func.func @_axial_stack_kernel(%arg0: i32, %arg1: memref<1x16x16x128xf32, #tpu.memory_space<vmem>>, %arg2: memref<2x128x128xbf16, #tpu.memory_space<vmem>>, %arg3: memref<2x256x128xbf16, #tpu.memory_space<vmem>>, %arg4: memref<2x3x128xf32, #tpu.memory_space<vmem>>, %arg5: memref<1x16x16x128xf32, #tpu.memory_space<vmem>>) attributes {dimension_semantics = [#tpu.dimension_semantics<parallel>], iteration_bounds = array<i64: 2>, scalar_prefetch = 0 : i64, scratch_operands = 0 : i64, tpu.core_type = #tpu.core_type<tc>, window_params = [{transform_indices = @transform_0, window_bounds = array<i64: 1, 16, 16, 128>}, {pipeline_mode = #tpu.pipeline_mode<synchronous>, transform_indices = @transform_1, window_bounds = array<i64: 2, 128, 128>}, {pipeline_mode = #tpu.pipeline_mode<synchronous>, transform_indices = @transform_2, window_bounds = array<i64: 2, 256, 128>}, {pipeline_mode = #tpu.pipeline_mode<synchronous>, transform_indices = @transform_3, window_bounds = array<i64: 2, 3, 128>}, {transform_indices = @transform_4, window_bounds = array<i64: 1, 16, 16, 128>}]} {
    %0 = tpu.iota {dimensions = array<i32: 2>} : vector<1x1x128xi32>
    %c64_i32 = arith.constant 64 : i32
    %1 = vector.broadcast %c64_i32 : i32 to vector<1x1x128xi32>
    %2 = arith.cmpi slt, %0, %1 : vector<1x1x128xi32>
    %c0 = arith.constant 0 : index
    %c0_0 = arith.constant 0 : index
    %c0_1 = arith.constant 0 : index
    %c0_2 = arith.constant 0 : index
    %3 = vector.load %arg1[%c0, %c0_0, %c0_1, %c0_2] : memref<1x16x16x128xf32, #tpu.memory_space<vmem>>, vector<1x16x16x128xf32>
    %4 = vector.shape_cast %3 : vector<1x16x16x128xf32> to vector<16x16x128xf32>
    %5 = vector.shape_cast %4 : vector<16x16x128xf32> to vector<256x128xf32>
    %c0_i32 = arith.constant 0 : i32
    %6 = arith.truncf %5 : vector<256x128xf32> to vector<256x128xbf16>
    %7 = arith.index_cast %c0_i32 : i32 to index
    %c0_3 = arith.constant 0 : index
    %c0_4 = arith.constant 0 : index
    %8 = vector.load %arg2[%7, %c0_3, %c0_4] : memref<2x128x128xbf16, #tpu.memory_space<vmem>>, vector<1x128x128xbf16>
    %9 = vector.shape_cast %8 : vector<1x128x128xbf16> to vector<128x128xbf16>
    %10 = arith.index_cast %c0_i32 : i32 to index
    %c0_5 = arith.constant 0 : index
    %c0_6 = arith.constant 0 : index
    %11 = vector.load %arg3[%10, %c0_5, %c0_6] : memref<2x256x128xbf16, #tpu.memory_space<vmem>>, vector<1x256x128xbf16>
    %12 = vector.shape_cast %11 : vector<1x256x128xbf16> to vector<256x128xbf16>
    %13 = arith.index_cast %c0_i32 : i32 to index
    %c0_7 = arith.constant 0 : index
    %c0_8 = arith.constant 0 : index
    %14 = vector.load %arg4[%13, %c0_7, %c0_8] : memref<2x3x128xf32, #tpu.memory_space<vmem>>, vector<1x3x128xf32>
    %15 = vector.shape_cast %14 : vector<1x3x128xf32> to vector<3x128xf32>
    %16 = vector.extract_strided_slice %15 {offsets = [0, 0], sizes = [1, 128], strides = [1, 1]} : vector<3x128xf32> to vector<1x128xf32>
    %17 = vector.extract_strided_slice %15 {offsets = [1, 0], sizes = [1, 128], strides = [1, 1]} : vector<3x128xf32> to vector<1x128xf32>
    %18 = vector.extract_strided_slice %15 {offsets = [2, 0], sizes = [1, 128], strides = [1, 1]} : vector<3x128xf32> to vector<1x128xf32>
    %cst = arith.constant dense<0.000000e+00> : vector<256x128xf32>
    %19 = tpu.matmul %6, %9, %cst {dimension_numbers = #tpu.dot_dimension_numbers<[1], [0], [0], [1], [0, 0, 1, 1], [], []>} : vector<256x128xbf16>, vector<128x128xbf16>, vector<256x128xf32> -> vector<256x128xf32>
    %20 = vector.shape_cast %19 : vector<256x128xf32> to vector<16x16x128xf32>
    %cst_9 = arith.constant dense<0xFF800000> : vector<16x128xf32>
    %21 = vector.multi_reduction <maximumf>, %20, %cst_9 [0] : vector<16x16x128xf32> to vector<16x128xf32>
    %22 = vector.shape_cast %21 : vector<16x128xf32> to vector<1x16x128xf32>
    %cst_10 = arith.constant dense<0xFF800000> : vector<16x128xf32>
    %23 = vector.multi_reduction <maximumf>, %20, %cst_10 [1] : vector<16x16x128xf32> to vector<16x128xf32>
    %24 = vector.shape_cast %23 : vector<16x128xf32> to vector<16x1x128xf32>
    %25 = vector.shape_cast %2 : vector<1x1x128xi1> to vector<1x1x128xi1>
    %26 = vector.broadcast %25 : vector<1x1x128xi1> to vector<16x16x128xi1>
    %27 = vector.shape_cast %22 : vector<1x16x128xf32> to vector<1x16x128xf32>
    %28 = vector.broadcast %27 : vector<1x16x128xf32> to vector<16x16x128xf32>
    %29 = vector.shape_cast %24 : vector<16x1x128xf32> to vector<16x1x128xf32>
    %30 = vector.broadcast %29 : vector<16x1x128xf32> to vector<16x16x128xf32>
    %31 = arith.select %26, %28, %30 : vector<16x16x128xi1>, vector<16x16x128xf32>
    %32 = arith.subf %20, %31 : vector<16x16x128xf32>
    %33 = math.exp %32 : vector<16x16x128xf32>
    %cst_11 = arith.constant dense<0.000000e+00> : vector<16x128xf32>
    %34 = vector.multi_reduction <add>, %33, %cst_11 [0] : vector<16x16x128xf32> to vector<16x128xf32>
    %35 = vector.shape_cast %34 : vector<16x128xf32> to vector<1x16x128xf32>
    %36 = tpu.reciprocal %35 {approx = true} : vector<1x16x128xf32> -> vector<1x16x128xf32>
    %cst_12 = arith.constant dense<0.000000e+00> : vector<16x128xf32>
    %37 = vector.multi_reduction <add>, %33, %cst_12 [1] : vector<16x16x128xf32> to vector<16x128xf32>
    %38 = vector.shape_cast %37 : vector<16x128xf32> to vector<16x1x128xf32>
    %39 = tpu.reciprocal %38 {approx = true} : vector<16x1x128xf32> -> vector<16x1x128xf32>
    %40 = vector.shape_cast %2 : vector<1x1x128xi1> to vector<1x1x128xi1>
    %41 = vector.broadcast %40 : vector<1x1x128xi1> to vector<16x16x128xi1>
    %42 = vector.shape_cast %36 : vector<1x16x128xf32> to vector<1x16x128xf32>
    %43 = vector.broadcast %42 : vector<1x16x128xf32> to vector<16x16x128xf32>
    %44 = vector.shape_cast %39 : vector<16x1x128xf32> to vector<16x1x128xf32>
    %45 = vector.broadcast %44 : vector<16x1x128xf32> to vector<16x16x128xf32>
    %46 = arith.select %41, %43, %45 : vector<16x16x128xi1>, vector<16x16x128xf32>
    %47 = arith.mulf %33, %46 : vector<16x16x128xf32>
    %cst_13 = arith.constant dense<0.000000e+00> : vector<16x16xf32>
    %48 = vector.multi_reduction <add>, %47, %cst_13 [2] : vector<16x16x128xf32> to vector<16x16xf32>
    %49 = vector.shape_cast %48 : vector<16x16xf32> to vector<16x16x1xf32>
    %cst_14 = arith.constant 0.000000e+00 : f32
    %50 = vector.shape_cast %2 : vector<1x1x128xi1> to vector<1x1x128xi1>
    %51 = vector.broadcast %50 : vector<1x1x128xi1> to vector<16x16x128xi1>
    %52 = vector.broadcast %cst_14 : f32 to vector<16x16x128xf32>
    %53 = arith.select %51, %47, %52 : vector<16x16x128xi1>, vector<16x16x128xf32>
    %cst_15 = arith.constant dense<0.000000e+00> : vector<16x16xf32>
    %54 = vector.multi_reduction <add>, %53, %cst_15 [2] : vector<16x16x128xf32> to vector<16x16xf32>
    %55 = vector.shape_cast %54 : vector<16x16xf32> to vector<16x16x1xf32>
    %56 = arith.subf %49, %55 : vector<16x16x1xf32>
    %57 = tpu.reciprocal %55 {approx = true} : vector<16x16x1xf32> -> vector<16x16x1xf32>
    %58 = tpu.reciprocal %56 {approx = true} : vector<16x16x1xf32> -> vector<16x16x1xf32>
    %59 = vector.shape_cast %2 : vector<1x1x128xi1> to vector<1x1x128xi1>
    %60 = vector.broadcast %59 : vector<1x1x128xi1> to vector<16x16x128xi1>
    %61 = vector.shape_cast %57 : vector<16x16x1xf32> to vector<16x16x1xf32>
    %62 = vector.broadcast %61 : vector<16x16x1xf32> to vector<16x16x128xf32>
    %63 = vector.shape_cast %58 : vector<16x16x1xf32> to vector<16x16x1xf32>
    %64 = vector.broadcast %63 : vector<16x16x1xf32> to vector<16x16x128xf32>
    %65 = arith.select %60, %62, %64 : vector<16x16x128xi1>, vector<16x16x128xf32>
    %66 = arith.mulf %47, %65 : vector<16x16x128xf32>
    %67 = vector.shape_cast %66 : vector<16x16x128xf32> to vector<256x128xf32>
    %68 = arith.truncf %67 : vector<256x128xf32> to vector<256x128xbf16>
    %69 = tpu.concatenate %6, %68 in 1 : vector<256x128xbf16>, vector<256x128xbf16> -> vector<256x256xbf16>
    %cst_16 = arith.constant dense<0.000000e+00> : vector<256x128xf32>
    %70 = tpu.matmul %69, %12, %cst_16 {dimension_numbers = #tpu.dot_dimension_numbers<[1], [0], [0], [1], [0, 0, 1, 1], [], []>} : vector<256x256xbf16>, vector<256x128xbf16>, vector<256x128xf32> -> vector<256x128xf32>
    %71 = vector.broadcast %16 : vector<1x128xf32> to vector<256x128xf32>
    %72 = arith.addf %70, %71 : vector<256x128xf32>
    %cst_17 = arith.constant dense<0.000000e+00> : vector<256xf32>
    %73 = vector.multi_reduction <add>, %72, %cst_17 [1] : vector<256x128xf32> to vector<256xf32>
    %74 = vector.shape_cast %73 : vector<256xf32> to vector<256x1xf32>
    %cst_18 = arith.constant 1.280000e+02 : f32
    %75 = vector.broadcast %cst_18 : f32 to vector<256x1xf32>
    %76 = arith.divf %74, %75 : vector<256x1xf32>
    %77 = vector.broadcast %76 : vector<256x1xf32> to vector<256x128xf32>
    %78 = arith.subf %72, %77 : vector<256x128xf32>
    %79 = arith.mulf %78, %78 : vector<256x128xf32>
    %cst_19 = arith.constant dense<0.000000e+00> : vector<256xf32>
    %80 = vector.multi_reduction <add>, %79, %cst_19 [1] : vector<256x128xf32> to vector<256xf32>
    %81 = vector.shape_cast %80 : vector<256xf32> to vector<256x1xf32>
    %cst_20 = arith.constant 1.280000e+02 : f32
    %82 = vector.broadcast %cst_20 : f32 to vector<256x1xf32>
    %83 = arith.divf %81, %82 : vector<256x1xf32>
    %84 = vector.broadcast %76 : vector<256x1xf32> to vector<256x128xf32>
    %85 = arith.subf %72, %84 : vector<256x128xf32>
    %cst_21 = arith.constant 9.99999974E-6 : f32
    %86 = vector.broadcast %cst_21 : f32 to vector<256x1xf32>
    %87 = arith.addf %83, %86 : vector<256x1xf32>
    %88 = math.rsqrt %87 : vector<256x1xf32>
    %89 = vector.broadcast %88 : vector<256x1xf32> to vector<256x128xf32>
    %90 = arith.mulf %85, %89 : vector<256x128xf32>
    %91 = vector.broadcast %17 : vector<1x128xf32> to vector<256x128xf32>
    %92 = arith.mulf %90, %91 : vector<256x128xf32>
    %93 = vector.broadcast %18 : vector<1x128xf32> to vector<256x128xf32>
    %94 = arith.addf %92, %93 : vector<256x128xf32>
    %c1_i32 = arith.constant 1 : i32
    %95 = arith.truncf %94 : vector<256x128xf32> to vector<256x128xbf16>
    %96 = arith.index_cast %c1_i32 : i32 to index
    %c0_22 = arith.constant 0 : index
    %c0_23 = arith.constant 0 : index
    %97 = vector.load %arg2[%96, %c0_22, %c0_23] : memref<2x128x128xbf16, #tpu.memory_space<vmem>>, vector<1x128x128xbf16>
    %98 = vector.shape_cast %97 : vector<1x128x128xbf16> to vector<128x128xbf16>
    %99 = arith.index_cast %c1_i32 : i32 to index
    %c0_24 = arith.constant 0 : index
    %c0_25 = arith.constant 0 : index
    %100 = vector.load %arg3[%99, %c0_24, %c0_25] : memref<2x256x128xbf16, #tpu.memory_space<vmem>>, vector<1x256x128xbf16>
    %101 = vector.shape_cast %100 : vector<1x256x128xbf16> to vector<256x128xbf16>
    %102 = arith.index_cast %c1_i32 : i32 to index
    %c0_26 = arith.constant 0 : index
    %c0_27 = arith.constant 0 : index
    %103 = vector.load %arg4[%102, %c0_26, %c0_27] : memref<2x3x128xf32, #tpu.memory_space<vmem>>, vector<1x3x128xf32>
    %104 = vector.shape_cast %103 : vector<1x3x128xf32> to vector<3x128xf32>
    %105 = vector.extract_strided_slice %104 {offsets = [0, 0], sizes = [1, 128], strides = [1, 1]} : vector<3x128xf32> to vector<1x128xf32>
    %106 = vector.extract_strided_slice %104 {offsets = [1, 0], sizes = [1, 128], strides = [1, 1]} : vector<3x128xf32> to vector<1x128xf32>
    %107 = vector.extract_strided_slice %104 {offsets = [2, 0], sizes = [1, 128], strides = [1, 1]} : vector<3x128xf32> to vector<1x128xf32>
    %cst_28 = arith.constant dense<0.000000e+00> : vector<256x128xf32>
    %108 = tpu.matmul %95, %98, %cst_28 {dimension_numbers = #tpu.dot_dimension_numbers<[1], [0], [0], [1], [0, 0, 1, 1], [], []>} : vector<256x128xbf16>, vector<128x128xbf16>, vector<256x128xf32> -> vector<256x128xf32>
    %109 = vector.shape_cast %108 : vector<256x128xf32> to vector<16x16x128xf32>
    %cst_29 = arith.constant dense<0xFF800000> : vector<16x128xf32>
    %110 = vector.multi_reduction <maximumf>, %109, %cst_29 [0] : vector<16x16x128xf32> to vector<16x128xf32>
    %111 = vector.shape_cast %110 : vector<16x128xf32> to vector<1x16x128xf32>
    %cst_30 = arith.constant dense<0xFF800000> : vector<16x128xf32>
    %112 = vector.multi_reduction <maximumf>, %109, %cst_30 [1] : vector<16x16x128xf32> to vector<16x128xf32>
    %113 = vector.shape_cast %112 : vector<16x128xf32> to vector<16x1x128xf32>
    %114 = vector.shape_cast %2 : vector<1x1x128xi1> to vector<1x1x128xi1>
    %115 = vector.broadcast %114 : vector<1x1x128xi1> to vector<16x16x128xi1>
    %116 = vector.shape_cast %111 : vector<1x16x128xf32> to vector<1x16x128xf32>
    %117 = vector.broadcast %116 : vector<1x16x128xf32> to vector<16x16x128xf32>
    %118 = vector.shape_cast %113 : vector<16x1x128xf32> to vector<16x1x128xf32>
    %119 = vector.broadcast %118 : vector<16x1x128xf32> to vector<16x16x128xf32>
    %120 = arith.select %115, %117, %119 : vector<16x16x128xi1>, vector<16x16x128xf32>
    %121 = arith.subf %109, %120 : vector<16x16x128xf32>
    %122 = math.exp %121 : vector<16x16x128xf32>
    %cst_31 = arith.constant dense<0.000000e+00> : vector<16x128xf32>
    %123 = vector.multi_reduction <add>, %122, %cst_31 [0] : vector<16x16x128xf32> to vector<16x128xf32>
    %124 = vector.shape_cast %123 : vector<16x128xf32> to vector<1x16x128xf32>
    %125 = tpu.reciprocal %124 {approx = true} : vector<1x16x128xf32> -> vector<1x16x128xf32>
    %cst_32 = arith.constant dense<0.000000e+00> : vector<16x128xf32>
    %126 = vector.multi_reduction <add>, %122, %cst_32 [1] : vector<16x16x128xf32> to vector<16x128xf32>
    %127 = vector.shape_cast %126 : vector<16x128xf32> to vector<16x1x128xf32>
    %128 = tpu.reciprocal %127 {approx = true} : vector<16x1x128xf32> -> vector<16x1x128xf32>
    %129 = vector.shape_cast %2 : vector<1x1x128xi1> to vector<1x1x128xi1>
    %130 = vector.broadcast %129 : vector<1x1x128xi1> to vector<16x16x128xi1>
    %131 = vector.shape_cast %125 : vector<1x16x128xf32> to vector<1x16x128xf32>
    %132 = vector.broadcast %131 : vector<1x16x128xf32> to vector<16x16x128xf32>
    %133 = vector.shape_cast %128 : vector<16x1x128xf32> to vector<16x1x128xf32>
    %134 = vector.broadcast %133 : vector<16x1x128xf32> to vector<16x16x128xf32>
    %135 = arith.select %130, %132, %134 : vector<16x16x128xi1>, vector<16x16x128xf32>
    %136 = arith.mulf %122, %135 : vector<16x16x128xf32>
    %cst_33 = arith.constant dense<0.000000e+00> : vector<16x16xf32>
    %137 = vector.multi_reduction <add>, %136, %cst_33 [2] : vector<16x16x128xf32> to vector<16x16xf32>
    %138 = vector.shape_cast %137 : vector<16x16xf32> to vector<16x16x1xf32>
    %cst_34 = arith.constant 0.000000e+00 : f32
    %139 = vector.shape_cast %2 : vector<1x1x128xi1> to vector<1x1x128xi1>
    %140 = vector.broadcast %139 : vector<1x1x128xi1> to vector<16x16x128xi1>
    %141 = vector.broadcast %cst_34 : f32 to vector<16x16x128xf32>
    %142 = arith.select %140, %136, %141 : vector<16x16x128xi1>, vector<16x16x128xf32>
    %cst_35 = arith.constant dense<0.000000e+00> : vector<16x16xf32>
    %143 = vector.multi_reduction <add>, %142, %cst_35 [2] : vector<16x16x128xf32> to vector<16x16xf32>
    %144 = vector.shape_cast %143 : vector<16x16xf32> to vector<16x16x1xf32>
    %145 = arith.subf %138, %144 : vector<16x16x1xf32>
    %146 = tpu.reciprocal %144 {approx = true} : vector<16x16x1xf32> -> vector<16x16x1xf32>
    %147 = tpu.reciprocal %145 {approx = true} : vector<16x16x1xf32> -> vector<16x16x1xf32>
    %148 = vector.shape_cast %2 : vector<1x1x128xi1> to vector<1x1x128xi1>
    %149 = vector.broadcast %148 : vector<1x1x128xi1> to vector<16x16x128xi1>
    %150 = vector.shape_cast %146 : vector<16x16x1xf32> to vector<16x16x1xf32>
    %151 = vector.broadcast %150 : vector<16x16x1xf32> to vector<16x16x128xf32>
    %152 = vector.shape_cast %147 : vector<16x16x1xf32> to vector<16x16x1xf32>
    %153 = vector.broadcast %152 : vector<16x16x1xf32> to vector<16x16x128xf32>
    %154 = arith.select %149, %151, %153 : vector<16x16x128xi1>, vector<16x16x128xf32>
    %155 = arith.mulf %136, %154 : vector<16x16x128xf32>
    %156 = vector.shape_cast %155 : vector<16x16x128xf32> to vector<256x128xf32>
    %157 = arith.truncf %156 : vector<256x128xf32> to vector<256x128xbf16>
    %158 = tpu.concatenate %95, %157 in 1 : vector<256x128xbf16>, vector<256x128xbf16> -> vector<256x256xbf16>
    %cst_36 = arith.constant dense<0.000000e+00> : vector<256x128xf32>
    %159 = tpu.matmul %158, %101, %cst_36 {dimension_numbers = #tpu.dot_dimension_numbers<[1], [0], [0], [1], [0, 0, 1, 1], [], []>} : vector<256x256xbf16>, vector<256x128xbf16>, vector<256x128xf32> -> vector<256x128xf32>
    %160 = vector.broadcast %105 : vector<1x128xf32> to vector<256x128xf32>
    %161 = arith.addf %159, %160 : vector<256x128xf32>
    %cst_37 = arith.constant dense<0.000000e+00> : vector<256xf32>
    %162 = vector.multi_reduction <add>, %161, %cst_37 [1] : vector<256x128xf32> to vector<256xf32>
    %163 = vector.shape_cast %162 : vector<256xf32> to vector<256x1xf32>
    %cst_38 = arith.constant 1.280000e+02 : f32
    %164 = vector.broadcast %cst_38 : f32 to vector<256x1xf32>
    %165 = arith.divf %163, %164 : vector<256x1xf32>
    %166 = vector.broadcast %165 : vector<256x1xf32> to vector<256x128xf32>
    %167 = arith.subf %161, %166 : vector<256x128xf32>
    %168 = arith.mulf %167, %167 : vector<256x128xf32>
    %cst_39 = arith.constant dense<0.000000e+00> : vector<256xf32>
    %169 = vector.multi_reduction <add>, %168, %cst_39 [1] : vector<256x128xf32> to vector<256xf32>
    %170 = vector.shape_cast %169 : vector<256xf32> to vector<256x1xf32>
    %cst_40 = arith.constant 1.280000e+02 : f32
    %171 = vector.broadcast %cst_40 : f32 to vector<256x1xf32>
    %172 = arith.divf %170, %171 : vector<256x1xf32>
    %173 = vector.broadcast %165 : vector<256x1xf32> to vector<256x128xf32>
    %174 = arith.subf %161, %173 : vector<256x128xf32>
    %cst_41 = arith.constant 9.99999974E-6 : f32
    %175 = vector.broadcast %cst_41 : f32 to vector<256x1xf32>
    %176 = arith.addf %172, %175 : vector<256x1xf32>
    %177 = math.rsqrt %176 : vector<256x1xf32>
    %178 = vector.broadcast %177 : vector<256x1xf32> to vector<256x128xf32>
    %179 = arith.mulf %174, %178 : vector<256x128xf32>
    %180 = vector.broadcast %106 : vector<1x128xf32> to vector<256x128xf32>
    %181 = arith.mulf %179, %180 : vector<256x128xf32>
    %182 = vector.broadcast %107 : vector<1x128xf32> to vector<256x128xf32>
    %183 = arith.addf %181, %182 : vector<256x128xf32>
    %c2_i32 = arith.constant 2 : i32
    %184 = vector.shape_cast %183 : vector<256x128xf32> to vector<16x16x128xf32>
    %c0_42 = arith.constant 0 : index
    %c0_43 = arith.constant 0 : index
    %c0_44 = arith.constant 0 : index
    %c0_45 = arith.constant 0 : index
    %185 = vector.load %arg5[%c0_42, %c0_43, %c0_44, %c0_45] : memref<1x16x16x128xf32, #tpu.memory_space<vmem>>, vector<1x16x16x128xf32>
    %186 = vector.shape_cast %185 : vector<1x16x16x128xf32> to vector<16x16x128xf32>
    %187 = vector.shape_cast %184 : vector<16x16x128xf32> to vector<1x16x16x128xf32>
    tpu.vector_store %arg5[%c0_42, %c0_43, %c0_44, %c0_45], %187 {strides = array<i32>} : memref<1x16x16x128xf32, #tpu.memory_space<vmem>>, vector<1x16x16x128xf32>,
    return
  }
  func.func @transform_0(%arg0: i32) -> (i32, i32, i32, i32) {
    %c0_i32 = arith.constant 0 : i32
    %c0_i32_0 = arith.constant 0 : i32
    %c0_i32_1 = arith.constant 0 : i32
    %c0_i32_2 = arith.constant 0 : i32
    return %arg0, %c0_i32, %c0_i32_0, %c0_i32_1 : i32, i32, i32, i32
  }
  func.func @transform_1(%arg0: i32) -> (i32, i32, i32) {
    %c0_i32 = arith.constant 0 : i32
    %c0_i32_0 = arith.constant 0 : i32
    %c0_i32_1 = arith.constant 0 : i32
    %c0_i32_2 = arith.constant 0 : i32
    return %c0_i32, %c0_i32_0, %c0_i32_1 : i32, i32, i32
  }
  func.func @transform_2(%arg0: i32) -> (i32, i32, i32) {
    %c0_i32 = arith.constant 0 : i32
    %c0_i32_0 = arith.constant 0 : i32
    %c0_i32_1 = arith.constant 0 : i32
    %c0_i32_2 = arith.constant 0 : i32
    return %c0_i32, %c0_i32_0, %c0_i32_1 : i32, i32, i32
  }
  func.func @transform_3(%arg0: i32) -> (i32, i32, i32) {
    %c0_i32 = arith.constant 0 : i32
    %c0_i32_0 = arith.constant 0 : i32
    %c0_i32_1 = arith.constant 0 : i32
    %c0_i32_2 = arith.constant 0 : i32
    return %c0_i32, %c0_i32_0, %c0_i32_1 : i32, i32, i32
  }
  func.func @transform_4(%arg0: i32) -> (i32, i32, i32, i32) {
    %c0_i32 = arith.constant 0 : i32
    %c0_i32_0 = arith.constant 0 : i32
    %c0_i32_1 = arith.constant 0 : i32
    %c0_i32_2 = arith.constant 0 : i32
    return %arg0, %c0_i32, %c0_i32_0, %c0_i32_1 : i32, i32, i32, i32
  }
}

</mosaic_0001>

<bundles_post_ra>
// kernel: tpu_custom_call.1
= control target key start
LH: loop header
LB: loop body
LE: loop exit
PB: predicated region body
PF: predicated region fallthrough
CT: control target
= control target key end

     0   :  { %9 = vsyncpa [#allocation3], 0  ;;  %s9172_s0 = inlined_call_operand.hbm [shape: f32[2,16,16,128], index: 0, kind: input, shape index: {}]   ;;  %s9173_s1 = inlined_call_operand.hbm [shape: bf16[2,128,128], index: 1, kind: input, shape index: {}]   ;;  %s9174_s2 = inlined_call_operand.hbm [shape: bf16[2,256,128], index: 2, kind: input, shape index: {}]   ;;  %s9175_s3 = inlined_call_operand.vmem [shape: f32[2,3,128], index: 3, kind: input, shape index: {}]   ;;  %s9176_s4 = inlined_call_operand.hbm [shape: f32[2,16,16,128], index: 4, kind: output, shape index: {}]  }
   0x1   :  { %11 = vsyncpa [#allocation3 + $0x1], 0 }
   0x2   :  { %12 = vsyncpa [#allocation6], 0 }
   0x3   :  { %13 = vsyncpa [#allocation4], 0 }
   0x4   :  { %15 = vsyncpa [#allocation4 + $0x1], 0  ;;  %s6045_s15 = smov 0   ;;  %s6047_s16 = smov 0  }
   0x5   :  { %s6049_s17 = smov 0   ;;  %s6051_s18 = smov 0  }
   0x6 LB: > { %s6066_s19 = sadd.s32 4294967295, %s6009_s18   ;;  %s4912_s20 = sadd.s32 4294967294, %s6009_s18   ;;  %s6009_s18 = sphi %s6051_s18, %s9335_s18   ;;  %s6005_s17 = sphi %s6049_s17, %s9334_s17   ;;  %s6001_s16 = sphi %s6047_s16, %s9333_s16   ;;  %s5997_s15 = sphi %s6045_s15, %s9332_s15  }
   0x7   : > { %p41_p0 = scmp.ne.s32.totalorder %s6001_s16, %s5997_s15  ;;  %p42_p1 = scmp.eq.s32.totalorder %s6066_s19, 0 }
   0x8   : > { %p128_p2 = scmp.eq.s32.totalorder %s6066_s19, 1  ;;  %p134_p3 = scmp.eq.s32.totalorder %s4912_s20, 1 }
   0x9   : > { %p6075_p4 = por %p42_p1, %p41_p0  ;;  %p4913_p5 = scmp.ge.s32.totalorder %s6009_s18, 1 }
   0xa   : > { %p6080_p6 = por %p134_p3, %p41_p0  ;;  %p141_p7 = scmp.lt.s32.totalorder %s6009_s18, 3 }
   0xb   : > { %s152_s25 = sshll.u32 %s9173_s1, 4  ;;  %s6011_s27 = smov [#allocation5]   ;;  %s153_s25 = int_to_ptr.hbm [resolvable:$true] %s152_s25 }
   0xc   : > { %p6088_p8 = pnand %p4913_p5, %p141_p7  ;;  %s154_s28 = sshll.u32 %s6011_s27, 4  ;;  %s155_s28 = int_to_ptr.vmem [resolvable:$true] %s154_s28 }
   0xd   : > { %s166_s5 = sshll.u32 %s9174_s2, 4  ;;  %s6012_s6 = smov 64   ;;  %s167_s5 = int_to_ptr.hbm [resolvable:$true] %s166_s5 }
   0xe   : > { %p5201_p9 = pneg %p6088_p8  ;;  %s6013_s7 = smov 4  }
   0xf   : > { %s6014_s8 = smov [#allocation7]   ;;  %s6101_s10 = sadd.s32 1, %s6009_s18  }
  0x10   : > { %p5202_p10 = pnand %p5201_p9, %p42_p1  ;;  %s168_s9 = sshll.u32 %s6014_s8, 4  ;;  %s169_s9 = int_to_ptr.vmem [resolvable:$true] %s168_s9 }
  0x11   : > { %s28_s11 = sadd.s32 1, %s6005_s17  ;;  %s25_s12 = ssub.s32 %s6009_s18, %s6101_s10 }
  0x12   : > { %5204 = dma.hbm_to_vmem [thread:$0]  (!%p5202_p10), %s153_s25, 2048, %s155_s28, [#allocation6], %s6012_s6, %s6012_s6, %s6013_s7  }
  0x13   : > { %5207 = dma.hbm_to_vmem [thread:$0]  (!%p5202_p10), %s167_s5, 4096, %s169_s9, [#allocation6], %s6012_s6, %s6012_s6, %s6013_s7  }
  0x14   : > { %p35_p12 = scmp.ne.s32.totalorder %s6005_s17, %s6001_s16  ;;  %p26_p13 = scmp.eq.s32.totalorder %s25_s12, 0 }
  0x15   : > { %p36_p0 = scmp.eq.s32.totalorder %s6009_s18, 0  ;;  %p5218_p5 = scmp.lt.s32.totalorder %s6009_s18, 2 }
  0x16   : > { %p6111_p3 = por %p128_p2, %p35_p12  ;;  %s185_s20 = sand.u32 1, %s6005_s17  }
  0x17   : > { %s6117_s14 = scalar_select %p26_p13, %s6005_s17, %s28_s11  }
  0x18   : > { %p37_p7 = por %p36_p0, %p35_p12  ;;  %s4917_s23 = sshll.u32 %s185_s20, 8 }
  0x19   : > { %s5123_s24 = sshll.u32 %s6009_s18, 8  ;;  %s189_s29 = scalar_lea.vmem [#allocation2], %s4917_s23 }
  0x1a   : > { %s194_s28 = scalar_lea.hbm %s9172_s0, %s5123_s24  ;;  %s197_s30 = sshll.u32 %s189_s29, 4  ;;  %s198_s30 = int_to_ptr.vmem [resolvable:$true] %s197_s30 }
  0x1b   : > { %s195_s5 = sshll.u32 %s194_s28, 4  ;;  %p6124_p2 = pnand %p5218_p5, %p37_p7  ;;  %s196_s5 = int_to_ptr.hbm [resolvable:$true] %s195_s5 }
  0x1c   : > { %s186_s7 = scalar_lea.sflag [#allocation3], %s185_s20  ;;  %s5909_s8 = sshra.s32 %s196_s5, 4  ;;  %s5910_s8 = int_to_ptr.hbm [resolvable:$true] %s5909_s8 }
  0x1d   : > { %s5911_s9 = scalar_lea.hbm %s5910_s8, 256  ;;  %p5913_p10 = pneg %p6124_p2 }
  0x1e   : > { %p5912_p9 = scmp.ne.s32.totalorder %s5910_s8, %s5911_s9  ;;  %s5916_s23 = scalar_lea.hbm %s9172_s0, 512 }
  0x1f   : > { %p5917_p0 = scmp.lt.s32.totalorder %s5910_s8, %s9172_s0  ;;  %p5918_p5 = scmp.lt.s32.totalorder %s5916_s23, %s5911_s9 }
  0x20   : > { %p5914_p12 = pnand %p5913_p10, %p5912_p9 }
  0x21   : > { %p5919_p7 = por %p5918_p5, %p5917_p0 }
  0x22   : > { %p5915_p13 = pneg %p5914_p12 }
  0x24   : > { %p5920_p11 = pnand %p5919_p7, %p5915_p13 }
  0x26   : > { %5923 = shalt.err (!%p5920_p11)
}
  0x27   : > { %s6015_s20 = smov 128   ;;  %s6016_s27 = smov 8  }
  0x28   : > { %5211 = dma.hbm_to_vmem [thread:$0]  (!%p6124_p2), %s196_s5, 4096, %s198_s30, %s186_s7, %s6015_s20, %s6015_s20, %s6016_s27  }
  0x29   : > { %209 = sbr.rel (%p6088_p8) target bundleno = 2509 (0x9cd), region = 36 }
  0x2e   : > { %s6141_s28 = sand.u32 1, %s6001_s16  }
  0x2f   : > { %s4921_s29 = sshll.u32 %s6141_s28, 8  ;;  %s212_s8 = scalar_lea.sflag [#allocation3], %s6141_s28 }
  0x30   : > { %s6147_s9 = scalar_lea.vmem [#allocation2], %s4921_s29 }
  0x31   : > { %5984 = dma.done.wait (%p6075_p4), %s212_s8, 4096  }
  0x32   : > { %5986 = vsyncadd (%p6075_p4), %s212_s8, 4294963200 }
  0x33   : > { %5988 = dma.done.wait (%p42_p1), [#allocation6], 6144  }
  0x34   : > { %5990 = vsyncadd (%p42_p1), [#allocation6], 4294961152  ;;  %v5131_v0 = vld [vmem:[#allocation5 + $0x38] sm:$0xff]  ;;  %v5130_v1 = vld [vmem:[#allocation5 + $0x30] sm:$0xff]  ;;  %s8905_s6 = scalar_lea.vmem [#allocation8], %s4921_s29  ;;  %s5172_s7 = sshll.u32 %s6066_s19, 8 }
  0x35   : > { %511 = vmatpush.bf16.msra.mxu0 %v5131_v0  ;;  %5173 = vmatpush.bf16.msra.mxu2 %v5131_v0  ;;  %v5129_v2 = vld [vmem:[#allocation5 + $0x28] sm:$0xff]  ;;  %v5128_v3 = vld [vmem:[#allocation5 + $0x20] sm:$0xff]  ;;  %v5127_v4 = vld [vmem:[#allocation5 + $0x18] sm:$0xff]  ;;  %s4816_s23 = scalar_lea.hbm %s9176_s4, %s5172_s7  ;;  %s4817_s24 = sshll.u32 %s8905_s6, 4  ;;  %s4818_s24 = int_to_ptr.vmem [resolvable:$true] %s4817_s24 }
  0x36   : > { %v5126_v5 = vld [vmem:[#allocation5 + $0x10] sm:$0xff]  ;;  %v254_v6 = vld [vmem:[%s6147_s9] sm:$0xff]  ;;  %v255_v7 = vld [vmem:[%s6147_s9 + $0x8] sm:$0xff]  ;;  %s4819_s19 = sshll.u32 %s4816_s23, 4  ;;  %s4805_s25 = scalar_lea.sflag [#allocation4], %s6141_s28  ;;  %s4820_s19 = int_to_ptr.hbm [resolvable:$true] %s4819_s19 }
  0x37   : > { %v270_v8 = vld [vmem:[%s6147_s9 + $0x80] sm:$0xff]  ;;  %v271_v9 = vld [vmem:[%s6147_s9 + $0x88] sm:$0xff]  ;;  %v286_v10 = vpack.c.bf16 %v254_v6, %v254_v6  ;;  %v287_v11 = vpack.c.bf16 %v255_v7, %v255_v7  ;;  %v256_v22 = vld [vmem:[%s6147_s9 + $0x10] sm:$0xff]  ;;  %s5953_s20 = sshra.s32 %s4820_s19, 4  ;;  %s5954_s20 = int_to_ptr.hbm [resolvable:$true] %s5953_s20 }
  0x38   : > { %v302_v12 = vpack.c.bf16 %v270_v8, %v270_v8  ;;  %v303_v13 = vpack.c.bf16 %v271_v9, %v271_v9  ;;  %v5125_v14 = vld [vmem:[#allocation5 + $0x8] sm:$0xff]  ;;  %v5124_v19 = vld [vmem:[#allocation5] sm:$0xff]  ;;  %v257_v23 = vld [vmem:[%s6147_s9 + $0x18] sm:$0xff]  ;;  %v288_v26 = vpack.c.bf16 %v256_v22, %v256_v22  ;;  %s5955_s27 = scalar_lea.hbm %s5954_s20, 256  ;;  %p5960_p11 = scmp.lt.s32.totalorder %s5954_s20, %s9176_s4 }
  0x39   : > { %512 = vmatpush.bf16.msra.mxu0 %v5130_v1  ;;  %5174 = vmatpush.bf16.msra.mxu2 %v5130_v1  ;;  %v399_v15 = vunpack.c.l.b16 %v286_v10  ;;  %v400_v16 = vunpack.c.l.b16 %v287_v11  ;;  %v272_v24 = vld [vmem:[%s6147_s9 + $0x90] sm:$0xff]  ;;  %v273_v25 = vld [vmem:[%s6147_s9 + $0x98] sm:$0xff]  ;;  %v289_v27 = vpack.c.bf16 %v257_v23, %v257_v23  ;;  %v258_v36 = vld [vmem:[%s6147_s9 + $0x20] sm:$0xff]  ;;  %p5956_p1 = scmp.ne.s32.totalorder %s5954_s20, %s5955_s27 }
  0x3a   : > { %v415_v17 = vunpack.c.l.b16 %v302_v12  ;;  %v416_v18 = vunpack.c.l.b16 %v303_v13  ;;  %v304_v28 = vpack.c.bf16 %v272_v24, %v272_v24  ;;  %v305_v29 = vpack.c.bf16 %v273_v25, %v273_v25  ;;  %v259_v37 = vld [vmem:[%s6147_s9 + $0x28] sm:$0xff]  ;;  %v274_v38 = vld [vmem:[%s6147_s9 + $0xa0] sm:$0xff]  ;;  %v260_v50 = vld [vmem:[%s6147_s9 + $0x30] sm:$0xff] }
  0x3b   : > { %v6161_v20 = vpack.c.b16 %v400_v16, %v399_v15  ;;  %v401_v30 = vunpack.c.l.b16 %v288_v26  ;;  %v402_v31 = vunpack.c.l.b16 %v289_v27  ;;  %v275_v39 = vld [vmem:[%s6147_s9 + $0xa8] sm:$0xff]  ;;  %v290_v40 = vpack.c.bf16 %v258_v36, %v258_v36  ;;  %v261_v51 = vld [vmem:[%s6147_s9 + $0x38] sm:$0xff]  ;;  %v276_v52 = vld [vmem:[%s6147_s9 + $0xb0] sm:$0xff]  ;;  %p5957_p4 = pnand %p5956_p1, %p6111_p3 }
  0x3c   : > { %v6163_v21 = vpack.c.b16 %v416_v18, %v415_v17  ;;  %v417_v32 = vunpack.c.l.b16 %v304_v28  ;;  %v418_v33 = vunpack.c.l.b16 %v305_v29  ;;  %v291_v41 = vpack.c.bf16 %v259_v37, %v259_v37  ;;  %v277_v53 = vld [vmem:[%s6147_s9 + $0xb8] sm:$0xff]  ;;  %v262_v0 = vld [vmem:[%s6147_s9 + $0x40] sm:$0xff]  ;;  %v263_v1 = vld [vmem:[%s6147_s9 + $0x48] sm:$0xff] }
  0x3d   : > { %513 = vmatpush.bf16.msra.mxu0 %v5129_v2  ;;  %5175 = vmatpush.bf16.msra.mxu2 %v5129_v2  ;;  %9225 = vst [vmem:[#allocation12_spill] sm:$0xff] %v6161_v20  ;;  %v6171_v34 = vpack.c.b16 %v402_v31, %v401_v30  ;;  %v306_v42 = vpack.c.bf16 %v274_v38, %v274_v38  ;;  %v403_v44 = vunpack.c.l.b16 %v290_v40  ;;  %v278_v2 = vld [vmem:[%s6147_s9 + $0xc0] sm:$0xff]  ;;  %v265_v15 = vld [vmem:[%s6147_s9 + $0x58] sm:$0xff]  ;;  %v280_v16 = vld [vmem:[%s6147_s9 + $0xd0] sm:$0xff]  ;;  %p5958_p8 = pneg %p5957_p4 }
  0x3e   : > { %9226 = vst [vmem:[#allocation13_spill] sm:$0xff] %v6163_v21  ;;  %v6173_v35 = vpack.c.b16 %v418_v33, %v417_v32  ;;  %v307_v43 = vpack.c.bf16 %v275_v39, %v275_v39  ;;  %v404_v45 = vunpack.c.l.b16 %v291_v41  ;;  %v292_v54 = vpack.c.bf16 %v260_v50, %v260_v50  ;;  %v281_v17 = vld [vmem:[%s6147_s9 + $0xd8] sm:$0xff]  ;;  %v266_v30 = vld [vmem:[%s6147_s9 + $0x60] sm:$0xff]  ;;  %v267_v31 = vld [vmem:[%s6147_s9 + $0x68] sm:$0xff] }
  0x3f   : > { %9227 = vst [vmem:[#allocation14_spill] sm:$0xff] %v6171_v34  ;;  %v419_v46 = vunpack.c.l.b16 %v306_v42  ;;  %v293_v55 = vpack.c.bf16 %v261_v51, %v261_v51  ;;  %v308_v56 = vpack.c.bf16 %v276_v52, %v276_v52  ;;  %v309_v57 = vpack.c.bf16 %v277_v53, %v277_v53  ;;  %v282_v32 = vld [vmem:[%s6147_s9 + $0xe0] sm:$0xff]  ;;  %v283_v33 = vld [vmem:[%s6147_s9 + $0xe8] sm:$0xff]  ;;  %v284_v50 = vld [vmem:[%s6147_s9 + $0xf0] sm:$0xff] }
  0x40   : > { %9228 = vst [vmem:[#allocation15_spill] sm:$0xff] %v6173_v35  ;;  %v420_v47 = vunpack.c.l.b16 %v307_v43  ;;  %v6181_v48 = vpack.c.b16 %v404_v45, %v403_v44  ;;  %v405_v58 = vunpack.c.l.b16 %v292_v54  ;;  %v310_v6 = vpack.c.bf16 %v278_v2, %v278_v2  ;;  %v285_v51 = vld [vmem:[%s6147_s9 + $0xf8] sm:$0xff] }
  0x41   : > { %514 = vmatpush.bf16.msra.mxu0 %v5128_v3  ;;  %5176 = vmatpush.bf16.msra.mxu2 %v5128_v3  ;;  %v406_v59 = vunpack.c.l.b16 %v293_v55  ;;  %v421_v60 = vunpack.c.l.b16 %v308_v56  ;;  %v422_v61 = vunpack.c.l.b16 %v309_v57  ;;  %v279_v3 = vld [vmem:[%s6147_s9 + $0xc8] sm:$0xff]  ;;  %v312_v22 = vpack.c.bf16 %v280_v16, %v280_v16 }
  0x42   : > { %9229 = vst [vmem:[#allocation16_spill] sm:$0xff] %v6181_v48  ;;  %v6183_v49 = vpack.c.b16 %v420_v47, %v419_v46  ;;  %v311_v7 = vpack.c.bf16 %v279_v3, %v279_v3  ;;  %v423_v10 = vunpack.c.l.b16 %v310_v6  ;;  %v313_v23 = vpack.c.bf16 %v281_v17, %v281_v17  ;;  %v268_v46 = vld [vmem:[%s6147_s9 + $0x70] sm:$0xff]  ;;  %v269_v47 = vld [vmem:[%s6147_s9 + $0x78] sm:$0xff] }
  0x43   : > { %v6191_v62 = vpack.c.b16 %v406_v59, %v405_v58  ;;  %v6193_v63 = vpack.c.b16 %v422_v61, %v421_v60  ;;  %v425_v26 = vunpack.c.l.b16 %v312_v22  ;;  %v298_v36 = vpack.c.bf16 %v266_v30, %v266_v30 }
  0x44   : > { %9230 = vst [vmem:[#allocation17_spill] sm:$0xff] %v6183_v49  ;;  %v424_v11 = vunpack.c.l.b16 %v311_v7  ;;  %v426_v27 = vunpack.c.l.b16 %v313_v23  ;;  %v299_v37 = vpack.c.bf16 %v267_v31, %v267_v31  ;;  %v314_v38 = vpack.c.bf16 %v282_v32, %v282_v32 }
  0x45   : > { %515 = vmatpush.bf16.msra.mxu0 %v5127_v4  ;;  %5177 = vmatpush.bf16.msra.mxu2 %v5127_v4  ;;  %9231 = vst [vmem:[#allocation18_spill] sm:$0xff] %v6191_v62  ;;  %v294_v4 = vpack.c.bf16 %v262_v0, %v262_v0  ;;  %v315_v39 = vpack.c.bf16 %v283_v33, %v283_v33  ;;  %v411_v40 = vunpack.c.l.b16 %v298_v36 }
  0x46   : > { %9232 = vst [vmem:[#allocation19_spill] sm:$0xff] %v6193_v63  ;;  %v6203_v13 = vpack.c.b16 %v424_v11, %v423_v10  ;;  %v6213_v29 = vpack.c.b16 %v426_v27, %v425_v26  ;;  %v412_v41 = vunpack.c.l.b16 %v299_v37  ;;  %v427_v42 = vunpack.c.l.b16 %v314_v38 }
  0x47   : > { %v407_v8 = vunpack.c.l.b16 %v294_v4  ;;  %v428_v43 = vunpack.c.l.b16 %v315_v39  ;;  %v300_v52 = vpack.c.bf16 %v268_v46, %v268_v46  ;;  %v301_v53 = vpack.c.bf16 %v269_v47, %v269_v47 }
  0x48   : > { %9234 = vst [vmem:[#allocation21_spill] sm:$0xff] %v6203_v13  ;;  %v6221_v44 = vpack.c.b16 %v412_v41, %v411_v40  ;;  %v316_v54 = vpack.c.bf16 %v284_v50, %v284_v50  ;;  %v317_v55 = vpack.c.bf16 %v285_v51, %v285_v51 }
  0x49   : > { %516 = vmatpush.bf16.msra.mxu0 %v5126_v5  ;;  %5178 = vmatpush.bf16.msra.mxu2 %v5126_v5  ;;  %v295_v5 = vpack.c.bf16 %v263_v1, %v263_v1  ;;  %9236 = vst [vmem:[#allocation23_spill] sm:$0xff] %v6213_v29  ;;  %v6223_v45 = vpack.c.b16 %v428_v43, %v427_v42  ;;  %v413_v56 = vunpack.c.l.b16 %v300_v52  ;;  %v414_v57 = vunpack.c.l.b16 %v301_v53 }
  0x4a   : > { %9237 = vst [vmem:[#allocation24_spill] sm:$0xff] %v6221_v44  ;;  %v429_v58 = vunpack.c.l.b16 %v316_v54  ;;  %v430_v59 = vunpack.c.l.b16 %v317_v55 }
  0x4b   : > { %v408_v9 = vunpack.c.l.b16 %v295_v5  ;;  %9238 = vst [vmem:[#allocation25_spill] sm:$0xff] %v6223_v45  ;;  %v6231_v60 = vpack.c.b16 %v414_v57, %v413_v56 }
  0x4c   : > { %v6233_v61 = vpack.c.b16 %v430_v59, %v429_v58 }
  0x4d   : > { %517 = vmatpush.bf16.msra.mxu0 %v5125_v14  ;;  %5179 = vmatpush.bf16.msra.mxu2 %v5125_v14  ;;  %v6201_v12 = vpack.c.b16 %v408_v9, %v407_v8  ;;  %v264_v14 = vld [vmem:[%s6147_s9 + $0x50] sm:$0xff]  ;;  %9239 = vst [vmem:[#allocation26_spill] sm:$0xff] %v6231_v60  ;;  %s5959_s9 = scalar_lea.hbm %s9176_s4, 512 }
  0x4e   : > { %v296_v18 = vpack.c.bf16 %v264_v14, %v264_v14  ;;  %9240 = vst [vmem:[#allocation27_spill] sm:$0xff] %v6233_v61  ;;  %p5961_p2 = scmp.lt.s32.totalorder %s5959_s9, %s5955_s27 }
  0x4f   : > { %9233 = vst [vmem:[#allocation20_spill] sm:$0xff] %v6201_v12 }
  0x50   : > { %v409_v24 = vunpack.c.l.b16 %v296_v18  ;;  %p5962_p9 = por %p5961_p2, %p5960_p11 }
  0x51   : > { %518 = vmatpush.bf16.msra.mxu0 %v5124_v19  ;;  %5180 = vmatpush.bf16.msra.mxu2 %v5124_v19  ;;  %v297_v19 = vpack.c.bf16 %v265_v15, %v265_v15 }
  0x52   : > { %p5963_p10 = pnand %p5962_p9, %p5958_p8 }
  0x53   : > { %v410_v25 = vunpack.c.l.b16 %v297_v19 }
  0x54   : > { %519 = vmatmul.bf16.vlgmr.msra.gmra.mxu0 %v6161_v20  ;;  %559 = vmatmul.bf16.vlgmr.msra.gmra.mxu2 %v6163_v21 }
  0x55   : > { %v6211_v28 = vpack.c.b16 %v410_v25, %v409_v24 }
  0x57   : > { %9235 = vst [vmem:[#allocation22_spill] sm:$0xff] %v6211_v28 }
  0x64   : > { %524 = vmatmul.bf16.gmra.mxu0 %v6171_v34  ;;  %564 = vmatmul.bf16.gmra.mxu2 %v6173_v35 }
  0x74   : > { %529 = vmatmul.bf16.gmra.mxu0 %v6181_v48  ;;  %569 = vmatmul.bf16.gmra.mxu2 %v6183_v49 }
  0x84   : > { %534 = vmatmul.bf16.gmra.mxu0 %v6191_v62  ;;  %574 = vmatmul.bf16.gmra.mxu2 %v6193_v63 }
  0x94   : > { %539 = vmatmul.bf16.gmra.mxu0 %v6201_v12  ;;  %579 = vmatmul.bf16.gmra.mxu2 %v6203_v13 }
  0xa4   : > { %544 = vmatmul.bf16.gmra.mxu0 %v6211_v28  ;;  %584 = vmatmul.bf16.gmra.mxu2 %v6213_v29 }
  0xb4   : > { %549 = vmatmul.bf16.gmra.mxu0 %v6221_v44  ;;  %589 = vmatmul.bf16.gmra.mxu2 %v6223_v45 }
  0xc4   : > { %554 = vmatmul.bf16.gmra.mxu0 %v6231_v60  ;;  %594 = vmatmul.bf16.gmra.mxu2 %v6233_v61 }
  0xd1   : > { %v6237_v0 = vpop.f32.mrf.mxu0 }
  0xd7   : > { %v6239_v1 = vpop.f32.mrf.mxu2 }
  0xd8   : > { %9241 = vst [vmem:[#allocation28_spill] sm:$0xff] %v6239_v1 }
  0xd9   : > { %v6241_v2 = vpop.f32.mrf.mxu0 }
  0xda   : > { %v630_v25 = vmax.f32 %v6237_v0, %v6241_v2 }
  0xdc   : > { %v631_v32 = vrot.slane %v630_v25, 4 }
  0xde   : > { %v632_v38 = vmax.f32 %v630_v25, %v631_v32 }
  0xdf   : > { %v6243_v3 = vpop.f32.mrf.mxu2 }
  0xe0   : > { %v686_v27 = vmax.f32 %v6239_v1, %v6243_v3  ;;  %v633_v46 = vrot.slane %v632_v38, 2 }
  0xe1   : > { %v6245_v4 = vpop.f32.mrf.mxu0 }
  0xe2   : > { %9242 = vst [vmem:[#allocation29_spill] sm:$0xff] %v6245_v4  ;;  %v687_v33 = vrot.slane %v686_v27, 4  ;;  %v634_v54 = vmax.f32 %v632_v38, %v633_v46 }
  0xe4   : > { %v688_v40 = vmax.f32 %v686_v27, %v687_v33 }
  0xe6   : > { %v689_v47 = vrot.slane %v688_v40, 2 }
  0xe7   : > { %v6247_v5 = vpop.f32.mrf.mxu2 }
  0xe8   : > { %9243 = vst [vmem:[#allocation30_spill] sm:$0xff] %v6247_v5  ;;  %v690_v56 = vmax.f32 %v688_v40, %v689_v47 }
  0xe9   : > { %v6249_v6 = vpop.f32.mrf.mxu0 }
  0xea   : > { %v637_v31 = vmax.f32 %v6245_v4, %v6249_v6  ;;  %v691_v32 = vrot.slane %v690_v56, 1 }
  0xec   : > { %v638_v36 = vrot.slane %v637_v31, 4  ;;  %v6309_v40 = vmax.f32 %v690_v56, %v691_v32 }
  0xee   : > { %v639_v42 = vmax.f32 %v637_v31, %v638_v36  ;;  %v635_v31 = vrot.slane %v634_v54, 1 }
  0xef   : > { %v6251_v7 = vpop.f32.mrf.mxu2 }
  0xf0   : > { %v693_v37 = vmax.f32 %v6247_v5, %v6251_v7  ;;  %v640_v51 = vrot.slane %v639_v42, 2 }
  0xf1   : > { %v6253_v8 = vpop.f32.mrf.mxu0 }
  0xf2   : > { %9244 = vst [vmem:[#allocation31_spill] sm:$0xff] %v6253_v8  ;;  %v694_v43 = vrot.slane %v693_v37, 4  ;;  %v641_v59 = vmax.f32 %v639_v42, %v640_v51  ;;  %v600_v42 = vmax.f32 %v6237_v0, %v6253_v8 }
  0xf4   : > { %v695_v52 = vmax.f32 %v693_v37, %v694_v43  ;;  %v642_v36 = vrot.slane %v641_v59, 1  ;;  %v6303_v37 = vmax.f32 %v634_v54, %v635_v31 }
  0xf6   : > { %v696_v25 = vrot.slane %v695_v52, 2  ;;  %v6324_v56 = vmax.f32 %v641_v59, %v642_v36 }
  0xf7   : > { %v6255_v9 = vpop.f32.mrf.mxu2 }
  0xf8   : > { %9245 = vst [vmem:[#allocation32_spill] sm:$0xff] %v6255_v9  ;;  %v697_v61 = vmax.f32 %v695_v52, %v696_v25 }
  0xf9   : > { %v6257_v10 = vpop.f32.mrf.mxu0 }
  0xfa   : > { %v644_v50 = vmax.f32 %v6253_v8, %v6257_v10  ;;  %v615_v38 = vmax.f32 %v6241_v2, %v6257_v10 }
  0xfc   : > { %v645_v57 = vrot.slane %v644_v50, 4 }
  0xfe   : > { %v646_v33 = vmax.f32 %v644_v50, %v645_v57  ;;  %v698_v57 = vrot.slane %v697_v61, 1 }
  0xff   : > { %v6259_v11 = vpop.f32.mrf.mxu2 }
 0x100   : > { %9246 = vst [vmem:[#allocation33_spill] sm:$0xff] %v6259_v11  ;;  %v700_v53 = vmax.f32 %v6255_v9, %v6259_v11  ;;  %v647_v46 = vrot.slane %v646_v33, 2  ;;  %v6342_v63 = vmax.f32 %v697_v61, %v698_v57 }
 0x101   : > { %v6261_v14 = vpop.f32.mrf.mxu0 }
 0x102   : > { %9247 = vst [vmem:[#allocation34_spill] sm:$0xff] %v6261_v14  ;;  %v701_v27 = vrot.slane %v700_v53, 4  ;;  %v601_v50 = vmax.f32 %v6245_v4, %v6261_v14  ;;  %v6334_v44 = vmax.f32 %v646_v33, %v647_v46 }
 0x104   : > { %v702_v60 = vmax.f32 %v700_v53, %v701_v27 }
 0x106   : > { %v703_v25 = vrot.slane %v702_v60, 2 }
 0x107   : > { %v6263_v15 = vpop.f32.mrf.mxu2 }
 0x108   : > { %9248 = vst [vmem:[#allocation35_spill] sm:$0xff] %v6263_v15  ;;  %v6344_v62 = vmax.f32 %v702_v60, %v703_v25 }
 0x109   : > { %v6265_v16 = vpop.f32.mrf.mxu0 }
 0x10a   : > { %v651_v47 = vmax.f32 %v6261_v14, %v6265_v16  ;;  %v616_v33 = vmax.f32 %v6249_v6, %v6265_v16 }
 0x10c   : > { %v652_v29 = vrot.slane %v651_v47, 4 }
 0x10e   : > { %v653_v60 = vmax.f32 %v651_v47, %v652_v29 }
 0x10f   : > { %v6267_v17 = vpop.f32.mrf.mxu2 }
 0x110   : > { %9249 = vst [vmem:[#allocation36_spill] sm:$0xff] %v6267_v17  ;;  %v707_v51 = vmax.f32 %v6263_v15, %v6267_v17 }
 0x111   : > { %v6269_v18 = vpop.f32.mrf.mxu0 }
 0x112   : > { %9250 = vst [vmem:[#allocation37_spill] sm:$0xff] %v6269_v18  ;;  %v708_v28 = vrot.slane %v707_v51, 4 }
 0x114   : > { %v709_v25 = vmax.f32 %v707_v51, %v708_v28  ;;  %v654_v51 = vrot.slane %v653_v60, 2 }
 0x117   : > { %v6271_v19 = vpop.f32.mrf.mxu2 }
 0x119   : > { %v6273_v22 = vpop.f32.mrf.mxu0 }
 0x11a   : > { %v617_v52 = vmax.f32 %v615_v38, %v6273_v22  ;;  %v658_v53 = vmax.f32 %v6269_v18, %v6273_v22 }
 0x11c   : > { %v659_v13 = vrot.slane %v658_v53, 4 }
 0x11e   : > { %v660_v21 = vmax.f32 %v658_v53, %v659_v13  ;;  %v710_v53 = vrot.slane %v709_v25, 2 }
 0x11f   : > { %v6275_v23 = vpop.f32.mrf.mxu2 }
 0x120   : > { %9251 = vst [vmem:[#allocation38_spill] sm:$0xff] %v6275_v23  ;;  %v714_v27 = vmax.f32 %v6271_v19, %v6275_v23 }
 0x121   : > { %v6277_v24 = vpop.f32.mrf.mxu0 }
 0x122   : > { %9252 = vst [vmem:[#allocation39_spill] sm:$0xff] %v6277_v24  ;;  %v603_v31 = vmax.f32 %v601_v50, %v6277_v24  ;;  %v602_v50 = vmax.f32 %v600_v42, %v6269_v18  ;;  %v715_v46 = vrot.slane %v714_v27, 4  ;;  %v649_v42 = vrot.slane %v6334_v44, 1 }
 0x123   : > { %v705_v18 = vrot.slane %v6344_v62, 1 }
 0x127   : > { %v6281_v26 = vpop.f32.mrf.mxu2 }
 0x129   : > { %v6285_v30 = vpop.f32.mrf.mxu0 }
 0x12a   : > { %v665_v32 = vmax.f32 %v6277_v24, %v6285_v30 }
 0x12f   : > { %v6291_v39 = vpop.f32.mrf.mxu2 }
 0x130   : > { %v721_v38 = vmax.f32 %v6281_v26, %v6291_v39 }
 0x131   : > { %v6293_v41 = vpop.f32.mrf.mxu0 }
 0x132   : > { %9253 = vst [vmem:[#allocation40_spill] sm:$0xff] %v6293_v41  ;;  %v722_v49 = vrot.slane %v721_v38, 4  ;;  %v604_v48 = vmax.f32 %v602_v50, %v6293_v41  ;;  %v716_v50 = vmax.f32 %v714_v27, %v715_v46 }
 0x134   : > { %v723_v8 = vmax.f32 %v721_v38, %v722_v49  ;;  %v717_v46 = vrot.slane %v716_v50, 2 }
 0x136   : > { %v724_v38 = vrot.slane %v723_v8, 2 }
 0x137   : > { %v6299_v55 = vpop.f32.mrf.mxu2 }
 0x139   : > { %v6301_v58 = vpop.f32.mrf.mxu0 }
 0x13a   : > { %v619_v45 = vmax.f32 %v617_v52, %v6301_v58  ;;  %v672_v59 = vmax.f32 %v6293_v41, %v6301_v58  ;;  %v666_v52 = vrot.slane %v665_v32, 4 }
 0x13c   : > { %v621_v35 = vmax.f32 %v619_v45, %v6243_v3  ;;  %v673_v61 = vrot.slane %v672_v59, 4  ;;  %v667_v14 = vmax.f32 %v665_v32, %v666_v52 }
 0x13e   : > { %v623_v29 = vmax.f32 %v621_v35, %v6259_v11  ;;  %v674_v28 = vmax.f32 %v672_v59, %v673_v61  ;;  %v668_v49 = vrot.slane %v667_v14, 2 }
 0x13f   : > { %v6307_v43 = vpop.f32.mrf.mxu2 }
 0x140   : > { %v728_v36 = vmax.f32 %v6299_v55, %v6307_v43  ;;  %v625_v35 = vmax.f32 %v623_v29, %v6275_v23  ;;  %v669_v29 = vmax.f32 %v667_v14, %v668_v49 }
 0x141   : > { %v6322_v54 = vpop.f32.mrf.mxu0 }
 0x142   : > { %v605_v12 = vmax.f32 %v603_v31, %v6322_v54  ;;  %v618_v31 = vmax.f32 %v616_v33, %v6285_v30  ;;  %v729_v57 = vrot.slane %v728_v36, 4  ;;  %v606_v33 = vmax.f32 %v604_v48, %v6239_v1 }
 0x144   : > { %v607_v20 = vmax.f32 %v605_v12, %v6247_v5  ;;  %v730_v13 = vmax.f32 %v728_v36, %v729_v57  ;;  %v661_v5 = vrot.slane %v660_v21, 2  ;;  %v608_v48 = vmax.f32 %v606_v33, %v6255_v9 }
 0x145   : > { %v675_v36 = vrot.slane %v674_v28, 2  ;;  %v725_v9 = vmax.f32 %v723_v8, %v724_v38 }
 0x146   : > { %v609_v27 = vmax.f32 %v607_v20, %v6263_v15  ;;  %v731_v52 = vrot.slane %v730_v13, 2  ;;  %v711_v20 = vmax.f32 %v709_v25, %v710_v53  ;;  %v610_v23 = vmax.f32 %v608_v48, %v6271_v19 }
 0x147   : > { %v6350_v34 = vpop.f32.mrf.mxu2  ;;  %v676_v11 = vmax.f32 %v674_v28, %v675_v36 }
 0x148   : > { %v611_v15 = vmax.f32 %v609_v27, %v6281_v26  ;;  %v612_v49 = vmax.f32 %v610_v23, %v6299_v55 }
 0x149   : > { %v6355_v24 = vpop.f32.mrf.mxu0 }
 0x14a   : > { %v620_v45 = vmax.f32 %v618_v31, %v6355_v24  ;;  %v679_v41 = vmax.f32 %v6322_v54, %v6355_v24  ;;  %v251_v31 = vlaneseq  ;;  %v613_v53 = vmax.f32 %v611_v15, %v6350_v34 }
 0x14c   : > { %v622_v12 = vmax.f32 %v620_v45, %v6251_v7  ;;  %v680_v47 = vrot.slane %v679_v41, 4  ;;  %v655_v45 = vmax.f32 %v653_v60, %v654_v51  ;;  %v6377_v60 = vand.u32 127, %v251_v31 }
 0x14d   : > { %v677_v31 = vrot.slane %v676_v11, 1 }
 0x14e   : > { %v681_v4 = vmax.f32 %v679_v41, %v680_v47  ;;  %v624_v32 = vmax.f32 %v622_v12, %v6267_v17  ;;  %v662_v12 = vmax.f32 %v660_v21, %v661_v5  ;;  %v718_v47 = vmax.f32 %v716_v50, %v717_v46 }
 0x14f   : > { %v6368_v59 = vpop.f32.mrf.mxu2  ;;  %v627_v17 = vmax.f32 %v625_v35, %v6307_v43  ;;  %v656_v51 = vrot.slane %v655_v45, 1  ;;  %v712_v5 = vrot.slane %v711_v20, 1  ;;  %v670_v50 = vrot.slane %v669_v29, 1 }
 0x150   : > { %v682_v61 = vrot.slane %v681_v4, 2  ;;  %v626_v57 = vmax.f32 %v624_v32, %v6291_v39  ;;  %v735_v41 = vmax.f32 %v6350_v34, %v6368_v59  ;;  %v732_v32 = vmax.f32 %v730_v13, %v731_v52 }
 0x151   : > { %v663_v14 = vrot.slane %v662_v12, 1  ;;  %v719_v8 = vrot.slane %v718_v47, 1  ;;  %v726_v46 = vrot.slane %v725_v9, 1  ;;  %v706_v13 = vmax.f32 %v6344_v62, %v705_v18 }
 0x152   : > { %v683_v1 = vmax.f32 %v681_v4, %v682_v61  ;;  %v628_v33 = vmax.f32 %v626_v57, %v6368_v59  ;;  %v736_v21 = vrot.slane %v735_v41, 4  ;;  %v650_v4 = vmax.f32 %v6334_v44, %v649_v42 }
 0x153   : > { %v733_v38 = vrot.slane %v732_v32, 1  ;;  %vm253_vm0 = vcmp.lt.s32.totalorder %v6377_v60, 64  ;;  %v657_v15 = vmax.f32 %v655_v45, %v656_v51  ;;  %v6392_v42 = vmax.f32 %v711_v20, %v712_v5 }
 0x154   : > { %v684_v25 = vrot.slane %v683_v1, 1  ;;  %v6380_v27 = vmax.f32 %v627_v17, %v628_v33  ;;  %v6386_v17 = vmax.f32 %v612_v49, %v613_v53  ;;  %v737_v48 = vmax.f32 %v735_v41, %v736_v21 }
 0x155   : > { %v664_v35 = vmax.f32 %v662_v12, %v663_v14  ;;  %v6401_v18 = vmax.f32 %v718_v47, %v719_v8  ;;  %v671_v23 = vmax.f32 %v669_v29, %v670_v50  ;;  %v6403_v36 = vmax.f32 %v725_v9, %v726_v46 }
 0x156   : > { %v685_v28 = vmax.f32 %v683_v1, %v684_v25  ;;  %v745_v44 = vsel %vm253_vm0, %v6380_v27, %v6303_v37  ;;  %v747_v62 = vsel %vm253_vm0, %v6380_v27, %v6324_v56  ;;  %v749_v1 = vsel %vm253_vm0, %v6380_v27, %v650_v4 }
 0x157   : > { %v678_v61 = vmax.f32 %v676_v11, %v677_v31  ;;  %v6408_v57 = vmax.f32 %v732_v32, %v733_v38  ;;  %v751_v45 = vsel %vm253_vm0, %v6380_v27, %v657_v15  ;;  %v777_v20 = vsub.f32 %v6241_v2, %v745_v44 }
 0x158   : > { %v758_v52 = vsel %vm253_vm0, %v6386_v17, %v685_v28  ;;  %v738_v41 = vrot.slane %v737_v48, 2  ;;  %v753_v12 = vsel %vm253_vm0, %v6380_v27, %v664_v35  ;;  %v779_v9 = vsub.f32 %v6249_v6, %v747_v62 }
 0x159   : > { %v781_v47 = vsub.f32 %v6257_v10, %v749_v1  ;;  %v790_v33 = vsub.f32 %v6322_v54, %v758_v52  ;;  %v759_v11 = vsel %vm253_vm0, %v6380_v27, %v685_v28  ;;  %v6427_v2 = vsel %vm253_vm0, %v6386_v17, %v6303_v37 }
 0x15a   : > { %v6433_v29 = vsel %vm253_vm0, %v6386_v17, %v6324_v56  ;;  %v783_v6 = vsub.f32 %v6265_v16, %v751_v45  ;;  %v6439_v10 = vsel %vm253_vm0, %v6386_v17, %v650_v4  ;;  %v6444_v54 = vsel %vm253_vm0, %v6386_v17, %v657_v15 }
 0x15b   : > { %v6449_v37 = vsel %vm253_vm0, %v6386_v17, %v664_v35  ;;  %v755_v56 = vsel %vm253_vm0, %v6380_v27, %v671_v23  ;;  %v785_v16 = vsub.f32 %v6273_v22, %v753_v12  ;;  %v810_v32 = vmul.f32 1.442695, %v777_v20 }
 0x15c   : > { %v6458_v25 = vsel %vm253_vm0, %v6386_v17, %v671_v23  ;;  %v739_v51 = vmax.f32 %v737_v48, %v738_v41  ;;  %v791_v53 = vsub.f32 %v6355_v24, %v759_v11  ;;  %v814_v21 = vmul.f32 1.442695, %v779_v9  ;;  %v9254_v41 = vld [vmem:[#allocation33_spill] sm:$0xff]  ;;  %v9256_v11 = vld [vmem:[#allocation31_spill] sm:$0xff] }
 0x15d   : > { %v818_v4 = vmul.f32 1.442695, %v781_v47  ;;  %v836_v5 = vmul.f32 1.442695, %v790_v33  ;;  %v757_v14 = vsel %vm253_vm0, %v6380_v27, %v678_v61  ;;  %5263 = vpow2.f32 %v810_v32  ;;  %v9255_v47 = vld [vmem:[#allocation29_spill] sm:$0xff] }
 0x15e   : > { %v6467_v22 = vsel %vm253_vm0, %v6386_v17, %v678_v61  ;;  %v787_v8 = vsub.f32 %v6285_v30, %v755_v56  ;;  %5265 = vpow2.f32 %v814_v21  ;;  %v822_v50 = vmul.f32 1.442695, %v783_v6 }
 0x15f   : > { %v6474_v24 = vsel %vm253_vm0, %v6386_v17, %v6309_v40  ;;  %v761_v46 = vsel %vm253_vm0, %v6380_v27, %v6309_v40  ;;  %v826_v49 = vmul.f32 1.442695, %v785_v16  ;;  %v6484_v28 = vsel %vm253_vm0, %v6386_v17, %v6342_v63 }
 0x160   : > { %v6489_v30 = vsel %vm253_vm0, %v6386_v17, %v706_v13  ;;  %v740_v31 = vrot.slane %v739_v51, 1  ;;  %v789_v38 = vsub.f32 %v6301_v58, %v757_v14  ;;  %5267 = vpow2.f32 %v818_v4  ;;  %v9259_v14 = vld [vmem:[#allocation37_spill] sm:$0xff] }
 0x161   : > { %v838_v15 = vmul.f32 1.442695, %v791_v53  ;;  %5269 = vpow2.f32 %v836_v5  ;;  %v763_v40 = vsel %vm253_vm0, %v6380_v27, %v6342_v63  ;;  %v6500_v48 = vsel %vm253_vm0, %v6386_v17, %v6392_v42 }
 0x162   : > { %v6506_v44 = vsel %vm253_vm0, %v6386_v17, %v6401_v18  ;;  %v765_v58 = vsel %vm253_vm0, %v6380_v27, %v706_v13  ;;  %5271 = vpow2.f32 %v822_v50  ;;  %v830_v35 = vmul.f32 1.442695, %v787_v8 }
 0x163   : > { %v6515_v63 = vsel %vm253_vm0, %v6386_v17, %v6403_v36  ;;  %v6517_v62 = vpop.eup %5263  ;;  %v793_v1 = vsub.f32 %v6243_v3, %v761_v46  ;;  %5273 = vpow2.f32 %v826_v49  ;;  %v6524_v23 = vsel %vm253_vm0, %v6386_v17, %v6408_v57  ;;  %v9260_v46 = vld [vmem:[#allocation38_spill] sm:$0xff] }
 0x164   : > { %v776_v13 = vsub.f32 %v6237_v0, %v6427_v2  ;;  %v6528_v52 = vpop.eup %5265  ;;  %v741_v61 = vmax.f32 %v739_v51, %v740_v31  ;;  %v795_v45 = vsub.f32 %v6251_v7, %v763_v40  ;;  %v834_v20 = vmul.f32 1.442695, %v789_v38 }
 0x165   : > { %5275 = vpow2.f32 %v838_v15  ;;  %v767_v3 = vsel %vm253_vm0, %v6380_v27, %v6392_v42  ;;  %v797_v12 = vsub.f32 %v9254_v41, %v765_v58  ;;  %v887_v9 = vadd.f32 %v6528_v52, %v6517_v62  ;;  %v9257_v42 = vld [vmem:[#allocation34_spill] sm:$0xff] }
 0x166   : > { %v778_v0 = vsub.f32 %v9255_v47, %v6433_v29  ;;  %v6540_v33 = vpop.eup %5267  ;;  %v769_v7 = vsel %vm253_vm0, %v6380_v27, %v6401_v18  ;;  %5277 = vpow2.f32 %v830_v35  ;;  %v780_v2 = vsub.f32 %v9256_v11, %v6439_v10 }
 0x167   : > { %v782_v6 = vsub.f32 %v9257_v42, %v6444_v54  ;;  %v6550_v56 = vpop.eup %5269  ;;  %v771_v29 = vsel %vm253_vm0, %v6380_v27, %v6403_v36  ;;  %v773_v16 = vsel %vm253_vm0, %v6380_v27, %v6408_v57  ;;  %v842_v18 = vmul.f32 1.442695, %v793_v1  ;;  %v9258_v54 = vld [vmem:[#allocation36_spill] sm:$0xff]  ;;  %v9264_v42 = vld [vmem:[#allocation30_spill] sm:$0xff] }
 0x168   : > { %v888_v32 = vadd.f32 %v6540_v33, %v887_v9  ;;  %v6561_v51 = vpop.eup %5271  ;;  %v774_v10 = vsel %vm253_vm0, %v6386_v17, %v741_v61  ;;  %v799_v53 = vsub.f32 %v9258_v54, %v767_v3  ;;  %5279 = vpow2.f32 %v834_v20  ;;  %v9262_v20 = vld [vmem:[#allocation40_spill] sm:$0xff] }
 0x169   : > { %v846_v21 = vmul.f32 1.442695, %v795_v45  ;;  %v6567_v4 = vpop.eup %5273  ;;  %v775_v36 = vsel %vm253_vm0, %v6380_v27, %v741_v61  ;;  %v850_v57 = vmul.f32 1.442695, %v797_v12  ;;  %v784_v8 = vsub.f32 %v9259_v14, %v6449_v37 }
 0x16a   : > { %v889_v5 = vadd.f32 %v6561_v51, %v888_v32  ;;  %v801_v17 = vsub.f32 %v9260_v46, %v769_v7  ;;  %v803_v49 = vsub.f32 %v6291_v39, %v771_v29  ;;  %v805_v31 = vsub.f32 %v6307_v43, %v773_v16  ;;  %v9261_v43 = vld [vmem:[#allocation39_spill] sm:$0xff]  ;;  %v9265_v16 = vld [vmem:[#allocation32_spill] sm:$0xff] }
 0x16b   : > { %v6575_v50 = vpop.eup %5275  ;;  %v808_v38 = vmul.f32 1.442695, %v776_v13  ;;  %v806_v15 = vsub.f32 %v6350_v34, %v774_v10  ;;  %5281 = vpow2.f32 %v842_v18  ;;  %v812_v40 = vmul.f32 1.442695, %v778_v0 }
 0x16c   : > { %v890_v27 = vadd.f32 %v6567_v4, %v889_v5  ;;  %v6582_v58 = vpop.eup %5277  ;;  %v807_v35 = vsub.f32 %v6368_v59, %v775_v36  ;;  %5283 = vpow2.f32 %v846_v21  ;;  %v854_v37 = vmul.f32 1.442695, %v799_v53  ;;  %v9263_v59 = vld [vmem:[#allocation28_spill] sm:$0xff] }
 0x16d   : > { %v953_v1 = vadd.f32 %v6575_v50, %v6550_v56  ;;  %5285 = vpow2.f32 %v850_v57  ;;  %v786_v13 = vsub.f32 %v9261_v43, %v6458_v25  ;;  %v816_v34 = vmul.f32 1.442695, %v780_v2 }
 0x16e   : > { %v891_v39 = vadd.f32 %v6582_v58, %v890_v27  ;;  %v6590_v61 = vpop.eup %5279  ;;  %v858_v45 = vmul.f32 1.442695, %v801_v17  ;;  %v788_v3 = vsub.f32 %v9262_v20, %v6467_v22  ;;  %v792_v41 = vsub.f32 %v9263_v59, %v6474_v24 }
 0x16f   : > { %5287 = vpow2.f32 %v808_v38  ;;  %v862_v12 = vmul.f32 1.442695, %v803_v49  ;;  %v820_v47 = vmul.f32 1.442695, %v782_v6  ;;  %v866_v0 = vmul.f32 1.442695, %v805_v31 }
 0x170   : > { %v892_v9 = vadd.f32 %v6590_v61, %v891_v39  ;;  %5289 = vpow2.f32 %v812_v40  ;;  %v868_v7 = vmul.f32 1.442695, %v806_v15  ;;  %v870_v25 = vmul.f32 1.442695, %v807_v35  ;;  %v9266_v6 = vld [vmem:[#allocation35_spill] sm:$0xff] }
 0x171   : > { %5291 = vpow2.f32 %v854_v37  ;;  %v6597_v11 = vpop.eup %5281  ;;  %v794_v22 = vsub.f32 %v9264_v42, %v6484_v28  ;;  %v824_v29 = vmul.f32 1.442695, %v784_v8  ;;  %v796_v18 = vsub.f32 %v9265_v16, %v6489_v30 }
 0x172   : > { %v893_v2 = vadd.f32 %v6575_v50, %v892_v9  ;;  %5293 = vpow2.f32 %v816_v34  ;;  %v6602_v24 = vpop.eup %5283  ;;  %v798_v32 = vsub.f32 %v9266_v6, %v6500_v48  ;;  %v828_v10 = vmul.f32 1.442695, %v786_v13 }
 0x173   : > { %5295 = vpow2.f32 %v858_v45  ;;  %v6608_v54 = vpop.eup %5285  ;;  %v800_v21 = vsub.f32 %v6271_v19, %v6506_v44  ;;  %v954_v28 = vrot.slane %v953_v1, 4  ;;  %v802_v57 = vsub.f32 %v6281_v26, %v6515_v63 }
 0x174   : > { %v894_v53 = vadd.f32 %v6597_v11, %v893_v2  ;;  %5297 = vpow2.f32 %v820_v47  ;;  %v804_v30 = vsub.f32 %v6299_v55, %v6524_v23  ;;  %v832_v48 = vmul.f32 1.442695, %v788_v3 }
 0x175   : > { %v6613_v36 = vpop.eup %5287  ;;  %5299 = vpow2.f32 %v862_v12  ;;  %v840_v8 = vmul.f32 1.442695, %v792_v41  ;;  %v844_v46 = vmul.f32 1.442695, %v794_v22  ;;  %v955_v49 = vadd.f32 %v954_v28, %v953_v1 }
 0x176   : > { %v6619_v5 = vpop.eup %5289  ;;  %v895_v14 = vadd.f32 %v6602_v24, %v894_v53  ;;  %5301 = vpow2.f32 %v824_v29  ;;  %v904_v19 = vadd.f32 %v6613_v36, %v6517_v62  ;;  %v848_v38 = vmul.f32 1.442695, %v796_v18 }
 0x177   : > { %v6624_v44 = vpop.eup %5291  ;;  %5303 = vpow2.f32 %v828_v10  ;;  %v872_v26 = vadd.f32 %v6619_v5, %v6613_v36  ;;  %v911_v55 = vadd.f32 %v6619_v5, %v6528_v52  ;;  %v852_v37 = vmul.f32 1.442695, %v798_v32 }
 0x178   : > { %v6630_v63 = vpop.eup %5293  ;;  %5305 = vpow2.f32 %v866_v0  ;;  %v896_v23 = vadd.f32 %v6608_v54, %v895_v14  ;;  %v905_v17 = vrot.slane %v904_v19, 4  ;;  %v856_v39 = vmul.f32 1.442695, %v800_v21 }
 0x179   : > { %v6633_v31 = vpop.eup %5295  ;;  %5307 = vpow2.f32 %v868_v7  ;;  %v873_v15 = vadd.f32 %v6630_v63, %v872_v26  ;;  %v912_v27 = vrot.slane %v911_v55, 4  ;;  %v860_v3 = vmul.f32 1.442695, %v802_v57 }
 0x17a   : > { %v6636_v40 = vpop.eup %5297  ;;  %v897_v35 = vadd.f32 %v6624_v44, %v896_v23  ;;  %5309 = vpow2.f32 %v832_v48  ;;  %v906_v1 = vadd.f32 %v905_v17, %v904_v19  ;;  %v956_v59 = vrot.slane %v955_v49, 2 }
 0x17b   : > { %v6639_v43 = vpop.eup %5299  ;;  %5311 = vpow2.f32 %v870_v25  ;;  %v874_v13 = vadd.f32 %v6636_v40, %v873_v15  ;;  %v925_v34 = vadd.f32 %v6636_v40, %v6561_v51  ;;  %v913_v9 = vadd.f32 %v912_v27, %v911_v55 }
 0x17c   : > { %v6644_v45 = vpop.eup %5301  ;;  %v898_v20 = vadd.f32 %v6633_v31, %v897_v35  ;;  %5313 = vpow2.f32 %v840_v8  ;;  %v918_v2 = vadd.f32 %v6630_v63, %v6540_v33  ;;  %v907_v16 = vrot.slane %v906_v1, 2 }
 0x17d   : > { %v6647_v41 = vpop.eup %5303  ;;  %v875_v12 = vadd.f32 %v6644_v45, %v874_v13  ;;  %v926_v47 = vrot.slane %v925_v34, 4  ;;  %v932_v0 = vadd.f32 %v6644_v45, %v6567_v4  ;;  %5315 = vpow2.f32 %v844_v46 }
 0x17e   : > { %v6652_v7 = vpop.eup %5305  ;;  %v899_v25 = vadd.f32 %v6639_v43, %v898_v20  ;;  %v939_v42 = vadd.f32 %v6647_v41, %v6582_v58  ;;  %5317 = vpow2.f32 %v848_v38  ;;  %v864_v53 = vmul.f32 1.442695, %v804_v30 }
 0x17f   : > { %v6659_v22 = vpop.eup %5307  ;;  %v876_v29 = vadd.f32 %v6647_v41, %v875_v12  ;;  %v927_v18 = vadd.f32 %v926_v47, %v925_v34  ;;  %v933_v6 = vrot.slane %v932_v0, 4  ;;  %5319 = vpow2.f32 %v852_v37 }
 0x180   : > { %v6662_v32 = vpop.eup %5309  ;;  %v900_v10 = vadd.f32 %v6652_v7, %v899_v25  ;;  %v940_v21 = vrot.slane %v939_v42, 4  ;;  %v914_v48 = vrot.slane %v913_v9, 2  ;;  %5321 = vpow2.f32 %v856_v39 }
 0x181   : > { %v6665_v28 = vpop.eup %5311  ;;  %v877_v57 = vadd.f32 %v6662_v32, %v876_v29  ;;  %v934_v14 = vadd.f32 %v933_v6, %v932_v0  ;;  %v919_v19 = vrot.slane %v918_v2, 4  ;;  %v957_v26 = vadd.f32 %v956_v59, %v955_v49 }
 0x182   : > { %v6668_v8 = vpop.eup %5313  ;;  %v941_v46 = vadd.f32 %v940_v21, %v939_v42  ;;  %v908_v23 = vadd.f32 %v907_v16, %v906_v1  ;;  %v928_v17 = vrot.slane %v927_v18, 2  ;;  %v901_v15 = vadd.f32 %v6665_v28, %v900_v10  ;;  %v5147_v42 = vld [vmem:[#allocation7 + $0x78] sm:$0xff] }
 0x183   : > { %v878_v55 = vadd.f32 %v6550_v56, %v877_v57  ;;  %v935_v38 = vrot.slane %v934_v14, 2  ;;  %v6671_v30 = vpop.eup %5315  ;;  %5323 = vpow2.f32 %v860_v3  ;;  %v946_v27 = vadd.f32 %v6662_v32, %v6590_v61  ;;  %1730 = vmatpush.bf16.msrb.mxu2 %v5147_v42 }
 0x184   : > { %5325 = vpow2.f32 %v864_v53  ;;  %v915_v37 = vadd.f32 %v914_v48, %v913_v9  ;;  %v6677_v13 = vpop.eup %5317  ;;  %v920_v49 = vadd.f32 %v919_v19, %v918_v2  ;;  %v942_v34 = vrot.slane %v941_v46, 2 }
 0x185   : > { %v879_v35 = vadd.f32 %v6668_v8, %v878_v55  ;;  %v936_v39 = vadd.f32 %v935_v38, %v934_v14  ;;  %v947_v1 = vrot.slane %v946_v27, 4  ;;  %v958_v20 = vrot.slane %v957_v26, 1  ;;  %v6679_v59 = vpop.eup %5319 }
 0x186   : > { %v909_v47 = vrot.slane %v908_v23, 1  ;;  %v929_v3 = vadd.f32 %v928_v17, %v927_v18  ;;  %v6682_v25 = vpop.eup %5321  ;;  %5327 = vrcp.f32 %v901_v15  ;;  %v960_v16 = vadd.f32 %v6668_v8, %v6597_v11 }
 0x187   : > { %v880_v12 = vadd.f32 %v6671_v30, %v879_v35  ;;  %v937_v0 = vrot.slane %v936_v39, 1  ;;  %v948_v29 = vadd.f32 %v947_v1, %v946_v27  ;;  %v959_v9 = vadd.f32 %v958_v20, %v957_v26 }
 0x188   : > { %v916_v6 = vrot.slane %v915_v37, 1  ;;  %v967_v53 = vadd.f32 %v6671_v30, %v6602_v24  ;;  %v943_v18 = vadd.f32 %v942_v34, %v941_v46  ;;  %v961_v48 = vrot.slane %v960_v16, 4 }
 0x189   : > { %v881_v2 = vadd.f32 %v6677_v13, %v880_v12  ;;  %v938_v10 = vadd.f32 %v937_v0, %v936_v39  ;;  %v6689_v21 = vpop.eup %5323  ;;  %v949_v57 = vrot.slane %v948_v29, 2  ;;  %5329 = vrcp.f32 %v959_v9 }
 0x18a   : > { %v6691_v14 = vpop.eup %5325  ;;  %v968_v26 = vrot.slane %v967_v53, 4  ;;  %v974_v55 = vadd.f32 %v6677_v13, %v6608_v54  ;;  %v921_v17 = vrot.slane %v920_v49, 2  ;;  %v930_v38 = vrot.slane %v929_v3, 1 }
 0x18b   : > { %v882_v19 = vadd.f32 %v6679_v59, %v881_v2  ;;  %5331 = vrcp.f32 %v938_v10  ;;  %v950_v15 = vadd.f32 %v949_v57, %v948_v29  ;;  %v962_v27 = vadd.f32 %v961_v48, %v960_v16 }
 0x18c   : > { %v910_v39 = vadd.f32 %v909_v47, %v908_v23  ;;  %v969_v46 = vadd.f32 %v968_v26, %v967_v53  ;;  %v6697_v34 = vpop.eup %5327  ;;  %v917_v0 = vadd.f32 %v916_v6, %v915_v37  ;;  %v944_v42 = vrot.slane %v943_v18, 1 }
 0x18d   : > { %v883_v35 = vadd.f32 %v6682_v25, %v882_v19  ;;  %v951_v1 = vrot.slane %v950_v15, 1  ;;  %v963_v20 = vrot.slane %v962_v27, 2  ;;  %v981_v9 = vadd.f32 %v6679_v59, %v6624_v44 }
 0x18e   : > { %v922_v10 = vadd.f32 %v921_v17, %v920_v49  ;;  %v931_v29 = vadd.f32 %v930_v38, %v929_v3  ;;  %v970_v57 = vrot.slane %v969_v46, 2  ;;  %5333 = vrcp.f32 %v910_v39 }
 0x18f   : > { %v884_v12 = vadd.f32 %v6689_v21, %v883_v35  ;;  %v6702_v2 = vpop.eup %5329  ;;  %v952_v16 = vadd.f32 %v951_v1, %v950_v15  ;;  %v975_v37 = vrot.slane %v974_v55, 4  ;;  %v964_v3 = vadd.f32 %v963_v20, %v962_v27 }
 0x190   : > { %v1047_v47 = vsel %vm253_vm0, %v6697_v34, %v6702_v2  ;;  %v945_v26 = vadd.f32 %v944_v42, %v943_v18  ;;  %v971_v38 = vadd.f32 %v970_v57, %v969_v46  ;;  %v923_v15 = vrot.slane %v922_v10, 1  ;;  %v5146_v46 = vld [vmem:[#allocation7 + $0x70] sm:$0xff] }
 0x191   : > { %v5332_v48 = vpop.eup %5331  ;;  %v885_v23 = vadd.f32 %v6691_v14, %v884_v12  ;;  %5335 = vrcp.f32 %v952_v16  ;;  %v6713_v49 = vmul.f32 %v6575_v50, %v1047_v47  ;;  %v965_v17 = vrot.slane %v964_v3, 1  ;;  %1731 = vmatpush.bf16.msrb.mxu2 %v5146_v46 }
 0x192   : > { %v1041_v6 = vsel %vm253_vm0, %v6697_v34, %v5332_v48  ;;  %5337 = vrcp.f32 %v917_v0  ;;  %v976_v35 = vadd.f32 %v975_v37, %v974_v55  ;;  %v972_v1 = vrot.slane %v971_v38, 1 }
 0x193   : > { %v886_v53 = vadd.f32 %v6659_v22, %v885_v23  ;;  %v6717_v19 = vmul.f32 %v6567_v4, %v1041_v6  ;;  %5339 = vrcp.f32 %v931_v29  ;;  %v966_v39 = vadd.f32 %v965_v17, %v964_v3 }
 0x194   : > { %v982_v12 = vrot.slane %v981_v9, 4  ;;  %v988_v50 = vadd.f32 %v6682_v25, %v6633_v31  ;;  %v5334_v27 = vpop.eup %5333  ;;  %v977_v20 = vrot.slane %v976_v35, 2  ;;  %v995_v4 = vadd.f32 %v6689_v21, %v6639_v43 }
 0x195   : > { %5341 = vrcp.f32 %v886_v53  ;;  %v1002_v18 = vadd.f32 %v6691_v14, %v6652_v7  ;;  %v973_v42 = vadd.f32 %v972_v1, %v971_v38  ;;  %v1033_v55 = vsel %vm253_vm0, %v6697_v34, %v5334_v27 }
 0x196   : > { %5343 = vrcp.f32 %v945_v26  ;;  %v924_v23 = vadd.f32 %v923_v15, %v922_v10  ;;  %v983_v37 = vadd.f32 %v982_v12, %v981_v9  ;;  %v978_v53 = vadd.f32 %v977_v20, %v976_v35 }
 0x197   : > { %v5336_v0 = vpop.eup %5335  ;;  %5345 = vrcp.f32 %v966_v39  ;;  %v989_v26 = vrot.slane %v988_v50, 4  ;;  %v996_v17 = vrot.slane %v995_v4, 4  ;;  %v6748_v10 = vmul.f32 %v6517_v62, %v1033_v55 }
 0x198   : > { %v5338_v29 = vpop.eup %5337  ;;  %v1045_v16 = vsel %vm253_vm0, %v6697_v34, %v5336_v0  ;;  %5347 = vrcp.f32 %v973_v42  ;;  %v1003_v12 = vrot.slane %v1002_v18, 4  ;;  %v984_v20 = vrot.slane %v983_v37, 2 }
 0x199   : > { %v6731_v57 = vpop.eup %5339  ;;  %v6734_v47 = vmul.f32 %v6590_v61, %v1045_v16  ;;  %v1035_v3 = vsel %vm253_vm0, %v6697_v34, %v5338_v29  ;;  %v990_v46 = vadd.f32 %v989_v26, %v988_v50  ;;  %v997_v42 = vadd.f32 %v996_v17, %v995_v4 }
 0x19a   : > { %5349 = vrcp.f32 %v924_v23 }
 0x19b   : > { %v6736_v6 = vpop.eup %5341 }
 0x19c   : > { %v1034_v38 = vsel %vm253_vm0, %v6736_v6, %v5338_v29  ;;  %v1032_v61 = vsel %vm253_vm0, %v6736_v6, %v5334_v27  ;;  %v1038_v9 = vsel %vm253_vm0, %v6736_v6, %v6731_v57  ;;  %v6754_v15 = vpop.eup %5343  ;;  %v1040_v62 = vsel %vm253_vm0, %v6736_v6, %v5332_v48 }
 0x19d   : > { %v6757_v35 = vmul.f32 %v6619_v5, %v1034_v38  ;;  %v6760_v39 = vmul.f32 %v6613_v36, %v1032_v61  ;;  %v6763_v1 = vmul.f32 %v6636_v40, %v1038_v9  ;;  %v1042_v27 = vsel %vm253_vm0, %v6736_v6, %v6754_v15  ;;  %v5346_v36 = vpop.eup %5345 }
 0x19e   : > { %v1044_v5 = vsel %vm253_vm0, %v6736_v6, %v5336_v0  ;;  %v979_v48 = vrot.slane %v978_v53, 1  ;;  %v5348_v29 = vpop.eup %5347  ;;  %v6781_v55 = vmul.f32 %v6644_v45, %v1040_v62  ;;  %v6784_v0 = vmul.f32 %v6647_v41, %v1042_v27 }
 0x19f   : > { %1100 = vadd.xlane.f32.xlu2 %v6757_v35  ;;  %1096 = vadd.xlane.f32.xlu0 %v6760_v39  ;;  %v1160_v40 = vsel %vm253_vm0, %v6760_v39, 0.0  ;;  %v6787_v16 = vmul.f32 %v6662_v32, %v1044_v5  ;;  %v1046_v38 = vsel %vm253_vm0, %v6736_v6, %v6702_v2  ;;  %v1048_v50 = vsel %vm253_vm0, %v6736_v6, %v5346_v36 }
 0x1a0   : > { %1192 = vadd.xlane.f32.xlu1 %v1160_v40  ;;  %v6794_v61 = vmul.f32 %v6550_v56, %v1046_v38  ;;  %v1049_v45 = vsel %vm253_vm0, %v6697_v34, %v5346_v36  ;;  %v1050_v41 = vsel %vm253_vm0, %v6736_v6, %v5348_v29  ;;  %v6806_v32 = vmul.f32 %v6668_v8, %v1048_v50  ;;  %v5350_v27 = vpop.eup %5349 }
 0x1a1   : > { %v1004_v2 = vadd.f32 %v1003_v12, %v1002_v18  ;;  %v6809_v56 = vmul.f32 %v6528_v52, %v1035_v3  ;;  %v6812_v4 = vmul.f32 %v6597_v11, %v1049_v45  ;;  %v6815_v26 = vmul.f32 %v6671_v30, %v1050_v41 }
 0x1a2   : > { %v1051_v17 = vsel %vm253_vm0, %v6697_v34, %v5348_v29  ;;  %v980_v23 = vadd.f32 %v979_v48, %v978_v53  ;;  %v985_v8 = vadd.f32 %v984_v20, %v983_v37  ;;  %v1161_v52 = vsel %vm253_vm0, %v6748_v10, 0.0 }
 0x1a3   : > { %v6821_v9 = vmul.f32 %v6602_v24, %v1051_v17  ;;  %v991_v18 = vrot.slane %v990_v46, 2  ;;  %v998_v3 = vrot.slane %v997_v42, 2  ;;  %v1005_v12 = vrot.slane %v1004_v2, 2  ;;  %v5145_v24 = vld [vmem:[#allocation7 + $0x68] sm:$0xff] }
 0x1a4   : > { %5351 = vrcp.f32 %v980_v23  ;;  %v986_v11 = vrot.slane %v985_v8, 1  ;;  %v1036_v36 = vsel %vm253_vm0, %v6736_v6, %v5350_v27  ;;  %1732 = vmatpush.bf16.msrb.mxu2 %v5145_v24 }
 0x1a5   : > { %v992_v30 = vadd.f32 %v991_v18, %v990_v46  ;;  %v999_v62 = vadd.f32 %v998_v3, %v997_v42  ;;  %v1006_v37 = vadd.f32 %v1005_v12, %v1004_v2  ;;  %v1037_v46 = vsel %vm253_vm0, %v6697_v34, %v5350_v27 }
 0x1a6   : > { %v987_v53 = vadd.f32 %v986_v11, %v985_v8  ;;  %v6835_v50 = vmul.f32 %v6630_v63, %v1036_v36  ;;  %v1162_v2 = vsel %vm253_vm0, %v6757_v35, 0.0  ;;  %v1163_v63 = vsel %vm253_vm0, %v6809_v56, 0.0  ;;  %v5144_v36 = vld [vmem:[#allocation7 + $0x60] sm:$0xff] }
 0x1a7   : > { %1102 = vadd.xlane.f32.xlu2 %v6809_v56  ;;  %1098 = vadd.xlane.f32.xlu0 %v6748_v10  ;;  %v993_v5 = vrot.slane %v992_v30, 1  ;;  %v1000_v20 = vrot.slane %v999_v62, 1  ;;  %v1007_v40 = vrot.slane %v1006_v37, 1 }
 0x1a8   : > { %1194 = vadd.xlane.f32.xlu1 %v1161_v52  ;;  %5353 = vrcp.f32 %v987_v53  ;;  %v6857_v52 = vmul.f32 %v6540_v33, %v1037_v46  ;;  %1733 = vmatpush.bf16.msrb.mxu2 %v5144_v36 }
 0x1a9   : > { %v994_v48 = vadd.f32 %v993_v5, %v992_v30  ;;  %v1001_v29 = vadd.f32 %v1000_v20, %v999_v62  ;;  %v1008_v42 = vadd.f32 %v1007_v40, %v1006_v37  ;;  %v1164_v20 = vsel %vm253_vm0, %v6835_v50, 0.0 }
 0x1aa   : > { %v5352_v38 = vpop.eup %5351  ;;  %v1165_v33 = vsel %vm253_vm0, %v6857_v52, 0.0  ;;  %v1039_v40 = vsel %vm253_vm0, %v6697_v34, %v6731_v57  ;;  %v1169_v57 = vsel %vm253_vm0, %v6717_v19, 0.0 }
 0x1ab   : > { %v1053_v45 = vsel %vm253_vm0, %v6697_v34, %v5352_v38  ;;  %v1052_v41 = vsel %vm253_vm0, %v6736_v6, %v5352_v38  ;;  %5355 = vrcp.f32 %v994_v48  ;;  %v1166_v48 = vsel %vm253_vm0, %v6763_v1, 0.0 }
 0x1ac   : > { %v6847_v17 = vmul.f32 %v6608_v54, %v1053_v45  ;;  %v6850_v23 = vmul.f32 %v6677_v13, %v1052_v41  ;;  %5357 = vrcp.f32 %v1001_v29  ;;  %v6922_v29 = vmul.f32 %v6561_v51, %v1039_v40  ;;  %v5142_v41 = vld [vmem:[#allocation7 + $0x50] sm:$0xff] }
 0x1ad   : > { %5359 = vrcp.f32 %v1008_v42  ;;  %v1168_v51 = vsel %vm253_vm0, %v6781_v55, 0.0  ;;  %v1043_v38 = vsel %vm253_vm0, %v6697_v34, %v6754_v15  ;;  %v1170_v45 = vsel %vm253_vm0, %v6784_v0, 0.0 }
 0x1ae   : > { %v5354_v8 = vpop.eup %5353  ;;  %v6943_v46 = vmul.f32 %v6582_v58, %v1043_v38  ;;  %v1172_v15 = vsel %vm253_vm0, %v6787_v16, 0.0  ;;  %v1173_v58 = vsel %vm253_vm0, %v6734_v47, 0.0  ;;  %v1180_v36 = vsel %vm253_vm0, %v6850_v23, 0.0 }
 0x1af   : > { %1104 = vadd.xlane.f32.xlu2 %v6835_v50  ;;  %1196 = vadd.xlane.f32.xlu0 %v1162_v2  ;;  %v1054_v54 = vsel %vm253_vm0, %v6736_v6, %v5354_v8  ;;  %v1055_v13 = vsel %vm253_vm0, %v6697_v34, %v5354_v8  ;;  %v5139_v2 = vld [vmem:[#allocation7 + $0x38] sm:$0xff]  ;;  %v5138_v8 = vld [vmem:[#allocation7 + $0x30] sm:$0xff]  ;;  %v1181_v40 = vsel %vm253_vm0, %v6847_v17, 0.0 }
 0x1b0   : > { %1198 = vadd.xlane.f32.xlu1 %v1163_v63  ;;  %v6866_v18 = vmul.f32 %v6679_v59, %v1054_v54  ;;  %v6869_v3 = vmul.f32 %v6624_v44, %v1055_v13  ;;  %v1171_v42 = vsel %vm253_vm0, %v6943_v46, 0.0  ;;  %v5141_v63 = vld [vmem:[#allocation7 + $0x48] sm:$0xff]  ;;  %1641 = vmatpush.bf16.msra.mxu1 %v5139_v2  ;;  %v1174_v54 = vsel %vm253_vm0, %v6794_v61, 0.0 }
 0x1b1   : > { %v5356_v11 = vpop.eup %5355  ;;  %5181 = vmatpush.bf16.msra.mxu3 %v5139_v2  ;;  %v1175_v13 = vsel %vm253_vm0, %v6713_v49, 0.0 }
 0x1b2   : > { %v5358_v12 = vpop.eup %5357  ;;  %v1056_v30 = vsel %vm253_vm0, %v6736_v6, %v5356_v11  ;;  %v1057_v62 = vsel %vm253_vm0, %v6697_v34, %v5356_v11  ;;  %v5137_v11 = vld [vmem:[#allocation7 + $0x28] sm:$0xff] }
 0x1b3   : > { %v5360_v27 = vpop.eup %5359  ;;  %v6881_v59 = vmul.f32 %v6682_v25, %v1056_v30  ;;  %v6884_v44 = vmul.f32 %v6633_v31, %v1057_v62  ;;  %v1059_v24 = vsel %vm253_vm0, %v6697_v34, %v5358_v12  ;;  %v1058_v53 = vsel %vm253_vm0, %v6736_v6, %v5358_v12  ;;  %v5135_v62 = vld [vmem:[#allocation7 + $0x18] sm:$0xff] }
 0x1b4   : > { %v6893_v37 = vmul.f32 %v6639_v43, %v1059_v24  ;;  %v6896_v5 = vmul.f32 %v6689_v21, %v1058_v53  ;;  %v1060_v25 = vsel %vm253_vm0, %v6736_v6, %v5360_v27  ;;  %v1061_v31 = vsel %vm253_vm0, %v6697_v34, %v5360_v27  ;;  %1642 = vmatpush.bf16.msra.mxu1 %v5138_v8  ;;  %v5140_v24 = vld [vmem:[#allocation7 + $0x40] sm:$0xff]  ;;  %v5134_v53 = vld [vmem:[#allocation7 + $0x10] sm:$0xff] }
 0x1b5   : > { %v6909_v43 = vmul.f32 %v6691_v14, %v1060_v25  ;;  %v6912_v21 = vmul.f32 %v6652_v7, %v1061_v31  ;;  %v1167_v7 = vsel %vm253_vm0, %v6922_v29, 0.0  ;;  %v5143_v14 = vld [vmem:[#allocation7 + $0x58] sm:$0xff]  ;;  %5182 = vmatpush.bf16.msra.mxu3 %v5138_v8  ;;  %v1177_v12 = vsel %vm253_vm0, %v6812_v4, 0.0  ;;  %v5133_v25 = vld [vmem:[#allocation7 + $0x8] sm:$0xff] }
 0x1b6   : > { %1734 = vmatpush.bf16.msrb.mxu2 %v5143_v14  ;;  %v1176_v30 = vsel %vm253_vm0, %v6806_v32, 0.0  ;;  %v1178_v27 = vsel %vm253_vm0, %v6815_v26, 0.0  ;;  %v1179_v31 = vsel %vm253_vm0, %v6821_v9, 0.0 }
 0x1b7   : > { %1202 = vadd.xlane.f32.xlu2 %v1165_v33  ;;  %1106 = vadd.xlane.f32.xlu0 %v6857_v52  ;;  %v5136_v33 = vld [vmem:[#allocation7 + $0x20] sm:$0xff] }
 0x1b8   : > { %1200 = vadd.xlane.f32.xlu1 %v1164_v20  ;;  %1643 = vmatpush.bf16.msra.mxu1 %v5137_v11  ;;  %v5132_v20 = vld [vmem:[#allocation7] sm:$0xff] }
 0x1b9   : > { %5183 = vmatpush.bf16.msra.mxu3 %v5137_v11  ;;  %v9269_v11 = vld [vmem:[#allocation14_spill] sm:$0xff] }
 0x1ba   : > { %1735 = vmatpush.bf16.msrb.mxu2 %v5142_v41 }
 0x1bc   : > { %1644 = vmatpush.bf16.msra.mxu1 %v5136_v33 }
 0x1bd   : > { %5184 = vmatpush.bf16.msra.mxu3 %v5136_v33 }
 0x1be   : > { %1736 = vmatpush.bf16.msrb.mxu2 %v5141_v63 }
 0x1bf   : > { %1204 = vadd.xlane.f32.xlu2 %v1166_v48  ;;  %1108 = vadd.xlane.f32.xlu0 %v6763_v1  ;;  %v9267_v48 = vld [vmem:[#allocation12_spill] sm:$0xff] }
 0x1c0   : > { %1110 = vadd.xlane.f32.xlu1 %v6922_v29  ;;  %1645 = vmatpush.bf16.msra.mxu1 %v5135_v62 }
 0x1c1   : > { %5185 = vmatpush.bf16.msra.mxu3 %v5135_v62 }
 0x1c2   : > { %1737 = vmatpush.bf16.msrb.mxu2 %v5140_v24 }
 0x1c4   : > { %1646 = vmatpush.bf16.msra.mxu1 %v5134_v53 }
 0x1c5   : > { %5186 = vmatpush.bf16.msra.mxu3 %v5134_v53 }
 0x1c7   : > { %1114 = vadd.xlane.f32.xlu2 %v6717_v19  ;;  %1206 = vadd.xlane.f32.xlu0 %v1167_v7  ;;  %v9268_v7 = vld [vmem:[#allocation13_spill] sm:$0xff] }
 0x1c8   : > { %1112 = vadd.xlane.f32.xlu1 %v6781_v55  ;;  %1647 = vmatpush.bf16.msra.mxu1 %v5133_v25 }
 0x1c9   : > { %5187 = vmatpush.bf16.msra.mxu3 %v5133_v25 }
 0x1cc   : > { %1648 = vmatpush.bf16.msra.mxu1 %v5132_v20 }
 0x1cd   : > { %5188 = vmatpush.bf16.msra.mxu3 %v5132_v20  ;;  %v1009_v20 = vadd.f32 %v6665_v28, %v6659_v22 }
 0x1cf   : > { %1116 = vadd.xlane.f32.xlu2 %v6784_v0  ;;  %1208 = vadd.xlane.f32.xlu0 %v1168_v51 }
 0x1d0   : > { %1210 = vadd.xlane.f32.xlu1 %v1169_v57  ;;  %1649 = vmatmul.bf16.vlgmr.msra.gmra.mxu1 %v9267_v48 }
 0x1d1   : > { %1689 = vmatmul.bf16.vlgmr.msra.gmra.mxu3 %v9268_v7 }
 0x1d7   : > { %1214 = vadd.xlane.f32.xlu2 %v1171_v42  ;;  %1118 = vadd.xlane.f32.xlu0 %v6943_v46  ;;  %v1183_v42 = vsel %vm253_vm0, %v6869_v3, 0.0 }
 0x1d8   : > { %1212 = vadd.xlane.f32.xlu1 %v1170_v45  ;;  %v1182_v45 = vsel %vm253_vm0, %v6866_v18, 0.0 }
 0x1df   : > { %1216 = vadd.xlane.f32.xlu2 %v1172_v15  ;;  %1120 = vadd.xlane.f32.xlu0 %v6787_v16 }
 0x1e0   : > { %1122 = vadd.xlane.f32.xlu1 %v6734_v47  ;;  %1654 = vmatmul.bf16.gmra.mxu1 %v9269_v11 }
 0x1e7   : > { %1126 = vadd.xlane.f32.xlu2 %v6713_v49  ;;  %1218 = vadd.xlane.f32.xlu0 %v1173_v58 }
 0x1e8   : > { %1124 = vadd.xlane.f32.xlu1 %v6794_v61 }
 0x1ef   : > { %1128 = vadd.xlane.f32.xlu2 %v6806_v32  ;;  %1220 = vadd.xlane.f32.xlu0 %v1174_v54  ;;  %v1184_v54 = vsel %vm253_vm0, %v6881_v59, 0.0 }
 0x1f0   : > { %1222 = vadd.xlane.f32.xlu1 %v1175_v13 }
 0x1f7   : > { %1226 = vadd.xlane.f32.xlu2 %v1177_v12  ;;  %1130 = vadd.xlane.f32.xlu0 %v6812_v4  ;;  %v9270_v12 = vld [vmem:[#allocation15_spill] sm:$0xff] }
 0x1f8   : > { %1224 = vadd.xlane.f32.xlu1 %v1176_v30  ;;  %1694 = vmatmul.bf16.gmra.mxu3 %v9270_v12 }
 0x1ff   : > { %1228 = vadd.xlane.f32.xlu2 %v1178_v27  ;;  %1132 = vadd.xlane.f32.xlu0 %v6815_v26 }
 0x200   : > { %1134 = vadd.xlane.f32.xlu1 %v6821_v9 }
 0x207   : > { %1138 = vadd.xlane.f32.xlu2 %v6847_v17  ;;  %1230 = vadd.xlane.f32.xlu0 %v1179_v31 }
 0x208   : > { %1136 = vadd.xlane.f32.xlu1 %v6850_v23 }
 0x20f   : > { %1140 = vadd.xlane.f32.xlu2 %v6866_v18  ;;  %1232 = vadd.xlane.f32.xlu0 %v1180_v36 }
 0x210   : > { %1234 = vadd.xlane.f32.xlu1 %v1181_v40  ;;  %v1185_v40 = vsel %vm253_vm0, %v6884_v44, 0.0 }
 0x212   : > { %v1101_v14 = vpop.xlane.xlu2 %1100  ;;  %v1097_v51 = vpop.xlane.xlu0 %1096 }
 0x213   : > { %v1193_v57 = vpop.xlane.xlu1 %1192 }
 0x214   : > { %v1256_v38 = vsub.f32 %v1097_v51, %v1193_v57  ;;  %v1010_v51 = vrot.slane %v1009_v20, 4 }
 0x216   : > { %5361 = vrcp.f32 %v1256_v38 }
 0x217   : > { %1238 = vadd.xlane.f32.xlu2 %v1183_v42  ;;  %1142 = vadd.xlane.f32.xlu0 %v6869_v3  ;;  %5363 = vrcp.f32 %v1193_v57 }
 0x218   : > { %1236 = vadd.xlane.f32.xlu1 %v1182_v45 }
 0x21a   : > { %v1103_v41 = vpop.xlane.xlu2 %1102  ;;  %v1099_v15 = vpop.xlane.xlu0 %1098 }
 0x21b   : > { %v1195_v58 = vpop.xlane.xlu1 %1194 }
 0x21c   : > { %v5362_v2 = vpop.eup %5361  ;;  %v1257_v63 = vsub.f32 %v1099_v15, %v1195_v58  ;;  %5365 = vrcp.f32 %v1195_v58 }
 0x21d   : > { %v5364_v8 = vpop.eup %5363 }
 0x21e   : > { %5367 = vrcp.f32 %v1257_v63  ;;  %v1352_v13 = vsel %vm253_vm0, %v5364_v8, %v5362_v2  ;;  %v1011_v63 = vadd.f32 %v1010_v51, %v1009_v20 }
 0x21f   : > { %1240 = vadd.xlane.f32.xlu2 %v1184_v54  ;;  %1144 = vadd.xlane.f32.xlu0 %v6881_v59  ;;  %v1384_v62 = vmul.f32 %v1352_v13, %v6760_v39 }
 0x220   : > { %1146 = vadd.xlane.f32.xlu1 %v6884_v44 }
 0x221   : > { %v1416_v48 = vpack.c.bf16 %v1384_v62, %v1384_v62  ;;  %v9271_v62 = vld [vmem:[#allocation16_spill] sm:$0xff] }
 0x222   : > { %v1105_v33 = vpop.xlane.xlu2 %1104  ;;  %v1197_v30 = vpop.xlane.xlu0 %1196  ;;  %1659 = vmatmul.bf16.gmra.mxu1 %v9271_v62 }
 0x223   : > { %v5366_v27 = vpop.eup %5365  ;;  %v1258_v24 = vsub.f32 %v1101_v14, %v1197_v30  ;;  %5369 = vrcp.f32 %v1197_v30  ;;  %v1199_v53 = vpop.xlane.xlu1 %1198  ;;  %v1480_v42 = vunpack.c.l.b16 %v1416_v48 }
 0x224   : > { %v5368_v25 = vpop.eup %5367  ;;  %v1259_v31 = vsub.f32 %v1103_v41, %v1199_v53  ;;  %5371 = vrcp.f32 %v1199_v53 }
 0x225   : > { %5373 = vrcp.f32 %v1258_v24  ;;  %v1353_v36 = vsel %vm253_vm0, %v5366_v27, %v5368_v25  ;;  %v1012_v27 = vrot.slane %v1011_v63, 2  ;;  %v9272_v24 = vld [vmem:[#allocation17_spill] sm:$0xff] }
 0x226   : > { %5375 = vrcp.f32 %v1259_v31  ;;  %v1385_v39 = vmul.f32 %v1353_v36, %v6748_v10  ;;  %1699 = vmatmul.bf16.gmra.mxu3 %v9272_v24 }
 0x227   : > { %1242 = vadd.xlane.f32.xlu0 %v1185_v40  ;;  %v1013_v20 = vadd.f32 %v1012_v27, %v1011_v63  ;;  %v9273_v63 = vld [vmem:[#allocation18_spill] sm:$0xff] }
 0x228   : > { %1150 = vadd.xlane.f32.xlu1 %v6893_v37  ;;  %v1417_v7 = vpack.c.bf16 %v1385_v39, %v1385_v39 }
 0x229   : > { %v5370_v14 = vpop.eup %5369  ;;  %v1014_v39 = vrot.slane %v1013_v20, 1 }
 0x22a   : > { %v5372_v57 = vpop.eup %5371  ;;  %v1107_v38 = vpop.xlane.xlu0 %1106  ;;  %v1481_v45 = vunpack.c.l.b16 %v1417_v7 }
 0x22b   : > { %v5374_v41 = vpop.eup %5373  ;;  %v1203_v58 = vpop.xlane.xlu2 %1202 }
 0x22c   : > { %v5376_v15 = vpop.eup %5375  ;;  %v1512_v2 = vpack.c.b16 %v1481_v45, %v1480_v42  ;;  %v1201_v8 = vpop.xlane.xlu1 %1200  ;;  %v1354_v10 = vsel %vm253_vm0, %v5370_v14, %v5374_v41  ;;  %v1261_v13 = vsub.f32 %v1107_v38, %v1203_v58  ;;  %v1015_v45 = vadd.f32 %v1014_v39, %v1013_v20 }
 0x22d   : > { %v1355_v54 = vsel %vm253_vm0, %v5372_v57, %v5376_v15  ;;  %v1260_v11 = vsub.f32 %v1105_v33, %v1201_v8  ;;  %v1386_v12 = vmul.f32 %v1354_v10, %v6757_v35  ;;  %v1187_v33 = vsel %vm253_vm0, %v6893_v37, 0.0  ;;  %v9274_v10 = vld [vmem:[#allocation19_spill] sm:$0xff] }
 0x22e   : > { %1738 = vmatmul.bf16.vlgmr.msrb.gmra.mxu2 %v1512_v2  ;;  %v1387_v30 = vmul.f32 %v1355_v54, %v6809_v56  ;;  %5377 = vrcp.f32 %v1261_v13 }
 0x22f   : > { %1148 = vadd.xlane.f32.xlu0 %v6896_v5  ;;  %5379 = vrcp.f32 %v1260_v11  ;;  %v1418_v25 = vpack.c.bf16 %v1386_v12, %v1386_v12  ;;  %v1189_v12 = vsel %vm253_vm0, %v6912_v21, 0.0 }
 0x230   : > { %v1419_v31 = vpack.c.bf16 %v1387_v30, %v1387_v30  ;;  %5381 = vrcp.f32 %v1203_v58 }
 0x231   : > { %5383 = vrcp.f32 %v1201_v8  ;;  %v1482_v35 = vunpack.c.l.b16 %v1418_v25 }
 0x232   : > { %v1109_v53 = vpop.xlane.xlu0 %1108  ;;  %v1483_v56 = vunpack.c.l.b16 %v1419_v31  ;;  %1664 = vmatmul.bf16.gmra.mxu1 %v9273_v63  ;;  %5385 = vrcp.f32 %v1015_v45 }
 0x233   : > { %v1205_v41 = vpop.xlane.xlu2 %1204 }
 0x234   : > { %v5378_v36 = vpop.eup %5377  ;;  %v1111_v40 = vpop.xlane.xlu1 %1110  ;;  %v1513_v51 = vpack.c.b16 %v1483_v56, %v1482_v35  ;;  %v1262_v8 = vsub.f32 %v1109_v53, %v1205_v41 }
 0x235   : > { %v5380_v48 = vpop.eup %5379 }
 0x236   : > { %v5382_v7 = vpop.eup %5381  ;;  %1704 = vmatmul.bf16.gmra.mxu3 %v9274_v10 }
 0x237   : > { %1246 = vadd.xlane.f32.xlu0 %v1187_v33  ;;  %v5384_v14 = vpop.eup %5383  ;;  %v1357_v42 = vsel %vm253_vm0, %v5382_v7, %v5378_v36 }
 0x238   : > { %v1356_v38 = vsel %vm253_vm0, %v5384_v14, %v5380_v48  ;;  %v1389_v2 = vmul.f32 %v1357_v42, %v6857_v52  ;;  %v5386_v30 = vpop.eup %5385  ;;  %v9276_v14 = vld [vmem:[#allocation21_spill] sm:$0xff] }
 0x239   : > { %v1388_v58 = vmul.f32 %v1356_v38, %v6835_v50  ;;  %v1062_v24 = vsel %vm253_vm0, %v6736_v6, %v5386_v30  ;;  %v1063_v6 = vsel %vm253_vm0, %v6697_v34, %v5386_v30 }
 0x23a   : > { %v1207_v57 = vpop.xlane.xlu0 %1206  ;;  %v1421_v11 = vpack.c.bf16 %v1389_v2, %v1389_v2  ;;  %v7049_v35 = vmul.f32 %v6659_v22, %v1062_v24  ;;  %v9275_v22 = vld [vmem:[#allocation20_spill] sm:$0xff] }
 0x23b   : > { %v1263_v15 = vsub.f32 %v1111_v40, %v1207_v57  ;;  %v1420_v13 = vpack.c.bf16 %v1388_v58, %v1388_v58  ;;  %v1115_v50 = vpop.xlane.xlu2 %1114 }
 0x23c   : > { %v1113_v54 = vpop.xlane.xlu1 %1112  ;;  %v1485_v62 = vunpack.c.l.b16 %v1421_v11 }
 0x23d   : > { %5387 = vrcp.f32 %v1263_v15  ;;  %v1484_v52 = vunpack.c.l.b16 %v1420_v13 }
 0x23e   : > { %1743 = vmatmul.bf16.gmra.mxu2 %v1513_v51  ;;  %5389 = vrcp.f32 %v1262_v8 }
 0x23f   : > { %1152 = vadd.xlane.f32.xlu0 %v6909_v43  ;;  %5391 = vrcp.f32 %v1207_v57  ;;  %v1514_v20 = vpack.c.b16 %v1485_v62, %v1484_v52  ;;  %v7063_v57 = vmul.f32 %v6665_v28, %v1063_v6  ;;  %v9277_v52 = vld [vmem:[#allocation22_spill] sm:$0xff]  ;;  %v9278_v62 = vld [vmem:[#allocation23_spill] sm:$0xff] }
 0x240   : > { %5393 = vrcp.f32 %v1205_v41 }
 0x241   : > { %v1191_v34 = vsel %vm253_vm0, %v7063_v57, 0.0 }
 0x242   : > { %v1209_v31 = vpop.xlane.xlu0 %1208  ;;  %1669 = vmatmul.bf16.gmra.mxu1 %v9275_v22 }
 0x243   : > { %v5388_v27 = vpop.eup %5387  ;;  %v1264_v40 = vsub.f32 %v1113_v54, %v1209_v31  ;;  %v1117_v51 = vpop.xlane.xlu2 %1116 }
 0x244   : > { %v5390_v53 = vpop.eup %5389  ;;  %v1211_v33 = vpop.xlane.xlu1 %1210 }
 0x245   : > { %v5392_v25 = vpop.eup %5391  ;;  %v1265_v48 = vsub.f32 %v1115_v50, %v1211_v33  ;;  %5395 = vrcp.f32 %v1264_v40 }
 0x246   : > { %v1359_v56 = vsel %vm253_vm0, %v5392_v25, %v5388_v27  ;;  %v5394_v36 = vpop.eup %5393  ;;  %1709 = vmatmul.bf16.gmra.mxu3 %v9276_v14 }
 0x247   : > { %1250 = vadd.xlane.f32.xlu0 %v1189_v12  ;;  %v1358_v39 = vsel %vm253_vm0, %v5394_v36, %v5390_v53  ;;  %v1391_v7 = vmul.f32 %v1359_v56, %v6922_v29  ;;  %5397 = vrcp.f32 %v1265_v48 }
 0x248   : > { %v1390_v38 = vmul.f32 %v1358_v39, %v6763_v1  ;;  %5399 = vrcp.f32 %v1209_v31 }
 0x249   : > { %v1423_v42 = vpack.c.bf16 %v1391_v7, %v1391_v7  ;;  %5401 = vrcp.f32 %v1211_v33 }
 0x24a   : > { %v1422_v29 = vpack.c.bf16 %v1390_v38, %v1390_v38  ;;  %v1119_v15 = vpop.xlane.xlu0 %1118 }
 0x24b   : > { %v1487_v45 = vunpack.c.l.b16 %v1423_v42  ;;  %v5396_v41 = vpop.eup %5395  ;;  %v1215_v8 = vpop.xlane.xlu2 %1214  ;;  %v9280_v42 = vld [vmem:[#allocation25_spill] sm:$0xff] }
 0x24c   : > { %v1486_v2 = vunpack.c.l.b16 %v1422_v29  ;;  %v1213_v10 = vpop.xlane.xlu1 %1212  ;;  %v1267_v11 = vsub.f32 %v1119_v15, %v1215_v8 }
 0x24d   : > { %v5398_v58 = vpop.eup %5397  ;;  %v1266_v12 = vsub.f32 %v1117_v51, %v1213_v10  ;;  %v9279_v51 = vld [vmem:[#allocation24_spill] sm:$0xff] }
 0x24e   : > { %1748 = vmatmul.bf16.gmra.mxu2 %v1514_v20  ;;  %v5400_v28 = vpop.eup %5399  ;;  %v1515_v1 = vpack.c.b16 %v1487_v45, %v1486_v2  ;;  %5403 = vrcp.f32 %v1267_v11 }
 0x24f   : > { %1156 = vadd.xlane.f32.xlu0 %v7049_v35  ;;  %v5402_v63 = vpop.eup %5401  ;;  %v1360_v54 = vsel %vm253_vm0, %v5400_v28, %v5396_v41  ;;  %5405 = vrcp.f32 %v1266_v12 }
 0x250   : > { %v1361_v13 = vsel %vm253_vm0, %v5402_v63, %v5398_v58  ;;  %v1392_v30 = vmul.f32 %v1360_v54, %v6781_v55  ;;  %5407 = vrcp.f32 %v1215_v8 }
 0x251   : > { %v1393_v50 = vmul.f32 %v1361_v13, %v6717_v19  ;;  %5409 = vrcp.f32 %v1213_v10 }
 0x252   : > { %1674 = vmatmul.bf16.gmra.mxu1 %v9277_v52  ;;  %v1121_v27 = vpop.xlane.xlu0 %1120  ;;  %v1424_v24 = vpack.c.bf16 %v1392_v30, %v1392_v30  ;;  %v9281_v30 = vld [vmem:[#allocation26_spill] sm:$0xff] }
 0x253   : > { %v1425_v53 = vpack.c.bf16 %v1393_v50, %v1393_v50  ;;  %v1217_v48 = vpop.xlane.xlu2 %1216  ;;  %v9282_v50 = vld [vmem:[#allocation27_spill] sm:$0xff] }
 0x254   : > { %v1488_v25 = vunpack.c.l.b16 %v1424_v24  ;;  %v5404_v20 = vpop.eup %5403  ;;  %v1123_v33 = vpop.xlane.xlu1 %1122  ;;  %v1268_v38 = vsub.f32 %v1121_v27, %v1217_v48 }
 0x255   : > { %v1489_v31 = vunpack.c.l.b16 %v1425_v53  ;;  %v5406_v56 = vpop.eup %5405 }
 0x256   : > { %1714 = vmatmul.bf16.gmra.mxu3 %v9278_v62  ;;  %v5408_v36 = vpop.eup %5407 }
 0x257   : > { %1254 = vadd.xlane.f32.xlu0 %v1191_v34  ;;  %v5410_v55 = vpop.eup %5409  ;;  %v1516_v40 = vpack.c.b16 %v1489_v31, %v1488_v25  ;;  %v1363_v39 = vsel %vm253_vm0, %v5408_v36, %v5404_v20 }
 0x258   : > { %v1362_v6 = vsel %vm253_vm0, %v5410_v55, %v5406_v56  ;;  %v1395_v14 = vmul.f32 %v1363_v39, %v6943_v46 }
 0x259   : > { %v1394_v22 = vmul.f32 %v1362_v6, %v6784_v0 }
 0x25a   : > { %v1219_v19 = vpop.xlane.xlu0 %1218  ;;  %v1427_v45 = vpack.c.bf16 %v1395_v14, %v1395_v14 }
 0x25b   : > { %v1269_v7 = vsub.f32 %v1123_v33, %v1219_v19  ;;  %v1426_v29 = vpack.c.bf16 %v1394_v22, %v1394_v22  ;;  %v1127_v41 = vpop.xlane.xlu2 %1126 }
 0x25c   : > { %v1125_v34 = vpop.xlane.xlu1 %1124  ;;  %v1491_v58 = vunpack.c.l.b16 %v1427_v45 }
 0x25d   : > { %5411 = vrcp.f32 %v1269_v7  ;;  %v1490_v15 = vunpack.c.l.b16 %v1426_v29 }
 0x25e   : > { %1753 = vmatmul.bf16.gmra.mxu2 %v1515_v1  ;;  %5413 = vrcp.f32 %v1268_v38 }
 0x25f   : > { %5415 = vrcp.f32 %v1219_v19  ;;  %v1517_v46 = vpack.c.b16 %v1491_v58, %v1490_v15 }
 0x260   : > { %5417 = vrcp.f32 %v1217_v48 }
 0x262   : > { %1679 = vmatmul.bf16.gmra.mxu1 %v9279_v51  ;;  %v1221_v63 = vpop.xlane.xlu0 %1220 }
 0x263   : > { %v5412_v2 = vpop.eup %5411  ;;  %v1270_v54 = vsub.f32 %v1125_v34, %v1221_v63  ;;  %v1129_v52 = vpop.xlane.xlu2 %1128 }
 0x264   : > { %v5414_v28 = vpop.eup %5413  ;;  %v1223_v8 = vpop.xlane.xlu1 %1222 }
 0x265   : > { %v5416_v0 = vpop.eup %5415  ;;  %v1271_v11 = vsub.f32 %v1127_v41, %v1223_v8  ;;  %5419 = vrcp.f32 %v1270_v54 }
 0x266   : > { %1719 = vmatmul.bf16.gmra.mxu3 %v9280_v42  ;;  %v1365_v1 = vsel %vm253_vm0, %v5416_v0, %v5412_v2  ;;  %v5418_v10 = vpop.eup %5417 }
 0x267   : > { %v1364_v13 = vsel %vm253_vm0, %v5418_v10, %v5414_v28  ;;  %v1397_v12 = vmul.f32 %v1365_v1, %v6734_v47  ;;  %5421 = vrcp.f32 %v1271_v11  ;;  %v1650_v1 = vpop.f32.mrf.mxu1  ;;  %v7108_v11 = vld [vmem:[%s9175_s3] sm:$0x7] }
 0x268   : > { %v1396_v62 = vmul.f32 %v1364_v13, %v6787_v16  ;;  %5423 = vrcp.f32 %v1221_v63 }
 0x269   : > { %v1429_v27 = vpack.c.bf16 %v1397_v12, %v1397_v12  ;;  %5425 = vrcp.f32 %v1223_v8 }
 0x26a   : > { %v1428_v24 = vpack.c.bf16 %v1396_v62, %v1396_v62  ;;  %v1131_v31 = vpop.xlane.xlu0 %1130 }
 0x26b   : > { %v1493_v53 = vunpack.c.l.b16 %v1429_v27  ;;  %v5420_v25 = vpop.eup %5419  ;;  %v1227_v36 = vpop.xlane.xlu2 %1226 }
 0x26c   : > { %v1492_v33 = vunpack.c.l.b16 %v1428_v24  ;;  %v1273_v6 = vsub.f32 %v1131_v31, %v1227_v36 }
 0x26d   : > { %v5422_v20 = vpop.eup %5421 }
 0x26e   : > { %1758 = vmatmul.bf16.gmra.mxu2 %v1516_v40  ;;  %v5424_v56 = vpop.eup %5423  ;;  %v1518_v55 = vpack.c.b16 %v1493_v53, %v1492_v33  ;;  %v1225_v40 = vpop.xlane.xlu1 %1224  ;;  %5427 = vrcp.f32 %v1273_v6 }
 0x26f   : > { %v5426_v47 = vpop.eup %5425  ;;  %v1366_v19 = vsel %vm253_vm0, %v5424_v56, %v5420_v25  ;;  %v1272_v39 = vsub.f32 %v1129_v52, %v1225_v40  ;;  %v1652_v62 = vpop.f32.mrf.mxu1 }
 0x270   : > { %v1367_v16 = vsel %vm253_vm0, %v5426_v47, %v5422_v20  ;;  %v1398_v48 = vmul.f32 %v1366_v19, %v6794_v61 }
 0x271   : > { %v1399_v7 = vmul.f32 %v1367_v16, %v6713_v49  ;;  %5429 = vrcp.f32 %v1272_v39 }
 0x272   : > { %1684 = vmatmul.bf16.gmra.mxu1 %v9281_v30  ;;  %v1133_v22 = vpop.xlane.xlu0 %1132  ;;  %v1430_v14 = vpack.c.bf16 %v1398_v48, %v1398_v48  ;;  %5431 = vrcp.f32 %v1227_v36 }
 0x273   : > { %v1431_v51 = vpack.c.bf16 %v1399_v7, %v1399_v7  ;;  %5433 = vrcp.f32 %v1225_v40  ;;  %v1229_v28 = vpop.xlane.xlu2 %1228 }
 0x274   : > { %v1494_v38 = vunpack.c.l.b16 %v1430_v14  ;;  %v5428_v34 = vpop.eup %5427  ;;  %v1274_v8 = vsub.f32 %v1133_v22, %v1229_v28 }
 0x275   : > { %v1495_v42 = vunpack.c.l.b16 %v1431_v51 }
 0x276   : > { %1724 = vmatmul.bf16.gmra.mxu3 %v9282_v50  ;;  %v1135_v29 = vpop.xlane.xlu1 %1134 }
 0x277   : > { %v5430_v45 = vpop.eup %5429  ;;  %v1519_v58 = vpack.c.b16 %v1495_v42, %v1494_v38  ;;  %v1655_v39 = vpop.f32.mrf.mxu1 }
 0x278   : > { %v5432_v41 = vpop.eup %5431 }
 0x279   : > { %v5434_v15 = vpop.eup %5433  ;;  %v1369_v49 = vsel %vm253_vm0, %v5432_v41, %v5428_v34 }
 0x27a   : > { %v1231_v2 = vpop.xlane.xlu0 %1230  ;;  %v1368_v61 = vsel %vm253_vm0, %v5434_v15, %v5430_v45 }
 0x27b   : > { %v1275_v0 = vsub.f32 %v1135_v29, %v1231_v2  ;;  %v1400_v63 = vmul.f32 %v1368_v61, %v6806_v32  ;;  %v1139_v12 = vpop.xlane.xlu2 %1138 }
 0x27d   : > { %5435 = vrcp.f32 %v1275_v0  ;;  %v1432_v54 = vpack.c.bf16 %v1400_v63, %v1400_v63 }
 0x27e   : > { %1763 = vmatmul.bf16.gmra.mxu2 %v1517_v46  ;;  %v1401_v46 = vmul.f32 %v1369_v49, %v6812_v4  ;;  %v1137_v10 = vpop.xlane.xlu1 %1136  ;;  %5437 = vrcp.f32 %v1274_v8  ;;  %v7111_v4 = vperm.slane %v7108_v11, 0 }
 0x27f   : > { %5439 = vrcp.f32 %v1231_v2  ;;  %v1496_v30 = vunpack.c.l.b16 %v1432_v54  ;;  %v1657_v2 = vpop.f32.mrf.mxu1 }
 0x280   : > { %v1433_v13 = vpack.c.bf16 %v1401_v46, %v1401_v46  ;;  %5441 = vrcp.f32 %v1229_v28  ;;  %v1651_v33 = vadd.f32 %v1650_v1, %v7111_v4  ;;  %v1653_v22 = vadd.f32 %v1652_v62, %v7111_v4 }
 0x281   : > { %v1656_v28 = vadd.f32 %v1655_v39, %v7111_v4 }
 0x282   : > { %v1497_v50 = vunpack.c.l.b16 %v1433_v13  ;;  %v1233_v24 = vpop.xlane.xlu0 %1232  ;;  %v1186_v13 = vsel %vm253_vm0, %v6896_v5, 0.0 }
 0x283   : > { %v5436_v32 = vpop.eup %5435  ;;  %v1276_v56 = vsub.f32 %v1137_v10, %v1233_v24  ;;  %v1141_v19 = vpop.xlane.xlu2 %1140 }
 0x284   : > { %v5438_v52 = vpop.eup %5437  ;;  %v1520_v53 = vpack.c.b16 %v1497_v50, %v1496_v30 }
 0x285   : > { %v5440_v27 = vpop.eup %5439  ;;  %5443 = vrcp.f32 %v1276_v56 }
 0x286   : > { %v1235_v25 = vpop.xlane.xlu1 %1234  ;;  %v1371_v31 = vsel %vm253_vm0, %v5440_v27, %v5436_v32  ;;  %v5442_v20 = vpop.eup %5441 }
 0x287   : > { %v1370_v47 = vsel %vm253_vm0, %v5442_v20, %v5438_v52  ;;  %v1277_v36 = vsub.f32 %v1139_v12, %v1235_v25 }
 0x288   : > { %v1402_v6 = vmul.f32 %v1370_v47, %v6815_v26 }
 0x289   : > { %5445 = vrcp.f32 %v1277_v36 }
 0x28a   : > { %5447 = vrcp.f32 %v1233_v24  ;;  %v1434_v7 = vpack.c.bf16 %v1402_v6, %v1402_v6 }
 0x28b   : > { %5449 = vrcp.f32 %v1235_v25  ;;  %v5444_v51 = vpop.eup %5443  ;;  %v1239_v41 = vpop.xlane.xlu2 %1238 }
 0x28c   : > { %v1498_v29 = vunpack.c.l.b16 %v1434_v7 }
 0x28e   : > { %1768 = vmatmul.bf16.gmra.mxu2 %v1518_v55  ;;  %v1403_v55 = vmul.f32 %v1371_v31, %v6821_v9  ;;  %v1143_v9 = vpop.xlane.xlu0 %1142 }
 0x28f   : > { %v5446_v42 = vpop.eup %5445  ;;  %v1279_v0 = vsub.f32 %v1143_v9, %v1239_v41 }
 0x290   : > { %v1435_v48 = vpack.c.bf16 %v1403_v55, %v1403_v55  ;;  %v5448_v26 = vpop.eup %5447 }
 0x291   : > { %v5450_v45 = vpop.eup %5449  ;;  %v1372_v61 = vsel %vm253_vm0, %v5448_v26, %v5444_v51  ;;  %5451 = vrcp.f32 %v1279_v0 }
 0x292   : > { %v1499_v14 = vunpack.c.l.b16 %v1435_v48  ;;  %v1373_v49 = vsel %vm253_vm0, %v5450_v45, %v5446_v42  ;;  %v1404_v46 = vmul.f32 %v1372_v61, %v6850_v23  ;;  %v1658_v23 = vadd.f32 %v1657_v2, %v7111_v4 }
 0x293   : > { %v1405_v8 = vmul.f32 %v1373_v49, %v6847_v17  ;;  %v1241_v47 = vpop.xlane.xlu2 %1240 }
 0x294   : > { %v1521_v15 = vpack.c.b16 %v1499_v14, %v1498_v29  ;;  %v1436_v12 = vpack.c.bf16 %v1404_v46, %v1404_v46  ;;  %v1188_v14 = vsel %vm253_vm0, %v6909_v43, 0.0 }
 0x295   : > { %v1437_v30 = vpack.c.bf16 %v1405_v8, %v1405_v8 }
 0x296   : > { %v1145_v54 = vpop.xlane.xlu0 %1144  ;;  %v1500_v50 = vunpack.c.l.b16 %v1436_v12 }
 0x297   : > { %v1501_v32 = vunpack.c.l.b16 %v1437_v30  ;;  %v5452_v52 = vpop.eup %5451  ;;  %v1280_v39 = vsub.f32 %v1145_v54, %v1241_v47 }
 0x299   : > { %v1522_v31 = vpack.c.b16 %v1501_v32, %v1500_v50 }
 0x29e   : > { %1773 = vmatmul.bf16.gmra.mxu2 %v1519_v58  ;;  %v1237_v58 = vpop.xlane.xlu1 %1236  ;;  %v1243_v20 = vpop.xlane.xlu0 %1242 }
 0x29f   : > { %v1278_v63 = vsub.f32 %v1141_v19, %v1237_v58  ;;  %v1660_v17 = vpop.f32.mrf.mxu1 }
 0x2a0   : > { %v1661_v36 = vadd.f32 %v1660_v17, %v7111_v4  ;;  %v6017_v17 = vmov 128.0  }
 0x2a1   : > { %5453 = vrcp.f32 %v1278_v63 }
 0x2a2   : > { %5455 = vrcp.f32 %v1239_v41 }
 0x2a3   : > { %5457 = vrcp.f32 %v1237_v58 }
 0x2a6   : > { %v1147_v55 = vpop.xlane.xlu1 %1146 }
 0x2a7   : > { %v5454_v27 = vpop.eup %5453  ;;  %v1662_v7 = vpop.f32.mrf.mxu1 }
 0x2ae   : > { %1778 = vmatmul.bf16.gmra.mxu2 %v1520_v53  ;;  %v5456_v53 = vpop.eup %5455 }
 0x2af   : > { %v5458_v25 = vpop.eup %5457  ;;  %v1375_v56 = vsel %vm253_vm0, %v5456_v53, %v5452_v52  ;;  %v1665_v41 = vpop.f32.mrf.mxu1 }
 0x2b0   : > { %v1407_v6 = vmul.f32 %v1375_v56, %v6869_v3  ;;  %v1666_v49 = vadd.f32 %v1665_v41, %v7111_v4  ;;  %v1149_v52 = vpop.xlane.xlu0 %1148 }
 0x2b1   : > { %v1739_v40 = vpop.f32.mrf.mxu2 }
 0x2b2   : > { %v7119_v16 = vadd.f32 %v1739_v40, %v1651_v33  ;;  %v1374_v33 = vsel %vm253_vm0, %v5458_v25, %v5454_v27  ;;  %v1281_v40 = vsub.f32 %v1147_v55, %v1243_v20  ;;  %v1439_v9 = vpack.c.bf16 %v1407_v6, %v1407_v6  ;;  %v1151_v27 = vpop.xlane.xlu1 %1150 }
 0x2b3   : > { %v1406_v19 = vmul.f32 %v1374_v33, %v6866_v18  ;;  %v1663_v18 = vadd.f32 %v1662_v7, %v7111_v4 }
 0x2b4   : > { %1819 = vadd.xlane.f32.xlu1 %v7119_v16  ;;  %5459 = vrcp.f32 %v1281_v40 }
 0x2b5   : > { %v1438_v51 = vpack.c.bf16 %v1406_v19, %v1406_v19  ;;  %5461 = vrcp.f32 %v1280_v39 }
 0x2b6   : > { %5463 = vrcp.f32 %v1243_v20 }
 0x2b7   : > { %5465 = vrcp.f32 %v1241_v47  ;;  %v1502_v3 = vunpack.c.l.b16 %v1438_v51 }
 0x2b8   : > { %5467 = vrcp.f32 %v6017_v17 }
 0x2b9   : > { %v1741_v38 = vpop.f32.mrf.mxu2 }
 0x2ba   : > { %v7124_v34 = vadd.f32 %v1741_v38, %v1653_v22  ;;  %v1503_v38 = vunpack.c.l.b16 %v1439_v9  ;;  %v5460_v29 = vpop.eup %5459 }
 0x2bb   : > { %v5462_v45 = vpop.eup %5461 }
 0x2bc   : > { %1821 = vadd.xlane.f32.xlu2 %v7124_v34  ;;  %1154 = vadd.xlane.f32.xlu1 %v6912_v21  ;;  %v1523_v58 = vpack.c.b16 %v1503_v38, %v1502_v3 }
 0x2be   : > { %1783 = vmatmul.bf16.gmra.mxu2 %v1521_v15  ;;  %v5464_v15 = vpop.eup %5463 }
 0x2bf   : > { %v1377_v2 = vsel %vm253_vm0, %v5464_v15, %v5460_v29  ;;  %v5466_v61 = vpop.eup %5465 }
 0x2c0   : > { %v1409_v0 = vmul.f32 %v1377_v2, %v6884_v44  ;;  %v5468_v44 = vpop.eup %5467 }
 0x2c1   : > { %v1744_v1 = vpop.f32.mrf.mxu2  ;;  %v1884_v50 = vmul.f32 128.0, %v5468_v44  ;;  %vm1888_vm1 = vweird.f32 %v5468_v44 }
 0x2c2   : > { %v7135_v10 = vadd.f32 %v1744_v1, %v1656_v28  ;;  %v1376_v28 = vsel %vm253_vm0, %v5466_v61, %v5462_v45  ;;  %v1190_v1 = vsel %vm253_vm0, %v7049_v35, 0.0  ;;  %v1441_v54 = vpack.c.bf16 %v1409_v0, %v1409_v0 }
 0x2c3   : > { %v1408_v8 = vmul.f32 %v1376_v28, %v6881_v59  ;;  %v1885_v32 = vsub.f32 1.0, %v1884_v50 }
 0x2c4   : > { %1244 = vadd.xlane.f32.xlu2 %v1186_v13  ;;  %1823 = vadd.xlane.f32.xlu1 %v7135_v10  ;;  %v1505_v12 = vunpack.c.l.b16 %v1441_v54 }
 0x2c5   : > { %v1440_v13 = vpack.c.bf16 %v1408_v8, %v1408_v8  ;;  %v1886_v59 = vmul.f32 %v5468_v44, %v1885_v32 }
 0x2c7   : > { %v1504_v30 = vunpack.c.l.b16 %v1440_v13  ;;  %v1887_v53 = vadd.f32 %v5468_v44, %v1886_v59 }
 0x2c9   : > { %v1746_v62 = vpop.f32.mrf.mxu2  ;;  %v7176_v20 = vsel %vm1888_vm1, %v5468_v44, %v1887_v53 }
 0x2ca   : > { %v7142_v24 = vadd.f32 %v1746_v62, %v1658_v23  ;;  %v1524_v23 = vpack.c.b16 %v1505_v12, %v1504_v30  ;;  %v1667_v62 = vpop.f32.mrf.mxu1  ;;  %9283 = vst [vmem:[#allocation33_spill] sm:$0xff] %v7176_v20 }
 0x2cb   : > { %v1668_v7 = vadd.f32 %v1667_v62, %v7111_v4 }
 0x2cc   : > { %1825 = vadd.xlane.f32.xlu2 %v7142_v24  ;;  %1158 = vadd.xlane.f32.xlu1 %v7063_v57 }
 0x2ce   : > { %1788 = vmatmul.bf16.gmra.mxu2 %v1522_v31  ;;  %v1247_v31 = vpop.xlane.xlu0 %1246 }
 0x2cf   : > { %v1283_v19 = vsub.f32 %v1151_v27, %v1247_v31 }
 0x2d1   : > { %v1749_v48 = vpop.f32.mrf.mxu2  ;;  %5469 = vrcp.f32 %v1283_v19 }
 0x2d2   : > { %v7153_v22 = vadd.f32 %v1749_v48, %v1661_v36  ;;  %v1670_v56 = vpop.f32.mrf.mxu1  ;;  %5471 = vrcp.f32 %v1247_v31 }
 0x2d3   : > { %v1671_v45 = vadd.f32 %v1670_v56, %v7111_v4 }
 0x2d4   : > { %1248 = vadd.xlane.f32.xlu2 %v1188_v14  ;;  %1827 = vadd.xlane.f32.xlu1 %v7153_v22 }
 0x2d6   : > { %v7184_v6 = vpop.xlane.xlu0 %1152 }
 0x2d7   : > { %v5470_v29 = vpop.eup %5469 }
 0x2d9   : > { %v1751_v42 = vpop.f32.mrf.mxu2 }
 0x2da   : > { %v7160_v26 = vadd.f32 %v1751_v42, %v1663_v18  ;;  %v1672_v51 = vpop.f32.mrf.mxu1 }
 0x2db   : > { %v1673_v12 = vadd.f32 %v1672_v51, %v7111_v4 }
 0x2dc   : > { %1829 = vadd.xlane.f32.xlu2 %v7160_v26 }
 0x2de   : > { %1793 = vmatmul.bf16.gmra.mxu2 %v1523_v58  ;;  %v5472_v58 = vpop.eup %5471 }
 0x2df   : > { %v1379_v61 = vsel %vm253_vm0, %v5472_v58, %v5470_v29 }
 0x2e0   : > { %v1411_v8 = vmul.f32 %v1379_v61, %v6893_v37 }
 0x2e1   : > { %v1754_v63 = vpop.f32.mrf.mxu2 }
 0x2e2   : > { %v7169_v46 = vadd.f32 %v1754_v63, %v1666_v49  ;;  %v1675_v28 = vpop.f32.mrf.mxu1  ;;  %v1443_v32 = vpack.c.bf16 %v1411_v8, %v1411_v8 }
 0x2e4   : > { %1252 = vadd.xlane.f32.xlu2 %v1190_v1  ;;  %1831 = vadd.xlane.f32.xlu0 %v7169_v46 }
 0x2e9   : > { %v1756_v25 = vpop.f32.mrf.mxu2 }
 0x2ea   : > { %v7193_v18 = vadd.f32 %v1756_v25, %v1668_v7  ;;  %v1677_v27 = vpop.f32.mrf.mxu1  ;;  %v1507_v25 = vunpack.c.l.b16 %v1443_v32 }
 0x2ee   : > { %1798 = vmatmul.bf16.gmra.mxu2 %v1524_v23 }
 0x2f1   : > { %v1759_v55 = vpop.f32.mrf.mxu2 }
 0x2f2   : > { %v7203_v49 = vadd.f32 %v1759_v55, %v1671_v45  ;;  %v1680_v45 = vpop.f32.mrf.mxu1 }
 0x2f9   : > { %v1761_v3 = vpop.f32.mrf.mxu2 }
 0x301   : > { %v1764_v23 = vpop.f32.mrf.mxu2 }
 0x327   : > { %v1820_v33 = vpop.xlane.xlu1 %1819 }
 0x328   : > { %v1890_v47 = vmul.f32 %v7176_v20, %v1820_v33 }
 0x32a   : > { %v7180_v36 = vsub.f32 %v7119_v16, %v1890_v47 }
 0x32c   : > { %v1954_v40 = vmul.f32 %v7180_v36, %v7180_v36 }
 0x32e   : > { %1986 = vadd.xlane.f32.xlu1 %v1954_v40 }
 0x32f   : > { %v1822_v39 = vpop.xlane.xlu2 %1821  ;;  %v1155_v48 = vpop.xlane.xlu1 %1154 }
 0x330   : > { %v1891_v14 = vmul.f32 %v7176_v20, %v1822_v39  ;;  %v1766_v39 = vpop.f32.mrf.mxu2 }
 0x332   : > { %v7189_v9 = vsub.f32 %v7124_v34, %v1891_v14  ;;  %v1251_v34 = vpop.xlane.xlu0 %1250 }
 0x333   : > { %v1285_v63 = vsub.f32 %v1155_v48, %v1251_v34 }
 0x334   : > { %v1955_v16 = vmul.f32 %v7189_v9, %v7189_v9 }
 0x336   : > { %1988 = vadd.xlane.f32.xlu2 %v1955_v16  ;;  %1833 = vadd.xlane.f32.xlu1 %v7193_v18 }
 0x337   : > { %v1245_v38 = vpop.xlane.xlu2 %1244  ;;  %v1824_v42 = vpop.xlane.xlu1 %1823 }
 0x338   : > { %v1282_v41 = vsub.f32 %v1149_v52, %v1245_v38  ;;  %v1892_v15 = vmul.f32 %v7176_v20, %v1824_v42  ;;  %5473 = vrcp.f32 %v1245_v38  ;;  %v7217_v52 = vadd.f32 %v1761_v3, %v1673_v12 }
 0x339   : > { %v1678_v42 = vadd.f32 %v1677_v27, %v7111_v4 }
 0x33a   : > { %5475 = vrcp.f32 %v1282_v41  ;;  %v7199_v2 = vsub.f32 %v7135_v10, %v1892_v15  ;;  %v1157_v37 = vpop.xlane.xlu0 %1156 }
 0x33b   : > { %5477 = vrcp.f32 %v1285_v63 }
 0x33c   : > { %v1956_v0 = vmul.f32 %v7199_v2, %v7199_v2  ;;  %5479 = vrcp.f32 %v1251_v34 }
 0x33e   : > { %1835 = vadd.xlane.f32.xlu1 %v7203_v49  ;;  %1990 = vadd.xlane.f32.xlu2 %v1956_v0  ;;  %v5474_v1 = vpop.eup %5473  ;;  %v1769_v0 = vpop.f32.mrf.mxu2 }
 0x33f   : > { %v1826_v54 = vpop.xlane.xlu2 %1825  ;;  %v1159_v13 = vpop.xlane.xlu1 %1158 }
 0x340   : > { %v5476_v10 = vpop.eup %5475  ;;  %v1893_v30 = vmul.f32 %v7176_v20, %v1826_v54 }
 0x341   : > { %v1378_v17 = vsel %vm253_vm0, %v5474_v1, %v5476_v10  ;;  %v5478_v33 = vpop.eup %5477 }
 0x342   : > { %v7214_v44 = vsub.f32 %v7142_v24, %v1893_v30  ;;  %v1410_v50 = vmul.f32 %v1378_v17, %v6896_v5  ;;  %v1676_v5 = vadd.f32 %v1675_v28, %v7111_v4  ;;  %v5480_v40 = vpop.eup %5479  ;;  %v1682_v17 = vpop.f32.mrf.mxu1 }
 0x343   : > { %v1381_v48 = vsel %vm253_vm0, %v5480_v40, %v5478_v33 }
 0x344   : > { %v1957_v59 = vmul.f32 %v7214_v44, %v7214_v44  ;;  %v1442_v62 = vpack.c.bf16 %v1410_v50, %v1410_v50  ;;  %v7230_v7 = vadd.f32 %v1764_v23, %v1676_v5  ;;  %v1413_v16 = vmul.f32 %v1381_v48, %v6912_v21 }
 0x345   : > { %v7244_v21 = vadd.f32 %v1766_v39, %v1678_v42  ;;  %v5161_v42 = vld [vmem:[#allocation7 + $0xa8] sm:$0xff] }
 0x346   : > { %1992 = vadd.xlane.f32.xlu0 %v1957_v59  ;;  %1837 = vadd.xlane.f32.xlu2 %v7217_v52  ;;  %v1506_v53 = vunpack.c.l.b16 %v1442_v62  ;;  %v1445_v58 = vpack.c.bf16 %v1413_v16, %v1413_v16  ;;  %v1771_v27 = vpop.f32.mrf.mxu2  ;;  %v5162_v16 = vld [vmem:[#allocation7 + $0xb0] sm:$0xff] }
 0x347   : > { %v1249_v31 = vpop.xlane.xlu2 %1248  ;;  %v1828_v24 = vpop.xlane.xlu1 %1827 }
 0x348   : > { %v1284_v56 = vsub.f32 %v7184_v6, %v1249_v31  ;;  %v1894_v47 = vmul.f32 %v7176_v20, %v1828_v24  ;;  %v1525_v55 = vpack.c.b16 %v1507_v25, %v1506_v53  ;;  %5481 = vrcp.f32 %v1249_v31  ;;  %v1255_v6 = vpop.xlane.xlu0 %1254 }
 0x349   : > { %v1287_v51 = vsub.f32 %v1159_v13, %v1255_v6  ;;  %v1509_v8 = vunpack.c.l.b16 %v1445_v58  ;;  %v1681_v13 = vadd.f32 %v1680_v45, %v7111_v4 }
 0x34a   : > { %5483 = vrcp.f32 %v1284_v56  ;;  %1803 = vmatmul.bf16.gmra.mxu2 %v1525_v55  ;;  %v7226_v19 = vsub.f32 %v7153_v22, %v1894_v47  ;;  %v1685_v56 = vpop.f32.mrf.mxu1 }
 0x34b   : > { %5485 = vrcp.f32 %v1287_v51  ;;  %v7256_v32 = vadd.f32 %v1769_v0, %v1681_v13  ;;  %v5154_v51 = vld [vmem:[#allocation5 + $0x70] sm:$0xff] }
 0x34c   : > { %v1958_v14 = vmul.f32 %v7226_v19, %v7226_v19  ;;  %5487 = vrcp.f32 %v1255_v6 }
 0x34e   : > { %1839 = vadd.xlane.f32.xlu2 %v7230_v7  ;;  %1994 = vadd.xlane.f32.xlu0 %v1958_v14  ;;  %v5482_v3 = vpop.eup %5481  ;;  %v1774_v39 = vpop.f32.mrf.mxu2  ;;  %v5155_v14 = vld [vmem:[#allocation5 + $0x78] sm:$0xff] }
 0x34f   : > { %v1830_v38 = vpop.xlane.xlu2 %1829  ;;  %2760 = vmatpush.bf16.msrb.mxu3 %v5155_v14 }
 0x350   : > { %v5484_v22 = vpop.eup %5483  ;;  %v1895_v29 = vmul.f32 %v7176_v20, %v1830_v38 }
 0x351   : > { %v1380_v41 = vsel %vm253_vm0, %v5482_v3, %v5484_v22  ;;  %v5153_v22 = vld [vmem:[#allocation5 + $0x68] sm:$0xff] }
 0x352   : > { %v7241_v15 = vsub.f32 %v7160_v26, %v1895_v29  ;;  %v1412_v34 = vmul.f32 %v1380_v41, %v6909_v43  ;;  %v5486_v26 = vpop.eup %5485  ;;  %v5152_v41 = vld [vmem:[#allocation5 + $0x60] sm:$0xff] }
 0x353   : > { %v5488_v30 = vpop.eup %5487  ;;  %2761 = vmatpush.bf16.msrb.mxu3 %v5154_v51  ;;  %v5148_v51 = vld [vmem:[#allocation5 + $0x40] sm:$0xff] }
 0x354   : > { %v1959_v61 = vmul.f32 %v7241_v15, %v7241_v15  ;;  %v1444_v28 = vpack.c.bf16 %v1412_v34, %v1412_v34  ;;  %v1383_v50 = vsel %vm253_vm0, %v5488_v30, %v5486_v26  ;;  %v5160_v34 = vld [vmem:[#allocation7 + $0xa0] sm:$0xff]  ;;  %v5159_v26 = vld [vmem:[#allocation7 + $0x98] sm:$0xff] }
 0x356   : > { %1996 = vadd.xlane.f32.xlu1 %v1959_v61  ;;  %1841 = vadd.xlane.f32.xlu0 %v7244_v21  ;;  %v1508_v63 = vunpack.c.l.b16 %v1444_v28  ;;  %v7276_v0 = vpop.f32.mrf.mxu2 }
 0x357   : > { %v1253_v1 = vpop.xlane.xlu2 %1252  ;;  %v1832_v54 = vpop.xlane.xlu0 %1831  ;;  %2762 = vmatpush.bf16.msrb.mxu3 %v5153_v22 }
 0x358   : > { %v1286_v43 = vsub.f32 %v1157_v37, %v1253_v1  ;;  %v1896_v10 = vmul.f32 %v7176_v20, %v1832_v54  ;;  %v1526_v12 = vpack.c.b16 %v1509_v8, %v1508_v63  ;;  %5489 = vrcp.f32 %v1253_v1  ;;  %v5151_v54 = vld [vmem:[#allocation5 + $0x58] sm:$0xff] }
 0x359   : > { %v1415_v37 = vmul.f32 %v1383_v50, %v7063_v57  ;;  %v1686_v57 = vadd.f32 %v1685_v56, %v7111_v4  ;;  %v1690_v50 = vpop.f32.mrf.mxu3 }
 0x35a   : > { %5491 = vrcp.f32 %v1286_v43  ;;  %1808 = vmatmul.bf16.gmra.mxu2 %v1526_v12  ;;  %v7252_v23 = vsub.f32 %v7169_v46, %v1896_v10  ;;  %v1683_v46 = vadd.f32 %v1682_v17, %v7111_v4  ;;  %v5150_v17 = vld [vmem:[#allocation5 + $0x50] sm:$0xff] }
 0x35b   : > { %v1447_v24 = vpack.c.bf16 %v1415_v37, %v1415_v37  ;;  %v7270_v48 = vadd.f32 %v1774_v39, %v1686_v57  ;;  %2763 = vmatpush.bf16.msrb.mxu3 %v5152_v41  ;;  %v7304_v39 = vperm.slane %v7108_v11, 1 }
 0x35c   : > { %v1960_v59 = vmul.f32 %v7252_v23, %v7252_v23  ;;  %v7266_v33 = vadd.f32 %v1771_v27, %v1683_v46 }
 0x35d   : > { %v1511_v55 = vunpack.c.l.b16 %v1447_v24  ;;  %v5149_v24 = vld [vmem:[#allocation5 + $0x48] sm:$0xff] }
 0x35e   : > { %1998 = vadd.xlane.f32.xlu1 %v1960_v59  ;;  %1843 = vadd.xlane.f32.xlu0 %v7256_v32  ;;  %v5490_v62 = vpop.eup %5489  ;;  %v1779_v56 = vpop.f32.mrf.mxu2 }
 0x35f   : > { %2764 = vmatpush.bf16.msrb.mxu3 %v5151_v54 }
 0x360   : > { %v5492_v53 = vpop.eup %5491 }
 0x361   : > { %v1382_v25 = vsel %vm253_vm0, %v5490_v62, %v5492_v53  ;;  %v1692_v41 = vpop.f32.mrf.mxu3 }
 0x362   : > { %v1414_v31 = vmul.f32 %v1382_v25, %v7049_v35  ;;  %v5163_v35 = vld [vmem:[#allocation7 + $0xb8] sm:$0xff] }
 0x363   : > { %3888 = vmatpush.bf16.msrb.mxu0 %v5163_v35  ;;  %2765 = vmatpush.bf16.msrb.mxu3 %v5150_v17 }
 0x364   : > { %v1446_v5 = vpack.c.bf16 %v1414_v31, %v1414_v31 }
 0x366   : > { %1845 = vadd.xlane.f32.xlu1 %v7266_v33  ;;  %v1510_v47 = vunpack.c.l.b16 %v1446_v5  ;;  %v5157_v5 = vld [vmem:[#allocation7 + $0x88] sm:$0xff] }
 0x367   : > { %3889 = vmatpush.bf16.msrb.mxu0 %v5162_v16  ;;  %2766 = vmatpush.bf16.msrb.mxu3 %v5149_v24  ;;  %v5156_v16 = vld [vmem:[#allocation7 + $0x80] sm:$0xff] }
 0x368   : > { %v1527_v40 = vpack.c.b16 %v1511_v55, %v1510_v47 }
 0x369   : > { %v1695_v47 = vpop.f32.mrf.mxu3 }
 0x36a   : > { %1813 = vmatmul.bf16.gmra.mxu2 %v1527_v40 }
 0x36b   : > { %3890 = vmatpush.bf16.msrb.mxu0 %v5161_v42  ;;  %2767 = vmatpush.bf16.msrb.mxu3 %v5148_v51  ;;  %v1693_v51 = vadd.f32 %v1692_v41, %v7111_v4 }
 0x36e   : > { %1847 = vadd.xlane.f32.xlu1 %v7270_v48 }
 0x36f   : > { %3891 = vmatpush.bf16.msrb.mxu0 %v5160_v34 }
 0x373   : > { %3892 = vmatpush.bf16.msrb.mxu0 %v5159_v26 }
 0x3a1   : > { %v1987_v6 = vpop.xlane.xlu1 %1986 }
 0x3a2   : > { %v2050_v3 = vmul.f32 %v1987_v6, %v7176_v20 }
 0x3a4   : > { %v2082_v38 = vadd.f32 1e-05, %v2050_v3 }
 0x3a6   : > { %5493 = vrsqrt.f32 %v2082_v38  ;;  %vm2120_vm3 = vweird.f32 %v2082_v38 }
 0x3a9   : > { %v1989_v29 = vpop.xlane.xlu2 %1988  ;;  %v1834_v45 = vpop.xlane.xlu1 %1833 }
 0x3aa   : > { %v2051_v58 = vmul.f32 %v1989_v29, %v7176_v20  ;;  %v1897_v61 = vmul.f32 %v7176_v20, %v1834_v45 }
 0x3ac   : > { %v5494_v28 = vpop.eup %5493  ;;  %v7278_v63 = vadd.f32 1e-05, %v2051_v58  ;;  %v7281_v8 = vsub.f32 %v7193_v18, %v1897_v61  ;;  %v5158_v18 = vld [vmem:[#allocation7 + $0x90] sm:$0xff] }
 0x3ad   : > { %v2115_v1 = vmul.f32 %v5494_v28, %v2082_v38  ;;  %vm2121_vm2 = vweird.f32 %v5494_v28  ;;  %3893 = vmatpush.bf16.msrb.mxu0 %v5158_v18 }
 0x3ae   : > { %5495 = vrsqrt.f32 %v7278_v63  ;;  %v1961_v13 = vmul.f32 %v7281_v8, %v7281_v8  ;;  %vm7294_vm4 = vmor %vm2120_vm3, %vm2121_vm2  ;;  %vm2130_vm6 = vweird.f32 %v7278_v63 }
 0x3af   : > { %v2116_v43 = vmul.f32 %v5494_v28, %v2115_v1 }
 0x3b0   : > { %2000 = vadd.xlane.f32.xlu2 %v1961_v13 }
 0x3b1   : > { %v2117_v10 = vmul.f32 0.5, %v2116_v43  ;;  %v1991_v12 = vpop.xlane.xlu2 %1990  ;;  %v1836_v30 = vpop.xlane.xlu1 %1835  ;;  %3894 = vmatpush.bf16.msrb.mxu0 %v5157_v5 }
 0x3b2   : > { %v2052_v59 = vmul.f32 %v1991_v12, %v7176_v20  ;;  %v1898_v37 = vmul.f32 %v7176_v20, %v1836_v30  ;;  %v1691_v30 = vadd.f32 %v1690_v50, %v7111_v4 }
 0x3b3   : > { %v2118_v62 = vsub.f32 1.5, %v2117_v10 }
 0x3b4   : > { %v5496_v27 = vpop.eup %5495  ;;  %v7288_v53 = vadd.f32 1e-05, %v2052_v59  ;;  %v7291_v46 = vsub.f32 %v7203_v49, %v1898_v37  ;;  %v1687_v49 = vpop.f32.mrf.mxu1  ;;  %v7342_v5 = vadd.f32 %v1779_v56, %v1691_v30 }
 0x3b5   : > { %v2119_v25 = vmul.f32 %v5494_v28, %v2118_v62  ;;  %v2125_v31 = vmul.f32 %v5496_v27, %v7278_v63  ;;  %v1688_v3 = vadd.f32 %v1687_v49, %v7111_v4  ;;  %vm2131_vm5 = vweird.f32 %v5496_v27  ;;  %3895 = vmatpush.bf16.msrb.mxu0 %v5156_v16 }
 0x3b6   : > { %5497 = vrsqrt.f32 %v7288_v53  ;;  %v1962_v55 = vmul.f32 %v7291_v46, %v7291_v46  ;;  %vm2132_vm7 = vmor %vm2130_vm6, %vm2131_vm5  ;;  %vm2140_vm9 = vweird.f32 %v7288_v53 }
 0x3b7   : > { %v2123_v57 = vsel %vm7294_vm4, %v5494_v28, %v2119_v25  ;;  %v2126_v40 = vmul.f32 %v5496_v27, %v2125_v31  ;;  %v7317_v28 = vperm.slane %v7108_v11, 2  ;;  %v1781_v11 = vpop.f32.mrf.mxu2 }
 0x3b8   : > { %2002 = vadd.xlane.f32.xlu2 %v1962_v55  ;;  %v2434_v42 = vmul.f32 %v2123_v57, %v7180_v36  ;;  %v7322_v36 = vadd.f32 %v7276_v0, %v1688_v3 }
 0x3b9   : > { %v2127_v14 = vmul.f32 0.5, %v2126_v40  ;;  %v1993_v35 = vpop.xlane.xlu0 %1992  ;;  %v1838_v6 = vpop.xlane.xlu2 %1837 }
 0x3ba   : > { %v2053_v38 = vmul.f32 %v1993_v35, %v7176_v20  ;;  %v1899_v22 = vmul.f32 %v7176_v20, %v1838_v6  ;;  %v2467_v61 = vmul.f32 %v7304_v39, %v2434_v42 }
 0x3bb   : > { %v2128_v29 = vsub.f32 1.5, %v2127_v14 }
 0x3bc   : > { %v5498_v45 = vpop.eup %5497  ;;  %v7310_v34 = vadd.f32 1e-05, %v2053_v38  ;;  %v7313_v58 = vsub.f32 %v7217_v52, %v1899_v22  ;;  %v2500_v43 = vadd.f32 %v7317_v28, %v2467_v61 }
 0x3bd   : > { %v2129_v1 = vmul.f32 %v5496_v27, %v2128_v29  ;;  %v2135_v54 = vmul.f32 %v5498_v45, %v7288_v53  ;;  %vm2141_vm8 = vweird.f32 %v5498_v45 }
 0x3be   : > { %5499 = vrsqrt.f32 %v7310_v34  ;;  %v1963_v52 = vmul.f32 %v7313_v58, %v7313_v58  ;;  %v2532_v31 = vpack.c.bf16 %v2500_v43, %v2500_v43  ;;  %vm2142_vm10 = vmor %vm2140_vm9, %vm2141_vm8  ;;  %vm2150_vm12 = vweird.f32 %v7310_v34 }
 0x3bf   : > { %v2133_v26 = vsel %vm2132_vm7, %v5496_v27, %v2129_v1  ;;  %v2136_v13 = vmul.f32 %v5498_v45, %v2135_v54  ;;  %v1784_v22 = vpop.f32.mrf.mxu2  ;;  %v7358_v54 = vadd.f32 %v1781_v11, %v1693_v51 }
 0x3c0   : > { %2004 = vadd.xlane.f32.xlu0 %v1963_v52  ;;  %1849 = vadd.xlane.f32.xlu2 %v7322_v36  ;;  %v2435_v63 = vmul.f32 %v2133_v26, %v7189_v9  ;;  %v2648_v40 = vunpack.c.l.b16 %v2532_v31 }
 0x3c1   : > { %v2137_v10 = vmul.f32 0.5, %v2136_v13  ;;  %v1840_v12 = vpop.xlane.xlu2 %1839  ;;  %v1995_v0 = vpop.xlane.xlu0 %1994 }
 0x3c2   : > { %v1900_v17 = vmul.f32 %v7176_v20, %v1840_v12  ;;  %v2054_v18 = vmul.f32 %v1995_v0, %v7176_v20  ;;  %v2468_v59 = vmul.f32 %v7304_v39, %v2435_v63  ;;  %v1697_v63 = vpop.f32.mrf.mxu3  ;;  %v1696_v12 = vadd.f32 %v1695_v47, %v7111_v4 }
 0x3c3   : > { %v2138_v37 = vsub.f32 1.5, %v2137_v10 }
 0x3c4   : > { %v5500_v62 = vpop.eup %5499  ;;  %v7334_v27 = vadd.f32 1e-05, %v2054_v18  ;;  %v7337_v9 = vsub.f32 %v7230_v7, %v1900_v17  ;;  %v2501_v25 = vadd.f32 %v7317_v28, %v2468_v59 }
 0x3c5   : > { %v2139_v24 = vmul.f32 %v5498_v45, %v2138_v37  ;;  %v2145_v50 = vmul.f32 %v5500_v62, %v7310_v34  ;;  %vm2151_vm11 = vweird.f32 %v5500_v62 }
 0x3c6   : > { %5501 = vrsqrt.f32 %v7334_v27  ;;  %v1964_v55 = vmul.f32 %v7337_v9, %v7337_v9  ;;  %v2533_v49 = vpack.c.bf16 %v2501_v25, %v2501_v25  ;;  %vm2152_vm13 = vmor %vm2150_vm12, %vm2151_vm11  ;;  %vm2160_vm15 = vweird.f32 %v7334_v27 }
 0x3c7   : > { %v2146_v7 = vmul.f32 %v5500_v62, %v2145_v50  ;;  %v2143_v57 = vsel %vm2142_vm10, %v5498_v45, %v2139_v24  ;;  %v1786_v37 = vpop.f32.mrf.mxu2  ;;  %v7375_v24 = vadd.f32 %v1784_v22, %v1696_v12 }
 0x3c8   : > { %2006 = vadd.xlane.f32.xlu0 %v1964_v55  ;;  %1851 = vadd.xlane.f32.xlu2 %v7342_v5  ;;  %v2649_v14 = vunpack.c.l.b16 %v2533_v49  ;;  %v2436_v56 = vmul.f32 %v2143_v57, %v7199_v2 }
 0x3c9   : > { %v2147_v53 = vmul.f32 0.5, %v2146_v7  ;;  %v1842_v35 = vpop.xlane.xlu0 %1841  ;;  %v1997_v6 = vpop.xlane.xlu1 %1996 }
 0x3ca   : > { %v1901_v16 = vmul.f32 %v7176_v20, %v1842_v35  ;;  %v2055_v3 = vmul.f32 %v1997_v6, %v7176_v20  ;;  %v2680_v38 = vpack.c.b16 %v2649_v14, %v2648_v40  ;;  %v2469_v41 = vmul.f32 %v7304_v39, %v2436_v56  ;;  %v1700_v35 = vpop.f32.mrf.mxu3 }
 0x3cb   : > { %v2148_v42 = vsub.f32 1.5, %v2147_v53  ;;  %v1698_v14 = vadd.f32 %v1697_v63, %v7111_v4 }
 0x3cc   : > { %v5502_v29 = vpop.eup %5501  ;;  %v2087_v45 = vadd.f32 1e-05, %v2055_v3  ;;  %2768 = vmatmul.bf16.vlgmr.msrb.gmra.mxu3 %v2680_v38  ;;  %3896 = vmatmul.bf16.vlgmr.msrb.gmra.mxu0 %v2680_v38  ;;  %v7353_v61 = vsub.f32 %v7244_v21, %v1901_v16  ;;  %v2502_v11 = vadd.f32 %v7317_v28, %v2469_v41 }
 0x3cd   : > { %v2149_v1 = vmul.f32 %v5500_v62, %v2148_v42  ;;  %v2155_v2 = vmul.f32 %v5502_v29, %v7334_v27  ;;  %vm2161_vm14 = vweird.f32 %v5502_v29 }
 0x3ce   : > { %5503 = vrsqrt.f32 %v2087_v45  ;;  %v1965_v52 = vmul.f32 %v7353_v61, %v7353_v61  ;;  %v2534_v31 = vpack.c.bf16 %v2502_v11, %v2502_v11  ;;  %vm2162_vm1 = vmor %vm2160_vm15, %vm2161_vm14  ;;  %vm2170_vm3 = vweird.f32 %v2087_v45 }
 0x3cf   : > { %v2156_v26 = vmul.f32 %v5502_v29, %v2155_v2  ;;  %v2153_v13 = vsel %vm2152_vm13, %v5500_v62, %v2149_v1  ;;  %v1789_v22 = vpop.f32.mrf.mxu2 }
 0x3d0   : > { %1853 = vadd.xlane.f32.xlu0 %v7358_v54  ;;  %2008 = vadd.xlane.f32.xlu1 %v1965_v52  ;;  %v2437_v21 = vmul.f32 %v2153_v13, %v7214_v44  ;;  %v2650_v40 = vunpack.c.l.b16 %v2534_v31 }
 0x3d1   : > { %v2157_v34 = vmul.f32 0.5, %v2156_v26  ;;  %v1844_v43 = vpop.xlane.xlu0 %1843  ;;  %v7364_v10 = vpop.xlane.xlu1 %1998 }
 0x3d2   : > { %v1902_v0 = vmul.f32 %v7176_v20, %v1844_v43  ;;  %v2470_v30 = vmul.f32 %v7304_v39, %v2437_v21  ;;  %v1702_v63 = vpop.f32.mrf.mxu3 }
 0x3d3   : > { %v2158_v17 = vsub.f32 1.5, %v2157_v34 }
 0x3d4   : > { %v5504_v18 = vpop.eup %5503  ;;  %v7371_v59 = vsub.f32 %v7256_v32, %v1902_v0  ;;  %v2503_v44 = vadd.f32 %v7317_v28, %v2470_v30  ;;  %v1703_v0 = vadd.f32 %v1702_v63, %v7111_v4 }
 0x3d5   : > { %v2159_v62 = vmul.f32 %v5502_v29, %v2158_v17  ;;  %v2165_v25 = vmul.f32 %v5504_v18, %v2087_v45  ;;  %vm2171_vm2 = vweird.f32 %v5504_v18  ;;  %v1701_v45 = vadd.f32 %v1700_v35, %v7111_v4 }
 0x3d6   : > { %v1966_v50 = vmul.f32 %v7371_v59, %v7371_v59  ;;  %v2535_v55 = vpack.c.bf16 %v2503_v44, %v2503_v44  ;;  %vm2172_vm4 = vmor %vm2170_vm3, %vm2171_vm2 }
 0x3d7   : > { %v2166_v47 = vmul.f32 %v5504_v18, %v2165_v25  ;;  %v2163_v49 = vsel %vm2162_vm1, %v5502_v29, %v2159_v62  ;;  %v7401_v21 = vadd.f32 %v1789_v22, %v1701_v45  ;;  %v1791_v12 = vpop.f32.mrf.mxu2  ;;  %v2056_v62 = vmul.f32 %v7364_v10, %v7176_v20 }
 0x3d8   : > { %1855 = vadd.xlane.f32.xlu0 %v7375_v24  ;;  %2010 = vadd.xlane.f32.xlu1 %v1966_v50  ;;  %v2438_v32 = vmul.f32 %v2163_v49, %v7226_v19  ;;  %v2651_v27 = vunpack.c.l.b16 %v2535_v55  ;;  %v7387_v19 = vadd.f32 %v1786_v37, %v1698_v14  ;;  %v7407_v30 = vadd.f32 %v1791_v12, %v1703_v0 }
 0x3d9   : > { %v2167_v7 = vmul.f32 0.5, %v2166_v47  ;;  %v1846_v57 = vpop.xlane.xlu1 %1845  ;;  %v2088_v25 = vadd.f32 1e-05, %v2056_v62 }
 0x3da   : > { %v1903_v53 = vmul.f32 %v7176_v20, %v1846_v57  ;;  %v2681_v56 = vpack.c.b16 %v2651_v27, %v2650_v40  ;;  %v2471_v16 = vmul.f32 %v7304_v39, %v2438_v32  ;;  %v1705_v17 = vpop.f32.mrf.mxu3 }
 0x3db   : > { %v2168_v6 = vsub.f32 1.5, %v2167_v7  ;;  %5505 = vrsqrt.f32 %v2088_v25  ;;  %vm2180_vm6 = vweird.f32 %v2088_v25 }
 0x3dc   : > { %v7384_v51 = vsub.f32 %v7266_v33, %v1903_v53  ;;  %2773 = vmatmul.bf16.gmra.mxu3 %v2681_v56  ;;  %3901 = vmatmul.bf16.gmra.mxu0 %v2681_v56  ;;  %v2504_v29 = vadd.f32 %v7317_v28, %v2471_v16 }
 0x3dd   : > { %v2169_v3 = vmul.f32 %v5504_v18, %v2168_v6 }
 0x3de   : > { %v1967_v38 = vmul.f32 %v7384_v51, %v7384_v51  ;;  %v2536_v13 = vpack.c.bf16 %v2504_v29, %v2504_v29 }
 0x3df   : > { %v2173_v42 = vsel %vm2172_vm4, %v5504_v18, %v2169_v3  ;;  %v1706_v18 = vadd.f32 %v1705_v17, %v7111_v4  ;;  %v1794_v44 = vpop.f32.mrf.mxu2 }
 0x3e0   : > { %1857 = vadd.xlane.f32.xlu1 %v7387_v19  ;;  %2012 = vadd.xlane.f32.xlu2 %v1967_v38  ;;  %v2439_v33 = vmul.f32 %v2173_v42, %v7241_v15  ;;  %v2652_v43 = vunpack.c.l.b16 %v2536_v13 }
 0x3e1   : > { %v1848_v1 = vpop.xlane.xlu1 %1847  ;;  %v7411_v37 = vadd.f32 %v1794_v44, %v1706_v18  ;;  %v5506_v31 = vpop.eup %5505 }
 0x3e2   : > { %v1904_v2 = vmul.f32 %v7176_v20, %v1848_v1  ;;  %v2472_v41 = vmul.f32 %v7304_v39, %v2439_v33  ;;  %v2175_v50 = vmul.f32 %v5506_v31, %v2088_v25  ;;  %vm2181_vm5 = vweird.f32 %v5506_v31  ;;  %v1707_v42 = vpop.f32.mrf.mxu3 }
 0x3e3   : > { %vm2182_vm7 = vmor %vm2180_vm6, %vm2181_vm5 }
 0x3e4   : > { %v7398_v52 = vsub.f32 %v7270_v48, %v1904_v2  ;;  %v2505_v26 = vadd.f32 %v7317_v28, %v2472_v41  ;;  %v2176_v47 = vmul.f32 %v5506_v31, %v2175_v50 }
 0x3e6   : > { %v1968_v15 = vmul.f32 %v7398_v52, %v7398_v52  ;;  %v2537_v34 = vpack.c.bf16 %v2505_v26, %v2505_v26  ;;  %v2177_v55 = vmul.f32 0.5, %v2176_v47 }
 0x3e7   : > { %v1796_v63 = vpop.f32.mrf.mxu2 }
 0x3e8   : > { %1859 = vadd.xlane.f32.xlu1 %v7401_v21  ;;  %2014 = vadd.xlane.f32.xlu2 %v1968_v15  ;;  %v2653_v11 = vunpack.c.l.b16 %v2537_v34  ;;  %v2178_v57 = vsub.f32 1.5, %v2177_v55 }
 0x3ea   : > { %v2682_v48 = vpack.c.b16 %v2653_v11, %v2652_v43  ;;  %v2179_v40 = vmul.f32 %v5506_v31, %v2178_v57 }
 0x3ec   : > { %2778 = vmatmul.bf16.gmra.mxu3 %v2682_v48  ;;  %3906 = vmatmul.bf16.gmra.mxu0 %v2682_v48  ;;  %v2183_v6 = vsel %vm2182_vm7, %v5506_v31, %v2179_v40  ;;  %v1710_v31 = vpop.f32.mrf.mxu3 }
 0x3ed   : > { %v2440_v16 = vmul.f32 %v2183_v6, %v7252_v23 }
 0x3ef   : > { %v2473_v26 = vmul.f32 %v7304_v39, %v2440_v16 }
 0x3f0   : > { %1861 = vadd.xlane.f32.xlu2 %v7407_v30 }
 0x3f8   : > { %1863 = vadd.xlane.f32.xlu2 %v7411_v37 }
 0x423   : > { %v2001_v49 = vpop.xlane.xlu2 %2000 }
 0x424   : > { %v2057_v32 = vmul.f32 %v2001_v49, %v7176_v20 }
 0x426   : > { %v2089_v7 = vadd.f32 1e-05, %v2057_v32 }
 0x428   : > { %5507 = vrsqrt.f32 %v2089_v7  ;;  %vm2190_vm9 = vweird.f32 %v2089_v7 }
 0x42b   : > { %v2003_v27 = vpop.xlane.xlu2 %2002 }
 0x42c   : > { %v2058_v14 = vmul.f32 %v2003_v27, %v7176_v20 }
 0x42e   : > { %v5508_v53 = vpop.eup %5507  ;;  %v2090_v10 = vadd.f32 1e-05, %v2058_v14  ;;  %v1799_v14 = vpop.f32.mrf.mxu2 }
 0x42f   : > { %v2185_v35 = vmul.f32 %v5508_v53, %v2089_v7  ;;  %vm2191_vm8 = vweird.f32 %v5508_v53 }
 0x430   : > { %5509 = vrsqrt.f32 %v2090_v10  ;;  %vm2192_vm10 = vmor %vm2190_vm9, %vm2191_vm8  ;;  %vm2200_vm12 = vweird.f32 %v2090_v10 }
 0x431   : > { %v2186_v56 = vmul.f32 %v5508_v53, %v2185_v35  ;;  %v1708_v35 = vadd.f32 %v1707_v42, %v7111_v4 }
 0x433   : > { %v2187_v3 = vmul.f32 0.5, %v2186_v56  ;;  %v2005_v38 = vpop.xlane.xlu0 %2004  ;;  %v1850_v22 = vpop.xlane.xlu2 %1849 }
 0x434   : > { %v2059_v33 = vmul.f32 %v2005_v38, %v7176_v20  ;;  %v1905_v29 = vmul.f32 %v7176_v20, %v1850_v22 }
 0x435   : > { %v2188_v1 = vsub.f32 1.5, %v2187_v3 }
 0x436   : > { %v5510_v45 = vpop.eup %5509  ;;  %v7421_v2 = vadd.f32 1e-05, %v2059_v33  ;;  %v7424_v41 = vsub.f32 %v7322_v36, %v1905_v29  ;;  %v2506_v36 = vadd.f32 %v7317_v28, %v2473_v26 }
 0x437   : > { %v2189_v13 = vmul.f32 %v5508_v53, %v2188_v1  ;;  %v2195_v23 = vmul.f32 %v5510_v45, %v2090_v10  ;;  %vm2201_vm11 = vweird.f32 %v5510_v45 }
 0x438   : > { %5511 = vrsqrt.f32 %v7421_v2  ;;  %v1969_v15 = vmul.f32 %v7424_v41, %v7424_v41  ;;  %v2538_v55 = vpack.c.bf16 %v2506_v36, %v2506_v36  ;;  %vm7442_vm13 = vmor %vm2200_vm12, %vm2201_vm11  ;;  %vm2210_vm15 = vweird.f32 %v7421_v2 }
 0x439   : > { %v2196_v34 = vmul.f32 %v5510_v45, %v2195_v23  ;;  %v2193_v43 = vsel %vm2192_vm10, %v5508_v53, %v2189_v13 }
 0x43a   : > { %2016 = vadd.xlane.f32.xlu0 %v1969_v15  ;;  %v2441_v11 = vmul.f32 %v2193_v43, %v7281_v8  ;;  %v2654_v53 = vunpack.c.l.b16 %v2538_v55  ;;  %v7463_v15 = vadd.f32 %v1796_v63, %v1708_v35 }
 0x43b   : > { %v2197_v12 = vmul.f32 0.5, %v2196_v34  ;;  %v2007_v0 = vpop.xlane.xlu0 %2006  ;;  %v1852_v48 = vpop.xlane.xlu2 %1851 }
 0x43c   : > { %v2060_v17 = vmul.f32 %v2007_v0, %v7176_v20  ;;  %v1906_v18 = vmul.f32 %v7176_v20, %v1852_v48  ;;  %v2474_v44 = vmul.f32 %v7304_v39, %v2441_v11  ;;  %v1711_v0 = vadd.f32 %v1710_v31, %v7111_v4 }
 0x43d   : > { %v2198_v62 = vsub.f32 1.5, %v2197_v12 }
 0x43e   : > { %v5512_v25 = vpop.eup %5511  ;;  %v7435_v50 = vadd.f32 1e-05, %v2060_v17  ;;  %v7438_v47 = vsub.f32 %v7342_v5, %v1906_v18  ;;  %v2507_v8 = vadd.f32 %v7317_v28, %v2474_v44  ;;  %v1801_v44 = vpop.f32.mrf.mxu2  ;;  %v7483_v7 = vadd.f32 %v1799_v14, %v1711_v0 }
 0x43f   : > { %v2199_v49 = vmul.f32 %v5510_v45, %v2198_v62  ;;  %v2205_v32 = vmul.f32 %v5512_v25, %v7421_v2  ;;  %vm2211_vm14 = vweird.f32 %v5512_v25 }
 0x440   : > { %5513 = vrsqrt.f32 %v7435_v50  ;;  %v1970_v57 = vmul.f32 %v7438_v47, %v7438_v47  ;;  %v2539_v40 = vpack.c.bf16 %v2507_v8, %v2507_v8  ;;  %vm2212_vm1 = vmor %vm2210_vm15, %vm2211_vm14  ;;  %vm2220_vm3 = vweird.f32 %v7435_v50 }
 0x441   : > { %v2203_v5 = vsel %vm7442_vm13, %v5510_v45, %v2199_v49  ;;  %v2206_v27 = vmul.f32 %v5512_v25, %v2205_v32 }
 0x442   : > { %2018 = vadd.xlane.f32.xlu0 %v1970_v57  ;;  %v2655_v10 = vunpack.c.l.b16 %v2539_v40  ;;  %v2442_v33 = vmul.f32 %v2203_v5, %v7291_v46  ;;  %v1712_v46 = vpop.f32.mrf.mxu3 }
 0x443   : > { %v2207_v6 = vmul.f32 0.5, %v2206_v27  ;;  %v1854_v56 = vpop.xlane.xlu0 %1853  ;;  %v2009_v16 = vpop.xlane.xlu1 %2008 }
 0x444   : > { %v1907_v3 = vmul.f32 %v7176_v20, %v1854_v56  ;;  %v2061_v38 = vmul.f32 %v2009_v16, %v7176_v20  ;;  %v2683_v22 = vpack.c.b16 %v2655_v10, %v2654_v53  ;;  %v2475_v42 = vmul.f32 %v7304_v39, %v2442_v33 }
 0x445   : > { %v2208_v29 = vsub.f32 1.5, %v2207_v6  ;;  %v1713_v56 = vadd.f32 %v1712_v46, %v7111_v4 }
 0x446   : > { %v5514_v1 = vpop.eup %5513  ;;  %v7455_v45 = vadd.f32 1e-05, %v2061_v38  ;;  %2783 = vmatmul.bf16.gmra.mxu3 %v2683_v22  ;;  %3911 = vmatmul.bf16.gmra.mxu0 %v2683_v22  ;;  %v7458_v26 = vsub.f32 %v7358_v54, %v1907_v3  ;;  %v2508_v2 = vadd.f32 %v7317_v28, %v2475_v42  ;;  %v1804_v22 = vpop.f32.mrf.mxu2 }
 0x447   : > { %v2209_v13 = vmul.f32 %v5512_v25, %v2208_v29  ;;  %v2215_v23 = vmul.f32 %v5514_v1, %v7435_v50  ;;  %vm2221_vm2 = vweird.f32 %v5514_v1  ;;  %v7499_v46 = vadd.f32 %v1801_v44, %v1713_v56 }
 0x448   : > { %5515 = vrsqrt.f32 %v7455_v45  ;;  %v1971_v34 = vmul.f32 %v7458_v26, %v7458_v26  ;;  %v2540_v49 = vpack.c.bf16 %v2508_v2, %v2508_v2  ;;  %vm2222_vm4 = vmor %vm2220_vm3, %vm2221_vm2  ;;  %vm2230_vm6 = vweird.f32 %v7455_v45 }
 0x449   : > { %v2213_v43 = vsel %vm2212_vm1, %v5512_v25, %v2209_v13  ;;  %v2216_v11 = vmul.f32 %v5514_v1, %v2215_v23 }
 0x44a   : > { %2020 = vadd.xlane.f32.xlu1 %v1971_v34  ;;  %1865 = vadd.xlane.f32.xlu0 %v7463_v15  ;;  %v2443_v54 = vmul.f32 %v2213_v43, %v7313_v58  ;;  %v1715_v57 = vpop.f32.mrf.mxu3  ;;  %v2656_v53 = vunpack.c.l.b16 %v2540_v49 }
 0x44b   : > { %v2217_v36 = vmul.f32 0.5, %v2216_v11  ;;  %v1856_v12 = vpop.xlane.xlu0 %1855  ;;  %v2011_v63 = vpop.xlane.xlu1 %2010 }
 0x44c   : > { %v1908_v48 = vmul.f32 %v7176_v20, %v1856_v12  ;;  %v2062_v17 = vmul.f32 %v2011_v63, %v7176_v20  ;;  %v2476_v18 = vmul.f32 %v7304_v39, %v2443_v54  ;;  %v1716_v63 = vadd.f32 %v1715_v57, %v7111_v4 }
 0x44d   : > { %v2218_v62 = vsub.f32 1.5, %v2217_v36 }
 0x44e   : > { %v5516_v25 = vpop.eup %5515  ;;  %v7475_v8 = vadd.f32 1e-05, %v2062_v17  ;;  %v7478_v58 = vsub.f32 %v7375_v24, %v1908_v48  ;;  %v2509_v55 = vadd.f32 %v7317_v28, %v2476_v18 }
 0x44f   : > { %v2219_v32 = vmul.f32 %v5514_v1, %v2218_v62  ;;  %v2225_v31 = vmul.f32 %v5516_v25, %v7455_v45  ;;  %vm2231_vm5 = vweird.f32 %v5516_v25  ;;  %v1806_v62 = vpop.f32.mrf.mxu2 }
 0x450   : > { %5517 = vrsqrt.f32 %v7475_v8  ;;  %v1972_v40 = vmul.f32 %v7478_v58, %v7478_v58  ;;  %v2541_v5 = vpack.c.bf16 %v2509_v55, %v2509_v55  ;;  %vm2232_vm7 = vmor %vm2230_vm6, %vm2231_vm5  ;;  %vm2240_vm9 = vweird.f32 %v7475_v8 }
 0x451   : > { %v2223_v24 = vsel %vm2222_vm4, %v5514_v1, %v2219_v32  ;;  %v2226_v27 = vmul.f32 %v5516_v25, %v2225_v31  ;;  %v7516_v32 = vadd.f32 %v1804_v22, %v1716_v63 }
 0x452   : > { %2022 = vadd.xlane.f32.xlu1 %v1972_v40  ;;  %1867 = vadd.xlane.f32.xlu0 %v7483_v7  ;;  %v2657_v10 = vunpack.c.l.b16 %v2541_v5  ;;  %v2444_v14 = vmul.f32 %v2223_v24, %v7337_v9  ;;  %v1717_v54 = vpop.f32.mrf.mxu3 }
 0x453   : > { %v2227_v50 = vmul.f32 0.5, %v2226_v27  ;;  %v2013_v35 = vpop.xlane.xlu2 %2012  ;;  %v1858_v6 = vpop.xlane.xlu1 %1857 }
 0x454   : > { %v2063_v16 = vmul.f32 %v2013_v35, %v7176_v20  ;;  %v1909_v3 = vmul.f32 %v7176_v20, %v1858_v6  ;;  %v2684_v38 = vpack.c.b16 %v2657_v10, %v2656_v53  ;;  %v2477_v23 = vmul.f32 %v7304_v39, %v2444_v14 }
 0x455   : > { %v2228_v33 = vsub.f32 1.5, %v2227_v50  ;;  %v1718_v10 = vadd.f32 %v1717_v54, %v7111_v4 }
 0x456   : > { %v5518_v29 = vpop.eup %5517  ;;  %v2095_v1 = vadd.f32 1e-05, %v2063_v16  ;;  %2788 = vmatmul.bf16.gmra.mxu3 %v2684_v38  ;;  %3916 = vmatmul.bf16.gmra.mxu0 %v2684_v38  ;;  %v7494_v42 = vsub.f32 %v7387_v19, %v1909_v3  ;;  %v2510_v12 = vadd.f32 %v7317_v28, %v2477_v23 }
 0x457   : > { %v2229_v13 = vmul.f32 %v5516_v25, %v2228_v33  ;;  %v2235_v9 = vmul.f32 %v5518_v29, %v7475_v8  ;;  %vm2241_vm8 = vweird.f32 %v5518_v29  ;;  %v1809_v22 = vpop.f32.mrf.mxu2 }
 0x458   : > { %5519 = vrsqrt.f32 %v2095_v1  ;;  %v1973_v34 = vmul.f32 %v7494_v42, %v7494_v42  ;;  %v2542_v49 = vpack.c.bf16 %v2510_v12, %v2510_v12  ;;  %vm2242_vm10 = vmor %vm2240_vm9, %vm2241_vm8  ;;  %vm2250_vm12 = vweird.f32 %v2095_v1 }
 0x459   : > { %v2233_v43 = vsel %vm2232_vm7, %v5516_v25, %v2229_v13  ;;  %v2236_v11 = vmul.f32 %v5518_v29, %v2235_v9 }
 0x45a   : > { %1869 = vadd.xlane.f32.xlu1 %v7499_v46  ;;  %2024 = vadd.xlane.f32.xlu2 %v1973_v34  ;;  %v2445_v19 = vmul.f32 %v2233_v43, %v7353_v61  ;;  %v2658_v53 = vunpack.c.l.b16 %v2542_v49  ;;  %v1720_v35 = vpop.f32.mrf.mxu3 }
 0x45b   : > { %v2237_v45 = vmul.f32 0.5, %v2236_v11  ;;  %v7505_v2 = vpop.xlane.xlu2 %2014  ;;  %v1860_v36 = vpop.xlane.xlu1 %1859 }
 0x45c   : > { %v1910_v0 = vmul.f32 %v7176_v20, %v1860_v36  ;;  %v2478_v48 = vmul.f32 %v7304_v39, %v2445_v19 }
 0x45d   : > { %v2238_v17 = vsub.f32 1.5, %v2237_v45 }
 0x45e   : > { %v5520_v18 = vpop.eup %5519  ;;  %v7512_v44 = vsub.f32 %v7401_v21, %v1910_v0  ;;  %v2511_v61 = vadd.f32 %v7317_v28, %v2478_v48 }
 0x45f   : > { %v2239_v25 = vmul.f32 %v5518_v29, %v2238_v17  ;;  %v2245_v55 = vmul.f32 %v5520_v18, %v2095_v1  ;;  %vm2251_vm11 = vweird.f32 %v5520_v18  ;;  %v1721_v1 = vadd.f32 %v1720_v35, %v7111_v4  ;;  %v1811_v63 = vpop.f32.mrf.mxu2 }
 0x460   : > { %v1974_v31 = vmul.f32 %v7512_v44, %v7512_v44  ;;  %v2543_v5 = vpack.c.bf16 %v2511_v61, %v2511_v61  ;;  %vm2252_vm13 = vmor %vm2250_vm12, %vm2251_vm11 }
 0x461   : > { %v2243_v57 = vsel %vm2242_vm10, %v5518_v29, %v2239_v25  ;;  %v2246_v40 = vmul.f32 %v5520_v18, %v2245_v55  ;;  %v7542_v19 = vadd.f32 %v1809_v22, %v1721_v1  ;;  %v2064_v25 = vmul.f32 %v7505_v2, %v7176_v20 }
 0x462   : > { %1871 = vadd.xlane.f32.xlu1 %v7516_v32  ;;  %2026 = vadd.xlane.f32.xlu2 %v1974_v31  ;;  %v2446_v21 = vmul.f32 %v2243_v57, %v7371_v59  ;;  %v2659_v8 = vunpack.c.l.b16 %v2543_v5  ;;  %v7528_v59 = vadd.f32 %v1806_v62, %v1718_v10  ;;  %v1722_v54 = vpop.f32.mrf.mxu3 }
 0x463   : > { %v2247_v24 = vmul.f32 0.5, %v2246_v40  ;;  %v1862_v27 = vpop.xlane.xlu2 %1861  ;;  %v1723_v0 = vadd.f32 %v1722_v54, %v7111_v4  ;;  %v2096_v55 = vadd.f32 1e-05, %v2064_v25 }
 0x464   : > { %v1911_v50 = vmul.f32 %v7176_v20, %v1862_v27  ;;  %v2685_v14 = vpack.c.b16 %v2659_v8, %v2658_v53  ;;  %v2479_v16 = vmul.f32 %v7304_v39, %v2446_v21 }
 0x465   : > { %v2248_v6 = vsub.f32 1.5, %v2247_v24  ;;  %v7548_v48 = vadd.f32 %v1811_v63, %v1723_v0  ;;  %5521 = vrsqrt.f32 %v2096_v55  ;;  %vm2260_vm15 = vweird.f32 %v2096_v55 }
 0x466   : > { %v7525_v56 = vsub.f32 %v7407_v30, %v1911_v50  ;;  %2793 = vmatmul.bf16.gmra.mxu3 %v2685_v14  ;;  %3921 = vmatmul.bf16.gmra.mxu0 %v2685_v14  ;;  %v2512_v29 = vadd.f32 %v7317_v28, %v2479_v16 }
 0x467   : > { %v2249_v3 = vmul.f32 %v5520_v18, %v2248_v6  ;;  %v1814_v61 = vpop.f32.mrf.mxu2 }
 0x468   : > { %v1975_v38 = vmul.f32 %v7525_v56, %v7525_v56  ;;  %v2544_v11 = vpack.c.bf16 %v2512_v29, %v2512_v29 }
 0x469   : > { %v2253_v33 = vsel %vm2252_vm13, %v5520_v18, %v2249_v3 }
 0x46a   : > { %2028 = vadd.xlane.f32.xlu0 %v1975_v38  ;;  %1873 = vadd.xlane.f32.xlu2 %v7528_v59  ;;  %v2447_v30 = vmul.f32 %v2253_v33, %v7384_v51  ;;  %v2660_v36 = vunpack.c.l.b16 %v2544_v11  ;;  %v1725_v17 = vpop.f32.mrf.mxu3 }
 0x46b   : > { %v1864_v13 = vpop.xlane.xlu2 %1863  ;;  %v1726_v18 = vadd.f32 %v1725_v17, %v7111_v4  ;;  %v5522_v49 = vpop.eup %5521 }
 0x46c   : > { %v1912_v9 = vmul.f32 %v7176_v20, %v1864_v13  ;;  %v2480_v23 = vmul.f32 %v7304_v39, %v2447_v30  ;;  %v2255_v31 = vmul.f32 %v5522_v49, %v2096_v55  ;;  %vm2261_vm14 = vweird.f32 %v5522_v49 }
 0x46d   : > { %v7552_v62 = vadd.f32 %v1814_v61, %v1726_v18  ;;  %vm2262_vm1 = vmor %vm2260_vm15, %vm2261_vm14 }
 0x46e   : > { %v7539_v34 = vsub.f32 %v7411_v37, %v1912_v9  ;;  %v2513_v43 = vadd.f32 %v7317_v28, %v2480_v23  ;;  %v2256_v57 = vmul.f32 %v5522_v49, %v2255_v31 }
 0x470   : > { %v1976_v51 = vmul.f32 %v7539_v34, %v7539_v34  ;;  %v2545_v45 = vpack.c.bf16 %v2513_v43, %v2513_v43  ;;  %v2257_v5 = vmul.f32 0.5, %v2256_v57 }
 0x472   : > { %2030 = vadd.xlane.f32.xlu0 %v1976_v51  ;;  %1875 = vadd.xlane.f32.xlu2 %v7542_v19  ;;  %v2661_v12 = vunpack.c.l.b16 %v2545_v45  ;;  %v2258_v27 = vsub.f32 1.5, %v2257_v5 }
 0x474   : > { %v2686_v37 = vpack.c.b16 %v2661_v12, %v2660_v36  ;;  %v2259_v8 = vmul.f32 %v5522_v49, %v2258_v27 }
 0x476   : > { %2798 = vmatmul.bf16.gmra.mxu3 %v2686_v37  ;;  %3926 = vmatmul.bf16.gmra.mxu0 %v2686_v37  ;;  %v2263_v6 = vsel %vm2262_vm1, %v5522_v49, %v2259_v8 }
 0x477   : > { %v2448_v22 = vmul.f32 %v2263_v6, %v7398_v52 }
 0x479   : > { %v2481_v11 = vmul.f32 %v7304_v39, %v2448_v22 }
 0x47a   : > { %1877 = vadd.xlane.f32.xlu0 %v7548_v48 }
 0x482   : > { %1879 = vadd.xlane.f32.xlu0 %v7552_v62 }
 0x4ad   : > { %v2017_v40 = vpop.xlane.xlu0 %2016 }
 0x4ae   : > { %v2065_v21 = vmul.f32 %v2017_v40, %v7176_v20 }
 0x4b0   : > { %v2097_v24 = vadd.f32 1e-05, %v2065_v21  ;;  %v1727_v21 = vpop.f32.mrf.mxu3 }
 0x4b2   : > { %5523 = vrsqrt.f32 %v2097_v24  ;;  %vm2270_vm3 = vweird.f32 %v2097_v24 }
 0x4b5   : > { %v2019_v53 = vpop.xlane.xlu0 %2018 }
 0x4b6   : > { %v2066_v10 = vmul.f32 %v2019_v53, %v7176_v20 }
 0x4b8   : > { %v5524_v50 = vpop.eup %5523  ;;  %v2098_v2 = vadd.f32 1e-05, %v2066_v10 }
 0x4b9   : > { %v2265_v35 = vmul.f32 %v5524_v50, %v2097_v24  ;;  %vm2271_vm2 = vweird.f32 %v5524_v50 }
 0x4ba   : > { %5525 = vrsqrt.f32 %v2098_v2  ;;  %vm2272_vm4 = vmor %vm2270_vm3, %vm2271_vm2  ;;  %vm2280_vm6 = vweird.f32 %v2098_v2 }
 0x4bb   : > { %v2266_v14 = vmul.f32 %v5524_v50, %v2265_v35  ;;  %v1728_v35 = vadd.f32 %v1727_v21, %v7111_v4 }
 0x4bd   : > { %v2267_v16 = vmul.f32 0.5, %v2266_v14  ;;  %v1866_v3 = vpop.xlane.xlu0 %1865  ;;  %v2021_v38 = vpop.xlane.xlu1 %2020 }
 0x4be   : > { %v1913_v33 = vmul.f32 %v7176_v20, %v1866_v3  ;;  %v2067_v30 = vmul.f32 %v2021_v38, %v7176_v20  ;;  %v1816_v3 = vpop.f32.mrf.mxu2 }
 0x4bf   : > { %v2268_v29 = vsub.f32 1.5, %v2267_v16 }
 0x4c0   : > { %v5526_v13 = vpop.eup %5525  ;;  %v2099_v1 = vadd.f32 1e-05, %v2067_v30  ;;  %v7563_v9 = vsub.f32 %v7463_v15, %v1913_v33  ;;  %v2514_v15 = vadd.f32 %v7317_v28, %v2481_v11 }
 0x4c1   : > { %v2269_v23 = vmul.f32 %v5524_v50, %v2268_v29  ;;  %v2275_v43 = vmul.f32 %v5526_v13, %v2098_v2  ;;  %vm2281_vm5 = vweird.f32 %v5526_v13 }
 0x4c2   : > { %5527 = vrsqrt.f32 %v2099_v1  ;;  %v1977_v52 = vmul.f32 %v7563_v9, %v7563_v9  ;;  %v2546_v57 = vpack.c.bf16 %v2514_v15, %v2514_v15  ;;  %vm7579_vm7 = vmor %vm2280_vm6, %vm2281_vm5  ;;  %vm2290_vm9 = vweird.f32 %v2099_v1 }
 0x4c3   : > { %v2273_v54 = vsel %vm2272_vm4, %v5524_v50, %v2269_v23  ;;  %v2276_v51 = vmul.f32 %v5526_v13, %v2275_v43  ;;  %v7597_v43 = vadd.f32 %v1816_v3, %v1728_v35 }
 0x4c4   : > { %2032 = vadd.xlane.f32.xlu1 %v1977_v52  ;;  %v2449_v45 = vmul.f32 %v2273_v54, %v7424_v41  ;;  %v2662_v50 = vunpack.c.l.b16 %v2546_v57 }
 0x4c5   : > { %v2277_v36 = vmul.f32 0.5, %v2276_v51  ;;  %v1868_v12 = vpop.xlane.xlu0 %1867  ;;  %v2023_v63 = vpop.xlane.xlu1 %2022 }
 0x4c6   : > { %v1914_v0 = vmul.f32 %v7176_v20, %v1868_v12  ;;  %v2068_v37 = vmul.f32 %v2023_v63, %v7176_v20  ;;  %v2482_v17 = vmul.f32 %v7304_v39, %v2449_v45 }
 0x4c7   : > { %v2278_v18 = vsub.f32 1.5, %v2277_v36 }
 0x4c8   : > { %v5528_v61 = vpop.eup %5527  ;;  %v7573_v25 = vadd.f32 1e-05, %v2068_v37  ;;  %v7576_v55 = vsub.f32 %v7483_v7, %v1914_v0  ;;  %v2515_v41 = vadd.f32 %v7317_v28, %v2482_v17 }
 0x4c9   : > { %v2279_v49 = vmul.f32 %v5526_v13, %v2278_v18  ;;  %v2285_v31 = vmul.f32 %v5528_v61, %v2099_v1  ;;  %vm2291_vm8 = vweird.f32 %v5528_v61 }
 0x4ca   : > { %5529 = vrsqrt.f32 %v7573_v25  ;;  %v1978_v5 = vmul.f32 %v7576_v55, %v7576_v55  ;;  %v2547_v27 = vpack.c.bf16 %v2515_v41, %v2515_v41  ;;  %vm2292_vm10 = vmor %vm2290_vm9, %vm2291_vm8  ;;  %vm2300_vm12 = vweird.f32 %v7573_v25 }
 0x4cb   : > { %v2283_v7 = vsel %vm7579_vm7, %v5526_v13, %v2279_v49  ;;  %v2286_v24 = vmul.f32 %v5528_v61, %v2285_v31 }
 0x4cc   : > { %2034 = vadd.xlane.f32.xlu1 %v1978_v5  ;;  %v2663_v2 = vunpack.c.l.b16 %v2547_v27  ;;  %v2450_v16 = vmul.f32 %v2283_v7, %v7438_v47 }
 0x4cd   : > { %v2287_v53 = vmul.f32 0.5, %v2286_v24  ;;  %v2025_v8 = vpop.xlane.xlu2 %2024  ;;  %v1870_v10 = vpop.xlane.xlu1 %1869 }
 0x4ce   : > { %v2069_v6 = vmul.f32 %v2025_v8, %v7176_v20  ;;  %v1915_v14 = vmul.f32 %v7176_v20, %v1870_v10  ;;  %v2687_v22 = vpack.c.b16 %v2663_v2, %v2662_v50  ;;  %v2483_v4 = vmul.f32 %v7304_v39, %v2450_v16 }
 0x4cf   : > { %v2288_v38 = vsub.f32 1.5, %v2287_v53 }
 0x4d0   : > { %v5530_v33 = vpop.eup %5529  ;;  %v2101_v30 = vadd.f32 1e-05, %v2069_v6  ;;  %v7593_v29 = vsub.f32 %v7499_v46, %v1915_v14  ;;  %2803 = vmatmul.bf16.gmra.mxu3 %v2687_v22  ;;  %3931 = vmatmul.bf16.gmra.mxu0 %v2687_v22  ;;  %v2516_v45 = vadd.f32 %v7317_v28, %v2483_v4 }
 0x4d1   : > { %v2289_v13 = vmul.f32 %v5528_v61, %v2288_v38  ;;  %v2295_v23 = vmul.f32 %v5530_v33, %v7573_v25  ;;  %vm2301_vm11 = vweird.f32 %v5530_v33 }
 0x4d2   : > { %5531 = vrsqrt.f32 %v2101_v30  ;;  %v1979_v52 = vmul.f32 %v7593_v29, %v7593_v29  ;;  %v2548_v41 = vpack.c.bf16 %v2516_v45, %v2516_v45  ;;  %vm2302_vm13 = vmor %vm2300_vm12, %vm2301_vm11  ;;  %vm2310_vm15 = vweird.f32 %v2101_v30 }
 0x4d3   : > { %v2293_v47 = vsel %vm2292_vm10, %v5528_v61, %v2289_v13  ;;  %v2296_v11 = vmul.f32 %v5530_v33, %v2295_v23 }
 0x4d4   : > { %1881 = vadd.xlane.f32.xlu1 %v7597_v43  ;;  %v2451_v46 = vmul.f32 %v2293_v47, %v7458_v26  ;;  %2036 = vadd.xlane.f32.xlu2 %v1979_v52  ;;  %v2664_v7 = vunpack.c.l.b16 %v2548_v41 }
 0x4d5   : > { %v2297_v1 = vmul.f32 0.5, %v2296_v11  ;;  %v2027_v54 = vpop.xlane.xlu2 %2026  ;;  %v1872_v51 = vpop.xlane.xlu1 %1871 }
 0x4d6   : > { %v2070_v36 = vmul.f32 %v2027_v54, %v7176_v20  ;;  %v1916_v12 = vmul.f32 %v7176_v20, %v1872_v51  ;;  %v2484_v63 = vmul.f32 %v7304_v39, %v2451_v46 }
 0x4d7   : > { %v2298_v15 = vsub.f32 1.5, %v2297_v1 }
 0x4d8   : > { %v5532_v0 = vpop.eup %5531  ;;  %v2102_v37 = vadd.f32 1e-05, %v2070_v36  ;;  %v7608_v17 = vsub.f32 %v7516_v32, %v1916_v12  ;;  %v2517_v26 = vadd.f32 %v7317_v28, %v2484_v63 }
 0x4d9   : > { %v2299_v18 = vmul.f32 %v5530_v33, %v2298_v15  ;;  %v2305_v61 = vmul.f32 %v5532_v0, %v2101_v30  ;;  %vm2311_vm14 = vweird.f32 %v5532_v0 }
 0x4da   : > { %5533 = vrsqrt.f32 %v2102_v37  ;;  %v1980_v57 = vmul.f32 %v7608_v17, %v7608_v17  ;;  %v2549_v40 = vpack.c.bf16 %v2517_v26, %v2517_v26  ;;  %vm2312_vm1 = vmor %vm2310_vm15, %vm2311_vm14  ;;  %vm2320_vm3 = vweird.f32 %v2102_v37 }
 0x4db   : > { %v2303_v49 = vsel %vm2302_vm13, %v5530_v33, %v2299_v18  ;;  %v2306_v31 = vmul.f32 %v5532_v0, %v2305_v61 }
 0x4dc   : > { %2038 = vadd.xlane.f32.xlu2 %v1980_v57  ;;  %v2665_v24 = vunpack.c.l.b16 %v2549_v40  ;;  %v2452_v27 = vmul.f32 %v2303_v49, %v7478_v58 }
 0x4dd   : > { %v2307_v5 = vmul.f32 0.5, %v2306_v31  ;;  %v2029_v21 = vpop.xlane.xlu0 %2028  ;;  %v1874_v32 = vpop.xlane.xlu2 %1873 }
 0x4de   : > { %v2071_v25 = vmul.f32 %v2029_v21, %v7176_v20  ;;  %v1917_v53 = vmul.f32 %v7176_v20, %v1874_v32  ;;  %v2688_v10 = vpack.c.b16 %v2665_v24, %v2664_v7  ;;  %v2485_v16 = vmul.f32 %v7304_v39, %v2452_v27 }
 0x4df   : > { %v2308_v8 = vsub.f32 1.5, %v2307_v5 }
 0x4e0   : > { %v5534_v50 = vpop.eup %5533  ;;  %v2103_v2 = vadd.f32 1e-05, %v2071_v25  ;;  %v7618_v35 = vsub.f32 %v7528_v59, %v1917_v53  ;;  %2808 = vmatmul.bf16.gmra.mxu3 %v2688_v10  ;;  %3936 = vmatmul.bf16.gmra.mxu0 %v2688_v10  ;;  %v2518_v30 = vadd.f32 %v7317_v28, %v2485_v16 }
 0x4e1   : > { %v2309_v6 = vmul.f32 %v5532_v0, %v2308_v8  ;;  %v2315_v14 = vmul.f32 %v5534_v50, %v2102_v37  ;;  %vm2321_vm2 = vweird.f32 %v5534_v50 }
 0x4e2   : > { %5535 = vrsqrt.f32 %v2103_v2  ;;  %v1981_v38 = vmul.f32 %v7618_v35, %v7618_v35  ;;  %v2550_v54 = vpack.c.bf16 %v2518_v30, %v2518_v30  ;;  %vm2322_vm4 = vmor %vm2320_vm3, %vm2321_vm2  ;;  %vm2330_vm6 = vweird.f32 %v2103_v2 }
 0x4e3   : > { %v2313_v58 = vsel %vm2312_vm1, %v5532_v0, %v2309_v6  ;;  %v2316_v3 = vmul.f32 %v5534_v50, %v2315_v14 }
 0x4e4   : > { %v2453_v22 = vmul.f32 %v2313_v58, %v7494_v42  ;;  %2040 = vadd.xlane.f32.xlu0 %v1981_v38 }
 0x4e5   : > { %v2317_v33 = vmul.f32 0.5, %v2316_v3  ;;  %v2031_v59 = vpop.xlane.xlu0 %2030  ;;  %v1876_v13 = vpop.xlane.xlu2 %1875 }
 0x4e6   : > { %v1918_v23 = vmul.f32 %v7176_v20, %v1876_v13  ;;  %v2486_v4 = vmul.f32 %v7304_v39, %v2453_v22 }
 0x4e7   : > { %v2318_v47 = vsub.f32 1.5, %v2317_v33 }
 0x4e8   : > { %v5536_v11 = vpop.eup %5535  ;;  %v7628_v52 = vsub.f32 %v7542_v19, %v1918_v23  ;;  %v2519_v46 = vadd.f32 %v7317_v28, %v2486_v4  ;;  %v2666_v19 = vunpack.c.l.b16 %v2550_v54 }
 0x4e9   : > { %v2319_v1 = vmul.f32 %v5534_v50, %v2318_v47  ;;  %v2325_v42 = vmul.f32 %v5536_v11, %v2103_v2  ;;  %vm2331_vm5 = vweird.f32 %v5536_v11 }
 0x4ea   : > { %v1982_v51 = vmul.f32 %v7628_v52, %v7628_v52  ;;  %v2551_v12 = vpack.c.bf16 %v2519_v46, %v2519_v46  ;;  %vm2332_vm7 = vmor %vm2330_vm6, %vm2331_vm5 }
 0x4eb   : > { %v2323_v45 = vsel %vm2322_vm4, %v5534_v50, %v2319_v1  ;;  %v2326_v36 = vmul.f32 %v5536_v11, %v2325_v42  ;;  %v2072_v50 = vmul.f32 %v2031_v59, %v7176_v20  ;;  %v7654_v59 = vpop.f32.mrf.mxu3 }
 0x4ec   : > { %v2454_v63 = vmul.f32 %v2323_v45, %v7512_v44  ;;  %2042 = vadd.xlane.f32.xlu1 %v1982_v51  ;;  %v2667_v26 = vunpack.c.l.b16 %v2551_v12  ;;  %9290 = vst [vmem:[#allocation29_spill] sm:$0xff] %v7654_v59 }
 0x4ed   : > { %v2327_v15 = vmul.f32 0.5, %v2326_v36  ;;  %v1878_v0 = vpop.xlane.xlu0 %1877  ;;  %v2104_v2 = vadd.f32 1e-05, %v2072_v50 }
 0x4ee   : > { %v1919_v18 = vmul.f32 %v7176_v20, %v1878_v0  ;;  %v2689_v37 = vpack.c.b16 %v2667_v26, %v2666_v19  ;;  %v2487_v49 = vmul.f32 %v7304_v39, %v2454_v63 }
 0x4ef   : > { %v2328_v61 = vsub.f32 1.5, %v2327_v15  ;;  %5537 = vrsqrt.f32 %v2104_v2  ;;  %vm2340_vm9 = vweird.f32 %v2104_v2 }
 0x4f0   : > { %v7636_v41 = vsub.f32 %v7548_v48, %v1919_v18  ;;  %2813 = vmatmul.bf16.gmra.mxu3 %v2689_v37  ;;  %3941 = vmatmul.bf16.gmra.mxu0 %v2689_v37  ;;  %v2520_v5 = vadd.f32 %v7317_v28, %v2487_v49 }
 0x4f1   : > { %v2329_v31 = vmul.f32 %v5536_v11, %v2328_v61 }
 0x4f2   : > { %v1983_v44 = vmul.f32 %v7636_v41, %v7636_v41  ;;  %v2552_v27 = vpack.c.bf16 %v2520_v5, %v2520_v5 }
 0x4f3   : > { %v2333_v57 = vsel %vm2332_vm7, %v5536_v11, %v2329_v31 }
 0x4f4   : > { %v2455_v40 = vmul.f32 %v2333_v57, %v7525_v56  ;;  %2044 = vadd.xlane.f32.xlu2 %v1983_v44  ;;  %v2668_v56 = vunpack.c.l.b16 %v2552_v27 }
 0x4f5   : > { %v1880_v21 = vpop.xlane.xlu0 %1879  ;;  %v5538_v6 = vpop.eup %5537 }
 0x4f6   : > { %v1920_v48 = vmul.f32 %v7176_v20, %v1880_v21  ;;  %v2488_v32 = vmul.f32 %v7304_v39, %v2455_v40  ;;  %vm2341_vm8 = vweird.f32 %v5538_v6 }
 0x4f7   : > { %vm2342_vm10 = vmor %vm2340_vm9, %vm2341_vm8 }
 0x4f8   : > { %v7646_v7 = vsub.f32 %v7552_v62, %v1920_v48  ;;  %v2521_v24 = vadd.f32 %v7317_v28, %v2488_v32  ;;  %v2335_v62 = vmul.f32 %v5538_v6, %v2104_v2 }
 0x4fa   : > { %v1984_v25 = vmul.f32 %v7646_v7, %v7646_v7  ;;  %v2553_v53 = vpack.c.bf16 %v2521_v24, %v2521_v24  ;;  %v2336_v14 = vmul.f32 %v5538_v6, %v2335_v62 }
 0x4fc   : > { %2046 = vadd.xlane.f32.xlu0 %v1984_v25  ;;  %v2669_v8 = vunpack.c.l.b16 %v2553_v53  ;;  %v2337_v16 = vmul.f32 0.5, %v2336_v14 }
 0x4fe   : > { %v2690_v10 = vpack.c.b16 %v2669_v8, %v2668_v56  ;;  %v2338_v22 = vsub.f32 1.5, %v2337_v16 }
 0x500   : > { %2818 = vmatmul.bf16.gmra.mxu3 %v2690_v10  ;;  %3946 = vmatmul.bf16.gmra.mxu0 %v2690_v10  ;;  %v2339_v33 = vmul.f32 %v5538_v6, %v2338_v22 }
 0x502   : > { %v2343_v47 = vsel %vm2342_vm10, %v5538_v6, %v2339_v33 }
 0x503   : > { %v2456_v1 = vmul.f32 %v2343_v47, %v7539_v34  ;;  %v7663_v34 = vpop.f32.mrf.mxu3 }
 0x505   : > { %v2489_v0 = vmul.f32 %v7304_v39, %v2456_v1 }
 0x50b   : > { %v7672_v8 = vpop.f32.mrf.mxu3 }
 0x50c   : > { %9291 = vst [vmem:[#allocation31_spill] sm:$0xff] %v7672_v8 }
 0x513   : > { %v7681_v1 = vpop.f32.mrf.mxu3 }
 0x537   : > { %v2033_v58 = vpop.xlane.xlu1 %2032 }
 0x538   : > { %v2073_v3 = vmul.f32 %v2033_v58, %v7176_v20 }
 0x53a   : > { %v2105_v38 = vadd.f32 1e-05, %v2073_v3  ;;  %v7676_v3 = vpop.f32.mrf.mxu0 }
 0x53b   : > { %9292 = vst [vmem:[#allocation34_spill] sm:$0xff] %v7676_v3 }
 0x53c   : > { %5539 = vrsqrt.f32 %v2105_v38  ;;  %vm2350_vm12 = vweird.f32 %v2105_v38 }
 0x53f   : > { %v2035_v13 = vpop.xlane.xlu1 %2034 }
 0x540   : > { %v2074_v30 = vmul.f32 %v2035_v13, %v7176_v20 }
 0x542   : > { %v5540_v23 = vpop.eup %5539  ;;  %v2106_v4 = vadd.f32 1e-05, %v2074_v30 }
 0x543   : > { %v2345_v11 = vmul.f32 %v5540_v23, %v2105_v38  ;;  %vm2351_vm11 = vweird.f32 %v5540_v23 }
 0x544   : > { %5541 = vrsqrt.f32 %v2106_v4  ;;  %vm2352_vm13 = vmor %vm2350_vm12, %vm2351_vm11  ;;  %vm2360_vm15 = vweird.f32 %v2106_v4 }
 0x545   : > { %v2346_v46 = vmul.f32 %v5540_v23, %v2345_v11 }
 0x547   : > { %v2347_v42 = vmul.f32 0.5, %v2346_v46  ;;  %v1882_v54 = vpop.xlane.xlu1 %1881  ;;  %v2037_v51 = vpop.xlane.xlu2 %2036 }
 0x548   : > { %v1921_v45 = vmul.f32 %v7176_v20, %v1882_v54  ;;  %v2075_v12 = vmul.f32 %v2037_v51, %v7176_v20 }
 0x549   : > { %v2348_v36 = vsub.f32 1.5, %v2347_v42 }
 0x54a   : > { %v5542_v63 = vpop.eup %5541  ;;  %v7660_v15 = vsub.f32 %v7597_v43, %v1921_v45  ;;  %v2107_v18 = vadd.f32 1e-05, %v2075_v12  ;;  %v2522_v43 = vadd.f32 %v7317_v28, %v2489_v0 }
 0x54b   : > { %v2349_v19 = vmul.f32 %v5540_v23, %v2348_v36  ;;  %v2355_v26 = vmul.f32 %v5542_v63, %v2106_v4  ;;  %vm2361_vm14 = vweird.f32 %v5542_v63 }
 0x54c   : > { %v1985_v61 = vmul.f32 %v7660_v15, %v7660_v15  ;;  %5543 = vrsqrt.f32 %v2107_v18  ;;  %v2554_v32 = vpack.c.bf16 %v2522_v43, %v2522_v43  ;;  %vm2362_vm1 = vmor %vm2360_vm15, %vm2361_vm14  ;;  %vm2370_vm3 = vweird.f32 %v2107_v18 }
 0x54d   : > { %v2353_v37 = vsel %vm2352_vm13, %v5540_v23, %v2349_v19  ;;  %v2356_v49 = vmul.f32 %v5542_v63, %v2355_v26  ;;  %v7686_v19 = vpop.f32.mrf.mxu0 }
 0x54e   : > { %v2457_v31 = vmul.f32 %v2353_v37, %v7563_v9  ;;  %2048 = vadd.xlane.f32.xlu1 %v1985_v61  ;;  %v2670_v50 = vunpack.c.l.b16 %v2554_v32  ;;  %9293 = vst [vmem:[#allocation36_spill] sm:$0xff] %v7686_v19 }
 0x54f   : > { %v2357_v44 = vmul.f32 0.5, %v2356_v49  ;;  %v2039_v57 = vpop.xlane.xlu2 %2038 }
 0x550   : > { %v2490_v40 = vmul.f32 %v7304_v39, %v2457_v31  ;;  %v2076_v21 = vmul.f32 %v2039_v57, %v7176_v20 }
 0x551   : > { %v2358_v5 = vsub.f32 1.5, %v2357_v44 }
 0x552   : > { %v2523_v48 = vadd.f32 %v7317_v28, %v2490_v40  ;;  %v5544_v24 = vpop.eup %5543  ;;  %v2108_v25 = vadd.f32 1e-05, %v2076_v21 }
 0x553   : > { %v2359_v27 = vmul.f32 %v5542_v63, %v2358_v5  ;;  %v2365_v9 = vmul.f32 %v5544_v24, %v2107_v18  ;;  %vm2371_vm2 = vweird.f32 %v5544_v24 }
 0x554   : > { %v2555_v53 = vpack.c.bf16 %v2523_v48, %v2523_v48  ;;  %5545 = vrsqrt.f32 %v2108_v25  ;;  %vm2372_vm4 = vmor %vm2370_vm3, %vm2371_vm2  ;;  %vm2380_vm6 = vweird.f32 %v2108_v25  ;;  %v7690_v48 = vpop.f32.mrf.mxu3 }
 0x555   : > { %v2363_v56 = vsel %vm2362_vm1, %v5542_v63, %v2359_v27  ;;  %v2366_v10 = vmul.f32 %v5544_v24, %v2365_v9  ;;  %9294 = vst [vmem:[#allocation37_spill] sm:$0xff] %v7690_v48 }
 0x556   : > { %v2671_v2 = vunpack.c.l.b16 %v2555_v53  ;;  %v2458_v6 = vmul.f32 %v2363_v56, %v7576_v55  ;;  %v7693_v53 = vpop.f32.mrf.mxu0 }
 0x557   : > { %v2367_v62 = vmul.f32 0.5, %v2366_v10  ;;  %v2041_v14 = vpop.xlane.xlu0 %2040  ;;  %9295 = vst [vmem:[#allocation38_spill] sm:$0xff] %v7693_v53 }
 0x558   : > { %v2691_v16 = vpack.c.b16 %v2671_v2, %v2670_v50  ;;  %v2077_v58 = vmul.f32 %v2041_v14, %v7176_v20  ;;  %v2491_v13 = vmul.f32 %v7304_v39, %v2458_v6 }
 0x559   : > { %v2368_v38 = vsub.f32 1.5, %v2367_v62 }
 0x55a   : > { %2823 = vmatmul.bf16.gmra.mxu3 %v2691_v16  ;;  %3951 = vmatmul.bf16.gmra.mxu0 %v2691_v16  ;;  %v5546_v22 = vpop.eup %5545  ;;  %v2109_v33 = vadd.f32 1e-05, %v2077_v58  ;;  %v2524_v46 = vadd.f32 %v7317_v28, %v2491_v13 }
 0x55b   : > { %v2369_v30 = vmul.f32 %v5544_v24, %v2368_v38  ;;  %v2375_v23 = vmul.f32 %v5546_v22, %v2108_v25  ;;  %vm2381_vm5 = vweird.f32 %v5546_v22 }
 0x55c   : > { %5547 = vrsqrt.f32 %v2109_v33  ;;  %v2556_v0 = vpack.c.bf16 %v2524_v46, %v2524_v46  ;;  %vm2382_vm7 = vmor %vm2380_vm6, %vm2381_vm5  ;;  %vm2390_vm9 = vweird.f32 %v2109_v33  ;;  %v7698_v38 = vpop.f32.mrf.mxu3 }
 0x55d   : > { %v2373_v55 = vsel %vm2372_vm4, %v5544_v24, %v2369_v30  ;;  %v2376_v4 = vmul.f32 %v5546_v22, %v2375_v23 }
 0x55e   : > { %v2459_v47 = vmul.f32 %v2373_v55, %v7593_v29  ;;  %v2672_v31 = vunpack.c.l.b16 %v2556_v0 }
 0x55f   : > { %v2043_v11 = vpop.xlane.xlu1 %2042  ;;  %v2377_v42 = vmul.f32 0.5, %v2376_v4  ;;  %v7702_v4 = vpop.f32.mrf.mxu0 }
 0x560   : > { %v2078_v54 = vmul.f32 %v2043_v11, %v7176_v20  ;;  %v2492_v51 = vmul.f32 %v7304_v39, %v2459_v47  ;;  %9296 = vst [vmem:[#allocation39_spill] sm:$0xff] %v7702_v4 }
 0x561   : > { %v2378_v45 = vsub.f32 1.5, %v2377_v42 }
 0x562   : > { %v2110_v36 = vadd.f32 1e-05, %v2078_v54  ;;  %v5548_v12 = vpop.eup %5547  ;;  %v2525_v63 = vadd.f32 %v7317_v28, %v2492_v51 }
 0x563   : > { %v2379_v29 = vmul.f32 %v5546_v22, %v2378_v45  ;;  %v2385_v26 = vmul.f32 %v5548_v12, %v2109_v33  ;;  %vm2391_vm8 = vweird.f32 %v5548_v12 }
 0x564   : > { %5549 = vrsqrt.f32 %v2110_v36  ;;  %v2557_v18 = vpack.c.bf16 %v2525_v63, %v2525_v63  ;;  %vm2392_vm10 = vmor %vm2390_vm9, %vm2391_vm8  ;;  %vm2400_vm12 = vweird.f32 %v2110_v36  ;;  %v7705_v45 = vpop.f32.mrf.mxu3 }
 0x565   : > { %v2383_v61 = vsel %vm2382_vm7, %v5546_v22, %v2379_v29  ;;  %v2386_v37 = vmul.f32 %v5548_v12, %v2385_v26  ;;  %9297 = vst [vmem:[#allocation40_spill] sm:$0xff] %v7705_v45 }
 0x566   : > { %v2673_v43 = vunpack.c.l.b16 %v2557_v18  ;;  %v2460_v44 = vmul.f32 %v2383_v61, %v7608_v17 }
 0x567   : > { %v2045_v49 = vpop.xlane.xlu2 %2044  ;;  %v2387_v57 = vmul.f32 0.5, %v2386_v37  ;;  %v7710_v0 = vpop.f32.mrf.mxu0 }
 0x568   : > { %v2079_v40 = vmul.f32 %v2045_v49, %v7176_v20  ;;  %v2692_v5 = vpack.c.b16 %v2673_v43, %v2672_v31  ;;  %v2493_v9 = vmul.f32 %v7304_v39, %v2460_v44  ;;  %9298 = vst [vmem:[#allocation28_spill] sm:$0xff] %v7710_v0 }
 0x569   : > { %v2388_v32 = vsub.f32 1.5, %v2387_v57 }
 0x56a   : > { %v5550_v21 = vpop.eup %5549  ;;  %v2111_v24 = vadd.f32 1e-05, %v2079_v40  ;;  %2828 = vmatmul.bf16.gmra.mxu3 %v2692_v5  ;;  %3956 = vmatmul.bf16.gmra.mxu0 %v2692_v5  ;;  %v2526_v2 = vadd.f32 %v7317_v28, %v2493_v9 }
 0x56b   : > { %v2395_v27 = vmul.f32 %v5550_v21, %v2110_v36  ;;  %v2389_v25 = vmul.f32 %v5548_v12, %v2388_v32  ;;  %vm2401_vm11 = vweird.f32 %v5550_v21 }
 0x56c   : > { %5551 = vrsqrt.f32 %v2111_v24  ;;  %vm2402_vm13 = vmor %vm2400_vm12, %vm2401_vm11  ;;  %v2558_v33 = vpack.c.bf16 %v2526_v2, %v2526_v2  ;;  %vm2410_vm15 = vweird.f32 %v2111_v24  ;;  %v7713_v61 = vpop.f32.mrf.mxu3 }
 0x56d   : > { %v2396_v17 = vmul.f32 %v5550_v21, %v2395_v27  ;;  %v2393_v56 = vsel %vm2392_vm10, %v5548_v12, %v2389_v25 }
 0x56e   : > { %v2461_v10 = vmul.f32 %v2393_v56, %v7618_v35  ;;  %v2674_v47 = vunpack.c.l.b16 %v2558_v33 }
 0x56f   : > { %v2397_v50 = vmul.f32 0.5, %v2396_v17  ;;  %v7715_v43 = vpop.f32.mrf.mxu0  ;;  %v2047_v40 = vpop.xlane.xlu0 %2046 }
 0x570   : > { %v2494_v62 = vmul.f32 %v7304_v39, %v2461_v10  ;;  %9299 = vst [vmem:[#allocation30_spill] sm:$0xff] %v7715_v43  ;;  %v2080_v5 = vmul.f32 %v2047_v40, %v7176_v20 }
 0x571   : > { %v2398_v6 = vsub.f32 1.5, %v2397_v50 }
 0x572   : > { %v5552_v14 = vpop.eup %5551  ;;  %v2527_v22 = vadd.f32 %v7317_v28, %v2494_v62 }
 0x573   : > { %v2399_v16 = vmul.f32 %v5550_v21, %v2398_v6  ;;  %v2405_v58 = vmul.f32 %v5552_v14, %v2111_v24  ;;  %vm2411_vm14 = vweird.f32 %v5552_v14 }
 0x574   : > { %v2559_v23 = vpack.c.bf16 %v2527_v22, %v2527_v22  ;;  %vm2412_vm1 = vmor %vm2410_vm15, %vm2411_vm14 }
 0x575   : > { %v2403_v13 = vsel %vm2402_vm13, %v5550_v21, %v2399_v16  ;;  %v2406_v30 = vmul.f32 %v5552_v14, %v2405_v58  ;;  %v2112_v21 = vadd.f32 1e-05, %v2080_v5 }
 0x576   : > { %v2462_v35 = vmul.f32 %v2403_v13, %v7628_v52  ;;  %v2675_v11 = vunpack.c.l.b16 %v2559_v23 }
 0x577   : > { %v2407_v55 = vmul.f32 0.5, %v2406_v30  ;;  %5553 = vrsqrt.f32 %v2112_v21  ;;  %vm2420_vm3 = vweird.f32 %v2112_v21 }
 0x578   : > { %v2693_v42 = vpack.c.b16 %v2675_v11, %v2674_v47  ;;  %v2495_v54 = vmul.f32 %v7304_v39, %v2462_v35 }
 0x579   : > { %v2408_v46 = vsub.f32 1.5, %v2407_v55 }
 0x57a   : > { %2833 = vmatmul.bf16.gmra.mxu3 %v2693_v42  ;;  %3961 = vmatmul.bf16.gmra.mxu0 %v2693_v42  ;;  %v2528_v12 = vadd.f32 %v7317_v28, %v2495_v54  ;;  %v7739_v54 = vpop.f32.mrf.mxu0 }
 0x57b   : > { %v2409_v51 = vmul.f32 %v5552_v14, %v2408_v46  ;;  %9303 = vst [vmem:[#allocation13_spill] sm:$0xff] %v7739_v54 }
 0x57c   : > { %v2560_v26 = vpack.c.bf16 %v2528_v12, %v2528_v12 }
 0x57d   : > { %v2413_v36 = vsel %vm2412_vm1, %v5552_v14, %v2409_v51  ;;  %v5554_v24 = vpop.eup %5553 }
 0x57e   : > { %v2463_v52 = vmul.f32 %v2413_v36, %v7636_v41  ;;  %v2676_v37 = vunpack.c.l.b16 %v2560_v26  ;;  %v7717_v41 = vpop.f32.mrf.mxu3  ;;  %v2415_v25 = vmul.f32 %v5554_v24, %v2112_v21  ;;  %vm2421_vm2 = vweird.f32 %v5554_v24 }
 0x57f   : > { %9300 = vst [vmem:[#allocation32_spill] sm:$0xff] %v7717_v41  ;;  %vm2422_vm4 = vmor %vm2420_vm3, %vm2421_vm2 }
 0x580   : > { %v2496_v63 = vmul.f32 %v7304_v39, %v2463_v52  ;;  %v2416_v9 = vmul.f32 %v5554_v24, %v2415_v25  ;;  %v2879_v25 = vmax.f32 %v7654_v59, %v7663_v34 }
 0x582   : > { %v2529_v29 = vadd.f32 %v7317_v28, %v2496_v63  ;;  %v2417_v17 = vmul.f32 0.5, %v2416_v9  ;;  %v2886_v9 = vmax.f32 %v7672_v8, %v7681_v1 }
 0x584   : > { %v2561_v18 = vpack.c.bf16 %v2529_v29, %v2529_v29  ;;  %v2418_v6 = vsub.f32 1.5, %v2417_v17  ;;  %v2893_v17 = vmax.f32 %v7690_v48, %v7698_v38 }
 0x586   : > { %v2677_v49 = vunpack.c.l.b16 %v2561_v18  ;;  %v7719_v44 = vpop.f32.mrf.mxu3  ;;  %v2419_v62 = vmul.f32 %v5554_v24, %v2418_v6  ;;  %v7745_v18 = vpop.f32.mrf.mxu0 }
 0x587   : > { %9304 = vst [vmem:[#allocation14_spill] sm:$0xff] %v7745_v18 }
 0x588   : > { %v2694_v31 = vpack.c.b16 %v2677_v49, %v2676_v37  ;;  %v2423_v58 = vsel %vm2422_vm4, %v5554_v24, %v2419_v62 }
 0x589   : > { %v2464_v13 = vmul.f32 %v2423_v58, %v7646_v7 }
 0x58a   : > { %2838 = vmatmul.bf16.gmra.mxu3 %v2694_v31  ;;  %3966 = vmatmul.bf16.gmra.mxu0 %v2694_v31 }
 0x58b   : > { %v2497_v55 = vmul.f32 %v7304_v39, %v2464_v13 }
 0x58d   : > { %v2530_v42 = vadd.f32 %v7317_v28, %v2497_v55 }
 0x58e   : > { %v7721_v57 = vpop.f32.mrf.mxu3 }
 0x58f   : > { %9301 = vst [vmem:[#allocation35_spill] sm:$0xff] %v7721_v57  ;;  %v2562_v36 = vpack.c.bf16 %v2530_v42, %v2530_v42 }
 0x591   : > { %v2678_v63 = vunpack.c.l.b16 %v2562_v36 }
 0x596   : > { %v7724_v32 = vpop.f32.mrf.mxu3 }
 0x59e   : > { %v7726_v27 = vpop.f32.mrf.mxu3 }
 0x59f   : > { %9302 = vst [vmem:[#allocation12_spill] sm:$0xff] %v7726_v27 }
 0x5a6   : > { %v7728_v10 = vpop.f32.mrf.mxu3 }
 0x5ae   : > { %v7731_v14 = vpop.f32.mrf.mxu3 }
 0x5b6   : > { %v7734_v23 = vpop.f32.mrf.mxu3 }
 0x5be   : > { %v7743_v52 = vpop.f32.mrf.mxu3 }
 0x5c1   : > { %v2049_v56 = vpop.xlane.xlu1 %2048 }
 0x5c2   : > { %v2081_v50 = vmul.f32 %v2049_v56, %v7176_v20  ;;  %v2880_v56 = vrot.slane %v2879_v25, 4 }
 0x5c4   : > { %v2113_v2 = vadd.f32 1e-05, %v2081_v50  ;;  %v2887_v50 = vrot.slane %v2886_v9, 4  ;;  %v2881_v62 = vmax.f32 %v2879_v25, %v2880_v56 }
 0x5c6   : > { %5555 = vrsqrt.f32 %v2113_v2  ;;  %vm2430_vm6 = vweird.f32 %v2113_v2 }
 0x5cc   : > { %v5556_v16 = vpop.eup %5555 }
 0x5cd   : > { %v2425_v22 = vmul.f32 %v5556_v16, %v2113_v2  ;;  %vm2431_vm5 = vweird.f32 %v5556_v16  ;;  %v2894_v2 = vrot.slane %v2893_v17, 4 }
 0x5ce   : > { %vm2432_vm7 = vmor %vm2430_vm6, %vm2431_vm5 }
 0x5cf   : > { %v2426_v33 = vmul.f32 %v5556_v16, %v2425_v22  ;;  %v2895_v58 = vmax.f32 %v2893_v17, %v2894_v2  ;;  %v2882_v22 = vrot.slane %v2881_v62, 2  ;;  %v2921_v17 = vmax.f32 %v7726_v27, %v7728_v10 }
 0x5d1   : > { %v2427_v30 = vmul.f32 0.5, %v2426_v33  ;;  %v2896_v13 = vrot.slane %v2895_v58, 2 }
 0x5d3   : > { %v2428_v35 = vsub.f32 1.5, %v2427_v30  ;;  %v2883_v30 = vmax.f32 %v2881_v62, %v2882_v22 }
 0x5d5   : > { %v2429_v47 = vmul.f32 %v5556_v16, %v2428_v35  ;;  %v2864_v35 = vmax.f32 %v7663_v34, %v7681_v1 }
 0x5d7   : > { %v2433_v11 = vsel %vm2432_vm7, %v5556_v16, %v2429_v47  ;;  %v2888_v16 = vmax.f32 %v2886_v9, %v2887_v50  ;;  %v2900_v47 = vmax.f32 %v7705_v45, %v7713_v61  ;;  %v2866_v42 = vmax.f32 %v2864_v35, %v7698_v38 }
 0x5d8   : > { %v2465_v46 = vmul.f32 %v2433_v11, %v7660_v15  ;;  %v7747_v15 = vpop.f32.mrf.mxu3  ;;  %v2928_v35 = vmax.f32 %v7731_v14, %v7734_v23 }
 0x5d9   : > { %9305 = vst [vmem:[#allocation15_spill] sm:$0xff] %v7747_v15  ;;  %v2889_v33 = vrot.slane %v2888_v16, 2 }
 0x5da   : > { %v2498_v51 = vmul.f32 %v7304_v39, %v2465_v46  ;;  %v2897_v46 = vmax.f32 %v2895_v58, %v2896_v13  ;;  %v2929_v18 = vrot.slane %v2928_v35, 4 }
 0x5db   : > { %v2890_v55 = vmax.f32 %v2888_v16, %v2889_v33 }
 0x5dc   : > { %v2531_v7 = vadd.f32 %v7317_v28, %v2498_v51  ;;  %v2884_v51 = vrot.slane %v2883_v30, 1  ;;  %v2898_v25 = vrot.slane %v2897_v46, 1 }
 0x5dd   : > { %v2891_v36 = vrot.slane %v2890_v55, 1 }
 0x5de   : > { %v2563_v12 = vpack.c.bf16 %v2531_v7, %v2531_v7  ;;  %v2907_v7 = vmax.f32 %v7717_v41, %v7719_v44  ;;  %v7792_v56 = vmax.f32 %v2883_v30, %v2884_v51  ;;  %v7798_v33 = vmax.f32 %v2897_v46, %v2898_v25 }
 0x5df   : > { %v7795_v62 = vmax.f32 %v2890_v55, %v2891_v36  ;;  %v2935_v30 = vmax.f32 %v7743_v52, %v7747_v15  ;;  %v2922_v51 = vrot.slane %v2921_v17, 4 }
 0x5e0   : > { %v2679_v29 = vunpack.c.l.b16 %v2563_v12  ;;  %v7749_v37 = vpop.f32.mrf.mxu3  ;;  %v2865_v12 = vmax.f32 %v2866_v42, %v7713_v61  ;;  %v2908_v2 = vrot.slane %v2907_v7, 4 }
 0x5e1   : > { %v2936_v54 = vrot.slane %v2935_v30, 4 }
 0x5e2   : > { %v2695_v26 = vpack.c.b16 %v2679_v29, %v2678_v63  ;;  %v2901_v63 = vrot.slane %v2900_v47, 4  ;;  %v2914_v29 = vmax.f32 %v7721_v57, %v7724_v32  ;;  %v2867_v9 = vmax.f32 %v2865_v12, %v7719_v44 }
 0x5e3   : > { %v2909_v12 = vmax.f32 %v2907_v7, %v2908_v2  ;;  %v2923_v2 = vmax.f32 %v2921_v17, %v2922_v51 }
 0x5e4   : > { %2843 = vmatmul.bf16.gmra.mxu3 %v2695_v26  ;;  %3971 = vmatmul.bf16.gmra.mxu0 %v2695_v26  ;;  %v2849_v26 = vmax.f32 %v7654_v59, %v7672_v8  ;;  %v2902_v16 = vmax.f32 %v2900_v47, %v2901_v63  ;;  %v2868_v58 = vmax.f32 %v7724_v32, %v2867_v9  ;;  %v2915_v22 = vrot.slane %v2914_v29, 4 }
 0x5e5   : > { %v2910_v4 = vrot.slane %v2909_v12, 2  ;;  %v2924_v17 = vrot.slane %v2923_v2, 2 }
 0x5e6   : > { %v2850_v50 = vmax.f32 %v7690_v48, %v2849_v26  ;;  %v2869_v42 = vmax.f32 %v7728_v10, %v2868_v58  ;;  %v2903_v25 = vrot.slane %v2902_v16, 2  ;;  %v2916_v9 = vmax.f32 %v2914_v29, %v2915_v22 }
 0x5e7   : > { %v2911_v59 = vmax.f32 %v2909_v12, %v2910_v4 }
 0x5e8   : > { %v7751_v49 = vpop.f32.mrf.mxu3  ;;  %v2851_v13 = vmax.f32 %v7705_v45, %v2850_v50  ;;  %v2870_v50 = vmax.f32 %v7734_v23, %v2869_v42  ;;  %v2904_v53 = vmax.f32 %v2902_v16, %v2903_v25  ;;  %v2917_v19 = vrot.slane %v2916_v9, 2 }
 0x5e9   : > { %9306 = vst [vmem:[#allocation16_spill] sm:$0xff] %v7751_v49  ;;  %v2942_v55 = vmax.f32 %v7749_v37, %v7751_v49  ;;  %v2937_v45 = vmax.f32 %v2935_v30, %v2936_v54  ;;  %v2925_v30 = vmax.f32 %v2923_v2, %v2924_v17 }
 0x5ea   : > { %v2852_v46 = vmax.f32 %v7717_v41, %v2851_v13  ;;  %v2871_v13 = vmax.f32 %v7747_v15, %v2870_v50  ;;  %v2930_v41 = vmax.f32 %v2928_v35, %v2929_v18  ;;  %v2905_v25 = vrot.slane %v2904_v53, 1 }
 0x5eb   : > { %v2943_v43 = vrot.slane %v2942_v55, 4  ;;  %v2938_v54 = vrot.slane %v2937_v45, 2  ;;  %v2926_v2 = vrot.slane %v2925_v30, 1 }
 0x5ec   : > { %v2853_v20 = vmax.f32 %v7721_v57, %v2852_v46  ;;  %v2872_v3 = vmax.f32 %v7751_v49, %v2871_v13  ;;  %v2918_v13 = vmax.f32 %v2916_v9, %v2917_v19  ;;  %v2931_v18 = vrot.slane %v2930_v41, 2 }
 0x5ed   : > { %v2944_v51 = vmax.f32 %v2942_v55, %v2943_v43 }
 0x5ee   : > { %v2854_v29 = vmax.f32 %v7726_v27, %v2853_v20  ;;  %v2919_v19 = vrot.slane %v2918_v13, 1 }
 0x5f0   : > { %v7753_v39 = vpop.f32.mrf.mxu3  ;;  %v2855_v57 = vmax.f32 %v7731_v14, %v2854_v29 }
 0x5f2   : > { %v2856_v20 = vmax.f32 %v7743_v52, %v2855_v57  ;;  %v2912_v57 = vrot.slane %v2911_v59, 1 }
 0x5f4   : > { %v2857_v35 = vmax.f32 %v7749_v37, %v2856_v20  ;;  %v2913_v17 = vmax.f32 %v2911_v59, %v2912_v57  ;;  %v2927_v59 = vmax.f32 %v2925_v30, %v2926_v2 }
 0x5f6   : > { %v2858_v55 = vmax.f32 %v7753_v39, %v2857_v35  ;;  %v2920_v35 = vmax.f32 %v2918_v13, %v2919_v19 }
 0x5f8   : > { %v7755_v28 = vpop.f32.mrf.mxu3 }
 0x5f9   : > { %v2949_v47 = vmax.f32 %v7753_v39, %v7755_v28  ;;  %v2873_v50 = vmax.f32 %v7755_v28, %v2872_v3  ;;  %v2945_v3 = vrot.slane %v2944_v51, 2 }
 0x5fb   : > { %v2950_v0 = vrot.slane %v2949_v47, 4 }
 0x5fd   : > { %v2951_v8 = vmax.f32 %v2949_v47, %v2950_v0 }
 0x5ff   : > { %v2952_v0 = vrot.slane %v2951_v8, 2 }
 0x600   : > { %v7757_v31 = vpop.f32.mrf.mxu3 }
 0x608   : > { %v7759_v40 = vpop.f32.mrf.mxu3 }
 0x609   : > { %v2956_v63 = vmax.f32 %v7757_v31, %v7759_v40  ;;  %v2874_v49 = vmax.f32 %v7759_v40, %v2873_v50 }
 0x60b   : > { %v2957_v22 = vrot.slane %v2956_v63, 4 }
 0x60d   : > { %v2958_v27 = vmax.f32 %v2956_v63, %v2957_v22  ;;  %v7835_v63 = vmax.f32 %v2904_v53, %v2905_v25  ;;  %v2939_v22 = vmax.f32 %v2937_v45, %v2938_v54 }
 0x60f   : > { %v2959_v47 = vrot.slane %v2958_v27, 2 }
 0x610   : > { %v7761_v5 = vpop.f32.mrf.mxu3 }
 0x611   : > { %v2960_v50 = vmax.f32 %v2958_v27, %v2959_v47 }
 0x618   : > { %v7763_v21 = vpop.f32.mrf.mxu3 }
 0x619   : > { %v2963_v26 = vmax.f32 %v7761_v5, %v7763_v21  ;;  %v2875_v4 = vmax.f32 %v7763_v21, %v2874_v49 }
 0x61b   : > { %v2964_v42 = vrot.slane %v2963_v26, 4 }
 0x61d   : > { %v2965_v15 = vmax.f32 %v2963_v26, %v2964_v42  ;;  %v2946_v42 = vmax.f32 %v2944_v51, %v2945_v3  ;;  %v2940_v51 = vrot.slane %v2939_v22, 1 }
 0x61f   : > { %v2966_v12 = vrot.slane %v2965_v15, 2  ;;  %v2947_v27 = vrot.slane %v2946_v42, 1  ;;  %v2941_v19 = vmax.f32 %v2939_v22, %v2940_v51 }
 0x620   : > { %v7765_v24 = vpop.f32.mrf.mxu3 }
 0x621   : > { %v2967_v53 = vmax.f32 %v2965_v15, %v2966_v12  ;;  %v2961_v15 = vrot.slane %v2960_v50, 1 }
 0x623   : > { %v2968_v57 = vrot.slane %v2967_v53, 1 }
 0x625   : > { %v7874_v22 = vmax.f32 %v2967_v53, %v2968_v57 }
 0x628   : > { %v7773_v6 = vpop.f32.mrf.mxu3 }
 0x629   : > { %v2970_v58 = vmax.f32 %v7765_v24, %v7773_v6  ;;  %v2876_v26 = vmax.f32 %v7773_v6, %v2875_v4 }
 0x62b   : > { %v2971_v46 = vrot.slane %v2970_v58, 4 }
 0x62d   : > { %v2972_v29 = vmax.f32 %v2970_v58, %v2971_v46  ;;  %v2932_v58 = vmax.f32 %v2930_v41, %v2931_v18  ;;  %v2953_v46 = vmax.f32 %v2951_v8, %v2952_v0 }
 0x62f   : > { %v2973_v9 = vrot.slane %v2972_v29, 2  ;;  %v2933_v18 = vrot.slane %v2932_v58, 1  ;;  %v2954_v3 = vrot.slane %v2953_v46, 1 }
 0x630   : > { %v7779_v11 = vpop.f32.mrf.mxu3 }
 0x631   : > { %v2974_v4 = vmax.f32 %v2972_v29, %v2973_v9  ;;  %v2934_v12 = vmax.f32 %v2932_v58, %v2933_v18 }
 0x638   : > { %v7810_v36 = vpop.f32.mrf.mxu3 }
 0x639   : > { %v2977_v7 = vmax.f32 %v7779_v11, %v7810_v36  ;;  %v2877_v49 = vmax.f32 %v7810_v36, %v2876_v26 }
 0x63b   : > { %v2978_v48 = vrot.slane %v2977_v7, 4 }
 0x63d   : > { %v2979_v43 = vmax.f32 %v2977_v7, %v2978_v48  ;;  %v2859_v48 = vmax.f32 %v7757_v31, %v2858_v55  ;;  %v2975_v55 = vrot.slane %v2974_v4, 1 }
 0x63f   : > { %v2980_v7 = vrot.slane %v2979_v43, 2  ;;  %v2860_v20 = vmax.f32 %v7761_v5, %v2859_v48  ;;  %v2948_v48 = vmax.f32 %v2946_v42, %v2947_v27  ;;  %v7876_v18 = vmax.f32 %v2974_v4, %v2975_v55 }
 0x641   : > { %v2861_v8 = vmax.f32 %v7765_v24, %v2860_v20  ;;  %v2981_v54 = vmax.f32 %v2979_v43, %v2980_v7  ;;  %v2955_v20 = vmax.f32 %v2953_v46, %v2954_v3 }
 0x643   : > { %v2862_v13 = vmax.f32 %v7779_v11, %v2861_v8  ;;  %v2982_v26 = vrot.slane %v2981_v54, 1 }
 0x645   : > { %v7881_v27 = vmax.f32 %v2981_v54, %v2982_v26 }
 0x667   : > { %v7829_v16 = vpop.f32.mrf.mxu3 }
 0x668   : > { %v7863_v9 = vmax.f32 %v7829_v16, %v2862_v13 }
 0x66a   : > { %v7930_v13 = vsel %vm253_vm0, %v7863_v9, %v2920_v35 }
 0x66f   : > { %v7841_v25 = vpop.f32.mrf.mxu3 }
 0x670   : > { %v7844_v41 = vmax.f32 %v7841_v25, %v2877_v49  ;;  %v2984_v45 = vmax.f32 %v7829_v16, %v7841_v25 }
 0x672   : > { %v2985_v0 = vrot.slane %v2984_v45, 4  ;;  %v2992_v29 = vsel %vm253_vm0, %v7844_v41, %v7792_v56  ;;  %v2994_v43 = vsel %vm253_vm0, %v7844_v41, %v7795_v62  ;;  %v2996_v30 = vsel %vm253_vm0, %v7844_v41, %v7798_v33 }
 0x673   : > { %v2998_v2 = vsel %vm253_vm0, %v7844_v41, %v7835_v63  ;;  %v3024_v49 = vsub.f32 %v7663_v34, %v2992_v29  ;;  %v3026_v8 = vsub.f32 %v7681_v1, %v2994_v43  ;;  %v3028_v58 = vsub.f32 %v7698_v38, %v2996_v30 }
 0x674   : > { %v2986_v47 = vmax.f32 %v2984_v45, %v2985_v0  ;;  %v7870_v45 = vmax.f32 %v2960_v50, %v2961_v15  ;;  %v3000_v51 = vsel %vm253_vm0, %v7844_v41, %v2913_v17  ;;  %v3030_v34 = vsub.f32 %v7713_v61, %v2998_v2 }
 0x675   : > { %v7888_v1 = vsel %vm253_vm0, %v7863_v9, %v7792_v56  ;;  %v7894_v38 = vsel %vm253_vm0, %v7863_v9, %v7795_v62  ;;  %v3002_v50 = vsel %vm253_vm0, %v7844_v41, %v2920_v35  ;;  %v3057_v53 = vmul.f32 1.442695, %v3024_v49 }
 0x676   : > { %v2987_v7 = vrot.slane %v2986_v47, 2  ;;  %v7903_v61 = vsel %vm253_vm0, %v7863_v9, %v7798_v33  ;;  %v3032_v56 = vsub.f32 %v7719_v44, %v3000_v51  ;;  %v3061_v4 = vmul.f32 1.442695, %v3026_v8 }
 0x677   : > { %v3065_v54 = vmul.f32 1.442695, %v3028_v58  ;;  %v7910_v62 = vsel %vm253_vm0, %v7863_v9, %v7835_v63  ;;  %v3004_v0 = vsel %vm253_vm0, %v7844_v41, %v2927_v59  ;;  %5557 = vpow2.f32 %v3057_v53 }
 0x678   : > { %v2988_v42 = vmax.f32 %v2986_v47, %v2987_v7  ;;  %v7918_v33 = vsel %vm253_vm0, %v7863_v9, %v2913_v17  ;;  %v3006_v44 = vsel %vm253_vm0, %v7844_v41, %v2934_v12  ;;  %v3034_v15 = vsub.f32 %v7724_v32, %v3002_v50 }
 0x679   : > { %5559 = vpow2.f32 %v3061_v4  ;;  %v3069_v63 = vmul.f32 1.442695, %v3030_v34  ;;  %v3008_v57 = vsel %vm253_vm0, %v7844_v41, %v2941_v19  ;;  %v7935_v17 = vsel %vm253_vm0, %v7863_v9, %v2927_v59 }
 0x67a   : > { %v2989_v46 = vrot.slane %v2988_v42, 1  ;;  %v7940_v32 = vsel %vm253_vm0, %v7863_v9, %v2934_v12  ;;  %v3010_v29 = vsel %vm253_vm0, %v7844_v41, %v2948_v48  ;;  %v3036_v55 = vsub.f32 %v7728_v10, %v3004_v0  ;;  %v9307_v12 = vld [vmem:[#allocation15_spill] sm:$0xff] }
 0x67b   : > { %5561 = vpow2.f32 %v3065_v54  ;;  %v3073_v47 = vmul.f32 1.442695, %v3032_v56  ;;  %v3038_v59 = vsub.f32 %v7734_v23, %v3006_v44  ;;  %v7953_v43 = vsel %vm253_vm0, %v7863_v9, %v2941_v19  ;;  %v9308_v23 = vld [vmem:[#allocation16_spill] sm:$0xff]  ;;  %v9309_v54 = vld [vmem:[#allocation29_spill] sm:$0xff]  ;;  %v9310_v0 = vld [vmem:[#allocation31_spill] sm:$0xff] }
 0x67c   : > { %v2990_v3 = vmax.f32 %v2988_v42, %v2989_v46  ;;  %v7958_v30 = vsel %vm253_vm0, %v7863_v9, %v2948_v48  ;;  %v3040_v26 = vsub.f32 %v9307_v12, %v3008_v57  ;;  %5563 = vpow2.f32 %v3069_v63  ;;  %v9311_v63 = vld [vmem:[#allocation37_spill] sm:$0xff] }
 0x67d   : > { %v3077_v7 = vmul.f32 1.442695, %v3034_v15  ;;  %v7964_v2 = vpop.eup %5557  ;;  %v3042_v49 = vsub.f32 %v9308_v23, %v3010_v29  ;;  %v7970_v19 = vsel %vm253_vm0, %v7863_v9, %v2955_v20  ;;  %v7976_v48 = vsel %vm253_vm0, %v7863_v9, %v7870_v45 }
 0x67e   : > { %v3021_v35 = vsel %vm253_vm0, %v7863_v9, %v2990_v3  ;;  %v3022_v10 = vsel %vm253_vm0, %v7844_v41, %v2990_v3  ;;  %v7982_v8 = vsel %vm253_vm0, %v7863_v9, %v7874_v22  ;;  %5565 = vpow2.f32 %v3073_v47  ;;  %v9313_v47 = vld [vmem:[#allocation40_spill] sm:$0xff] }
 0x67f   : > { %v7984_v58 = vpop.eup %5559  ;;  %v3053_v42 = vsub.f32 %v7829_v16, %v3021_v35  ;;  %v3081_v51 = vmul.f32 1.442695, %v3036_v55  ;;  %v7991_v34 = vsel %vm253_vm0, %v7863_v9, %v7876_v18  ;;  %v3012_v46 = vsel %vm253_vm0, %v7844_v41, %v2955_v20 }
 0x680   : > { %v3054_v50 = vsub.f32 %v7841_v25, %v3022_v10  ;;  %v3085_v53 = vmul.f32 1.442695, %v3038_v59  ;;  %v3134_v56 = vadd.f32 %v7984_v58, %v7964_v2  ;;  %5567 = vpow2.f32 %v3077_v7 }
 0x681   : > { %v7999_v4 = vpop.eup %5561  ;;  %v3089_v16 = vmul.f32 1.442695, %v3040_v26  ;;  %v3023_v3 = vsub.f32 %v9309_v54, %v7888_v1  ;;  %v3025_v44 = vsub.f32 %v9310_v0, %v7894_v38  ;;  %v3014_v20 = vsel %vm253_vm0, %v7844_v41, %v7870_v45  ;;  %v9317_v0 = vld [vmem:[#allocation12_spill] sm:$0xff] }
 0x682   : > { %v3093_v25 = vmul.f32 1.442695, %v3042_v49  ;;  %v3135_v15 = vadd.f32 %v7999_v4, %v3134_v56  ;;  %v3027_v57 = vsub.f32 %v9311_v63, %v7903_v61  ;;  %v8012_v29 = vpop.eup %5563  ;;  %v3044_v55 = vsub.f32 %v7755_v28, %v3012_v46 }
 0x683   : > { %9312 = vst [vmem:[#allocation17_spill] sm:$0xff] %v8012_v29  ;;  %5569 = vpow2.f32 %v3081_v51  ;;  %v3115_v1 = vmul.f32 1.442695, %v3053_v42  ;;  %v3029_v38 = vsub.f32 %v9313_v47, %v7910_v62  ;;  %v3016_v45 = vsel %vm253_vm0, %v7844_v41, %v7874_v22 }
 0x684   : > { %5571 = vpow2.f32 %v3085_v53  ;;  %v3117_v35 = vmul.f32 1.442695, %v3054_v50  ;;  %v3136_v59 = vadd.f32 %v8012_v29, %v3135_v15  ;;  %v8022_v10 = vpop.eup %5565  ;;  %v3018_v28 = vsel %vm253_vm0, %v7844_v41, %v7876_v18  ;;  %v9315_v18 = vld [vmem:[#allocation32_spill] sm:$0xff] }
 0x685   : > { %9314 = vst [vmem:[#allocation18_spill] sm:$0xff] %v8022_v10  ;;  %v3046_v61 = vsub.f32 %v7759_v40, %v3014_v20  ;;  %5573 = vpow2.f32 %v3089_v16  ;;  %v3055_v62 = vmul.f32 1.442695, %v3023_v3  ;;  %v3020_v22 = vsel %vm253_vm0, %v7844_v41, %v7881_v27 }
 0x686   : > { %5575 = vpow2.f32 %v3093_v25  ;;  %v3137_v12 = vadd.f32 %v8022_v10, %v3136_v59  ;;  %v3059_v26 = vmul.f32 1.442695, %v3025_v44  ;;  %v8034_v7 = vpop.eup %5567  ;;  %v3048_v23 = vsub.f32 %v7763_v21, %v3016_v45 }
 0x687   : > { %v3097_v49 = vmul.f32 1.442695, %v3044_v55  ;;  %5577 = vpow2.f32 %v3115_v1  ;;  %v3031_v40 = vsub.f32 %v9315_v18, %v7918_v33  ;;  %v3050_v42 = vsub.f32 %v7773_v6, %v3018_v28  ;;  %v9316_v33 = vld [vmem:[#allocation35_spill] sm:$0xff] }
 0x688   : > { %5579 = vpow2.f32 %v3117_v35  ;;  %v3138_v51 = vadd.f32 %v8034_v7, %v3137_v12  ;;  %v3063_v46 = vmul.f32 1.442695, %v3027_v57  ;;  %v3052_v50 = vsub.f32 %v7810_v36, %v3020_v22 }
 0x689   : > { %v8041_v41 = vpop.eup %5569  ;;  %v3101_v53 = vmul.f32 1.442695, %v3046_v61  ;;  %v8048_v21 = vsel %vm253_vm0, %v7863_v9, %v7881_v27  ;;  %5581 = vpow2.f32 %v3055_v62  ;;  %v3033_v16 = vsub.f32 %v9316_v33, %v7930_v13 }
 0x68a   : > { %v8050_v56 = vpop.eup %5571  ;;  %v3139_v6 = vadd.f32 %v8041_v41, %v3138_v51  ;;  %5583 = vpow2.f32 %v3059_v26  ;;  %v3067_v54 = vmul.f32 1.442695, %v3029_v38  ;;  %v3105_v36 = vmul.f32 1.442695, %v3048_v23 }
 0x68b   : > { %v8055_v3 = vpop.eup %5573  ;;  %5585 = vpow2.f32 %v3097_v49  ;;  %v3035_v44 = vsub.f32 %v9317_v0, %v7935_v17  ;;  %v3037_v9 = vsub.f32 %v7731_v14, %v7940_v32  ;;  %v3109_v20 = vmul.f32 1.442695, %v3050_v42 }
 0x68c   : > { %v8061_v27 = vpop.eup %5575  ;;  %v3140_v25 = vadd.f32 %v8050_v56, %v3139_v6  ;;  %5587 = vpow2.f32 %v3063_v46  ;;  %v3071_v15 = vmul.f32 1.442695, %v3031_v40  ;;  %v3113_v63 = vmul.f32 1.442695, %v3052_v50 }
 0x68d   : > { %v8064_v13 = vpop.eup %5577  ;;  %5589 = vpow2.f32 %v3101_v53  ;;  %v3039_v57 = vsub.f32 %v7743_v52, %v7953_v43  ;;  %v3041_v17 = vsub.f32 %v7749_v37, %v7958_v30  ;;  %v3043_v32 = vsub.f32 %v7753_v39, %v7970_v19 }
 0x68e   : > { %v8070_v55 = vpop.eup %5579  ;;  %v3141_v14 = vadd.f32 %v8055_v3, %v3140_v25  ;;  %5591 = vpow2.f32 %v3067_v54  ;;  %v3075_v1 = vmul.f32 1.442695, %v3033_v16  ;;  %v3045_v52 = vsub.f32 %v7757_v31, %v7976_v48 }
 0x68f   : > { %9318 = vst [vmem:[#allocation19_spill] sm:$0xff] %v8070_v55  ;;  %v8075_v47 = vpop.eup %5581  ;;  %5593 = vpow2.f32 %v3105_v36  ;;  %v8079_v38 = vadd.f32 %v8070_v55, %v8064_v13  ;;  %v3047_v37 = vsub.f32 %v7761_v5, %v7982_v8  ;;  %v3079_v39 = vmul.f32 1.442695, %v3035_v44 }
 0x690   : > { %v8085_v43 = vpop.eup %5583  ;;  %v3142_v30 = vadd.f32 %v8061_v27, %v3141_v14  ;;  %5595 = vpow2.f32 %v3071_v15  ;;  %v3151_v19 = vadd.f32 %v8075_v47, %v7964_v2  ;;  %v3049_v35 = vsub.f32 %v7765_v24, %v7991_v34 }
 0x691   : > { %v8090_v45 = vpop.eup %5585  ;;  %5597 = vpow2.f32 %v3109_v20  ;;  %v3119_v31 = vadd.f32 %v8085_v43, %v8075_v47  ;;  %v3158_v5 = vadd.f32 %v8085_v43, %v7984_v58  ;;  %v3083_v59 = vmul.f32 1.442695, %v3037_v9 }
 0x692   : > { %v8098_v48 = vpop.eup %5587  ;;  %v3143_v8 = vadd.f32 %v8090_v45, %v3142_v30  ;;  %5599 = vpow2.f32 %v3075_v1  ;;  %v3152_v28 = vrot.slane %v3151_v19, 4  ;;  %v3051_v62 = vsub.f32 %v7779_v11, %v8048_v21 }
 0x693   : > { %v8101_v61 = vpop.eup %5589  ;;  %5601 = vpow2.f32 %v3113_v63  ;;  %v3087_v24 = vmul.f32 1.442695, %v3039_v57  ;;  %v3120_v34 = vadd.f32 %v8098_v48, %v3119_v31  ;;  %v3159_v23 = vrot.slane %v3158_v5, 4 }
 0x694   : > { %v8106_v22 = vpop.eup %5591  ;;  %v3144_v12 = vadd.f32 %v8101_v61, %v3143_v8  ;;  %5603 = vpow2.f32 %v3079_v39  ;;  %v3153_v26 = vadd.f32 %v3152_v28, %v3151_v19  ;;  %v3091_v18 = vmul.f32 1.442695, %v3041_v17 }
 0x695   : > { %v8109_v49 = vpop.eup %5593  ;;  %v3095_v40 = vmul.f32 1.442695, %v3043_v32  ;;  %v3099_v42 = vmul.f32 1.442695, %v3045_v52  ;;  %v3121_v51 = vadd.f32 %v8106_v22, %v3120_v34  ;;  %5605 = vpow2.f32 %v3083_v59 }
 0x696   : > { %v8112_v46 = vpop.eup %5595  ;;  %v3145_v11 = vadd.f32 %v8109_v49, %v3144_v12  ;;  %v3103_v50 = vmul.f32 1.442695, %v3047_v37  ;;  %v3154_v53 = vrot.slane %v3153_v26, 2  ;;  %5607 = vpow2.f32 %v3087_v24 }
 0x697   : > { %v8115_v21 = vpop.eup %5597  ;;  %v3107_v6 = vmul.f32 1.442695, %v3049_v35  ;;  %v3111_v33 = vmul.f32 1.442695, %v3051_v62  ;;  %v3122_v16 = vadd.f32 %v8112_v46, %v3121_v51  ;;  %v3160_v44 = vadd.f32 %v3159_v23, %v3158_v5 }
 0x698   : > { %v8118_v54 = vpop.eup %5599  ;;  %v3146_v36 = vadd.f32 %v8115_v21, %v3145_v11  ;;  %v3155_v0 = vadd.f32 %v3154_v53, %v3153_v26  ;;  %v3172_v9 = vadd.f32 %v8106_v22, %v8012_v29  ;;  %5609 = vpow2.f32 %v3091_v18 }
 0x699   : > { %v8123_v20 = vpop.eup %5601  ;;  %v3123_v25 = vadd.f32 %v8118_v54, %v3122_v16  ;;  %v3165_v15 = vadd.f32 %v8098_v48, %v7999_v4  ;;  %v3179_v63 = vadd.f32 %v8112_v46, %v8022_v10  ;;  %5611 = vpow2.f32 %v3095_v40 }
 0x69a   : > { %v8130_v57 = vpop.eup %5603  ;;  %v3147_v17 = vadd.f32 %v8123_v20, %v3146_v36  ;;  %v3156_v14 = vrot.slane %v3155_v0, 1  ;;  %v3173_v32 = vrot.slane %v3172_v9, 4  ;;  %5613 = vpow2.f32 %v3099_v42 }
 0x69b   : > { %v3124_v1 = vadd.f32 %v8130_v57, %v3123_v25  ;;  %v3180_v52 = vrot.slane %v3179_v63, 4  ;;  %v3186_v37 = vadd.f32 %v8118_v54, %v8034_v7  ;;  %v8136_v30 = vpop.eup %5605  ;;  %v3161_v35 = vrot.slane %v3160_v44, 2  ;;  %v5171_v25 = vld [vmem:[#allocation7 + $0xf8] sm:$0xff] }
 0x69c   : > { %v3148_v39 = vadd.f32 %v8070_v55, %v3147_v17  ;;  %v3157_v19 = vadd.f32 %v3156_v14, %v3155_v0  ;;  %v3174_v31 = vadd.f32 %v3173_v32, %v3172_v9  ;;  %v8139_v5 = vpop.eup %5607  ;;  %v3166_v59 = vrot.slane %v3165_v15, 4  ;;  %3977 = vmatpush.bf16.msrb.mxu1 %v5171_v25 }
 0x69d   : > { %v3125_v8 = vadd.f32 %v8136_v30, %v3124_v1  ;;  %v3181_v28 = vadd.f32 %v3180_v52, %v3179_v63  ;;  %v3187_v62 = vrot.slane %v3186_v37, 4  ;;  %v3257_v24 = vrot.slane %v8079_v38, 4 }
 0x69e   : > { %5615 = vrcp.f32 %v3148_v39  ;;  %v3175_v34 = vrot.slane %v3174_v31, 2  ;;  %v3193_v12 = vadd.f32 %v8130_v57, %v8041_v41  ;;  %v8145_v26 = vpop.eup %5609  ;;  %v3162_v51 = vadd.f32 %v3161_v35, %v3160_v44 }
 0x69f   : > { %v3126_v23 = vadd.f32 %v8139_v5, %v3125_v8  ;;  %5617 = vrcp.f32 %v3157_v19  ;;  %v3182_v18 = vrot.slane %v3181_v28, 2  ;;  %v3188_v40 = vadd.f32 %v3187_v62, %v3186_v37  ;;  %v8148_v42 = vpop.eup %5611 }
 0x6a0   : > { %5619 = vpow2.f32 %v3103_v50  ;;  %v3194_v11 = vrot.slane %v3193_v12, 4  ;;  %v3200_v53 = vadd.f32 %v8136_v30, %v8050_v56  ;;  %v8152_v16 = vpop.eup %5613  ;;  %v3167_v0 = vadd.f32 %v3166_v59, %v3165_v15 }
 0x6a1   : > { %5621 = vpow2.f32 %v3107_v6  ;;  %v3127_v36 = vadd.f32 %v8145_v26, %v3126_v23  ;;  %v3189_v9 = vrot.slane %v3188_v40, 2  ;;  %v3176_v63 = vadd.f32 %v3175_v34, %v3174_v31 }
 0x6a2   : > { %v3195_v17 = vadd.f32 %v3194_v11, %v3193_v12  ;;  %v3201_v14 = vrot.slane %v3200_v53, 4  ;;  %v3207_v32 = vadd.f32 %v8139_v5, %v8055_v3  ;;  %v3183_v44 = vadd.f32 %v3182_v18, %v3181_v28 }
 0x6a3   : > { %v3128_v50 = vadd.f32 %v8148_v42, %v3127_v36  ;;  %v3190_v1 = vadd.f32 %v3189_v9, %v3188_v40  ;;  %v3214_v52 = vadd.f32 %v8145_v26, %v8061_v27  ;;  %5623 = vpow2.f32 %v3111_v33 }
 0x6a4   : > { %v8160_v37 = vpop.eup %5615  ;;  %v3163_v6 = vrot.slane %v3162_v51, 1  ;;  %v3196_v15 = vrot.slane %v3195_v17, 2  ;;  %v3202_v39 = vadd.f32 %v3201_v14, %v3200_v53  ;;  %v3208_v8 = vrot.slane %v3207_v32, 4 }
 0x6a5   : > { %v8162_v19 = vpop.eup %5617  ;;  %v3129_v35 = vadd.f32 %v8152_v16, %v3128_v50  ;;  %v3191_v31 = vrot.slane %v3190_v1, 1  ;;  %v3215_v59 = vrot.slane %v3214_v52, 4  ;;  %v3177_v34 = vrot.slane %v3176_v63, 1 }
 0x6a6   : > { %v8165_v62 = vpop.eup %5619  ;;  %v3280_v28 = vsel %vm253_vm0, %v8160_v37, %v8162_v19  ;;  %v3197_v33 = vadd.f32 %v3196_v15, %v3195_v17  ;;  %v3203_v12 = vrot.slane %v3202_v39, 2  ;;  %v3184_v11 = vrot.slane %v3183_v44, 1 }
 0x6a7   : > { %v8171_v23 = vpop.eup %5621  ;;  %v3130_v18 = vadd.f32 %v8165_v62, %v3129_v35  ;;  %v8175_v40 = vmul.f32 %v7964_v2, %v3280_v28  ;;  %v3168_v53 = vrot.slane %v3167_v0, 2  ;;  %v3192_v36 = vadd.f32 %v3191_v31, %v3190_v1 }
 0x6a8   : > { %v3198_v9 = vrot.slane %v3197_v33, 1  ;;  %v3204_v25 = vadd.f32 %v3203_v12, %v3202_v39  ;;  %v3164_v50 = vadd.f32 %v3163_v6, %v3162_v51  ;;  %v3209_v10 = vadd.f32 %v3208_v8, %v3207_v32 }
 0x6a9   : > { %v3131_v14 = vadd.f32 %v8171_v23, %v3130_v18  ;;  %3345 = vadd.xlane.f32.xlu0 %v8175_v40  ;;  %v3216_v17 = vadd.f32 %v3215_v59, %v3214_v52  ;;  %v8179_v15 = vpop.eup %5623  ;;  %v3258_v55 = vadd.f32 %v3257_v24, %v8079_v38  ;;  %v3178_v35 = vadd.f32 %v3177_v34, %v3176_v63 }
 0x6aa   : > { %5625 = vrcp.f32 %v3192_v36  ;;  %v3199_v2 = vadd.f32 %v3198_v9, %v3197_v33  ;;  %v3185_v29 = vadd.f32 %v3184_v11, %v3183_v44  ;;  %v3205_v1 = vrot.slane %v3204_v25, 1 }
 0x6ab   : > { %v3132_v28 = vadd.f32 %v8179_v15, %v3131_v14  ;;  %v3210_v31 = vrot.slane %v3209_v10, 2  ;;  %v3217_v39 = vrot.slane %v3216_v17, 2  ;;  %v3221_v12 = vadd.f32 %v8148_v42, %v8090_v45 }
 0x6ac   : > { %5627 = vrcp.f32 %v3199_v2  ;;  %v3228_v51 = vadd.f32 %v8152_v16, %v8101_v61  ;;  %v3169_v38 = vadd.f32 %v3168_v53, %v3167_v0  ;;  %v3206_v24 = vadd.f32 %v3205_v1, %v3204_v25  ;;  %v5170_v53 = vld [vmem:[#allocation7 + $0xf0] sm:$0xff] }
 0x6ad   : > { %v3133_v32 = vadd.f32 %v8064_v13, %v3132_v28  ;;  %5629 = vrcp.f32 %v3164_v50  ;;  %v3211_v63 = vadd.f32 %v3210_v31, %v3209_v10  ;;  %v3218_v52 = vadd.f32 %v3217_v39, %v3216_v17  ;;  %3978 = vmatpush.bf16.msrb.mxu1 %v5170_v53 }
 0x6ae   : > { %5631 = vrcp.f32 %v3178_v35  ;;  %v3222_v44 = vrot.slane %v3221_v12, 4  ;;  %v3229_v6 = vrot.slane %v3228_v51, 4  ;;  %v3259_v59 = vrot.slane %v3258_v55, 2 }
 0x6af   : > { %5633 = vrcp.f32 %v3133_v32  ;;  %v3212_v34 = vrot.slane %v3211_v63, 1  ;;  %v3219_v33 = vrot.slane %v3218_v52, 1  ;;  %v3170_v18 = vrot.slane %v3169_v38, 1 }
 0x6b0   : > { %v5626_v8 = vpop.eup %5625  ;;  %5635 = vrcp.f32 %v3185_v29  ;;  %v3223_v36 = vadd.f32 %v3222_v44, %v3221_v12  ;;  %v3235_v14 = vadd.f32 %v8165_v62, %v8109_v49  ;;  %v3230_v17 = vadd.f32 %v3229_v6, %v3228_v51 }
 0x6b1   : > { %v3290_v11 = vsel %vm253_vm0, %v8160_v37, %v5626_v8  ;;  %5637 = vrcp.f32 %v3206_v24  ;;  %v3213_v9 = vadd.f32 %v3212_v34, %v3211_v63  ;;  %v3220_v25 = vadd.f32 %v3219_v33, %v3218_v52 }
 0x6b2   : > { %v5628_v0 = vpop.eup %5627  ;;  %v8192_v10 = vmul.f32 %v8034_v7, %v3290_v11  ;;  %v3242_v35 = vadd.f32 %v8171_v23, %v8115_v21  ;;  %v3260_v1 = vadd.f32 %v3259_v59, %v3258_v55  ;;  %v3171_v39 = vadd.f32 %v3170_v18, %v3169_v38 }
 0x6b3   : > { %v5630_v29 = vpop.eup %5629  ;;  %v3292_v50 = vsel %vm253_vm0, %v8160_v37, %v5628_v0  ;;  %5639 = vrcp.f32 %v3213_v9  ;;  %v3224_v12 = vrot.slane %v3223_v36, 2  ;;  %v3236_v9 = vrot.slane %v3235_v14, 4 }
 0x6b4   : > { %v8201_v2 = vpop.eup %5631  ;;  %v8204_v7 = vmul.f32 %v8041_v41, %v3292_v50  ;;  %v3282_v31 = vsel %vm253_vm0, %v8160_v37, %v5630_v29  ;;  %5641 = vrcp.f32 %v3220_v25  ;;  %v3261_v25 = vrot.slane %v3260_v1, 1 }
 0x6b5   : > { %v8206_v28 = vpop.eup %5633  ;;  %v8251_v59 = vmul.f32 %v7984_v58, %v3282_v31  ;;  %5643 = vrcp.f32 %v3171_v39 }
 0x6b6   : > { %v8211_v51 = vpop.eup %5635  ;;  %v3279_v32 = vsel %vm253_vm0, %v8206_v28, %v8162_v19  ;;  %v3281_v41 = vsel %vm253_vm0, %v8206_v28, %v5630_v29  ;;  %v3285_v55 = vsel %vm253_vm0, %v8206_v28, %v8201_v2  ;;  %v3231_v19 = vrot.slane %v3230_v17, 2 }
 0x6b7   : > { %v5638_v24 = vpop.eup %5637  ;;  %v8225_v38 = vmul.f32 %v8075_v47, %v3279_v32  ;;  %v8228_v63 = vmul.f32 %v8085_v43, %v3281_v41  ;;  %v8231_v52 = vmul.f32 %v8106_v22, %v3285_v55  ;;  %v3287_v44 = vsel %vm253_vm0, %v8206_v28, %v8211_v51 }
 0x6b8   : > { %v3289_v6 = vsel %vm253_vm0, %v8206_v28, %v5626_v8  ;;  %v3291_v47 = vsel %vm253_vm0, %v8206_v28, %v5628_v0  ;;  %v3294_v43 = vsel %vm253_vm0, %v8160_v37, %v5638_v24  ;;  %v3225_v8 = vadd.f32 %v3224_v12, %v3223_v36 }
 0x6b9   : > { %3343 = vadd.xlane.f32.xlu2 %v8225_v38  ;;  %v3407_v22 = vsel %vm253_vm0, %v8225_v38, 0.0  ;;  %3347 = vadd.xlane.f32.xlu0 %v8228_v63  ;;  %v5640_v34 = vpop.eup %5639  ;;  %v8255_v33 = vmul.f32 %v8112_v46, %v3287_v44  ;;  %v8258_v18 = vmul.f32 %v8118_v54, %v3289_v6  ;;  %v8261_v11 = vmul.f32 %v8130_v57, %v3291_v47 }
 0x6ba   : > { %3439 = vadd.xlane.f32.xlu1 %v3407_v22  ;;  %v8264_v0 = vmul.f32 %v8050_v56, %v3294_v43  ;;  %v3293_v58 = vsel %vm253_vm0, %v8206_v28, %v5638_v24  ;;  %v3295_v36 = vsel %vm253_vm0, %v8206_v28, %v5640_v34  ;;  %v3296_v46 = vsel %vm253_vm0, %v8160_v37, %v5640_v34  ;;  %v5642_v53 = vpop.eup %5641  ;;  %v5169_v43 = vld [vmem:[#allocation7 + $0xe8] sm:$0xff] }
 0x6bb   : > { %v3232_v54 = vadd.f32 %v3231_v19, %v3230_v17  ;;  %v8276_v57 = vmul.f32 %v8136_v30, %v3293_v58  ;;  %v3243_v56 = vrot.slane %v3242_v35, 4  ;;  %v8279_v29 = vmul.f32 %v8139_v5, %v3295_v36  ;;  %v5644_v12 = vpop.eup %5643  ;;  %3979 = vmatpush.bf16.msrb.mxu1 %v5169_v43  ;;  %v9319_v43 = vld [vmem:[#allocation17_spill] sm:$0xff] }
 0x6bc   : > { %v8282_v50 = vmul.f32 %v8055_v3, %v3296_v46  ;;  %v3297_v31 = vsel %vm253_vm0, %v8206_v28, %v5642_v53  ;;  %v3408_v17 = vsel %vm253_vm0, %v8175_v40, 0.0  ;;  %v3298_v39 = vsel %vm253_vm0, %v8160_v37, %v5642_v53 }
 0x6bd   : > { %v8291_v30 = vmul.f32 %v8145_v26, %v3297_v31  ;;  %v3226_v5 = vrot.slane %v3225_v8, 1  ;;  %v3410_v3 = vsel %vm253_vm0, %v8251_v59, 0.0  ;;  %v8300_v32 = vmul.f32 %v8061_v27, %v3298_v39 }
 0x6be   : > { %v3233_v41 = vrot.slane %v3232_v54, 1  ;;  %v3283_v55 = vsel %vm253_vm0, %v8206_v28, %v5644_v12  ;;  %v3237_v24 = vadd.f32 %v3236_v9, %v3235_v14  ;;  %v3244_v19 = vadd.f32 %v3243_v56, %v3242_v35 }
 0x6bf   : > { %v3227_v26 = vadd.f32 %v3226_v5, %v3225_v8  ;;  %v3249_v6 = vadd.f32 %v8179_v15, %v8123_v20  ;;  %v3262_v47 = vadd.f32 %v3261_v25, %v3260_v1  ;;  %v8309_v58 = vmul.f32 %v8098_v48, %v3283_v55 }
 0x6c0   : > { %v3234_v44 = vadd.f32 %v3233_v41, %v3232_v54  ;;  %v3238_v27 = vrot.slane %v3237_v24, 2  ;;  %v3245_v22 = vrot.slane %v3244_v19, 2  ;;  %v3284_v1 = vsel %vm253_vm0, %v8160_v37, %v5644_v12 }
 0x6c1   : > { %3441 = vadd.xlane.f32.xlu2 %v3408_v17  ;;  %3445 = vadd.xlane.f32.xlu0 %v3410_v3  ;;  %5645 = vrcp.f32 %v3227_v26  ;;  %v3250_v34 = vrot.slane %v3249_v6, 4  ;;  %v3409_v9 = vsel %vm253_vm0, %v8228_v63, 0.0  ;;  %v3411_v48 = vsel %vm253_vm0, %v8309_v58, 0.0 }
 0x6c2   : > { %3349 = vadd.xlane.f32.xlu1 %v8251_v59  ;;  %5647 = vrcp.f32 %v3234_v44  ;;  %v3239_v14 = vadd.f32 %v3238_v27, %v3237_v24  ;;  %v3246_v35 = vadd.f32 %v3245_v22, %v3244_v19 }
 0x6c3   : > { %5649 = vrcp.f32 %v3262_v47  ;;  %v3251_v8 = vadd.f32 %v3250_v34, %v3249_v6  ;;  %v8353_v6 = vmul.f32 %v7999_v4, %v3284_v1 }
 0x6c4   : > { %v3240_v36 = vrot.slane %v3239_v14, 1  ;;  %v3247_v46 = vrot.slane %v3246_v35, 1 }
 0x6c5   : > { %v3252_v54 = vrot.slane %v3251_v8, 2  ;;  %v3412_v4 = vsel %vm253_vm0, %v8353_v6, 0.0 }
 0x6c6   : > { %v3241_v56 = vadd.f32 %v3240_v36, %v3239_v14  ;;  %v3248_v25 = vadd.f32 %v3247_v46, %v3246_v35  ;;  %v5168_v14 = vld [vmem:[#allocation7 + $0xe0] sm:$0xff] }
 0x6c7   : > { %v5646_v53 = vpop.eup %5645  ;;  %v3253_v5 = vadd.f32 %v3252_v54, %v3251_v8  ;;  %3980 = vmatpush.bf16.msrb.mxu1 %v5168_v14 }
 0x6c8   : > { %v5648_v31 = vpop.eup %5647  ;;  %v3300_v17 = vsel %vm253_vm0, %v8160_v37, %v5646_v53  ;;  %v3299_v39 = vsel %vm253_vm0, %v8206_v28, %v5646_v53  ;;  %5651 = vrcp.f32 %v3241_v56 }
 0x6c9   : > { %3443 = vadd.xlane.f32.xlu2 %v3409_v9  ;;  %3447 = vadd.xlane.f32.xlu0 %v3411_v48  ;;  %v5650_v12 = vpop.eup %5649  ;;  %v8328_v3 = vmul.f32 %v8090_v45, %v3300_v17  ;;  %v8331_v41 = vmul.f32 %v8148_v42, %v3299_v39  ;;  %v3301_v55 = vsel %vm253_vm0, %v8206_v28, %v5648_v31  ;;  %v3254_v45 = vrot.slane %v3253_v5, 1  ;;  %v5167_v17 = vld [vmem:[#allocation7 + $0xd8] sm:$0xff] }
 0x6ca   : > { %3351 = vadd.xlane.f32.xlu1 %v8309_v58  ;;  %v3302_v26 = vsel %vm253_vm0, %v8160_v37, %v5648_v31  ;;  %v8340_v24 = vmul.f32 %v8152_v16, %v3301_v55  ;;  %v3286_v42 = vsel %vm253_vm0, %v8160_v37, %v8201_v2  ;;  %5653 = vrcp.f32 %v3248_v25  ;;  %v9320_v2 = vld [vmem:[#allocation19_spill] sm:$0xff] }
 0x6cb   : > { %v8343_v19 = vmul.f32 %v8101_v61, %v3302_v26  ;;  %v3309_v44 = vsel %vm253_vm0, %v8206_v28, %v5650_v12  ;;  %v3255_v16 = vadd.f32 %v3254_v45, %v3253_v5  ;;  %v3310_v61 = vsel %vm253_vm0, %v8160_v37, %v5650_v12  ;;  %3981 = vmatpush.bf16.msrb.mxu1 %v5167_v17  ;;  %v5166_v5 = vld [vmem:[#allocation7 + $0xd0] sm:$0xff]  ;;  %v5165_v45 = vld [vmem:[#allocation7 + $0xc8] sm:$0xff] }
 0x6cc   : > { %v8356_v47 = vmul.f32 %v8064_v13, %v3309_v44  ;;  %v8362_v27 = vmul.f32 %v9319_v43, %v3286_v42  ;;  %v8365_v22 = vmul.f32 %v9320_v2, %v3310_v61  ;;  %v3418_v39 = vsel %vm253_vm0, %v8192_v10, 0.0  ;;  %v5164_v61 = vld [vmem:[#allocation7 + $0xc0] sm:$0xff] }
 0x6cd   : > { %5655 = vrcp.f32 %v3255_v16  ;;  %v3419_v12 = vsel %vm253_vm0, %v8261_v11, 0.0  ;;  %v3420_v55 = vsel %vm253_vm0, %v8204_v7, 0.0  ;;  %v3422_v26 = vsel %vm253_vm0, %v8264_v0, 0.0 }
 0x6ce   : > { %v5652_v34 = vpop.eup %5651  ;;  %v3421_v42 = vsel %vm253_vm0, %v8276_v57, 0.0  ;;  %v3423_v44 = vsel %vm253_vm0, %v8279_v29, 0.0  ;;  %v3424_v16 = vsel %vm253_vm0, %v8282_v50, 0.0  ;;  %v3425_v43 = vsel %vm253_vm0, %v8291_v30, 0.0 }
 0x6cf   : > { %v3303_v35 = vsel %vm253_vm0, %v8206_v28, %v5652_v34  ;;  %v3304_v8 = vsel %vm253_vm0, %v8160_v37, %v5652_v34  ;;  %3982 = vmatpush.bf16.msrb.mxu1 %v5166_v5  ;;  %v3426_v2 = vsel %vm253_vm0, %v8300_v32, 0.0  ;;  %v3428_v34 = vsel %vm253_vm0, %v8328_v3, 0.0 }
 0x6d0   : > { %v5654_v13 = vpop.eup %5653  ;;  %v8379_v36 = vmul.f32 %v8165_v62, %v3303_v35  ;;  %v8382_v46 = vmul.f32 %v8109_v49, %v3304_v8  ;;  %v3429_v14 = vsel %vm253_vm0, %v8340_v24, 0.0 }
 0x6d1   : > { %3353 = vadd.xlane.f32.xlu2 %v8353_v6  ;;  %3357 = vadd.xlane.f32.xlu0 %v8362_v27  ;;  %v3306_v1 = vsel %vm253_vm0, %v8160_v37, %v5654_v13  ;;  %v3305_v54 = vsel %vm253_vm0, %v8206_v28, %v5654_v13  ;;  %v3427_v13 = vsel %vm253_vm0, %v8331_v41, 0.0 }
 0x6d2   : > { %3449 = vadd.xlane.f32.xlu1 %v3412_v4  ;;  %v8391_v53 = vmul.f32 %v8115_v21, %v3306_v1  ;;  %v8394_v9 = vmul.f32 %v8171_v23, %v3305_v54  ;;  %v3413_v21 = vsel %vm253_vm0, %v8231_v52, 0.0  ;;  %v3288_v23 = vsel %vm253_vm0, %v8160_v37, %v8211_v51 }
 0x6d3   : > { %v5656_v62 = vpop.eup %5655  ;;  %v3417_v51 = vsel %vm253_vm0, %v8258_v18, 0.0  ;;  %3983 = vmatpush.bf16.msrb.mxu1 %v5165_v45 }
 0x6d4   : > { %v3307_v49 = vsel %vm253_vm0, %v8206_v28, %v5656_v62  ;;  %v3308_v48 = vsel %vm253_vm0, %v8160_v37, %v5656_v62  ;;  %v9321_v28 = vld [vmem:[#allocation18_spill] sm:$0xff]  ;;  %v3415_v37 = vsel %vm253_vm0, %v8255_v33, 0.0  ;;  %v3430_v62 = vsel %vm253_vm0, %v8343_v19, 0.0 }
 0x6d5   : > { %v8403_v56 = vmul.f32 %v8179_v15, %v3307_v49  ;;  %v8406_v25 = vmul.f32 %v8123_v20, %v3308_v48  ;;  %v8418_v15 = vmul.f32 %v9321_v28, %v3288_v23  ;;  %v3414_v20 = vsel %vm253_vm0, %v8362_v27, 0.0 }
 0x6d7   : > { %v3416_v31 = vsel %vm253_vm0, %v8418_v15, 0.0  ;;  %3984 = vmatpush.bf16.msrb.mxu1 %v5164_v61 }
 0x6d9   : > { %3355 = vadd.xlane.f32.xlu2 %v8231_v52  ;;  %3359 = vadd.xlane.f32.xlu0 %v8255_v33 }
 0x6da   : > { %3451 = vadd.xlane.f32.xlu1 %v3413_v21 }
 0x6e1   : > { %3453 = vadd.xlane.f32.xlu2 %v3414_v20  ;;  %3457 = vadd.xlane.f32.xlu0 %v3416_v31 }
 0x6e2   : > { %3361 = vadd.xlane.f32.xlu1 %v8418_v15 }
 0x6e9   : > { %3455 = vadd.xlane.f32.xlu2 %v3415_v37  ;;  %3459 = vadd.xlane.f32.xlu0 %v3417_v51  ;;  %v3431_v37 = vsel %vm253_vm0, %v8379_v36, 0.0 }
 0x6ea   : > { %3363 = vadd.xlane.f32.xlu1 %v8258_v18 }
 0x6f1   : > { %3365 = vadd.xlane.f32.xlu2 %v8192_v10  ;;  %3369 = vadd.xlane.f32.xlu0 %v8204_v7 }
 0x6f2   : > { %3461 = vadd.xlane.f32.xlu1 %v3418_v39 }
 0x6f9   : > { %3367 = vadd.xlane.f32.xlu2 %v8261_v11  ;;  %3371 = vadd.xlane.f32.xlu0 %v8276_v57 }
 0x6fa   : > { %3463 = vadd.xlane.f32.xlu1 %v3419_v12 }
 0x701   : > { %3465 = vadd.xlane.f32.xlu2 %v3420_v55  ;;  %3469 = vadd.xlane.f32.xlu0 %v3422_v26 }
 0x702   : > { %3373 = vadd.xlane.f32.xlu1 %v8264_v0 }
 0x709   : > { %3467 = vadd.xlane.f32.xlu2 %v3421_v42  ;;  %3471 = vadd.xlane.f32.xlu0 %v3423_v44 }
 0x70a   : > { %3375 = vadd.xlane.f32.xlu1 %v8279_v29 }
 0x711   : > { %3377 = vadd.xlane.f32.xlu2 %v8282_v50  ;;  %3381 = vadd.xlane.f32.xlu0 %v8300_v32 }
 0x712   : > { %3473 = vadd.xlane.f32.xlu1 %v3424_v16  ;;  %v3432_v16 = vsel %vm253_vm0, %v8382_v46, 0.0 }
 0x719   : > { %3379 = vadd.xlane.f32.xlu2 %v8291_v30  ;;  %3383 = vadd.xlane.f32.xlu0 %v8331_v41 }
 0x71a   : > { %3475 = vadd.xlane.f32.xlu1 %v3425_v43 }
 0x71c   : > { %v3346_v4 = vpop.xlane.xlu0 %3345 }
 0x721   : > { %3477 = vadd.xlane.f32.xlu2 %v3426_v2  ;;  %3481 = vadd.xlane.f32.xlu0 %v3428_v34 }
 0x722   : > { %3385 = vadd.xlane.f32.xlu1 %v8328_v3 }
 0x729   : > { %3479 = vadd.xlane.f32.xlu2 %v3427_v13  ;;  %3483 = vadd.xlane.f32.xlu0 %v3429_v14 }
 0x72a   : > { %3387 = vadd.xlane.f32.xlu1 %v8340_v24 }
 0x72c   : > { %v3344_v35 = vpop.xlane.xlu2 %3343  ;;  %v3348_v8 = vpop.xlane.xlu0 %3347 }
 0x72d   : > { %v3440_v1 = vpop.xlane.xlu1 %3439 }
 0x72e   : > { %v3503_v54 = vsub.f32 %v3344_v35, %v3440_v1 }
 0x730   : > { %5657 = vrcp.f32 %v3503_v54 }
 0x731   : > { %5659 = vrcp.f32 %v3440_v1  ;;  %3389 = vadd.xlane.f32.xlu2 %v8343_v19  ;;  %3393 = vadd.xlane.f32.xlu0 %v8382_v46 }
 0x732   : > { %3485 = vadd.xlane.f32.xlu1 %v3430_v62 }
 0x734   : > { %v3442_v49 = vpop.xlane.xlu2 %3441  ;;  %v3446_v48 = vpop.xlane.xlu0 %3445 }
 0x735   : > { %v3350_v21 = vpop.xlane.xlu1 %3349  ;;  %v3504_v23 = vsub.f32 %v3346_v4, %v3442_v49  ;;  %5661 = vrcp.f32 %v3442_v49 }
 0x736   : > { %v5658_v28 = vpop.eup %5657  ;;  %v3506_v31 = vsub.f32 %v3350_v21, %v3446_v48  ;;  %v3435_v21 = vsel %vm253_vm0, %v8403_v56, 0.0 }
 0x737   : > { %v5660_v20 = vpop.eup %5659  ;;  %5663 = vrcp.f32 %v3504_v23 }
 0x738   : > { %v3599_v17 = vsel %vm253_vm0, %v5660_v20, %v5658_v28  ;;  %5665 = vrcp.f32 %v3506_v31 }
 0x739   : > { %3391 = vadd.xlane.f32.xlu2 %v8379_v36  ;;  %3395 = vadd.xlane.f32.xlu0 %v8394_v9  ;;  %v3631_v51 = vmul.f32 %v3599_v17, %v8225_v38  ;;  %5667 = vrcp.f32 %v3446_v48  ;;  %v3434_v38 = vsel %vm253_vm0, %v8391_v53, 0.0  ;;  %v3433_v48 = vsel %vm253_vm0, %v8394_v9, 0.0 }
 0x73a   : > { %3487 = vadd.xlane.f32.xlu1 %v3431_v37 }
 0x73b   : > { %v5662_v39 = vpop.eup %5661  ;;  %v3663_v44 = vpack.c.bf16 %v3631_v51, %v3631_v51  ;;  %v3436_v51 = vsel %vm253_vm0, %v8406_v25, 0.0 }
 0x73c   : > { %v3444_v5 = vpop.xlane.xlu2 %3443  ;;  %v3448_v1 = vpop.xlane.xlu0 %3447 }
 0x73d   : > { %v5664_v12 = vpop.eup %5663  ;;  %v3505_v55 = vsub.f32 %v3348_v8, %v3444_v5  ;;  %v3352_v26 = vpop.xlane.xlu1 %3351  ;;  %5669 = vrcp.f32 %v3444_v5  ;;  %v3727_v34 = vunpack.c.l.b16 %v3663_v44 }
 0x73e   : > { %v3600_v45 = vsel %vm253_vm0, %v5662_v39, %v5664_v12  ;;  %v5666_v61 = vpop.eup %5665  ;;  %v3507_v23 = vsub.f32 %v3352_v26, %v3448_v1 }
 0x73f   : > { %5671 = vrcp.f32 %v3505_v55  ;;  %v3632_v42 = vmul.f32 %v3600_v45, %v8175_v40  ;;  %v5668_v2 = vpop.eup %5667 }
 0x740   : > { %v3602_v14 = vsel %vm253_vm0, %v5668_v2, %v5666_v61  ;;  %5673 = vrcp.f32 %v3507_v23 }
 0x741   : > { %3489 = vadd.xlane.f32.xlu2 %v3432_v16  ;;  %v3664_v43 = vpack.c.bf16 %v3632_v42, %v3632_v42  ;;  %3493 = vadd.xlane.f32.xlu0 %v3434_v38  ;;  %v3634_v62 = vmul.f32 %v3602_v14, %v8251_v59  ;;  %5675 = vrcp.f32 %v3448_v1 }
 0x742   : > { %3397 = vadd.xlane.f32.xlu1 %v8391_v53 }
 0x743   : > { %v3728_v4 = vunpack.c.l.b16 %v3664_v43  ;;  %v5670_v13 = vpop.eup %5669  ;;  %v3666_v31 = vpack.c.bf16 %v3634_v62, %v3634_v62  ;;  %v3437_v43 = vsel %vm253_vm0, %v8356_v47, 0.0 }
 0x744   : > { %v3354_v40 = vpop.xlane.xlu2 %3353 }
 0x745   : > { %v5672_v35 = vpop.eup %5671  ;;  %v3759_v8 = vpack.c.b16 %v3728_v4, %v3727_v34  ;;  %v3450_v49 = vpop.xlane.xlu1 %3449  ;;  %v3730_v37 = vunpack.c.l.b16 %v3666_v31 }
 0x746   : > { %v3601_v54 = vsel %vm253_vm0, %v5670_v13, %v5672_v35  ;;  %v3508_v20 = vsub.f32 %v3354_v40, %v3450_v49  ;;  %v5674_v5 = vpop.eup %5673  ;;  %v3438_v35 = vsel %vm253_vm0, %v8365_v22, 0.0 }
 0x747   : > { %3985 = vmatmul.bf16.vlgmr.msrb.gmra.mxu1 %v3759_v8  ;;  %v3633_v28 = vmul.f32 %v3601_v54, %v8228_v63  ;;  %v3358_v63 = vpop.xlane.xlu0 %3357  ;;  %v5676_v55 = vpop.eup %5675 }
 0x748   : > { %5677 = vrcp.f32 %v3508_v20  ;;  %v3603_v42 = vsel %vm253_vm0, %v5676_v55, %v5674_v5 }
 0x749   : > { %3491 = vadd.xlane.f32.xlu2 %v3433_v48  ;;  %3495 = vadd.xlane.f32.xlu0 %v3435_v21  ;;  %v3665_v59 = vpack.c.bf16 %v3633_v28, %v3633_v28  ;;  %5679 = vrcp.f32 %v3450_v49  ;;  %v3635_v2 = vmul.f32 %v3603_v42, %v8309_v58 }
 0x74a   : > { %3399 = vadd.xlane.f32.xlu1 %v8403_v56 }
 0x74b   : > { %v3729_v39 = vunpack.c.l.b16 %v3665_v59  ;;  %v3667_v40 = vpack.c.bf16 %v3635_v2, %v3635_v2 }
 0x74c   : > { %v3356_v17 = vpop.xlane.xlu2 %3355 }
 0x74d   : > { %v3760_v12 = vpack.c.b16 %v3730_v37, %v3729_v39  ;;  %v3452_v16 = vpop.xlane.xlu1 %3451  ;;  %v3731_v8 = vunpack.c.l.b16 %v3667_v40 }
 0x74e   : > { %v5678_v26 = vpop.eup %5677  ;;  %v3509_v34 = vsub.f32 %v3356_v17, %v3452_v16 }
 0x74f   : > { %v5680_v44 = vpop.eup %5679  ;;  %v3360_v13 = vpop.xlane.xlu0 %3359 }
 0x750   : > { %v3604_v38 = vsel %vm253_vm0, %v5680_v44, %v5678_v26 }
 0x751   : > { %3401 = vadd.xlane.f32.xlu2 %v8406_v25  ;;  %3405 = vadd.xlane.f32.xlu0 %v8365_v22  ;;  %v3636_v4 = vmul.f32 %v3604_v38, %v8353_v6 }
 0x752   : > { %3497 = vadd.xlane.f32.xlu1 %v3436_v51 }
 0x753   : > { %v3668_v14 = vpack.c.bf16 %v3636_v4, %v3636_v4 }
 0x754   : > { %v3454_v45 = vpop.xlane.xlu2 %3453 }
 0x755   : > { %v3510_v61 = vsub.f32 %v3358_v63, %v3454_v45  ;;  %v3732_v54 = vunpack.c.l.b16 %v3668_v14  ;;  %v3362_v62 = vpop.xlane.xlu1 %3361 }
 0x757   : > { %3990 = vmatmul.bf16.gmra.mxu1 %v3760_v12  ;;  %5681 = vrcp.f32 %v3510_v61  ;;  %v3761_v48 = vpack.c.b16 %v3732_v54, %v3731_v8  ;;  %v3458_v6 = vpop.xlane.xlu0 %3457 }
 0x758   : > { %5683 = vrcp.f32 %v3509_v34  ;;  %v3512_v31 = vsub.f32 %v3362_v62, %v3458_v6 }
 0x759   : > { %3403 = vadd.xlane.f32.xlu2 %v8356_v47  ;;  %5685 = vrcp.f32 %v3454_v45 }
 0x75a   : > { %3499 = vadd.xlane.f32.xlu1 %v3437_v43  ;;  %5687 = vrcp.f32 %v3452_v16 }
 0x75b   : > { %5689 = vrcp.f32 %v3512_v31 }
 0x75c   : > { %v3456_v28 = vpop.xlane.xlu2 %3455  ;;  %5691 = vrcp.f32 %v3458_v6 }
 0x75d   : > { %v5682_v1 = vpop.eup %5681  ;;  %v3511_v59 = vsub.f32 %v3360_v13, %v3456_v28  ;;  %v3364_v39 = vpop.xlane.xlu1 %3363 }
 0x75e   : > { %v5684_v58 = vpop.eup %5683 }
 0x75f   : > { %v5686_v49 = vpop.eup %5685  ;;  %5693 = vrcp.f32 %v3511_v59  ;;  %v3460_v16 = vpop.xlane.xlu0 %3459 }
 0x760   : > { %v3606_v21 = vsel %vm253_vm0, %v5686_v49, %v5682_v1  ;;  %v5688_v23 = vpop.eup %5687  ;;  %5695 = vrcp.f32 %v3456_v28  ;;  %v3513_v43 = vsub.f32 %v3364_v39, %v3460_v16 }
 0x761   : > { %3501 = vadd.xlane.f32.xlu2 %v3438_v35  ;;  %v3605_v20 = vsel %vm253_vm0, %v5688_v23, %v5684_v58  ;;  %v3638_v17 = vmul.f32 %v3606_v21, %v8362_v27  ;;  %v5690_v55 = vpop.eup %5689 }
 0x762   : > { %v3637_v37 = vmul.f32 %v3605_v20, %v8231_v52  ;;  %v5692_v45 = vpop.eup %5691  ;;  %5697 = vrcp.f32 %v3513_v43 }
 0x763   : > { %v3670_v51 = vpack.c.bf16 %v3638_v17, %v3638_v17  ;;  %v3608_v27 = vsel %vm253_vm0, %v5692_v45, %v5690_v55  ;;  %5699 = vrcp.f32 %v3460_v16 }
 0x764   : > { %v3669_v63 = vpack.c.bf16 %v3637_v37, %v3637_v37  ;;  %v3366_v12 = vpop.xlane.xlu2 %3365  ;;  %v3640_v2 = vmul.f32 %v3608_v27, %v8418_v15 }
 0x765   : > { %v3734_v5 = vunpack.c.l.b16 %v3670_v51  ;;  %v5694_v42 = vpop.eup %5693  ;;  %v3462_v52 = vpop.xlane.xlu1 %3461 }
 0x766   : > { %v3733_v26 = vunpack.c.l.b16 %v3669_v63  ;;  %v5696_v38 = vpop.eup %5695  ;;  %v3514_v34 = vsub.f32 %v3366_v12, %v3462_v52  ;;  %v3672_v40 = vpack.c.bf16 %v3640_v2, %v3640_v2 }
 0x767   : > { %3995 = vmatmul.bf16.gmra.mxu1 %v3761_v48  ;;  %v3607_v61 = vsel %vm253_vm0, %v5696_v38, %v5694_v42  ;;  %v3370_v8 = vpop.xlane.xlu0 %3369 }
 0x768   : > { %v3762_v44 = vpack.c.b16 %v3734_v5, %v3733_v26  ;;  %v3639_v4 = vmul.f32 %v3607_v61, %v8255_v33  ;;  %5701 = vrcp.f32 %v3514_v34  ;;  %v3736_v35 = vunpack.c.l.b16 %v3672_v40  ;;  %v5698_v1 = vpop.eup %5697 }
 0x769   : > { %5703 = vrcp.f32 %v3462_v52  ;;  %v5700_v58 = vpop.eup %5699 }
 0x76a   : > { %v3671_v14 = vpack.c.bf16 %v3639_v4, %v3639_v4  ;;  %v3609_v15 = vsel %vm253_vm0, %v5700_v58, %v5698_v1 }
 0x76b   : > { %v3641_v28 = vmul.f32 %v3609_v15, %v8258_v18 }
 0x76c   : > { %v3368_v13 = vpop.xlane.xlu2 %3367  ;;  %v3735_v54 = vunpack.c.l.b16 %v3671_v14 }
 0x76d   : > { %v3464_v33 = vpop.xlane.xlu1 %3463  ;;  %v3673_v59 = vpack.c.bf16 %v3641_v28, %v3641_v28 }
 0x76e   : > { %v5702_v62 = vpop.eup %5701  ;;  %v3763_v49 = vpack.c.b16 %v3736_v35, %v3735_v54  ;;  %v3515_v20 = vsub.f32 %v3368_v13, %v3464_v33 }
 0x76f   : > { %v5704_v6 = vpop.eup %5703  ;;  %v3372_v17 = vpop.xlane.xlu0 %3371  ;;  %v3737_v51 = vunpack.c.l.b16 %v3673_v59 }
 0x770   : > { %v3610_v21 = vsel %vm253_vm0, %v5704_v6, %v5702_v62 }
 0x771   : > { %v3642_v31 = vmul.f32 %v3610_v21, %v8192_v10 }
 0x773   : > { %v3674_v37 = vpack.c.bf16 %v3642_v31, %v3642_v31 }
 0x774   : > { %v3466_v48 = vpop.xlane.xlu2 %3465 }
 0x775   : > { %v3516_v23 = vsub.f32 %v3370_v8, %v3466_v48  ;;  %v3738_v63 = vunpack.c.l.b16 %v3674_v37  ;;  %v3374_v12 = vpop.xlane.xlu1 %3373 }
 0x777   : > { %4000 = vmatmul.bf16.gmra.mxu1 %v3762_v44  ;;  %5705 = vrcp.f32 %v3516_v23  ;;  %v3764_v26 = vpack.c.b16 %v3738_v63, %v3737_v51  ;;  %v3470_v45 = vpop.xlane.xlu0 %3469 }
 0x778   : > { %5707 = vrcp.f32 %v3515_v20  ;;  %v3518_v16 = vsub.f32 %v3374_v12, %v3470_v45 }
 0x779   : > { %5709 = vrcp.f32 %v3466_v48 }
 0x77a   : > { %5711 = vrcp.f32 %v3464_v33 }
 0x77b   : > { %5713 = vrcp.f32 %v3518_v16 }
 0x77c   : > { %v3468_v10 = vpop.xlane.xlu2 %3467  ;;  %5715 = vrcp.f32 %v3470_v45  ;;  %v8575_v45 = vld [vmem:[%s9175_s3 + $0x4] sm:$0x7] }
 0x77d   : > { %v5706_v39 = vpop.eup %5705  ;;  %v3517_v38 = vsub.f32 %v3372_v17, %v3468_v10  ;;  %v3376_v43 = vpop.xlane.xlu1 %3375 }
 0x77e   : > { %v5708_v5 = vpop.eup %5707 }
 0x77f   : > { %v5710_v55 = vpop.eup %5709  ;;  %5717 = vrcp.f32 %v3517_v38  ;;  %v3472_v1 = vpop.xlane.xlu0 %3471 }
 0x780   : > { %v3612_v18 = vsel %vm253_vm0, %v5710_v55, %v5706_v39  ;;  %v5712_v42 = vpop.eup %5711  ;;  %5719 = vrcp.f32 %v3468_v10  ;;  %v3519_v62 = vsub.f32 %v3376_v43, %v3472_v1  ;;  %v8578_v10 = vperm.slane %v8575_v45, 0 }
 0x781   : > { %v3611_v44 = vsel %vm253_vm0, %v5712_v42, %v5708_v5  ;;  %v3644_v27 = vmul.f32 %v3612_v18, %v8204_v7  ;;  %v5714_v13 = vpop.eup %5713 }
 0x782   : > { %v3643_v52 = vmul.f32 %v3611_v44, %v8261_v11  ;;  %v5716_v14 = vpop.eup %5715  ;;  %5721 = vrcp.f32 %v3519_v62 }
 0x783   : > { %v3676_v61 = vpack.c.bf16 %v3644_v27, %v3644_v27  ;;  %v3614_v7 = vsel %vm253_vm0, %v5716_v14, %v5714_v13  ;;  %5723 = vrcp.f32 %v3472_v1  ;;  %v9322_v27 = vld [vmem:[#allocation34_spill] sm:$0xff] }
 0x784   : > { %v3675_v2 = vpack.c.bf16 %v3643_v52, %v3643_v52  ;;  %v3378_v4 = vpop.xlane.xlu2 %3377 }
 0x785   : > { %v3740_v34 = vunpack.c.l.b16 %v3676_v61  ;;  %v5718_v35 = vpop.eup %5717  ;;  %v3474_v11 = vpop.xlane.xlu1 %3473 }
 0x786   : > { %v3739_v40 = vunpack.c.l.b16 %v3675_v2  ;;  %v5720_v54 = vpop.eup %5719  ;;  %v3520_v48 = vsub.f32 %v3378_v4, %v3474_v11 }
 0x787   : > { %4005 = vmatmul.bf16.gmra.mxu1 %v3763_v49  ;;  %v3613_v58 = vsel %vm253_vm0, %v5720_v54, %v5718_v35  ;;  %v3646_v49 = vmul.f32 %v3614_v7, %v8264_v0  ;;  %v3382_v28 = vpop.xlane.xlu0 %3381  ;;  %v9323_v54 = vld [vmem:[#allocation36_spill] sm:$0xff] }
 0x788   : > { %v3765_v8 = vpack.c.b16 %v3740_v34, %v3739_v40  ;;  %v3645_v15 = vmul.f32 %v3613_v58, %v8276_v57  ;;  %5725 = vrcp.f32 %v3520_v48  ;;  %v5722_v20 = vpop.eup %5721 }
 0x789   : > { %v3678_v33 = vpack.c.bf16 %v3646_v49, %v3646_v49  ;;  %5727 = vrcp.f32 %v3474_v11  ;;  %v5724_v17 = vpop.eup %5723  ;;  %v3900_v11 = vadd.f32 %v9323_v54, %v8578_v10 }
 0x78a   : > { %v3677_v21 = vpack.c.bf16 %v3645_v15, %v3645_v15  ;;  %v3615_v0 = vsel %vm253_vm0, %v5724_v17, %v5722_v20 }
 0x78b   : > { %v3742_v23 = vunpack.c.l.b16 %v3678_v33  ;;  %v3647_v12 = vmul.f32 %v3615_v0, %v8279_v29 }
 0x78c   : > { %v3380_v6 = vpop.xlane.xlu2 %3379  ;;  %v3741_v31 = vunpack.c.l.b16 %v3677_v21 }
 0x78d   : > { %v3476_v57 = vpop.xlane.xlu1 %3475  ;;  %v3679_v42 = vpack.c.bf16 %v3647_v12, %v3647_v12 }
 0x78e   : > { %v5726_v59 = vpop.eup %5725  ;;  %v3766_v37 = vpack.c.b16 %v3742_v23, %v3741_v31  ;;  %v3521_v55 = vsub.f32 %v3380_v6, %v3476_v57 }
 0x78f   : > { %v5728_v39 = vpop.eup %5727  ;;  %v3384_v18 = vpop.xlane.xlu0 %3383  ;;  %v3743_v16 = vunpack.c.l.b16 %v3679_v42 }
 0x790   : > { %v3616_v63 = vsel %vm253_vm0, %v5728_v39, %v5726_v59 }
 0x794   : > { %v3478_v51 = vpop.xlane.xlu2 %3477 }
 0x795   : > { %v3522_v5 = vsub.f32 %v3382_v28, %v3478_v51  ;;  %v3386_v61 = vpop.xlane.xlu1 %3385  ;;  %v9324_v28 = vld [vmem:[#allocation38_spill] sm:$0xff] }
 0x796   : > { %v3903_v20 = vadd.f32 %v9324_v28, %v8578_v10 }
 0x797   : > { %4010 = vmatmul.bf16.gmra.mxu1 %v3764_v26  ;;  %v3648_v26 = vmul.f32 %v3616_v63, %v8282_v50  ;;  %5729 = vrcp.f32 %v3522_v5  ;;  %v3898_v50 = vadd.f32 %v9322_v27, %v8578_v10  ;;  %v3482_v13 = vpop.xlane.xlu0 %3481  ;;  %v8602_v63 = vpop.f32.mrf.mxu0 }
 0x798   : > { %5731 = vrcp.f32 %v3521_v55  ;;  %v3524_v1 = vsub.f32 %v3386_v61, %v3482_v13 }
 0x799   : > { %5733 = vrcp.f32 %v3478_v51  ;;  %v3680_v44 = vpack.c.bf16 %v3648_v26, %v3648_v26 }
 0x79a   : > { %5735 = vrcp.f32 %v3476_v57 }
 0x79b   : > { %v3744_v38 = vunpack.c.l.b16 %v3680_v44  ;;  %5737 = vrcp.f32 %v3524_v1 }
 0x79c   : > { %v3480_v35 = vpop.xlane.xlu2 %3479  ;;  %5739 = vrcp.f32 %v3482_v13 }
 0x79d   : > { %v5730_v29 = vpop.eup %5729  ;;  %v3767_v4 = vpack.c.b16 %v3744_v38, %v3743_v16  ;;  %v3523_v58 = vsub.f32 %v3384_v18, %v3480_v35  ;;  %v3388_v6 = vpop.xlane.xlu1 %3387  ;;  %v9325_v18 = vld [vmem:[#allocation39_spill] sm:$0xff] }
 0x79e   : > { %v5732_v52 = vpop.eup %5731  ;;  %v3905_v42 = vadd.f32 %v9325_v18, %v8578_v10 }
 0x79f   : > { %v5734_v2 = vpop.eup %5733  ;;  %5741 = vrcp.f32 %v3523_v58  ;;  %v3484_v0 = vpop.xlane.xlu0 %3483 }
 0x7a0   : > { %v3618_v40 = vsel %vm253_vm0, %v5734_v2, %v5730_v29  ;;  %v5736_v14 = vpop.eup %5735  ;;  %5743 = vrcp.f32 %v3480_v35  ;;  %v3525_v55 = vsub.f32 %v3388_v6, %v3484_v0  ;;  %v8614_v61 = vpop.f32.mrf.mxu0 }
 0x7a1   : > { %v3650_v7 = vmul.f32 %v3618_v40, %v8300_v32  ;;  %v5738_v23 = vpop.eup %5737 }
 0x7a2   : > { %5745 = vrcp.f32 %v3525_v55 }
 0x7a3   : > { %v3682_v15 = vpack.c.bf16 %v3650_v7, %v3650_v7  ;;  %5747 = vrcp.f32 %v3484_v0 }
 0x7a4   : > { %v3390_v32 = vpop.xlane.xlu2 %3389 }
 0x7a5   : > { %v3746_v21 = vunpack.c.l.b16 %v3682_v15  ;;  %v3486_v5 = vpop.xlane.xlu1 %3485 }
 0x7a6   : > { %v3526_v44 = vsub.f32 %v3390_v32, %v3486_v5 }
 0x7a7   : > { %4015 = vmatmul.bf16.gmra.mxu1 %v3765_v8  ;;  %v3617_v8 = vsel %vm253_vm0, %v5736_v14, %v5732_v52 }
 0x7a8   : > { %v3649_v62 = vmul.f32 %v3617_v8, %v8291_v30  ;;  %v5740_v30 = vpop.eup %5739  ;;  %5749 = vrcp.f32 %v3526_v44  ;;  %v8628_v32 = vpop.f32.mrf.mxu0 }
 0x7a9   : > { %v5742_v59 = vpop.eup %5741  ;;  %v3620_v39 = vsel %vm253_vm0, %v5740_v30, %v5738_v23  ;;  %5751 = vrcp.f32 %v3486_v5 }
 0x7aa   : > { %v3681_v33 = vpack.c.bf16 %v3649_v62, %v3649_v62  ;;  %v5744_v57 = vpop.eup %5743  ;;  %v3652_v26 = vmul.f32 %v3620_v39, %v8328_v3 }
 0x7ab   : > { %v3619_v12 = vsel %vm253_vm0, %v5744_v57, %v5742_v59  ;;  %v5746_v2 = vpop.eup %5745 }
 0x7ac   : > { %v3745_v31 = vunpack.c.l.b16 %v3681_v33  ;;  %v3651_v16 = vmul.f32 %v3619_v12, %v8331_v41  ;;  %v3392_v29 = vpop.xlane.xlu2 %3391  ;;  %v3684_v38 = vpack.c.bf16 %v3652_v26, %v3652_v26  ;;  %v5748_v40 = vpop.eup %5747  ;;  %v9327_v33 = vld [vmem:[#allocation30_spill] sm:$0xff] }
 0x7ad   : > { %v3621_v54 = vsel %vm253_vm0, %v5748_v40, %v5746_v2  ;;  %v3488_v58 = vpop.xlane.xlu1 %3487 }
 0x7ae   : > { %v3768_v51 = vpack.c.b16 %v3746_v21, %v3745_v31  ;;  %v3683_v52 = vpack.c.bf16 %v3651_v16, %v3651_v16  ;;  %v3748_v3 = vunpack.c.l.b16 %v3684_v38  ;;  %v5750_v35 = vpop.eup %5749  ;;  %v3653_v15 = vmul.f32 %v3621_v54, %v8340_v24 }
 0x7af   : > { %v3527_v6 = vsub.f32 %v3392_v29, %v3488_v58  ;;  %v3910_v21 = vadd.f32 %v9327_v33, %v8578_v10 }
 0x7b0   : > { %v3747_v13 = vunpack.c.l.b16 %v3683_v52  ;;  %v3685_v30 = vpack.c.bf16 %v3653_v15, %v3653_v15  ;;  %v8638_v18 = vpop.f32.mrf.mxu0 }
 0x7b2   : > { %v3769_v1 = vpack.c.b16 %v3748_v3, %v3747_v13  ;;  %v3749_v24 = vunpack.c.l.b16 %v3685_v30  ;;  %v9329_v3 = vld [vmem:[#allocation14_spill] sm:$0xff] }
 0x7b4   : > { %v3490_v7 = vpop.xlane.xlu2 %3489 }
 0x7b7   : > { %4020 = vmatmul.bf16.gmra.mxu1 %v3766_v37 }
 0x7bc   : > { %v3492_v29 = vpop.xlane.xlu2 %3491 }
 0x7c4   : > { %v3986_v43 = vpop.f32.mrf.mxu1 }
 0x7c5   : > { %v8582_v34 = vadd.f32 %v3986_v43, %v3898_v50  ;;  %v3394_v43 = vpop.xlane.xlu0 %3393 }
 0x7c7   : > { %4066 = vadd.xlane.f32.xlu0 %v8582_v34  ;;  %4025 = vmatmul.bf16.gmra.mxu1 %v3767_v4  ;;  %v9326_v4 = vld [vmem:[#allocation28_spill] sm:$0xff] }
 0x7c8   : > { %v3908_v41 = vadd.f32 %v9326_v4, %v8578_v10 }
 0x7cc   : > { %v3988_v49 = vpop.f32.mrf.mxu1 }
 0x7cd   : > { %v8593_v48 = vadd.f32 %v3988_v49, %v3900_v11  ;;  %v5752_v11 = vpop.eup %5751  ;;  %v3528_v49 = vsub.f32 %v3394_v43, %v3490_v7  ;;  %v3396_v28 = vpop.xlane.xlu0 %3395  ;;  %v3915_v43 = vadd.f32 %v9329_v3, %v8578_v10 }
 0x7ce   : > { %v3622_v62 = vsel %vm253_vm0, %v5752_v11, %v5750_v35  ;;  %v3529_v2 = vsub.f32 %v3396_v28, %v3492_v29 }
 0x7cf   : > { %4068 = vadd.xlane.f32.xlu1 %v8593_v48  ;;  %v3654_v23 = vmul.f32 %v3622_v62, %v8343_v19  ;;  %5753 = vrcp.f32 %v3528_v49  ;;  %v3398_v19 = vpop.xlane.xlu1 %3397 }
 0x7d0   : > { %5755 = vrcp.f32 %v3527_v6 }
 0x7d1   : > { %5757 = vrcp.f32 %v3490_v7  ;;  %v3402_v7 = vpop.xlane.xlu2 %3401 }
 0x7d2   : > { %5759 = vrcp.f32 %v3488_v58 }
 0x7d4   : > { %v3991_v17 = vpop.f32.mrf.mxu1 }
 0x7d5   : > { %v8598_v37 = vadd.f32 %v3991_v17, %v3903_v20  ;;  %v3686_v17 = vpack.c.bf16 %v3654_v23, %v3654_v23  ;;  %v5754_v59 = vpop.eup %5753 }
 0x7d6   : > { %v5756_v57 = vpop.eup %5755 }
 0x7d7   : > { %4070 = vadd.xlane.f32.xlu2 %v8598_v37  ;;  %4030 = vmatmul.bf16.gmra.mxu1 %v3768_v51  ;;  %v9328_v51 = vld [vmem:[#allocation13_spill] sm:$0xff]  ;;  %v3750_v39 = vunpack.c.l.b16 %v3686_v17  ;;  %v5758_v12 = vpop.eup %5757 }
 0x7d8   : > { %v3913_v0 = vadd.f32 %v9328_v51, %v8578_v10  ;;  %v3624_v44 = vsel %vm253_vm0, %v5758_v12, %v5754_v59  ;;  %v5760_v16 = vpop.eup %5759 }
 0x7d9   : > { %v3770_v26 = vpack.c.b16 %v3750_v39, %v3749_v24  ;;  %v3656_v52 = vmul.f32 %v3624_v44, %v8382_v46  ;;  %v3920_v24 = vadd.f32 %v8614_v61, %v8578_v10  ;;  %v3923_v61 = vadd.f32 %v8628_v32, %v8578_v10 }
 0x7db   : > { %v3688_v40 = vpack.c.bf16 %v3656_v52, %v3656_v52 }
 0x7dc   : > { %v3993_v27 = vpop.f32.mrf.mxu1 }
 0x7dd   : > { %v8611_v50 = vadd.f32 %v3993_v27, %v3905_v42  ;;  %v3494_v42 = vpop.xlane.xlu0 %3493  ;;  %v3623_v27 = vsel %vm253_vm0, %v5760_v16, %v5756_v57  ;;  %v3752_v46 = vunpack.c.l.b16 %v3688_v40 }
 0x7de   : > { %v3530_v38 = vsub.f32 %v3398_v19, %v3494_v42  ;;  %v3655_v4 = vmul.f32 %v3623_v27, %v8379_v36  ;;  %v3918_v36 = vadd.f32 %v8602_v63, %v8578_v10 }
 0x7df   : > { %4072 = vadd.xlane.f32.xlu0 %v8611_v50 }
 0x7e0   : > { %5761 = vrcp.f32 %v3530_v38  ;;  %v3687_v35 = vpack.c.bf16 %v3655_v4, %v3655_v4 }
 0x7e1   : > { %5763 = vrcp.f32 %v3494_v42 }
 0x7e2   : > { %5765 = vrcp.f32 %v3529_v2  ;;  %v3751_v11 = vunpack.c.l.b16 %v3687_v35 }
 0x7e3   : > { %5767 = vrcp.f32 %v3492_v29 }
 0x7e4   : > { %v3996_v14 = vpop.f32.mrf.mxu1  ;;  %v3771_v6 = vpack.c.b16 %v3752_v46, %v3751_v11 }
 0x7e5   : > { %v8618_v8 = vadd.f32 %v3996_v14, %v3908_v41  ;;  %v3400_v14 = vpop.xlane.xlu1 %3399  ;;  %v3496_v33 = vpop.xlane.xlu0 %3495 }
 0x7e6   : > { %v5762_v54 = vpop.eup %5761  ;;  %v3531_v63 = vsub.f32 %v3400_v14, %v3496_v33  ;;  %v3925_v14 = vadd.f32 %v8638_v18, %v8578_v10 }
 0x7e7   : > { %4074 = vadd.xlane.f32.xlu1 %v8618_v8  ;;  %4035 = vmatmul.bf16.gmra.mxu1 %v3769_v1  ;;  %v8652_v1 = vpop.f32.mrf.mxu0  ;;  %v5764_v58 = vpop.eup %5763 }
 0x7e8   : > { %v5766_v49 = vpop.eup %5765  ;;  %5769 = vrcp.f32 %v3531_v63 }
 0x7e9   : > { %v5768_v23 = vpop.eup %5767  ;;  %5771 = vrcp.f32 %v3496_v33 }
 0x7ec   : > { %v3998_v20 = vpop.f32.mrf.mxu1 }
 0x7ed   : > { %v8631_v31 = vadd.f32 %v3998_v20, %v3910_v21  ;;  %v3626_v21 = vsel %vm253_vm0, %v5764_v58, %v5762_v54  ;;  %v3498_v28 = vpop.xlane.xlu1 %3497  ;;  %v3625_v20 = vsel %vm253_vm0, %v5768_v23, %v5766_v49  ;;  %v3406_v38 = vpop.xlane.xlu0 %3405 }
 0x7ee   : > { %v3658_v30 = vmul.f32 %v3626_v21, %v8391_v53  ;;  %v3532_v59 = vsub.f32 %v3402_v7, %v3498_v28  ;;  %v3657_v51 = vmul.f32 %v3625_v20, %v8394_v9 }
 0x7ef   : > { %4076 = vadd.xlane.f32.xlu2 %v8631_v31  ;;  %v8664_v17 = vpop.f32.mrf.mxu0 }
 0x7f0   : > { %v3690_v19 = vpack.c.bf16 %v3658_v30, %v3658_v30  ;;  %5773 = vrcp.f32 %v3532_v59  ;;  %v3930_v30 = vadd.f32 %v8664_v17, %v8578_v10 }
 0x7f1   : > { %5775 = vrcp.f32 %v3498_v28 }
 0x7f2   : > { %v3754_v53 = vunpack.c.l.b16 %v3690_v19 }
 0x7f4   : > { %v4001_v5 = vpop.f32.mrf.mxu1 }
 0x7f5   : > { %v8636_v55 = vadd.f32 %v4001_v5, %v3913_v0  ;;  %v3404_v0 = vpop.xlane.xlu2 %3403  ;;  %v3689_v5 = vpack.c.bf16 %v3657_v51, %v3657_v51  ;;  %v3500_v2 = vpop.xlane.xlu1 %3499 }
 0x7f6   : > { %v3533_v40 = vsub.f32 %v3404_v0, %v3500_v2 }
 0x7f7   : > { %4078 = vadd.xlane.f32.xlu0 %v8636_v55  ;;  %4040 = vmatmul.bf16.gmra.mxu1 %v3770_v26  ;;  %v3932_v12 = vpop.f32.mrf.mxu0  ;;  %v5770_v26 = vpop.eup %5769  ;;  %v3753_v42 = vunpack.c.l.b16 %v3689_v5 }
 0x7f8   : > { %v5772_v9 = vpop.eup %5771 }
 0x7f9   : > { %v5774_v16 = vpop.eup %5773  ;;  %v3772_v27 = vpack.c.b16 %v3754_v53, %v3753_v42  ;;  %v3627_v3 = vsel %vm253_vm0, %v5772_v9, %v5770_v26  ;;  %v3933_v53 = vadd.f32 %v3932_v12, %v8578_v10  ;;  %v9330_v9 = vld [vmem:[#allocation33_spill] sm:$0xff] }
 0x7fc   : > { %v4003_v41 = vpop.f32.mrf.mxu1 }
 0x7fd   : > { %v8649_v13 = vadd.f32 %v4003_v41, %v3915_v43  ;;  %v3502_v52 = vpop.xlane.xlu2 %3501  ;;  %v5776_v43 = vpop.eup %5775  ;;  %v3659_v41 = vmul.f32 %v3627_v3, %v8403_v56 }
 0x7fe   : > { %v3628_v32 = vsel %vm253_vm0, %v5776_v43, %v5774_v16  ;;  %v3534_v4 = vsub.f32 %v3406_v38, %v3502_v52 }
 0x7ff   : > { %4080 = vadd.xlane.f32.xlu1 %v8649_v13  ;;  %v3660_v35 = vmul.f32 %v3628_v32, %v8406_v25  ;;  %v3934_v46 = vpop.f32.mrf.mxu0 }
 0x800   : > { %5777 = vrcp.f32 %v3534_v4  ;;  %v3935_v42 = vadd.f32 %v3934_v46, %v8578_v10 }
 0x801   : > { %5779 = vrcp.f32 %v3533_v40  ;;  %v3692_v11 = vpack.c.bf16 %v3660_v35, %v3660_v35 }
 0x802   : > { %5781 = vrcp.f32 %v3502_v52 }
 0x803   : > { %5783 = vrcp.f32 %v3500_v2  ;;  %v3756_v18 = vunpack.c.l.b16 %v3692_v11 }
 0x804   : > { %v4006_v62 = vpop.f32.mrf.mxu1 }
 0x805   : > { %v8656_v15 = vadd.f32 %v4006_v62, %v3918_v36  ;;  %v3691_v36 = vpack.c.bf16 %v3659_v41, %v3659_v41  ;;  %v3928_v62 = vadd.f32 %v8652_v1, %v8578_v10 }
 0x806   : > { %v5778_v56 = vpop.eup %5777 }
 0x807   : > { %4082 = vadd.xlane.f32.xlu2 %v8656_v15  ;;  %4045 = vmatmul.bf16.gmra.mxu1 %v3771_v6  ;;  %v3755_v58 = vunpack.c.l.b16 %v3691_v36  ;;  %v5780_v49 = vpop.eup %5779  ;;  %v3937_v23 = vpop.f32.mrf.mxu0 }
 0x808   : > { %v5782_v6 = vpop.eup %5781  ;;  %v3938_v3 = vadd.f32 %v3937_v23, %v8578_v10 }
 0x809   : > { %v3773_v21 = vpack.c.b16 %v3756_v18, %v3755_v58  ;;  %v3630_v28 = vsel %vm253_vm0, %v5782_v6, %v5778_v56  ;;  %v5784_v20 = vpop.eup %5783 }
 0x80a   : > { %v3629_v63 = vsel %vm253_vm0, %v5784_v20, %v5780_v49  ;;  %v3662_v1 = vmul.f32 %v3630_v28, %v8365_v22 }
 0x80c   : > { %v4008_v39 = vpop.f32.mrf.mxu1  ;;  %v3694_v0 = vpack.c.bf16 %v3662_v1, %v3662_v1 }
 0x80d   : > { %v8669_v57 = vadd.f32 %v4008_v39, %v3920_v24  ;;  %v3661_v24 = vmul.f32 %v3629_v63, %v8356_v47 }
 0x80e   : > { %v3758_v5 = vunpack.c.l.b16 %v3694_v0 }
 0x80f   : > { %4084 = vadd.xlane.f32.xlu0 %v8669_v57  ;;  %v3693_v39 = vpack.c.bf16 %v3661_v24, %v3661_v24  ;;  %v3939_v19 = vpop.f32.mrf.mxu0 }
 0x811   : > { %v3757_v60 = vunpack.c.l.b16 %v3693_v39 }
 0x813   : > { %v3774_v22 = vpack.c.b16 %v3758_v5, %v3757_v60 }
 0x814   : > { %v4011_v44 = vpop.f32.mrf.mxu1 }
 0x815   : > { %v8674_v29 = vadd.f32 %v4011_v44, %v3923_v61 }
 0x817   : > { %4086 = vadd.xlane.f32.xlu1 %v8674_v29  ;;  %4050 = vmatmul.bf16.gmra.mxu1 %v3772_v27  ;;  %v3942_v47 = vpop.f32.mrf.mxu0 }
 0x818   : > { %v3943_v56 = vadd.f32 %v3942_v47, %v8578_v10 }
 0x81c   : > { %v4013_v7 = vpop.f32.mrf.mxu1 }
 0x81d   : > { %v8685_v54 = vadd.f32 %v4013_v7, %v3925_v14  ;;  %v3940_v14 = vadd.f32 %v3939_v19, %v8578_v10 }
 0x81f   : > { %4088 = vadd.xlane.f32.xlu2 %v8685_v54  ;;  %v3944_v2 = vpop.f32.mrf.mxu0 }
 0x820   : > { %v3945_v23 = vadd.f32 %v3944_v2, %v8578_v10 }
 0x824   : > { %v4016_v25 = vpop.f32.mrf.mxu1 }
 0x825   : > { %v8690_v33 = vadd.f32 %v4016_v25, %v3928_v62 }
 0x827   : > { %4090 = vadd.xlane.f32.xlu0 %v8690_v33  ;;  %4055 = vmatmul.bf16.gmra.mxu1 %v3773_v21 }
 0x82c   : > { %v4018_v59 = vpop.f32.mrf.mxu1 }
 0x82d   : > { %v8701_v51 = vadd.f32 %v4018_v59, %v3930_v30 }
 0x82f   : > { %4092 = vadd.xlane.f32.xlu1 %v8701_v51 }
 0x834   : > { %v4021_v26 = vpop.f32.mrf.mxu1 }
 0x835   : > { %v8705_v61 = vadd.f32 %v4021_v26, %v3933_v53 }
 0x837   : > { %4094 = vadd.xlane.f32.xlu2 %v8705_v61  ;;  %4060 = vmatmul.bf16.gmra.mxu1 %v3774_v22 }
 0x83a   : > { %v4067_v17 = vpop.xlane.xlu0 %4066 }
 0x83b   : > { %v4130_v44 = vmul.f32 %v4067_v17, %v9330_v9 }
 0x83c   : > { %v4023_v16 = vpop.f32.mrf.mxu1 }
 0x83d   : > { %v8711_v27 = vsub.f32 %v8582_v34, %v4130_v44  ;;  %v8713_v38 = vadd.f32 %v4023_v16, %v3935_v42 }
 0x83f   : > { %4096 = vadd.xlane.f32.xlu0 %v8713_v38  ;;  %v4194_v12 = vmul.f32 %v8711_v27, %v8711_v27 }
 0x841   : > { %4226 = vadd.xlane.f32.xlu2 %v4194_v12 }
 0x842   : > { %v4069_v52 = vpop.xlane.xlu1 %4068 }
 0x843   : > { %v4131_v43 = vmul.f32 %v4069_v52, %v9330_v9 }
 0x844   : > { %v4026_v32 = vpop.f32.mrf.mxu1 }
 0x845   : > { %v8721_v4 = vsub.f32 %v8593_v48, %v4131_v43  ;;  %v8723_v34 = vadd.f32 %v4026_v32, %v3938_v3  ;;  %v3947_v48 = vpop.f32.mrf.mxu0 }
 0x846   : > { %v3948_v59 = vadd.f32 %v3947_v48, %v8578_v10 }
 0x847   : > { %4098 = vadd.xlane.f32.xlu1 %v8723_v34  ;;  %v4195_v41 = vmul.f32 %v8721_v4, %v8721_v4 }
 0x849   : > { %4228 = vadd.xlane.f32.xlu0 %v4195_v41 }
 0x84a   : > { %v4071_v40 = vpop.xlane.xlu2 %4070 }
 0x84b   : > { %v4132_v35 = vmul.f32 %v4071_v40, %v9330_v9 }
 0x84c   : > { %v4028_v46 = vpop.f32.mrf.mxu1 }
 0x84d   : > { %v8731_v7 = vsub.f32 %v8598_v37, %v4132_v35  ;;  %v8733_v36 = vadd.f32 %v4028_v46, %v3940_v14  ;;  %v3949_v6 = vpop.f32.mrf.mxu0 }
 0x84e   : > { %v3950_v26 = vadd.f32 %v3949_v6, %v8578_v10 }
 0x84f   : > { %4100 = vadd.xlane.f32.xlu2 %v8733_v36  ;;  %v4196_v11 = vmul.f32 %v8731_v7, %v8731_v7 }
 0x851   : > { %4230 = vadd.xlane.f32.xlu1 %v4196_v11 }
 0x852   : > { %v4073_v58 = vpop.xlane.xlu0 %4072 }
 0x853   : > { %v4133_v62 = vmul.f32 %v4073_v58, %v9330_v9 }
 0x854   : > { %v4031_v18 = vpop.f32.mrf.mxu1 }
 0x855   : > { %v8741_v49 = vsub.f32 %v8611_v50, %v4133_v62  ;;  %v8743_v37 = vadd.f32 %v4031_v18, %v3943_v56  ;;  %v3952_v30 = vpop.f32.mrf.mxu0 }
 0x856   : > { %v3953_v16 = vadd.f32 %v3952_v30, %v8578_v10 }
 0x857   : > { %4102 = vadd.xlane.f32.xlu0 %v8743_v37  ;;  %v4197_v25 = vmul.f32 %v8741_v49, %v8741_v49 }
 0x859   : > { %4232 = vadd.xlane.f32.xlu2 %v4197_v25 }
 0x85a   : > { %v4075_v21 = vpop.xlane.xlu1 %4074 }
 0x85b   : > { %v4134_v28 = vmul.f32 %v4075_v21, %v9330_v9 }
 0x85c   : > { %v4033_v20 = vpop.f32.mrf.mxu1 }
 0x85d   : > { %v8751_v63 = vsub.f32 %v8618_v8, %v4134_v28  ;;  %v8753_v50 = vadd.f32 %v4033_v20, %v3945_v23  ;;  %v3954_v53 = vpop.f32.mrf.mxu0 }
 0x85e   : > { %v3955_v41 = vadd.f32 %v3954_v53, %v8578_v10 }
 0x85f   : > { %4104 = vadd.xlane.f32.xlu1 %v8753_v50  ;;  %v4198_v1 = vmul.f32 %v8751_v63, %v8751_v63 }
 0x861   : > { %4234 = vadd.xlane.f32.xlu0 %v4198_v1 }
 0x862   : > { %v4077_v24 = vpop.xlane.xlu2 %4076 }
 0x863   : > { %v4135_v0 = vmul.f32 %v4077_v24, %v9330_v9 }
 0x864   : > { %v4036_v39 = vpop.f32.mrf.mxu1 }
 0x865   : > { %v8761_v19 = vsub.f32 %v8631_v31, %v4135_v0  ;;  %v8763_v8 = vadd.f32 %v4036_v39, %v3948_v59  ;;  %v3957_v52 = vpop.f32.mrf.mxu0 }
 0x866   : > { %v3958_v58 = vadd.f32 %v3957_v52, %v8578_v10 }
 0x867   : > { %4106 = vadd.xlane.f32.xlu2 %v8763_v8  ;;  %v4199_v5 = vmul.f32 %v8761_v19, %v8761_v19 }
 0x869   : > { %4236 = vadd.xlane.f32.xlu1 %v4199_v5 }
 0x86a   : > { %v4079_v60 = vpop.xlane.xlu0 %4078 }
 0x86b   : > { %v4136_v22 = vmul.f32 %v4079_v60, %v9330_v9 }
 0x86c   : > { %v4038_v47 = vpop.f32.mrf.mxu1 }
 0x86d   : > { %v8771_v17 = vsub.f32 %v8636_v55, %v4136_v22  ;;  %v8773_v31 = vadd.f32 %v4038_v47, %v3950_v26 }
 0x86f   : > { %4108 = vadd.xlane.f32.xlu0 %v8773_v31  ;;  %v4200_v42 = vmul.f32 %v8771_v17, %v8771_v17 }
 0x871   : > { %4238 = vadd.xlane.f32.xlu2 %v4200_v42 }
 0x872   : > { %v4081_v44 = vpop.xlane.xlu1 %4080 }
 0x873   : > { %v4137_v12 = vmul.f32 %v4081_v44, %v9330_v9 }
 0x874   : > { %v4041_v3 = vpop.f32.mrf.mxu1 }
 0x875   : > { %v8781_v43 = vsub.f32 %v8649_v13, %v4137_v12  ;;  %v8783_v55 = vadd.f32 %v4041_v3, %v3953_v16  ;;  %v3959_v13 = vpop.f32.mrf.mxu0 }
 0x876   : > { %v3960_v23 = vadd.f32 %v3959_v13, %v8578_v10 }
 0x877   : > { %4110 = vadd.xlane.f32.xlu1 %v8783_v55  ;;  %v4201_v2 = vmul.f32 %v8781_v43, %v8781_v43 }
 0x879   : > { %4240 = vadd.xlane.f32.xlu0 %v4201_v2 }
 0x87a   : > { %v4083_v32 = vpop.xlane.xlu2 %4082 }
 0x87b   : > { %v4138_v40 = vmul.f32 %v4083_v32, %v9330_v9 }
 0x87c   : > { %v4043_v14 = vpop.f32.mrf.mxu1 }
 0x87d   : > { %v8791_v35 = vsub.f32 %v8656_v15, %v4138_v40  ;;  %v8793_v46 = vadd.f32 %v4043_v14, %v3955_v41  ;;  %v3962_v6 = vpop.f32.mrf.mxu0 }
 0x87e   : > { %v3963_v0 = vadd.f32 %v3962_v6, %v8578_v10 }
 0x87f   : > { %4112 = vadd.xlane.f32.xlu2 %v8793_v46  ;;  %v4202_v48 = vmul.f32 %v8791_v35, %v8791_v35 }
 0x881   : > { %4242 = vadd.xlane.f32.xlu1 %v4202_v48 }
 0x882   : > { %v4085_v11 = vpop.xlane.xlu0 %4084 }
 0x883   : > { %v4139_v56 = vmul.f32 %v4085_v11, %v9330_v9 }
 0x884   : > { %v4046_v62 = vpop.f32.mrf.mxu1 }
 0x885   : > { %v8801_v18 = vsub.f32 %v8669_v57, %v4139_v56  ;;  %v8803_v15 = vadd.f32 %v4046_v62, %v3958_v58  ;;  %v3964_v24 = vpop.f32.mrf.mxu0 }
 0x886   : > { %v3965_v22 = vadd.f32 %v3964_v24, %v8578_v10 }
 0x887   : > { %4114 = vadd.xlane.f32.xlu0 %v8803_v15  ;;  %v4203_v25 = vmul.f32 %v8801_v18, %v8801_v18 }
 0x889   : > { %4244 = vadd.xlane.f32.xlu2 %v4203_v25 }
 0x88a   : > { %v4087_v21 = vpop.xlane.xlu1 %4086 }
 0x88b   : > { %v4140_v28 = vmul.f32 %v4087_v21, %v9330_v9 }
 0x88c   : > { %v4048_v20 = vpop.f32.mrf.mxu1 }
 0x88d   : > { %v8811_v1 = vsub.f32 %v8674_v29, %v4140_v28  ;;  %v8813_v57 = vadd.f32 %v4048_v20, %v3960_v23  ;;  %v3967_v42 = vpop.f32.mrf.mxu0 }
 0x88e   : > { %v3968_v3 = vadd.f32 %v3967_v42, %v8578_v10 }
 0x88f   : > { %4116 = vadd.xlane.f32.xlu1 %v8813_v57  ;;  %v4204_v30 = vmul.f32 %v8811_v1, %v8811_v1 }
 0x891   : > { %4246 = vadd.xlane.f32.xlu0 %v4204_v30 }
 0x892   : > { %v4089_v59 = vpop.xlane.xlu2 %4088 }
 0x893   : > { %v4141_v39 = vmul.f32 %v4089_v59, %v9330_v9 }
 0x894   : > { %v4051_v5 = vpop.f32.mrf.mxu1 }
 0x895   : > { %v8821_v53 = vsub.f32 %v8685_v54, %v4141_v39  ;;  %v8823_v29 = vadd.f32 %v4051_v5, %v3963_v0 }
 0x897   : > { %4118 = vadd.xlane.f32.xlu2 %v8823_v29  ;;  %v4205_v60 = vmul.f32 %v8821_v53, %v8821_v53 }
 0x899   : > { %4248 = vadd.xlane.f32.xlu1 %v4205_v60 }
 0x89a   : > { %v4091_v26 = vpop.xlane.xlu0 %4090 }
 0x89b   : > { %v4142_v47 = vmul.f32 %v4091_v26, %v9330_v9 }
 0x89c   : > { %v4053_v44 = vpop.f32.mrf.mxu1 }
 0x89d   : > { %v8831_v16 = vsub.f32 %v8690_v33, %v4142_v47  ;;  %v8833_v54 = vadd.f32 %v4053_v44, %v3965_v22  ;;  %v3969_v33 = vpop.f32.mrf.mxu0 }
 0x89e   : > { %v3970_v13 = vadd.f32 %v3969_v33, %v8578_v10 }
 0x89f   : > { %4120 = vadd.xlane.f32.xlu0 %v8833_v54  ;;  %v4206_v12 = vmul.f32 %v8831_v16, %v8831_v16 }
 0x8a1   : > { %4250 = vadd.xlane.f32.xlu2 %v4206_v12 }
 0x8a2   : > { %v4093_v52 = vpop.xlane.xlu1 %4092 }
 0x8a3   : > { %v4143_v2 = vmul.f32 %v4093_v52, %v9330_v9 }
 0x8a4   : > { %v4056_v32 = vpop.f32.mrf.mxu1 }
 0x8a5   : > { %v8841_v41 = vsub.f32 %v8701_v51, %v4143_v2  ;;  %v8843_v40 = vadd.f32 %v4056_v32, %v3968_v3  ;;  %v3972_v56 = vpop.f32.mrf.mxu0 }
 0x8a6   : > { %v3973_v62 = vadd.f32 %v3972_v56, %v8578_v10 }
 0x8a7   : > { %4122 = vadd.xlane.f32.xlu1 %v8843_v40  ;;  %v4207_v14 = vmul.f32 %v8841_v41, %v8841_v41 }
 0x8a9   : > { %4252 = vadd.xlane.f32.xlu0 %v4207_v14 }
 0x8aa   : > { %v4095_v48 = vpop.xlane.xlu2 %4094 }
 0x8ab   : > { %v4144_v26 = vmul.f32 %v4095_v48, %v9330_v9 }
 0x8ac   : > { %v4058_v11 = vpop.f32.mrf.mxu1 }
 0x8ad   : > { %v8849_v58 = vadd.f32 %v4058_v11, %v3970_v13  ;;  %v3974_v59 = vpop.f32.mrf.mxu0  ;;  %v8876_v3 = vsub.f32 %v8705_v61, %v4144_v26 }
 0x8ae   : > { %v3975_v39 = vadd.f32 %v3974_v59, %v8578_v10  ;;  %v8889_v59 = vperm.slane %v8575_v45, 2 }
 0x8af   : > { %4124 = vadd.xlane.f32.xlu2 %v8849_v58  ;;  %v4208_v48 = vmul.f32 %v8876_v3, %v8876_v3 }
 0x8b2   : > { %v4097_v51 = vpop.xlane.xlu0 %4096 }
 0x8b3   : > { %v4145_v25 = vmul.f32 %v4097_v51, %v9330_v9 }
 0x8b4   : > { %v4061_v6 = vpop.f32.mrf.mxu1  ;;  %v4227_v21 = vpop.xlane.xlu2 %4226 }
 0x8b5   : > { %v8855_v23 = vsub.f32 %v8713_v38, %v4145_v25  ;;  %v8857_v28 = vadd.f32 %v4061_v6, %v3973_v62  ;;  %v4290_v20 = vmul.f32 %v4227_v21, %v9330_v9  ;;  %v8883_v25 = vperm.slane %v8575_v45, 1 }
 0x8b7   : > { %v4322_v30 = vadd.f32 1e-05, %v4290_v20  ;;  %4126 = vadd.xlane.f32.xlu0 %v8857_v28  ;;  %v4209_v24 = vmul.f32 %v8855_v23, %v8855_v23 }
 0x8b9   : > { %5785 = vrsqrt.f32 %v4322_v30  ;;  %4256 = vadd.xlane.f32.xlu2 %v4209_v24  ;;  %vm4360_vm8 = vweird.f32 %v4322_v30 }
 0x8ba   : > { %v4099_v0 = vpop.xlane.xlu1 %4098 }
 0x8bb   : > { %v4146_v5 = vmul.f32 %v4099_v0, %v9330_v9 }
 0x8bc   : > { %v4229_v38 = vpop.xlane.xlu0 %4228  ;;  %v4063_v60 = vpop.f32.mrf.mxu1 }
 0x8bd   : > { %v8867_v22 = vsub.f32 %v8723_v34, %v4146_v5  ;;  %v4291_v47 = vmul.f32 %v4229_v38, %v9330_v9  ;;  %v8870_v42 = vadd.f32 %v4063_v60, %v3975_v39 }
 0x8bf   : > { %v5786_v44 = vpop.eup %5785  ;;  %v4323_v12 = vadd.f32 1e-05, %v4291_v47  ;;  %4128 = vadd.xlane.f32.xlu1 %v8870_v42  ;;  %v4210_v10 = vmul.f32 %v8867_v22, %v8867_v22 }
 0x8c0   : > { %v4355_v52 = vmul.f32 %v5786_v44, %v4322_v30  ;;  %vm4361_vm0 = vweird.f32 %v5786_v44 }
 0x8c1   : > { %5787 = vrsqrt.f32 %v4323_v12  ;;  %4258 = vadd.xlane.f32.xlu0 %v4210_v10  ;;  %vm4362_vm9 = vmor %vm4360_vm8, %vm4361_vm0  ;;  %vm4370_vm11 = vweird.f32 %v4323_v12 }
 0x8c2   : > { %v4356_v2 = vmul.f32 %v5786_v44, %v4355_v52  ;;  %v4101_v34 = vpop.xlane.xlu2 %4100 }
 0x8c3   : > { %v4147_v14 = vmul.f32 %v4101_v34, %v9330_v9 }
 0x8c4   : > { %v4357_v32 = vmul.f32 0.5, %v4356_v2  ;;  %v4231_v33 = vpop.xlane.xlu1 %4230 }
 0x8c5   : > { %v4292_v13 = vmul.f32 %v4231_v33, %v9330_v9  ;;  %v8886_v6 = vsub.f32 %v8733_v36, %v4147_v14 }
 0x8c6   : > { %v4358_v11 = vsub.f32 1.5, %v4357_v32 }
 0x8c7   : > { %v5788_v56 = vpop.eup %5787  ;;  %v4324_v51 = vadd.f32 1e-05, %v4292_v13  ;;  %4254 = vadd.xlane.f32.xlu1 %v4208_v48  ;;  %v4211_v26 = vmul.f32 %v8886_v6, %v8886_v6 }
 0x8c8   : > { %v4359_v61 = vmul.f32 %v5786_v44, %v4358_v11  ;;  %v4365_v62 = vmul.f32 %v5788_v56, %v4323_v12  ;;  %vm4371_vm10 = vweird.f32 %v5788_v56 }
 0x8c9   : > { %5789 = vrsqrt.f32 %v4324_v51  ;;  %vm4372_vm12 = vmor %vm4370_vm11, %vm4371_vm10  ;;  %vm4380_vm14 = vweird.f32 %v4324_v51 }
 0x8ca   : > { %v4363_v21 = vsel %vm4362_vm9, %v5786_v44, %v4359_v61  ;;  %v4366_v20 = vmul.f32 %v5788_v56, %v4365_v62  ;;  %v4103_v24 = vpop.xlane.xlu0 %4102 }
 0x8cb   : > { %v4674_v0 = vmul.f32 %v4363_v21, %v8711_v27  ;;  %v4148_v39 = vmul.f32 %v4103_v24, %v9330_v9 }
 0x8cc   : > { %v4367_v30 = vmul.f32 0.5, %v4366_v20  ;;  %v4233_v5 = vpop.xlane.xlu2 %4232 }
 0x8cd   : > { %v4707_v38 = vmul.f32 %v8883_v25, %v4674_v0  ;;  %v8895_v60 = vsub.f32 %v8743_v37, %v4148_v39  ;;  %v4293_v36 = vmul.f32 %v4233_v5, %v9330_v9 }
 0x8ce   : > { %v4368_v47 = vsub.f32 1.5, %v4367_v30 }
 0x8cf   : > { %v5790_v45 = vpop.eup %5789  ;;  %v4740_v27 = vadd.f32 %v8889_v59, %v4707_v38  ;;  %v4325_v44 = vadd.f32 1e-05, %v4293_v36  ;;  %4260 = vadd.xlane.f32.xlu1 %v4211_v26  ;;  %v4212_v10 = vmul.f32 %v8895_v60, %v8895_v60 }
 0x8d0   : > { %v4369_v52 = vmul.f32 %v5788_v56, %v4368_v47  ;;  %v4375_v2 = vmul.f32 %v5790_v45, %v4324_v51  ;;  %vm4381_vm13 = vweird.f32 %v5790_v45 }
 0x8d1   : > { %4772 = vst [vmem:[%s8905_s6] sm:$0xff] %v4740_v27  ;;  %5791 = vrsqrt.f32 %v4325_v44  ;;  %4262 = vadd.xlane.f32.xlu2 %v4212_v10  ;;  %vm4382_vm15 = vmor %vm4380_vm14, %vm4381_vm13  ;;  %vm4390_vm2 = vweird.f32 %v4325_v44 }
 0x8d2   : > { %v4373_v37 = vsel %vm4372_vm12, %v5788_v56, %v4369_v52  ;;  %v4376_v34 = vmul.f32 %v5790_v45, %v4375_v2  ;;  %v4105_v32 = vpop.xlane.xlu1 %4104 }
 0x8d3   : > { %v4675_v33 = vmul.f32 %v4373_v37, %v8721_v4  ;;  %v4149_v14 = vmul.f32 %v4105_v32, %v9330_v9 }
 0x8d4   : > { %v4377_v13 = vmul.f32 0.5, %v4376_v34  ;;  %v4235_v48 = vpop.xlane.xlu0 %4234 }
 0x8d5   : > { %v4708_v12 = vmul.f32 %v8883_v25, %v4675_v33  ;;  %v8912_v11 = vsub.f32 %v8753_v50, %v4149_v14  ;;  %v4294_v61 = vmul.f32 %v4235_v48, %v9330_v9 }
 0x8d6   : > { %v4378_v62 = vsub.f32 1.5, %v4377_v13 }
 0x8d7   : > { %v5792_v21 = vpop.eup %5791  ;;  %v4741_v56 = vadd.f32 %v8889_v59, %v4708_v12  ;;  %v4326_v20 = vadd.f32 1e-05, %v4294_v61  ;;  %v4213_v4 = vmul.f32 %v8912_v11, %v8912_v11 }
 0x8d8   : > { %v4379_v24 = vmul.f32 %v5790_v45, %v4378_v62  ;;  %v4385_v0 = vmul.f32 %v5792_v21, %v4325_v44  ;;  %vm4391_vm1 = vweird.f32 %v5792_v21 }
 0x8d9   : > { %4773 = vst [vmem:[%s8905_s6 + $0x8] sm:$0xff] %v4741_v56  ;;  %5793 = vrsqrt.f32 %v4326_v20  ;;  %4264 = vadd.xlane.f32.xlu0 %v4213_v4  ;;  %vm4392_vm3 = vmor %vm4390_vm2, %vm4391_vm1  ;;  %vm4400_vm5 = vweird.f32 %v4326_v20 }
 0x8da   : > { %v4383_v50 = vsel %vm4382_vm15, %v5790_v45, %v4379_v24  ;;  %v4386_v39 = vmul.f32 %v5792_v21, %v4385_v0  ;;  %v4107_v30 = vpop.xlane.xlu2 %4106 }
 0x8db   : > { %v4676_v5 = vmul.f32 %v4383_v50, %v8731_v7  ;;  %v4150_v38 = vmul.f32 %v4107_v30, %v9330_v9 }
 0x8dc   : > { %v4387_v36 = vmul.f32 0.5, %v4386_v39  ;;  %v4237_v26 = vpop.xlane.xlu1 %4236 }
 0x8dd   : > { %v4709_v47 = vmul.f32 %v8883_v25, %v4676_v5  ;;  %v8923_v27 = vsub.f32 %v8763_v8, %v4150_v38  ;;  %v4295_v51 = vmul.f32 %v4237_v26, %v9330_v9 }
 0x8de   : > { %v4388_v10 = vsub.f32 1.5, %v4387_v36 }
 0x8df   : > { %v5794_v52 = vpop.eup %5793  ;;  %v4742_v45 = vadd.f32 %v8889_v59, %v4709_v47  ;;  %v4327_v2 = vadd.f32 1e-05, %v4295_v51  ;;  %v4214_v7 = vmul.f32 %v8923_v27, %v8923_v27 }
 0x8e0   : > { %v4389_v37 = vmul.f32 %v5792_v21, %v4388_v10  ;;  %v4395_v34 = vmul.f32 %v5794_v52, %v4326_v20  ;;  %vm4401_vm4 = vweird.f32 %v5794_v52 }
 0x8e1   : > { %4774 = vst [vmem:[%s8905_s6 + $0x10] sm:$0xff] %v4742_v45  ;;  %5795 = vrsqrt.f32 %v4327_v2  ;;  %4266 = vadd.xlane.f32.xlu1 %v4214_v7  ;;  %vm4402_vm6 = vmor %vm4400_vm5, %vm4401_vm4  ;;  %vm4410_vm0 = vweird.f32 %v4327_v2 }
 0x8e2   : > { %v4393_v8 = vsel %vm4392_vm3, %v5792_v21, %v4389_v37  ;;  %v4396_v32 = vmul.f32 %v5794_v52, %v4395_v34  ;;  %v4109_v33 = vpop.xlane.xlu0 %4108 }
 0x8e3   : > { %v4677_v14 = vmul.f32 %v4393_v8, %v8741_v49  ;;  %v4151_v13 = vmul.f32 %v4109_v33, %v9330_v9 }
 0x8e4   : > { %v4397_v48 = vmul.f32 0.5, %v4396_v32  ;;  %v4239_v12 = vpop.xlane.xlu2 %4238 }
 0x8e5   : > { %v4710_v61 = vmul.f32 %v8883_v25, %v4677_v14  ;;  %v8934_v62 = vsub.f32 %v8773_v31, %v4151_v13  ;;  %v4296_v44 = vmul.f32 %v4239_v12, %v9330_v9 }
 0x8e6   : > { %v4398_v56 = vsub.f32 1.5, %v4397_v48 }
 0x8e7   : > { %v5796_v4 = vpop.eup %5795  ;;  %v4743_v21 = vadd.f32 %v8889_v59, %v4710_v61  ;;  %v4328_v24 = vadd.f32 1e-05, %v4296_v44  ;;  %v4215_v49 = vmul.f32 %v8934_v62, %v8934_v62 }
 0x8e8   : > { %v4399_v0 = vmul.f32 %v5794_v52, %v4398_v56  ;;  %v4405_v50 = vmul.f32 %v5796_v4, %v4327_v2  ;;  %vm4411_vm7 = vweird.f32 %v5796_v4 }
 0x8e9   : > { %4775 = vst [vmem:[%s8905_s6 + $0x18] sm:$0xff] %v4743_v21  ;;  %5797 = vrsqrt.f32 %v4328_v24  ;;  %4268 = vadd.xlane.f32.xlu2 %v4215_v49  ;;  %vm4412_vm8 = vmor %vm4410_vm0, %vm4411_vm7  ;;  %vm4420_vm10 = vweird.f32 %v4328_v24 }
 0x8ea   : > { %v4403_v31 = vsel %vm4402_vm6, %v5794_v52, %v4399_v0  ;;  %v4406_v39 = vmul.f32 %v5796_v4, %v4405_v50  ;;  %v4111_v30 = vpop.xlane.xlu1 %4110 }
 0x8eb   : > { %v4678_v5 = vmul.f32 %v4403_v31, %v8751_v63  ;;  %v4152_v38 = vmul.f32 %v4111_v30, %v9330_v9 }
 0x8ec   : > { %v4407_v36 = vmul.f32 0.5, %v4406_v39  ;;  %v4241_v26 = vpop.xlane.xlu0 %4240 }
 0x8ed   : > { %v4711_v47 = vmul.f32 %v8883_v25, %v4678_v5  ;;  %v8945_v51 = vsub.f32 %v8783_v55, %v4152_v38  ;;  %v4297_v20 = vmul.f32 %v4241_v26, %v9330_v9 }
 0x8ee   : > { %v4408_v10 = vsub.f32 1.5, %v4407_v36 }
 0x8ef   : > { %v5798_v45 = vpop.eup %5797  ;;  %v4744_v52 = vadd.f32 %v8889_v59, %v4711_v47  ;;  %v4329_v7 = vadd.f32 1e-05, %v4297_v20  ;;  %v4216_v63 = vmul.f32 %v8945_v51, %v8945_v51 }
 0x8f0   : > { %v4409_v37 = vmul.f32 %v5796_v4, %v4408_v10  ;;  %v4415_v34 = vmul.f32 %v5798_v45, %v4328_v24  ;;  %vm4421_vm9 = vweird.f32 %v5798_v45 }
 0x8f1   : > { %4776 = vst [vmem:[%s8905_s6 + $0x20] sm:$0xff] %v4744_v52  ;;  %5799 = vrsqrt.f32 %v4329_v7  ;;  %4270 = vadd.xlane.f32.xlu0 %v4216_v63  ;;  %vm4422_vm11 = vmor %vm4420_vm10, %vm4421_vm9  ;;  %vm4430_vm13 = vweird.f32 %v4329_v7 }
 0x8f2   : > { %v4413_v55 = vsel %vm4412_vm8, %v5796_v4, %v4409_v37  ;;  %v4416_v8 = vmul.f32 %v5798_v45, %v4415_v34  ;;  %v4113_v32 = vpop.xlane.xlu2 %4112 }
 0x8f3   : > { %v4679_v33 = vmul.f32 %v4413_v55, %v8761_v19  ;;  %v4153_v14 = vmul.f32 %v4113_v32, %v9330_v9 }
 0x8f4   : > { %v4417_v13 = vmul.f32 0.5, %v4416_v8  ;;  %v4243_v48 = vpop.xlane.xlu1 %4242 }
 0x8f5   : > { %v4712_v12 = vmul.f32 %v8883_v25, %v4679_v33  ;;  %v8956_v61 = vsub.f32 %v8793_v46, %v4153_v14  ;;  %v4298_v2 = vmul.f32 %v4243_v48, %v9330_v9 }
 0x8f6   : > { %v4418_v44 = vsub.f32 1.5, %v4417_v13 }
 0x8f7   : > { %v5800_v56 = vpop.eup %5799  ;;  %v4745_v4 = vadd.f32 %v8889_v59, %v4712_v12  ;;  %v4330_v21 = vadd.f32 1e-05, %v4298_v2  ;;  %v4217_v19 = vmul.f32 %v8956_v61, %v8956_v61 }
 0x8f8   : > { %v4419_v49 = vmul.f32 %v5798_v45, %v4418_v44  ;;  %v4425_v0 = vmul.f32 %v5800_v56, %v4329_v7  ;;  %vm4431_vm12 = vweird.f32 %v5800_v56 }
 0x8f9   : > { %4777 = vst [vmem:[%s8905_s6 + $0x28] sm:$0xff] %v4745_v4  ;;  %5801 = vrsqrt.f32 %v4330_v21  ;;  %4272 = vadd.xlane.f32.xlu1 %v4217_v19  ;;  %vm4432_vm14 = vmor %vm4430_vm13, %vm4431_vm12  ;;  %vm4440_vm1 = vweird.f32 %v4330_v21 }
 0x8fa   : > { %v4423_v46 = vsel %vm4422_vm11, %v5798_v45, %v4419_v49  ;;  %v4426_v50 = vmul.f32 %v5800_v56, %v4425_v0  ;;  %v4115_v31 = vpop.xlane.xlu0 %4114 }
 0x8fb   : > { %v4680_v39 = vmul.f32 %v4423_v46, %v8771_v17  ;;  %v4154_v30 = vmul.f32 %v4115_v31, %v9330_v9 }
 0x8fc   : > { %v4427_v5 = vmul.f32 0.5, %v4426_v50  ;;  %v4245_v38 = vpop.xlane.xlu2 %4244 }
 0x8fd   : > { %v4713_v36 = vmul.f32 %v8883_v25, %v4680_v39  ;;  %v8967_v26 = vsub.f32 %v8803_v15, %v4154_v30  ;;  %v4299_v24 = vmul.f32 %v4245_v38, %v9330_v9 }
 0x8fe   : > { %v4428_v47 = vsub.f32 1.5, %v4427_v5 }
 0x8ff   : > { %v5802_v20 = vpop.eup %5801  ;;  %v4746_v10 = vadd.f32 %v8889_v59, %v4713_v36  ;;  %v4331_v45 = vadd.f32 1e-05, %v4299_v24  ;;  %v4218_v17 = vmul.f32 %v8967_v26, %v8967_v26 }
 0x900   : > { %v4429_v52 = vmul.f32 %v5800_v56, %v4428_v47  ;;  %v4435_v63 = vmul.f32 %v5802_v20, %v4330_v21  ;;  %vm4441_vm15 = vweird.f32 %v5802_v20 }
 0x901   : > { %4778 = vst [vmem:[%s8905_s6 + $0x30] sm:$0xff] %v4746_v10  ;;  %5803 = vrsqrt.f32 %v4331_v45  ;;  %4274 = vadd.xlane.f32.xlu2 %v4218_v17  ;;  %vm4442_vm2 = vmor %vm4440_vm1, %vm4441_vm15  ;;  %vm4450_vm4 = vweird.f32 %v4331_v45 }
 0x902   : > { %v4433_v15 = vsel %vm4432_vm14, %v5800_v56, %v4429_v52  ;;  %v4436_v37 = vmul.f32 %v5802_v20, %v4435_v63  ;;  %v4117_v34 = vpop.xlane.xlu1 %4116 }
 0x903   : > { %v4681_v55 = vmul.f32 %v4433_v15, %v8781_v43  ;;  %v4155_v8 = vmul.f32 %v4117_v34, %v9330_v9 }
 0x904   : > { %v4437_v32 = vmul.f32 0.5, %v4436_v37  ;;  %v4247_v33 = vpop.xlane.xlu0 %4246 }
 0x905   : > { %v4714_v14 = vmul.f32 %v8883_v25, %v4681_v55  ;;  %v8978_v13 = vsub.f32 %v8813_v57, %v4155_v8  ;;  %v4300_v7 = vmul.f32 %v4247_v33, %v9330_v9 }
 0x906   : > { %v4438_v48 = vsub.f32 1.5, %v4437_v32 }
 0x907   : > { %v5804_v12 = vpop.eup %5803  ;;  %v4747_v2 = vadd.f32 %v8889_v59, %v4714_v14  ;;  %v4332_v44 = vadd.f32 1e-05, %v4300_v7  ;;  %v4219_v43 = vmul.f32 %v8978_v13, %v8978_v13 }
 0x908   : > { %v4439_v56 = vmul.f32 %v5802_v20, %v4438_v48  ;;  %v4445_v4 = vmul.f32 %v5804_v12, %v4331_v45  ;;  %vm4451_vm3 = vweird.f32 %v5804_v12 }
 0x909   : > { %4779 = vst [vmem:[%s8905_s6 + $0x38] sm:$0xff] %v4747_v2  ;;  %5805 = vrsqrt.f32 %v4332_v44  ;;  %4276 = vadd.xlane.f32.xlu0 %v4219_v43  ;;  %vm4452_vm5 = vmor %vm4450_vm4, %vm4451_vm3  ;;  %vm4460_vm7 = vweird.f32 %v4332_v44 }
 0x90a   : > { %v4443_v57 = vsel %vm4442_vm2, %v5802_v20, %v4439_v56  ;;  %v4446_v19 = vmul.f32 %v5804_v12, %v4445_v4  ;;  %v4119_v49 = vpop.xlane.xlu2 %4118 }
 0x90b   : > { %v4682_v0 = vmul.f32 %v4443_v57, %v8791_v35  ;;  %v4156_v46 = vmul.f32 %v4119_v49, %v9330_v9 }
 0x90c   : > { %v4447_v50 = vmul.f32 0.5, %v4446_v19  ;;  %v4249_v31 = vpop.xlane.xlu1 %4248 }
 0x90d   : > { %v4715_v39 = vmul.f32 %v8883_v25, %v4682_v0  ;;  %v8989_v30 = vsub.f32 %v8823_v29, %v4156_v46  ;;  %v4301_v21 = vmul.f32 %v4249_v31, %v9330_v9 }
 0x90e   : > { %v4448_v5 = vsub.f32 1.5, %v4447_v50 }
 0x90f   : > { %v5806_v38 = vpop.eup %5805  ;;  %v4748_v36 = vadd.f32 %v8889_v59, %v4715_v39  ;;  %v4333_v24 = vadd.f32 1e-05, %v4301_v21  ;;  %v4220_v35 = vmul.f32 %v8989_v30, %v8989_v30 }
 0x910   : > { %v4449_v47 = vmul.f32 %v5804_v12, %v4448_v5  ;;  %v4455_v20 = vmul.f32 %v5806_v38, %v4332_v44  ;;  %vm4461_vm6 = vweird.f32 %v5806_v38 }
 0x911   : > { %4780 = vst [vmem:[%s8905_s6 + $0x40] sm:$0xff] %v4748_v36  ;;  %5807 = vrsqrt.f32 %v4333_v24  ;;  %4278 = vadd.xlane.f32.xlu1 %v4220_v35  ;;  %vm4462_vm0 = vmor %vm4460_vm7, %vm4461_vm6  ;;  %vm4470_vm9 = vweird.f32 %v4333_v24 }
 0x912   : > { %v4453_v29 = vsel %vm4452_vm5, %v5804_v12, %v4449_v47  ;;  %v4456_v10 = vmul.f32 %v5806_v38, %v4455_v20  ;;  %v4121_v17 = vpop.xlane.xlu0 %4120 }
 0x913   : > { %v4683_v52 = vmul.f32 %v4453_v29, %v8801_v18  ;;  %v4157_v63 = vmul.f32 %v4121_v17, %v9330_v9 }
 0x914   : > { %v4457_v15 = vmul.f32 0.5, %v4456_v10  ;;  %v4251_v37 = vpop.xlane.xlu2 %4250 }
 0x915   : > { %v4716_v34 = vmul.f32 %v8883_v25, %v4683_v52  ;;  %v9000_v55 = vsub.f32 %v8833_v54, %v4157_v63  ;;  %v4302_v45 = vmul.f32 %v4251_v37, %v9330_v9 }
 0x916   : > { %v4458_v8 = vsub.f32 1.5, %v4457_v15 }
 0x917   : > { %v5808_v32 = vpop.eup %5807  ;;  %v4749_v33 = vadd.f32 %v8889_v59, %v4716_v34  ;;  %v4334_v14 = vadd.f32 1e-05, %v4302_v45  ;;  %v4221_v18 = vmul.f32 %v9000_v55, %v9000_v55 }
 0x918   : > { %v4459_v7 = vmul.f32 %v5806_v38, %v4458_v8  ;;  %v4465_v48 = vmul.f32 %v5808_v32, %v4333_v24  ;;  %vm4471_vm8 = vweird.f32 %v5808_v32 }
 0x919   : > { %4781 = vst [vmem:[%s8905_s6 + $0x48] sm:$0xff] %v4749_v33  ;;  %5809 = vrsqrt.f32 %v4334_v14  ;;  %4280 = vadd.xlane.f32.xlu2 %v4221_v18  ;;  %vm4472_vm10 = vmor %vm4470_vm9, %vm4471_vm8  ;;  %vm4480_vm12 = vweird.f32 %v4334_v14 }
 0x91a   : > { %v4463_v54 = vsel %vm4462_vm0, %v5806_v38, %v4459_v7  ;;  %v4466_v12 = vmul.f32 %v5808_v32, %v4465_v48  ;;  %v4123_v2 = vpop.xlane.xlu1 %4122 }
 0x91b   : > { %v4684_v43 = vmul.f32 %v4463_v54, %v8811_v1  ;;  %v4158_v56 = vmul.f32 %v4123_v2, %v9330_v9 }
 0x91c   : > { %v4467_v4 = vmul.f32 0.5, %v4466_v12  ;;  %v4253_v57 = vpop.xlane.xlu0 %4252 }
 0x91d   : > { %v4717_v19 = vmul.f32 %v8883_v25, %v4684_v43  ;;  %v9011_v49 = vsub.f32 %v8843_v40, %v4158_v56  ;;  %v4303_v44 = vmul.f32 %v4253_v57, %v9330_v9 }
 0x91e   : > { %v4468_v0 = vsub.f32 1.5, %v4467_v4 }
 0x91f   : > { %v5810_v46 = vpop.eup %5809  ;;  %v4750_v50 = vadd.f32 %v8889_v59, %v4717_v19  ;;  %v4335_v31 = vadd.f32 1e-05, %v4303_v44  ;;  %v4222_v1 = vmul.f32 %v9011_v49, %v9011_v49 }
 0x920   : > { %v4469_v39 = vmul.f32 %v5808_v32, %v4468_v0  ;;  %v4475_v21 = vmul.f32 %v5810_v46, %v4334_v14  ;;  %vm4481_vm11 = vweird.f32 %v5810_v46 }
 0x921   : > { %4782 = vst [vmem:[%s8905_s6 + $0x50] sm:$0xff] %v4750_v50  ;;  %5811 = vrsqrt.f32 %v4335_v31  ;;  %4282 = vadd.xlane.f32.xlu0 %v4222_v1  ;;  %vm4482_vm13 = vmor %vm4480_vm12, %vm4481_vm11  ;;  %vm4490_vm15 = vweird.f32 %v4335_v31 }
 0x922   : > { %v4473_v40 = vsel %vm4472_vm10, %v5808_v32, %v4469_v39  ;;  %v4476_v5 = vmul.f32 %v5810_v46, %v4475_v21  ;;  %v4125_v38 = vpop.xlane.xlu2 %4124 }
 0x923   : > { %v4685_v36 = vmul.f32 %v4473_v40, %v8821_v53  ;;  %v4159_v35 = vmul.f32 %v4125_v38, %v9330_v9 }
 0x924   : > { %v4477_v47 = vmul.f32 0.5, %v4476_v5 }
 0x925   : > { %v4718_v20 = vmul.f32 %v8883_v25, %v4685_v36  ;;  %v9022_v29 = vsub.f32 %v8849_v58, %v4159_v35 }
 0x926   : > { %v4478_v24 = vsub.f32 1.5, %v4477_v47 }
 0x927   : > { %v5812_v10 = vpop.eup %5811  ;;  %v4751_v17 = vadd.f32 %v8889_v59, %v4718_v20  ;;  %v4223_v52 = vmul.f32 %v9022_v29, %v9022_v29 }
 0x928   : > { %v4479_v63 = vmul.f32 %v5810_v46, %v4478_v24  ;;  %v4485_v15 = vmul.f32 %v5812_v10, %v4335_v31  ;;  %vm4491_vm14 = vweird.f32 %v5812_v10 }
 0x929   : > { %4783 = vst [vmem:[%s8905_s6 + $0x58] sm:$0xff] %v4751_v17  ;;  %4284 = vadd.xlane.f32.xlu1 %v4223_v52  ;;  %vm4492_vm1 = vmor %vm4490_vm15, %vm4491_vm14 }
 0x92a   : > { %v4483_v53 = vsel %vm4482_vm13, %v5810_v46, %v4479_v63  ;;  %v4486_v37 = vmul.f32 %v5812_v10, %v4485_v15  ;;  %v4127_v34 = vpop.xlane.xlu0 %4126 }
 0x92b   : > { %v4686_v58 = vmul.f32 %v4483_v53, %v8831_v16  ;;  %v4160_v45 = vmul.f32 %v4127_v34, %v9330_v9 }
 0x92c   : > { %v4487_v8 = vmul.f32 0.5, %v4486_v37  ;;  %v4257_v32 = vpop.xlane.xlu2 %4256 }
 0x92d   : > { %v4719_v33 = vmul.f32 %v8883_v25, %v4686_v58  ;;  %v9032_v18 = vsub.f32 %v8857_v28, %v4160_v45  ;;  %v4305_v14 = vmul.f32 %v4257_v32, %v9330_v9 }
 0x92e   : > { %v4488_v7 = vsub.f32 1.5, %v4487_v8 }
 0x92f   : > { %v4752_v48 = vadd.f32 %v8889_v59, %v4719_v33  ;;  %v4337_v54 = vadd.f32 1e-05, %v4305_v14  ;;  %v4224_v12 = vmul.f32 %v9032_v18, %v9032_v18 }
 0x930   : > { %v4489_v16 = vmul.f32 %v5812_v10, %v4488_v7 }
 0x931   : > { %4784 = vst [vmem:[%s8905_s6 + $0x60] sm:$0xff] %v4752_v48  ;;  %5813 = vrsqrt.f32 %v4337_v54  ;;  %4286 = vadd.xlane.f32.xlu2 %v4224_v12  ;;  %vm4510_vm3 = vweird.f32 %v4337_v54 }
 0x932   : > { %v4493_v2 = vsel %vm4492_vm1, %v5812_v10, %v4489_v16  ;;  %v4129_v28 = vpop.xlane.xlu1 %4128 }
 0x933   : > { %v4687_v43 = vmul.f32 %v4493_v2, %v8841_v41  ;;  %v4161_v56 = vmul.f32 %v4129_v28, %v9330_v9 }
 0x934   : > { %v4259_v4 = vpop.xlane.xlu0 %4258 }
 0x935   : > { %v4720_v57 = vmul.f32 %v8883_v25, %v4687_v43  ;;  %v9043_v19 = vsub.f32 %v8870_v42, %v4161_v56  ;;  %v4306_v44 = vmul.f32 %v4259_v4, %v9330_v9 }
 0x937   : > { %v5814_v0 = vpop.eup %5813  ;;  %v4753_v46 = vadd.f32 %v8889_v59, %v4720_v57  ;;  %v4338_v50 = vadd.f32 1e-05, %v4306_v44  ;;  %v4225_v31 = vmul.f32 %v9043_v19, %v9043_v19 }
 0x938   : > { %v4505_v1 = vmul.f32 %v5814_v0, %v4337_v54  ;;  %vm4511_vm2 = vweird.f32 %v5814_v0 }
 0x939   : > { %4785 = vst [vmem:[%s8905_s6 + $0x68] sm:$0xff] %v4753_v46  ;;  %5815 = vrsqrt.f32 %v4338_v50  ;;  %4288 = vadd.xlane.f32.xlu0 %v4225_v31  ;;  %vm4512_vm4 = vmor %vm4510_vm3, %vm4511_vm2  ;;  %vm4520_vm6 = vweird.f32 %v4338_v50 }
 0x93a   : > { %v4506_v41 = vmul.f32 %v5814_v0, %v4505_v1  ;;  %v4255_v39 = vpop.xlane.xlu1 %4254 }
 0x93b   : > { %v4304_v21 = vmul.f32 %v4255_v39, %v9330_v9 }
 0x93c   : > { %v4507_v40 = vmul.f32 0.5, %v4506_v41 }
 0x93d   : > { %v4336_v42 = vadd.f32 1e-05, %v4304_v21 }
 0x93e   : > { %v4508_v5 = vsub.f32 1.5, %v4507_v40 }
 0x93f   : > { %v5816_v38 = vpop.eup %5815  ;;  %5817 = vrsqrt.f32 %v4336_v42  ;;  %vm4500_vm8 = vweird.f32 %v4336_v42 }
 0x940   : > { %v4509_v36 = vmul.f32 %v5814_v0, %v4508_v5  ;;  %v4515_v35 = vmul.f32 %v5816_v38, %v4338_v50  ;;  %vm4521_vm5 = vweird.f32 %v5816_v38 }
 0x941   : > { %vm4522_vm7 = vmor %vm4520_vm6, %vm4521_vm5 }
 0x942   : > { %v4513_v47 = vsel %vm4512_vm4, %v5814_v0, %v4509_v36  ;;  %v4516_v20 = vmul.f32 %v5816_v38, %v4515_v35  ;;  %v4261_v24 = vpop.xlane.xlu1 %4260 }
 0x943   : > { %v4689_v10 = vmul.f32 %v4513_v47, %v8855_v23  ;;  %v4307_v17 = vmul.f32 %v4261_v24, %v9330_v9 }
 0x944   : > { %v4517_v52 = vmul.f32 0.5, %v4516_v20  ;;  %v4263_v63 = vpop.xlane.xlu2 %4262 }
 0x945   : > { %v5818_v15 = vpop.eup %5817  ;;  %v4722_v53 = vmul.f32 %v8883_v25, %v4689_v10  ;;  %v4339_v37 = vadd.f32 1e-05, %v4307_v17  ;;  %v4308_v34 = vmul.f32 %v4263_v63, %v9330_v9 }
 0x946   : > { %v4518_v58 = vsub.f32 1.5, %v4517_v52  ;;  %v4495_v45 = vmul.f32 %v5818_v15, %v4336_v42  ;;  %vm4501_vm0 = vweird.f32 %v5818_v15 }
 0x947   : > { %v4755_v8 = vadd.f32 %v8889_v59, %v4722_v53  ;;  %5819 = vrsqrt.f32 %v4339_v37  ;;  %v4340_v32 = vadd.f32 1e-05, %v4308_v34  ;;  %vm4502_vm9 = vmor %vm4500_vm8, %vm4501_vm0  ;;  %vm4530_vm11 = vweird.f32 %v4339_v37 }
 0x948   : > { %v4519_v33 = vmul.f32 %v5816_v38, %v4518_v58  ;;  %v4496_v23 = vmul.f32 %v5818_v15, %v4495_v45 }
 0x949   : > { %4787 = vst [vmem:[%s8905_s6 + $0x78] sm:$0xff] %v4755_v8  ;;  %5821 = vrsqrt.f32 %v4340_v32  ;;  %vm4540_vm14 = vweird.f32 %v4340_v32 }
 0x94a   : > { %v4523_v14 = vsel %vm4522_vm7, %v5816_v38, %v4519_v33  ;;  %v4497_v7 = vmul.f32 0.5, %v4496_v23 }
 0x94b   : > { %v4690_v48 = vmul.f32 %v4523_v14, %v8867_v22 }
 0x94c   : > { %v4498_v54 = vsub.f32 1.5, %v4497_v7  ;;  %v4265_v12 = vpop.xlane.xlu0 %4264 }
 0x94d   : > { %v5820_v16 = vpop.eup %5819  ;;  %v4723_v2 = vmul.f32 %v8883_v25, %v4690_v48  ;;  %v4309_v28 = vmul.f32 %v4265_v12, %v9330_v9 }
 0x94e   : > { %v4499_v43 = vmul.f32 %v5818_v15, %v4498_v54  ;;  %v4525_v56 = vmul.f32 %v5820_v16, %v4339_v37  ;;  %vm4531_vm10 = vweird.f32 %v5820_v16 }
 0x94f   : > { %v5822_v4 = vpop.eup %5821  ;;  %v4756_v57 = vadd.f32 %v8889_v59, %v4723_v2  ;;  %v4341_v44 = vadd.f32 1e-05, %v4309_v28  ;;  %vm4532_vm13 = vmor %vm4530_vm11, %vm4531_vm10 }
 0x950   : > { %v4503_v0 = vsel %vm4502_vm9, %v5818_v15, %v4499_v43  ;;  %v4526_v46 = vmul.f32 %v5820_v16, %v4525_v56  ;;  %v4535_v22 = vmul.f32 %v5822_v4, %v4340_v32  ;;  %vm4541_vm12 = vweird.f32 %v5822_v4 }
 0x951   : > { %4788 = vst [vmem:[%s8905_s6 + $0x80] sm:$0xff] %v4756_v57  ;;  %v4688_v50 = vmul.f32 %v4503_v0, %v8876_v3  ;;  %5823 = vrsqrt.f32 %v4341_v44  ;;  %vm4542_vm15 = vmor %vm4540_vm14, %vm4541_vm12  ;;  %vm4550_vm2 = vweird.f32 %v4341_v44 }
 0x952   : > { %v4527_v31 = vmul.f32 0.5, %v4526_v46  ;;  %v4536_v1 = vmul.f32 %v5822_v4, %v4535_v22 }
 0x953   : > { %v4721_v41 = vmul.f32 %v8883_v25, %v4688_v50 }
 0x954   : > { %v4528_v39 = vsub.f32 1.5, %v4527_v31  ;;  %v4537_v21 = vmul.f32 0.5, %v4536_v1  ;;  %v4267_v40 = vpop.xlane.xlu1 %4266 }
 0x955   : > { %v4754_v42 = vadd.f32 %v8889_v59, %v4721_v41  ;;  %v4310_v5 = vmul.f32 %v4267_v40, %v9330_v9 }
 0x956   : > { %v4529_v38 = vmul.f32 %v5820_v16, %v4528_v39  ;;  %v4538_v36 = vsub.f32 1.5, %v4537_v21 }
 0x957   : > { %v5824_v35 = vpop.eup %5823  ;;  %4786 = vst [vmem:[%s8905_s6 + $0x70] sm:$0xff] %v4754_v42  ;;  %v4342_v3 = vadd.f32 1e-05, %v4310_v5 }
 0x958   : > { %v4533_v47 = vsel %vm4532_vm13, %v5820_v16, %v4529_v38  ;;  %v4539_v20 = vmul.f32 %v5822_v4, %v4538_v36  ;;  %v4545_v24 = vmul.f32 %v5824_v35, %v4341_v44  ;;  %vm4551_vm1 = vweird.f32 %v5824_v35 }
 0x959   : > { %v4691_v10 = vmul.f32 %v4533_v47, %v8886_v6  ;;  %5825 = vrsqrt.f32 %v4342_v3  ;;  %vm4552_vm3 = vmor %vm4550_vm2, %vm4551_vm1  ;;  %vm4560_vm5 = vweird.f32 %v4342_v3 }
 0x95a   : > { %v4543_v17 = vsel %vm4542_vm15, %v5822_v4, %v4539_v20  ;;  %v4546_v52 = vmul.f32 %v5824_v35, %v4545_v24 }
 0x95b   : > { %v4724_v63 = vmul.f32 %v8883_v25, %v4691_v10  ;;  %v4692_v15 = vmul.f32 %v4543_v17, %v8895_v60 }
 0x95c   : > { %v4547_v53 = vmul.f32 0.5, %v4546_v52  ;;  %v4269_v37 = vpop.xlane.xlu2 %4268 }
 0x95d   : > { %v4757_v34 = vadd.f32 %v8889_v59, %v4724_v63  ;;  %v4725_v58 = vmul.f32 %v8883_v25, %v4692_v15  ;;  %v4311_v45 = vmul.f32 %v4269_v37, %v9330_v9 }
 0x95e   : > { %v4548_v8 = vsub.f32 1.5, %v4547_v53 }
 0x95f   : > { %v5826_v6 = vpop.eup %5825  ;;  %4789 = vst [vmem:[%s8905_s6 + $0x88] sm:$0xff] %v4757_v34  ;;  %v4758_v32 = vadd.f32 %v8889_v59, %v4725_v58  ;;  %v4343_v33 = vadd.f32 1e-05, %v4311_v45 }
 0x960   : > { %v4549_v23 = vmul.f32 %v5824_v35, %v4548_v8  ;;  %v4555_v14 = vmul.f32 %v5826_v6, %v4342_v3  ;;  %vm4561_vm4 = vweird.f32 %v5826_v6 }
 0x961   : > { %4790 = vst [vmem:[%s8905_s6 + $0x90] sm:$0xff] %v4758_v32  ;;  %5827 = vrsqrt.f32 %v4343_v33  ;;  %vm4562_vm6 = vmor %vm4560_vm5, %vm4561_vm4  ;;  %vm4570_vm0 = vweird.f32 %v4343_v33 }
 0x962   : > { %v4553_v60 = vsel %vm4552_vm3, %v5824_v35, %v4549_v23  ;;  %v4556_v7 = vmul.f32 %v5826_v6, %v4555_v14 }
 0x963   : > { %v4693_v48 = vmul.f32 %v4553_v60, %v8912_v11 }
 0x964   : > { %v4557_v54 = vmul.f32 0.5, %v4556_v7  ;;  %v4271_v12 = vpop.xlane.xlu0 %4270 }
 0x965   : > { %v4726_v16 = vmul.f32 %v8883_v25, %v4693_v48  ;;  %v4312_v2 = vmul.f32 %v4271_v12, %v9330_v9 }
 0x966   : > { %v4558_v28 = vsub.f32 1.5, %v4557_v54 }
 0x967   : > { %v5828_v43 = vpop.eup %5827  ;;  %v4759_v56 = vadd.f32 %v8889_v59, %v4726_v16  ;;  %v4344_v4 = vadd.f32 1e-05, %v4312_v2 }
 0x968   : > { %v4559_v57 = vmul.f32 %v5826_v6, %v4558_v28  ;;  %v4565_v44 = vmul.f32 %v5828_v43, %v4343_v33  ;;  %vm4571_vm7 = vweird.f32 %v5828_v43 }
 0x969   : > { %4791 = vst [vmem:[%s8905_s6 + $0x98] sm:$0xff] %v4759_v56  ;;  %5829 = vrsqrt.f32 %v4344_v4  ;;  %vm4572_vm8 = vmor %vm4570_vm0, %vm4571_vm7  ;;  %vm4580_vm10 = vweird.f32 %v4344_v4 }
 0x96a   : > { %v4563_v11 = vsel %vm4562_vm6, %v5826_v6, %v4559_v57  ;;  %v4566_v0 = vmul.f32 %v5828_v43, %v4565_v44 }
 0x96b   : > { %v4694_v46 = vmul.f32 %v4563_v11, %v8923_v27 }
 0x96c   : > { %v4567_v22 = vmul.f32 0.5, %v4566_v0  ;;  %v4273_v50 = vpop.xlane.xlu1 %4272 }
 0x96d   : > { %v4727_v31 = vmul.f32 %v8883_v25, %v4694_v46  ;;  %v4313_v1 = vmul.f32 %v4273_v50, %v9330_v9 }
 0x96e   : > { %v4568_v41 = vsub.f32 1.5, %v4567_v22 }
 0x96f   : > { %v5830_v39 = vpop.eup %5829  ;;  %v4760_v21 = vadd.f32 %v8889_v59, %v4727_v31  ;;  %v4345_v40 = vadd.f32 1e-05, %v4313_v1 }
 0x970   : > { %v4569_v42 = vmul.f32 %v5828_v43, %v4568_v41  ;;  %v4575_v5 = vmul.f32 %v5830_v39, %v4344_v4  ;;  %vm4581_vm9 = vweird.f32 %v5830_v39 }
 0x971   : > { %4792 = vst [vmem:[%s8905_s6 + $0xa0] sm:$0xff] %v4760_v21  ;;  %5831 = vrsqrt.f32 %v4345_v40  ;;  %vm4582_vm11 = vmor %vm4580_vm10, %vm4581_vm9  ;;  %vm4590_vm13 = vweird.f32 %v4345_v40 }
 0x972   : > { %v4573_v27 = vsel %vm4572_vm8, %v5828_v43, %v4569_v42  ;;  %v4576_v38 = vmul.f32 %v5830_v39, %v4575_v5 }
 0x973   : > { %v4695_v36 = vmul.f32 %v4573_v27, %v8934_v62 }
 0x974   : > { %v4577_v35 = vmul.f32 0.5, %v4576_v38  ;;  %v4275_v3 = vpop.xlane.xlu2 %4274 }
 0x975   : > { %v4728_v47 = vmul.f32 %v8883_v25, %v4695_v36  ;;  %v4314_v20 = vmul.f32 %v4275_v3, %v9330_v9 }
 0x976   : > { %v4578_v24 = vsub.f32 1.5, %v4577_v35 }
 0x977   : > { %v5832_v10 = vpop.eup %5831  ;;  %v4761_v17 = vadd.f32 %v8889_v59, %v4728_v47  ;;  %v4346_v52 = vadd.f32 1e-05, %v4314_v20 }
 0x978   : > { %v4579_v63 = vmul.f32 %v5830_v39, %v4578_v24  ;;  %v4585_v15 = vmul.f32 %v5832_v10, %v4345_v40  ;;  %vm4591_vm12 = vweird.f32 %v5832_v10 }
 0x979   : > { %4793 = vst [vmem:[%s8905_s6 + $0xa8] sm:$0xff] %v4761_v17  ;;  %5833 = vrsqrt.f32 %v4346_v52  ;;  %vm4592_vm14 = vmor %vm4590_vm13, %vm4591_vm12  ;;  %vm4600_vm1 = vweird.f32 %v4346_v52 }
 0x97a   : > { %v4583_v62 = vsel %vm4582_vm11, %v5830_v39, %v4579_v63  ;;  %v4586_v53 = vmul.f32 %v5832_v10, %v4585_v15 }
 0x97b   : > { %v4696_v37 = vmul.f32 %v4583_v62, %v8945_v51 }
 0x97c   : > { %v4587_v34 = vmul.f32 0.5, %v4586_v53  ;;  %v4277_v58 = vpop.xlane.xlu0 %4276 }
 0x97d   : > { %v4729_v45 = vmul.f32 %v8883_v25, %v4696_v37  ;;  %v4315_v8 = vmul.f32 %v4277_v58, %v9330_v9 }
 0x97e   : > { %v4588_v6 = vsub.f32 1.5, %v4587_v34 }
 0x97f   : > { %v5834_v32 = vpop.eup %5833  ;;  %v4762_v33 = vadd.f32 %v8889_v59, %v4729_v45  ;;  %v4347_v23 = vadd.f32 1e-05, %v4315_v8 }
 0x980   : > { %v4589_v14 = vmul.f32 %v5832_v10, %v4588_v6  ;;  %v4595_v60 = vmul.f32 %v5834_v32, %v4346_v52  ;;  %vm4601_vm15 = vweird.f32 %v5834_v32 }
 0x981   : > { %4794 = vst [vmem:[%s8905_s6 + $0xb0] sm:$0xff] %v4762_v33  ;;  %5835 = vrsqrt.f32 %v4347_v23  ;;  %vm4602_vm2 = vmor %vm4600_vm1, %vm4601_vm15  ;;  %vm4610_vm4 = vweird.f32 %v4347_v23 }
 0x982   : > { %v4593_v51 = vsel %vm4592_vm14, %v5832_v10, %v4589_v14  ;;  %v4596_v7 = vmul.f32 %v5834_v32, %v4595_v60 }
 0x983   : > { %v4697_v48 = vmul.f32 %v4593_v51, %v8956_v61 }
 0x984   : > { %v4597_v54 = vmul.f32 0.5, %v4596_v7  ;;  %v4279_v12 = vpop.xlane.xlu1 %4278 }
 0x985   : > { %v4730_v16 = vmul.f32 %v8883_v25, %v4697_v48  ;;  %v4316_v2 = vmul.f32 %v4279_v12, %v9330_v9 }
 0x986   : > { %v4598_v28 = vsub.f32 1.5, %v4597_v54 }
 0x987   : > { %v5836_v43 = vpop.eup %5835  ;;  %v4763_v56 = vadd.f32 %v8889_v59, %v4730_v16  ;;  %v4348_v4 = vadd.f32 1e-05, %v4316_v2 }
 0x988   : > { %v4599_v57 = vmul.f32 %v5834_v32, %v4598_v28  ;;  %v4605_v44 = vmul.f32 %v5836_v43, %v4347_v23  ;;  %vm4611_vm3 = vweird.f32 %v5836_v43 }
 0x989   : > { %4795 = vst [vmem:[%s8905_s6 + $0xb8] sm:$0xff] %v4763_v56  ;;  %5837 = vrsqrt.f32 %v4348_v4  ;;  %vm4612_vm5 = vmor %vm4610_vm4, %vm4611_vm3  ;;  %vm4620_vm7 = vweird.f32 %v4348_v4 }
 0x98a   : > { %v4603_v61 = vsel %vm4602_vm2, %v5834_v32, %v4599_v57  ;;  %v4606_v11 = vmul.f32 %v5836_v43, %v4605_v44 }
 0x98b   : > { %v4698_v0 = vmul.f32 %v4603_v61, %v8967_v26 }
 0x98c   : > { %v4607_v46 = vmul.f32 0.5, %v4606_v11  ;;  %v4281_v22 = vpop.xlane.xlu2 %4280 }
 0x98d   : > { %v4731_v50 = vmul.f32 %v8883_v25, %v4698_v0  ;;  %v4317_v31 = vmul.f32 %v4281_v22, %v9330_v9 }
 0x98e   : > { %v4608_v1 = vsub.f32 1.5, %v4607_v46 }
 0x98f   : > { %v5838_v41 = vpop.eup %5837  ;;  %v4764_v39 = vadd.f32 %v8889_v59, %v4731_v50  ;;  %v4349_v21 = vadd.f32 1e-05, %v4317_v31 }
 0x990   : > { %v4609_v40 = vmul.f32 %v5836_v43, %v4608_v1  ;;  %v4615_v42 = vmul.f32 %v5838_v41, %v4348_v4  ;;  %vm4621_vm6 = vweird.f32 %v5838_v41 }
 0x991   : > { %4796 = vst [vmem:[%s8905_s6 + $0xc0] sm:$0xff] %v4764_v39  ;;  %5839 = vrsqrt.f32 %v4349_v21  ;;  %vm4622_vm0 = vmor %vm4620_vm7, %vm4621_vm6  ;;  %vm4630_vm9 = vweird.f32 %v4349_v21 }
 0x992   : > { %v4613_v26 = vsel %vm4612_vm5, %v5836_v43, %v4609_v40  ;;  %v4616_v5 = vmul.f32 %v5838_v41, %v4615_v42 }
 0x993   : > { %v4699_v27 = vmul.f32 %v4613_v26, %v8978_v13 }
 0x994   : > { %v4617_v38 = vmul.f32 0.5, %v4616_v5  ;;  %v4283_v36 = vpop.xlane.xlu0 %4282 }
 0x995   : > { %v4732_v35 = vmul.f32 %v8883_v25, %v4699_v27  ;;  %v4318_v3 = vmul.f32 %v4283_v36, %v9330_v9 }
 0x996   : > { %v4618_v47 = vsub.f32 1.5, %v4617_v38 }
 0x997   : > { %v5840_v20 = vpop.eup %5839  ;;  %v4765_v24 = vadd.f32 %v8889_v59, %v4732_v35  ;;  %v4350_v10 = vadd.f32 1e-05, %v4318_v3 }
 0x998   : > { %v4619_v17 = vmul.f32 %v5838_v41, %v4618_v47  ;;  %v4625_v52 = vmul.f32 %v5840_v20, %v4349_v21  ;;  %vm4631_vm8 = vweird.f32 %v5840_v20 }
 0x999   : > { %4797 = vst [vmem:[%s8905_s6 + $0xc8] sm:$0xff] %v4765_v24  ;;  %5841 = vrsqrt.f32 %v4350_v10  ;;  %vm4632_vm10 = vmor %vm4630_vm9, %vm4631_vm8  ;;  %vm4640_vm12 = vweird.f32 %v4350_v10 }
 0x99a   : > { %v4623_v13 = vsel %vm4622_vm0, %v5838_v41, %v4619_v17  ;;  %v4626_v63 = vmul.f32 %v5840_v20, %v4625_v52 }
 0x99b   : > { %v4700_v15 = vmul.f32 %v4623_v13, %v8989_v30 }
 0x99c   : > { %v4627_v62 = vmul.f32 0.5, %v4626_v63  ;;  %v4285_v53 = vpop.xlane.xlu1 %4284 }
 0x99d   : > { %v4733_v37 = vmul.f32 %v8883_v25, %v4700_v15  ;;  %v4319_v34 = vmul.f32 %v4285_v53, %v9330_v9 }
 0x99e   : > { %v4628_v58 = vsub.f32 1.5, %v4627_v62 }
 0x99f   : > { %v5842_v45 = vpop.eup %5841  ;;  %v4766_v8 = vadd.f32 %v8889_v59, %v4733_v37  ;;  %v4351_v6 = vadd.f32 1e-05, %v4319_v34 }
 0x9a0   : > { %v4629_v32 = vmul.f32 %v5840_v20, %v4628_v58  ;;  %v4635_v33 = vmul.f32 %v5842_v45, %v4350_v10  ;;  %vm4641_vm11 = vweird.f32 %v5842_v45 }
 0x9a1   : > { %4798 = vst [vmem:[%s8905_s6 + $0xd0] sm:$0xff] %v4766_v8  ;;  %5843 = vrsqrt.f32 %v4351_v6  ;;  %vm4642_vm13 = vmor %vm4640_vm12, %vm4641_vm11  ;;  %vm4650_vm15 = vweird.f32 %v4351_v6 }
 0x9a2   : > { %v4633_v30 = vsel %vm4632_vm10, %v5840_v20, %v4629_v32  ;;  %v4636_v23 = vmul.f32 %v5842_v45, %v4635_v33 }
 0x9a3   : > { %v4701_v14 = vmul.f32 %v4633_v30, %v9000_v55 }
 0x9a4   : > { %v4637_v60 = vmul.f32 0.5, %v4636_v23  ;;  %v4287_v51 = vpop.xlane.xlu2 %4286 }
 0x9a5   : > { %v4734_v7 = vmul.f32 %v8883_v25, %v4701_v14  ;;  %v4320_v48 = vmul.f32 %v4287_v51, %v9330_v9 }
 0x9a6   : > { %v4638_v54 = vsub.f32 1.5, %v4637_v60 }
 0x9a7   : > { %v5844_v12 = vpop.eup %5843  ;;  %v4767_v16 = vadd.f32 %v8889_v59, %v4734_v7  ;;  %v4352_v2 = vadd.f32 1e-05, %v4320_v48 }
 0x9a8   : > { %v4639_v28 = vmul.f32 %v5842_v45, %v4638_v54  ;;  %v4645_v43 = vmul.f32 %v5844_v12, %v4351_v6  ;;  %vm4651_vm14 = vweird.f32 %v5844_v12 }
 0x9a9   : > { %4799 = vst [vmem:[%s8905_s6 + $0xd8] sm:$0xff] %v4767_v16  ;;  %5845 = vrsqrt.f32 %v4352_v2  ;;  %vm4652_vm1 = vmor %vm4650_vm15, %vm4651_vm14  ;;  %vm4660_vm3 = vweird.f32 %v4352_v2 }
 0x9aa   : > { %v4643_v55 = vsel %vm4642_vm13, %v5842_v45, %v4639_v28  ;;  %v4646_v56 = vmul.f32 %v5844_v12, %v4645_v43 }
 0x9ab   : > { %v4702_v4 = vmul.f32 %v4643_v55, %v9011_v49 }
 0x9ac   : > { %v4647_v57 = vmul.f32 0.5, %v4646_v56  ;;  %v4289_v44 = vpop.xlane.xlu0 %4288 }
 0x9ad   : > { %v4735_v61 = vmul.f32 %v8883_v25, %v4702_v4  ;;  %v4321_v11 = vmul.f32 %v4289_v44, %v9330_v9 }
 0x9ae   : > { %v4648_v0 = vsub.f32 1.5, %v4647_v57 }
 0x9af   : > { %v5846_v46 = vpop.eup %5845  ;;  %v4768_v22 = vadd.f32 %v8889_v59, %v4735_v61  ;;  %v4353_v50 = vadd.f32 1e-05, %v4321_v11 }
 0x9b0   : > { %v4649_v31 = vmul.f32 %v5844_v12, %v4648_v0  ;;  %v4655_v1 = vmul.f32 %v5846_v46, %v4352_v2  ;;  %vm4661_vm2 = vweird.f32 %v5846_v46 }
 0x9b1   : > { %4800 = vst [vmem:[%s8905_s6 + $0xe0] sm:$0xff] %v4768_v22  ;;  %5847 = vrsqrt.f32 %v4353_v50  ;;  %vm4662_vm4 = vmor %vm4660_vm3, %vm4661_vm2  ;;  %vm4670_vm6 = vweird.f32 %v4353_v50 }
 0x9b2   : > { %v4653_v49 = vsel %vm4652_vm1, %v5844_v12, %v4649_v31  ;;  %v4656_v41 = vmul.f32 %v5846_v46, %v4655_v1 }
 0x9b3   : > { %v4703_v39 = vmul.f32 %v4653_v49, %v9022_v29 }
 0x9b4   : > { %v4657_v21 = vmul.f32 0.5, %v4656_v41 }
 0x9b5   : > { %v4736_v9 = vmul.f32 %v8883_v25, %v4703_v39 }
 0x9b6   : > { %v4658_v40 = vsub.f32 1.5, %v4657_v21 }
 0x9b7   : > { %v5848_v42 = vpop.eup %5847  ;;  %v4769_v26 = vadd.f32 %v8889_v59, %v4736_v9 }
 0x9b8   : > { %v4659_v5 = vmul.f32 %v5846_v46, %v4658_v40  ;;  %v4665_v27 = vmul.f32 %v5848_v42, %v4353_v50  ;;  %vm4671_vm5 = vweird.f32 %v5848_v42 }
 0x9b9   : > { %4801 = vst [vmem:[%s8905_s6 + $0xe8] sm:$0xff] %v4769_v26  ;;  %vm4672_vm7 = vmor %vm4670_vm6, %vm4671_vm5 }
 0x9ba   : > { %v4663_v38 = vsel %vm4662_vm4, %v5846_v46, %v4659_v5  ;;  %v4666_v36 = vmul.f32 %v5848_v42, %v4665_v27 }
 0x9bb   : > { %v4704_v29 = vmul.f32 %v4663_v38, %v9032_v18 }
 0x9bc   : > { %v4667_v35 = vmul.f32 0.5, %v4666_v36 }
 0x9bd   : > { %v4737_v3 = vmul.f32 %v8883_v25, %v4704_v29 }
 0x9be   : > { %v4668_v47 = vsub.f32 1.5, %v4667_v35 }
 0x9bf   : > { %v4770_v20 = vadd.f32 %v8889_v59, %v4737_v3 }
 0x9c0   : > { %v4669_v24 = vmul.f32 %v5848_v42, %v4668_v47 }
 0x9c1   : > { %4802 = vst [vmem:[%s8905_s6 + $0xf0] sm:$0xff] %v4770_v20 }
 0x9c2   : > { %v4673_v18 = vsel %vm4672_vm7, %v5848_v42, %v4669_v24 }
 0x9c3   : > { %v4705_v10 = vmul.f32 %v4673_v18, %v9043_v19 }
 0x9c5   : > { %v4738_v17 = vmul.f32 %v8883_v25, %v4705_v10 }
 0x9c7   : > { %v4771_v52 = vadd.f32 %v8889_v59, %v4738_v17 }
 0x9c9   : > { %4803 = vst [vmem:[%s8905_s6 + $0xf8] sm:$0xff] %v4771_v52 }
 0x9ca   : > { %5966 = shalt.err (!%p5963_p10)
}
 0x9cb   : > { %s6018_s28 = smov 128   ;;  %s6019_s30 = smov 8  }
 0x9cc   : > { %5199 = dma.vmem_to_hbm [thread:$0]  (%p6111_p3), %s4818_s24, 4096, %s4820_s19, %s4805_s25, %s6018_s28, %s6018_s28, %s6019_s30  }
 0x9cd PF: > { %s4834_s5 = sand.u32 1, %s5997_s15   ;;  %p9331_p12 = scmp.ge.s32.totalorder %s6009_s18, 2 }
 0x9ce   : > { %s4835_s6 = scalar_lea.sflag [#allocation4], %s4834_s5 }
 0x9cf   : > { %p5213_p13 = pnand %p9331_p12, %p6080_p6 }
 0x9d1   : > { %p5214_p0 = pneg %p5213_p13 }
 0x9d3   : > { %5992 = dma.done.wait (%p5214_p0), %s4835_s6, 4096  }
 0x9d4   : > { %5994 = vsyncadd (%p5214_p0), %s4835_s6, 4294963200  ;;  %p18_p5 = scmp.ge.s32.totalorder %s6101_s10, 4   ;;  %s9332_s15 = smov %s6001_s16 }
 0x9d5   : > { %s9333_s16 = smov %s6005_s17  ;;  %s9334_s17 = smov %s6117_s14 }
 0x9d6   : > { %s9335_s18 = smov %s6101_s10  ;;  %20 = sbr.rel (!%p18_p5) target bundleno = 6 (0x6), region = 92 }
 0x9db   :  { %4841 = vsyncpa [#allocation3], 1 }
 0x9dc   :  { %4843 = vsyncpa [#allocation3 + $0x1], 1 }
 0x9dd   :  { %4844 = vsyncpa [#allocation6], 1 }
 0x9de   :  { %4845 = vsyncpa [#allocation4], 1 }
 0x9df   :  { %4847 = vsyncpa [#allocation4 + $0x1], 1 }

</bundles_post_ra>
